<compile_context>
chip_gen: v5e
topology: v5e:2x2
jax: 0.10.0
libtpu: 0.0.40
codegen_flags: <defaults>
</compile_context>

<pallas_src>
import math

import jax
import jax.numpy as jnp
from jax import lax
from jax.experimental import pallas as pl
from jax.experimental.pallas import tpu as pltpu

MXU_DTYPE = jnp.bfloat16   # set to jnp.float32 for bit-faithful f32 matmuls
LANE = 128
SUBLANE = 8


def _round_up(x, m):
    return ((x + m - 1) // m) * m


# --------------------------------------------------------------------------
# Fused kernel: [GRU x num_layers] -> padding_value fill -> Linear -> Sigmoid
# --------------------------------------------------------------------------
def _make_kernel(num_layers, padding_value, s, b_blk, hp, mxu_dtype,
                 n_chains, unroll):
    h3 = 3 * hp
    b_sub = b_blk // n_chains

    def kernel(*refs):
        n_w = 4 * num_layers
        x_ref, t_ref = refs[0], refs[1]
        w_refs = refs[2:2 + n_w]
        w_lin_ref = refs[2 + n_w]
        b_lin_ref = refs[3 + n_w]
        out_ref = refs[4 + n_w]
        xproj_buf = refs[5 + n_w]                  # (S, b_blk, 3*hp) f32 scratch
        act_bufs = (refs[6 + n_w], refs[7 + n_w])  # ping/pong (S, b_blk, hp) bf16

        t_col = t_ref[...]                         # (b_blk, 1) int32 lengths

        for layer in range(num_layers):
            w_ih_ref = w_refs[4 * layer + 0]       # (Din, 3*hp)  mxu_dtype
            w_hh_ref = w_refs[4 * layer + 1]       # (hp, 3*hp)   mxu_dtype
            b_i_ref = w_refs[4 * layer + 2]        # (1, 3*hp)    f32
            b_hn_ref = w_refs[4 * layer + 3]       # (1, hp)      f32
            out_buf = act_bufs[layer % 2]

            # ---- hoisted input projection: one large MXU matmul -----------
            if layer == 0:
                xin = x_ref[...].astype(mxu_dtype)
            else:
                xin = act_bufs[(layer - 1) % 2][...]   # already mxu_dtype
            d_in = xin.shape[-1]
            xin_flat = xin.reshape(s * b_blk, d_in)
            xproj = (jnp.dot(xin_flat, w_ih_ref[...],
                             preferred_element_type=jnp.float32)
                     + b_i_ref[...])               # (S*B, 3*hp) f32
            xproj_buf[...] = xproj.reshape(s, b_blk, h3)

            b_hn = b_hn_ref[...]                   # (1, hp) f32

            # ---- recurrence: n_chains independent h-chains per step -------
            # (independent chains let the LLO scheduler overlap one chain's
            #  EUP/VPU gate math with the other chain's MXU matmul)
            def step(t, hs):
                xp = xproj_buf[t]                  # (b_blk, 3*hp) f32
                w_hh = w_hh_ref[...]               # (hp, 3*hp)
                new_hs = []
                for c in range(n_chains):
                    h = hs[c]                      # (b_sub, hp) f32
                    r0 = c * b_sub
                    hh = jnp.dot(h.astype(mxu_dtype), w_hh,
                                 preferred_element_type=jnp.float32)
                    xpc = xp[r0:r0 + b_sub]
                    r = jax.nn.sigmoid(xpc[:, 0 * hp:1 * hp] + hh[:, 0 * hp:1 * hp])
                    z = jax.nn.sigmoid(xpc[:, 1 * hp:2 * hp] + hh[:, 1 * hp:2 * hp])
                    n = jnp.tanh(xpc[:, 2 * hp:3 * hp]
                                 + r * (hh[:, 2 * hp:3 * hp] + b_hn))
                    h_new = (1.0 - z) * n + z * h
                    # packed-sequence semantics: freeze h for t >= T[b]
                    m = (t < t_col[r0:r0 + b_sub]).astype(jnp.float32)
                    new_hs.append(m * h_new + (1.0 - m) * h)
                h_cat = (new_hs[0] if n_chains == 1
                         else jnp.concatenate(new_hs, axis=0))
                out_buf[t] = h_cat.astype(mxu_dtype)
                return tuple(new_hs)

            init = tuple(jnp.zeros((b_sub, hp), jnp.float32)
                         for _ in range(n_chains))
            lax.fori_loop(0, s, step, init, unroll=unroll)

        # ---- head: Linear + Sigmoid on h_last, constant pad row selected --
        # No h_fill materialization: padded positions (t >= T) map to the
        # constant row sigmoid(padding_value * sum_j W_lin[j,:] + b_lin)
        # (identical to filling h with padding_value; padded hidden lanes of
        #  W_lin are zero rows so they stay inert -- keep that invariant).
        h_last = act_bufs[(num_layers - 1) % 2][...]          # (S, b_blk, hp)
        logits = (jnp.dot(h_last.reshape(s * b_blk, hp), w_lin_ref[...],
                          preferred_element_type=jnp.float32)
                  + b_lin_ref[...])
        sig = jax.nn.sigmoid(logits).reshape(s, b_blk, hp)
        w_col_sum = jnp.sum(w_lin_ref[...].astype(jnp.float32),
                            axis=0, keepdims=True)            # (1, hp)
        pad_out = jax.nn.sigmoid(padding_value * w_col_sum + b_lin_ref[...])
        t_idx = lax.broadcasted_iota(jnp.int32, (s, b_blk, hp), 0)
        valid = t_idx < t_col[None]                            # (S, b_blk, hp)
        out_ref[...] = jnp.where(valid, sig, pad_out.reshape(1, 1, hp))

    return kernel


# --------------------------------------------------------------------------
# Wrapper
# --------------------------------------------------------------------------
def generator_network_forward(Z, T, packed, *, hidden_dim, padding_value,
                              max_seq_len, mxu_dtype=MXU_DTYPE,
                              b_blk_target=256, min_batch_blocks=1):
    """Z: (B, S, Z_dim), T: (B,) lengths. Returns H: (B, S, hidden_dim).

    b_blk_target: desired batch rows per grid step (128 on v5e, 256 on
        v6e/v7x is a good start); auto-shrunk to fit VMEM.
    min_batch_blocks: set to 2 on v7x so both TensorCores get a grid block.
    """
    B, S, F = Z.shape
    assert S == max_seq_len
    hp = packed["hp"]
    f_pad = packed["f_pad"]
    h3 = 3 * hp
    num_layers = len(packed["gru"])
    assert F <= f_pad

    # Flat weight list in the order the kernel expects.
    weight_arrays = []
    for layer_arrays in packed["gru"]:
        weight_arrays.extend(layer_arrays)
    weight_arrays.extend([packed["w_lin"], packed["b_lin"]])
    weight_bytes = sum(int(a.size) * a.dtype.itemsize for a in weight_arrays)
    act_itemsize = jnp.dtype(mxu_dtype).itemsize

    def vmem_bytes(b):
        # weights x2 (BlockSpec double-buffering) + grid IO blocks x2 +
        # explicit scratch + one xproj-sized / one logits-sized compiler temp.
        io = 2 * (S * b * f_pad * 4 + b * 4 + S * b * hp * 4)
        scratch = S * b * h3 * 4 + 2 * S * b * hp * act_itemsize
        temps = S * b * h3 * 4 + S * b * hp * 4
        return 2 * weight_bytes + io + scratch + temps

    try:
        vmem_cap = int(pltpu.get_tpu_info().vmem_capacity_bytes)
    except Exception:
        vmem_cap = 128 * 1024 * 1024
    budget = int(vmem_cap * 0.75)        # ~96 MiB on v5e/v6e, ~48 MiB on v7x

    # ---- choose the batch tile ------------------------------------------
    b_cap = _round_up(B, SUBLANE)
    b_blk = min(_round_up(b_blk_target, SUBLANE), b_cap)
    if min_batch_blocks > 1:             # e.g. v7x: feed both TensorCores
        b_blk = min(b_blk, max(SUBLANE,
                               _round_up(-(-b_cap // min_batch_blocks), SUBLANE)))
    while b_blk > SUBLANE and vmem_bytes(b_blk) > budget:
        b_blk = max(SUBLANE, _round_up(b_blk // 2, SUBLANE))
    # TODO(synk): if even b_blk == SUBLANE exceeds budget (huge S), chunk time.

    b_pad = _round_up(B, b_blk)
    n_blk = b_pad // b_blk
    n_chains = 2 if (b_blk >= 2 * SUBLANE and b_blk % (2 * SUBLANE) == 0) else 1
    if b_blk <= SUBLANE:
        unroll = True if S <= 32 else 8
    elif b_blk <= 32:
        unroll = 4
    else:
        unroll = 2

    # Pad batch (zero rows, length 0) and feature dim; go time-major.
    z_pad = jnp.zeros((b_pad, S, f_pad), jnp.float32).at[:B, :, :F].set(
        Z.astype(jnp.float32))
    t_pad = jnp.zeros((b_pad, 1), jnp.int32).at[:B, 0].set(T.astype(jnp.int32))
    x_tm = jnp.transpose(z_pad, (1, 0, 2))   # (S, b_pad, f_pad)

    inputs = [x_tm, t_pad]
    in_specs = [
        pl.BlockSpec((S, b_blk, f_pad), lambda i: (0, i, 0)),
        pl.BlockSpec((b_blk, 1), lambda i: (i, 0)),
    ]
    full2d = lambda i: (0, 0)                # weights: fetched once, resident
    for arr in weight_arrays:
        inputs.append(arr)
        in_specs.append(pl.BlockSpec(arr.shape, full2d))

    est = vmem_bytes(b_blk)
    vmem_limit = int(min(budget, max(32 * 1024 * 1024, est + (8 << 20))))

    kernel = _make_kernel(num_layers=num_layers, padding_value=padding_value,
                          s=S, b_blk=b_blk, hp=hp, mxu_dtype=mxu_dtype,
                          n_chains=n_chains, unroll=unroll)

    out_tm = pl.pallas_call(
        kernel,
        out_shape=jax.ShapeDtypeStruct((S, b_pad, hp), jnp.float32),
        grid=(n_blk,),
        in_specs=in_specs,
        out_specs=pl.BlockSpec((S, b_blk, hp), lambda i: (0, i, 0)),
        scratch_shapes=[
            pltpu.VMEM((S, b_blk, h3), jnp.float32),  # hoisted input projection
            pltpu.VMEM((S, b_blk, hp), mxu_dtype),    # layer activations (ping)
            pltpu.VMEM((S, b_blk, hp), mxu_dtype),    # layer activations (pong)
        ],
        compiler_params=pltpu.CompilerParams(
            dimension_semantics=("parallel",),        # batch blocks independent
            vmem_limit_bytes=vmem_limit,
        ),
    )(*inputs)

    # Un-pad (batch-pad rows / padded lanes are garbage by design) and return
    # batch-major (B, S, hidden_dim).
    return jnp.transpose(out_tm[:, :B, :hidden_dim], (1, 0, 2))


# --------------------------------------------------------------------------
# Parameters: torch-style init, then re-pack into the kernel's fused layout
# --------------------------------------------------------------------------
def _xavier_uniform(key, shape):
    fan_out, fan_in = shape                  # torch layout (out_features, in_features)
    bound = math.sqrt(6.0 / (fan_in + fan_out))
    return jax.random.uniform(key, shape, jnp.float32, -bound, bound)


def init_raw_params(key, z_dim, hidden_dim, num_layers):
    """Raw parameters in the PyTorch layout / init scheme of the module."""
    raw = {"gru": []}
    for layer in range(num_layers):
        d_in = z_dim if layer == 0 else hidden_dim
        key, k1, k2 = jax.random.split(key, 3)
        w_ih = _xavier_uniform(k1, (3 * hidden_dim, d_in))    # xavier_uniform_
        w_hh = _xavier_uniform(k2, (3 * hidden_dim, hidden_dim))
        b_ih = jnp.ones((3 * hidden_dim,), jnp.float32)       # bias_ih.fill_(1)
        b_hh = jnp.zeros((3 * hidden_dim,), jnp.float32)      # bias_hh.fill_(0)
        raw["gru"].append((w_ih, w_hh, b_ih, b_hh))
    key, k3 = jax.random.split(key)
    raw["w_lin"] = _xavier_uniform(k3, (hidden_dim, hidden_dim))
    raw["b_lin"] = jnp.zeros((hidden_dim,), jnp.float32)      # bias.fill_(0)
    return raw


def pack_params(raw, hidden_dim, mxu_dtype=MXU_DTYPE):
    """Pad hidden to a multiple of 128 lanes and layer-0 input features to a
    multiple of 8 (zero weights -> padded lanes stay exactly 0), concat gates
    as (Din, 3*Hp) in (r|z|n) order, fold b_ih+b_hh for the r/z gates,
    transpose everything to (in, out)."""
    H = hidden_dim
    hp = _round_up(H, LANE)
    z_dim = raw["gru"][0][0].shape[1]
    f_pad = _round_up(z_dim, SUBLANE)
    packed = {"gru": [], "hp": hp, "f_pad": f_pad}

    def pad_mat(m, rows, cols):
        return jnp.zeros((rows, cols), jnp.float32).at[:m.shape[0], :m.shape[1]].set(m)

    def pad_row(v):
        return jnp.zeros((1, hp), jnp.float32).at[0, :H].set(v)

    for layer, (w_ih, w_hh, b_ih, b_hh) in enumerate(raw["gru"]):
        d_in = w_ih.shape[1]
        d_in_p = f_pad if layer == 0 else hp   # layer>0 consumes the padded hidden
        w_ih_g = w_ih.reshape(3, H, d_in)      # gate order (r, z, n)
        w_hh_g = w_hh.reshape(3, H, H)
        b_ih_g = b_ih.reshape(3, H)
        b_hh_g = b_hh.reshape(3, H)

        w_ih_cat = jnp.concatenate(
            [pad_mat(w_ih_g[g].T, d_in_p, hp) for g in range(3)], axis=1)
        w_hh_cat = jnp.concatenate(
            [pad_mat(w_hh_g[g].T, hp, hp) for g in range(3)], axis=1)
        b_i_cat = jnp.concatenate(
            [pad_row(b_ih_g[0] + b_hh_g[0]),   # r: b_ir + b_hr
             pad_row(b_ih_g[1] + b_hh_g[1]),   # z: b_iz + b_hz
             pad_row(b_ih_g[2])], axis=1)      # n: b_in (b_hn applied inside r*(.))
        b_hn = pad_row(b_hh_g[2])

        packed["gru"].append((w_ih_cat.astype(mxu_dtype),
                              w_hh_cat.astype(mxu_dtype),
                              b_i_cat, b_hn))

    packed["w_lin"] = pad_mat(raw["w_lin"].T, hp, hp).astype(mxu_dtype)
    packed["b_lin"] = pad_row(raw["b_lin"])
    return packed


# --------------------------------------------------------------------------
# Pure-JAX reference (same math, unpadded weights) for a correctness check
# --------------------------------------------------------------------------
def reference_forward(Z, T, raw, padding_value, mxu_dtype=MXU_DTYPE):
    B, S, _ = Z.shape
    H = raw["w_lin"].shape[0]
    mask = (jnp.arange(S)[None, :, None] < T[:, None, None]).astype(jnp.float32)
    h_seq = Z.astype(jnp.float32)
    for (w_ih, w_hh, b_ih, b_hh) in raw["gru"]:
        w_ih_g = w_ih.reshape(3, H, -1).astype(mxu_dtype)
        w_hh_g = w_hh.reshape(3, H, H).astype(mxu_dtype)
        b_ih_g = b_ih.reshape(3, H)
        b_hh_g = b_hh.reshape(3, H)
        h = jnp.zeros((B, H), jnp.float32)
        outs = []
        for t in range(S):
            x_t = h_seq[:, t, :].astype(mxu_dtype)
            h_b = h.astype(mxu_dtype)
            gi = [jnp.dot(x_t, w_ih_g[g].T, preferred_element_type=jnp.float32)
                  + b_ih_g[g] for g in range(3)]
            gh = [jnp.dot(h_b, w_hh_g[g].T, preferred_element_type=jnp.float32)
                  + b_hh_g[g] for g in range(3)]
            r = jax.nn.sigmoid(gi[0] + gh[0])
            z = jax.nn.sigmoid(gi[1] + gh[1])
            n = jnp.tanh(gi[2] + r * gh[2])
            h_new = (1.0 - z) * n + z * h
            m = mask[:, t, :]
            h = m * h_new + (1.0 - m) * h
            outs.append(h)
        h_seq = jnp.stack(outs, axis=1)
    h_pad = mask * h_seq + (1.0 - mask) * padding_value
    logits = jnp.dot(h_pad.reshape(B * S, H).astype(mxu_dtype),
                     raw["w_lin"].T.astype(mxu_dtype),
                     preferred_element_type=jnp.float32) + raw["b_lin"]
    return jax.nn.sigmoid(logits).reshape(B, S, H)


# --------------------------------------------------------------------------
if __name__ == "__main__":
    B, S, Z_DIM, HIDDEN, LAYERS = 2, 8, 4, 32, 2
    PADDING_VALUE = -1.0

    key = jax.random.PRNGKey(0)
    key, kz = jax.random.split(key)
    Z = jax.random.normal(kz, (B, S, Z_DIM), jnp.float32)
    T = jnp.array([8, 5], jnp.int32)     # per-sequence lengths

    raw = init_raw_params(key, Z_DIM, HIDDEN, LAYERS)
    packed = pack_params(raw, HIDDEN, mxu_dtype=MXU_DTYPE)

    out = generator_network_forward(Z, T, packed, hidden_dim=HIDDEN,
                                    padding_value=PADDING_VALUE,
                                    max_seq_len=S, mxu_dtype=MXU_DTYPE)
    out = jax.block_until_ready(out)

    ref = reference_forward(Z, T, raw, PADDING_VALUE, mxu_dtype=MXU_DTYPE)

    assert out.shape == (B, S, HIDDEN)
    assert bool(jnp.all(jnp.isfinite(out)))
    err = float(jnp.max(jnp.abs(out - ref)))
    assert bool(jnp.allclose(out, ref, atol=5e-3, rtol=5e-3)), f"max |err| = {err}"
    print("KERNEL_OK")
</pallas_src>

<mosaic_0001>
module attributes {stable_mosaic.version = 11 : i64} {
  func.func @kernel(%arg0: i32, %arg1: memref<8x8x8xf32, #tpu.memory_space<vmem>>, %arg2: memref<8x1xi32, #tpu.memory_space<vmem>>, %arg3: memref<8x384xbf16, #tpu.memory_space<vmem>>, %arg4: memref<128x384xbf16, #tpu.memory_space<vmem>>, %arg5: memref<1x384xf32, #tpu.memory_space<vmem>>, %arg6: memref<1x128xf32, #tpu.memory_space<vmem>>, %arg7: memref<128x384xbf16, #tpu.memory_space<vmem>>, %arg8: memref<128x384xbf16, #tpu.memory_space<vmem>>, %arg9: memref<1x384xf32, #tpu.memory_space<vmem>>, %arg10: memref<1x128xf32, #tpu.memory_space<vmem>>, %arg11: memref<128x128xbf16, #tpu.memory_space<vmem>>, %arg12: memref<1x128xf32, #tpu.memory_space<vmem>>, %arg13: memref<8x8x128xf32, #tpu.memory_space<vmem>>, %arg14: memref<8x8x384xf32, #tpu.memory_space<vmem>>, %arg15: memref<8x8x128xbf16, #tpu.memory_space<vmem>>, %arg16: memref<8x8x128xbf16, #tpu.memory_space<vmem>>) attributes {dimension_semantics = [#tpu.dimension_semantics<parallel>], iteration_bounds = array<i64: 1>, scalar_prefetch = 0 : i64, scratch_operands = 3 : i64, tpu.core_type = #tpu.core_type<tc>, window_params = [{transform_indices = @transform_0, window_bounds = array<i64: 8, 8, 8>}, {transform_indices = @transform_1, window_bounds = array<i64: 8, 1>}, {pipeline_mode = #tpu.pipeline_mode<synchronous>, transform_indices = @transform_2, window_bounds = array<i64: 8, 384>}, {pipeline_mode = #tpu.pipeline_mode<synchronous>, transform_indices = @transform_3, window_bounds = array<i64: 128, 384>}, {pipeline_mode = #tpu.pipeline_mode<synchronous>, transform_indices = @transform_4, window_bounds = array<i64: 1, 384>}, {pipeline_mode = #tpu.pipeline_mode<synchronous>, transform_indices = @transform_5, window_bounds = array<i64: 1, 128>}, {pipeline_mode = #tpu.pipeline_mode<synchronous>, transform_indices = @transform_6, window_bounds = array<i64: 128, 384>}, {pipeline_mode = #tpu.pipeline_mode<synchronous>, transform_indices = @transform_7, window_bounds = array<i64: 128, 384>}, {pipeline_mode = #tpu.pipeline_mode<synchronous>, transform_indices = @transform_8, window_bounds = array<i64: 1, 384>}, {pipeline_mode = #tpu.pipeline_mode<synchronous>, transform_indices = @transform_9, window_bounds = array<i64: 1, 128>}, {pipeline_mode = #tpu.pipeline_mode<synchronous>, transform_indices = @transform_10, window_bounds = array<i64: 128, 128>}, {pipeline_mode = #tpu.pipeline_mode<synchronous>, transform_indices = @transform_11, window_bounds = array<i64: 1, 128>}, {transform_indices = @transform_12, window_bounds = array<i64: 8, 8, 128>}]} {
    %c0 = arith.constant 0 : index
    %c0_0 = arith.constant 0 : index
    %0 = vector.load %arg2[%c0, %c0_0] : memref<8x1xi32, #tpu.memory_space<vmem>>, vector<8x1xi32>
    %c0_1 = arith.constant 0 : index
    %c0_2 = arith.constant 0 : index
    %c0_3 = arith.constant 0 : index
    %1 = vector.load %arg1[%c0_1, %c0_2, %c0_3] : memref<8x8x8xf32, #tpu.memory_space<vmem>>, vector<8x8x8xf32>
    %2 = arith.truncf %1 : vector<8x8x8xf32> to vector<8x8x8xbf16>
    %3 = vector.shape_cast %2 : vector<8x8x8xbf16> to vector<64x8xbf16>
    %c0_4 = arith.constant 0 : index
    %c0_5 = arith.constant 0 : index
    %4 = vector.load %arg3[%c0_4, %c0_5] : memref<8x384xbf16, #tpu.memory_space<vmem>>, vector<8x384xbf16>
    %cst = arith.constant dense<0.000000e+00> : vector<64x384xf32>
    %5 = tpu.matmul %3, %4, %cst {dimension_numbers = #tpu.dot_dimension_numbers<[1], [0], [0], [1], [0, 0, 1, 1], [], []>} : vector<64x8xbf16>, vector<8x384xbf16>, vector<64x384xf32> -> vector<64x384xf32>
    %c0_6 = arith.constant 0 : index
    %c0_7 = arith.constant 0 : index
    %6 = vector.load %arg5[%c0_6, %c0_7] : memref<1x384xf32, #tpu.memory_space<vmem>>, vector<1x384xf32>
    %7 = vector.broadcast %6 : vector<1x384xf32> to vector<64x384xf32>
    %8 = arith.addf %5, %7 : vector<64x384xf32>
    %9 = vector.shape_cast %8 : vector<64x384xf32> to vector<8x8x384xf32>
    %c0_8 = arith.constant 0 : index
    %c0_9 = arith.constant 0 : index
    %c0_10 = arith.constant 0 : index
    %10 = vector.load %arg14[%c0_8, %c0_9, %c0_10] : memref<8x8x384xf32, #tpu.memory_space<vmem>>, vector<8x8x384xf32>
    tpu.vector_store %arg14[%c0_8, %c0_9, %c0_10], %9 {strides = array<i32>} : memref<8x8x384xf32, #tpu.memory_space<vmem>>, vector<8x8x384xf32>,
    %c0_11 = arith.constant 0 : index
    %c0_12 = arith.constant 0 : index
    %11 = vector.load %arg6[%c0_11, %c0_12] : memref<1x128xf32, #tpu.memory_space<vmem>>, vector<1x128xf32>
    %cst_13 = arith.constant 0.000000e+00 : f32
    %12 = vector.broadcast %cst_13 : f32 to vector<8x128xf32>
    %c0_i32 = arith.constant 0 : i32
    %13 = arith.index_cast %c0_i32 : i32 to index
    %c0_14 = arith.constant 0 : index
    %c0_15 = arith.constant 0 : index
    %14 = vector.load %arg14[%13, %c0_14, %c0_15] : memref<8x8x384xf32, #tpu.memory_space<vmem>>, vector<1x8x384xf32>
    %15 = vector.shape_cast %14 : vector<1x8x384xf32> to vector<8x384xf32>
    %c0_16 = arith.constant 0 : index
    %c0_17 = arith.constant 0 : index
    %16 = vector.load %arg4[%c0_16, %c0_17] : memref<128x384xbf16, #tpu.memory_space<vmem>>, vector<128x384xbf16>
    %17 = arith.truncf %12 : vector<8x128xf32> to vector<8x128xbf16>
    %cst_18 = arith.constant dense<0.000000e+00> : vector<8x384xf32>
    %18 = tpu.matmul %17, %16, %cst_18 {dimension_numbers = #tpu.dot_dimension_numbers<[1], [0], [0], [1], [0, 0, 1, 1], [], []>} : vector<8x128xbf16>, vector<128x384xbf16>, vector<8x384xf32> -> vector<8x384xf32>
    %19 = vector.extract_strided_slice %15 {offsets = [0, 0], sizes = [8, 128], strides = [1, 1]} : vector<8x384xf32> to vector<8x128xf32>
    %20 = vector.extract_strided_slice %18 {offsets = [0, 0], sizes = [8, 128], strides = [1, 1]} : vector<8x384xf32> to vector<8x128xf32>
    %21 = arith.addf %19, %20 : vector<8x128xf32>
    %22 = arith.negf %21 : vector<8x128xf32>
    %23 = math.exp %22 : vector<8x128xf32>
    %cst_19 = arith.constant 1.000000e+00 : f32
    %24 = vector.broadcast %cst_19 : f32 to vector<8x128xf32>
    %25 = arith.addf %24, %23 : vector<8x128xf32>
    %26 = arith.divf %24, %25 : vector<8x128xf32>
    %27 = vector.extract_strided_slice %15 {offsets = [0, 128], sizes = [8, 128], strides = [1, 1]} : vector<8x384xf32> to vector<8x128xf32>
    %28 = vector.extract_strided_slice %18 {offsets = [0, 128], sizes = [8, 128], strides = [1, 1]} : vector<8x384xf32> to vector<8x128xf32>
    %29 = arith.addf %27, %28 : vector<8x128xf32>
    %30 = arith.negf %29 : vector<8x128xf32>
    %31 = math.exp %30 : vector<8x128xf32>
    %cst_20 = arith.constant 1.000000e+00 : f32
    %32 = vector.broadcast %cst_20 : f32 to vector<8x128xf32>
    %33 = arith.addf %32, %31 : vector<8x128xf32>
    %34 = arith.divf %32, %33 : vector<8x128xf32>
    %35 = vector.extract_strided_slice %15 {offsets = [0, 256], sizes = [8, 128], strides = [1, 1]} : vector<8x384xf32> to vector<8x128xf32>
    %36 = vector.extract_strided_slice %18 {offsets = [0, 256], sizes = [8, 128], strides = [1, 1]} : vector<8x384xf32> to vector<8x128xf32>
    %37 = vector.broadcast %11 : vector<1x128xf32> to vector<8x128xf32>
    %38 = arith.addf %36, %37 : vector<8x128xf32>
    %39 = arith.mulf %26, %38 : vector<8x128xf32>
    %40 = arith.addf %35, %39 : vector<8x128xf32>
    %41 = math.tanh %40 : vector<8x128xf32>
    %cst_21 = arith.constant 1.000000e+00 : f32
    %42 = vector.broadcast %cst_21 : f32 to vector<8x128xf32>
    %43 = arith.subf %42, %34 : vector<8x128xf32>
    %44 = arith.mulf %43, %41 : vector<8x128xf32>
    %45 = arith.mulf %34, %12 : vector<8x128xf32>
    %46 = arith.addf %44, %45 : vector<8x128xf32>
    %47 = vector.broadcast %c0_i32 : i32 to vector<8x1xi32>
    %48 = arith.cmpi slt, %47, %0 : vector<8x1xi32>
    %49 = arith.extui %48 : vector<8x1xi1> to vector<8x1xi32>
    %50 = arith.sitofp %49 : vector<8x1xi32> to vector<8x1xf32>
    %51 = vector.broadcast %50 : vector<8x1xf32> to vector<8x128xf32>
    %52 = arith.mulf %51, %46 : vector<8x128xf32>
    %cst_22 = arith.constant 1.000000e+00 : f32
    %53 = vector.broadcast %cst_22 : f32 to vector<8x1xf32>
    %54 = arith.subf %53, %50 : vector<8x1xf32>
    %55 = vector.broadcast %54 : vector<8x1xf32> to vector<8x128xf32>
    %56 = arith.mulf %55, %12 : vector<8x128xf32>
    %57 = arith.addf %52, %56 : vector<8x128xf32>
    %58 = arith.truncf %57 : vector<8x128xf32> to vector<8x128xbf16>
    %59 = arith.index_cast %c0_i32 : i32 to index
    %c0_23 = arith.constant 0 : index
    %c0_24 = arith.constant 0 : index
    %60 = vector.load %arg15[%59, %c0_23, %c0_24] : memref<8x8x128xbf16, #tpu.memory_space<vmem>>, vector<1x8x128xbf16>
    %61 = vector.shape_cast %60 : vector<1x8x128xbf16> to vector<8x128xbf16>
    %62 = vector.shape_cast %58 : vector<8x128xbf16> to vector<1x8x128xbf16>
    tpu.vector_store %arg15[%59, %c0_23, %c0_24], %62 {strides = array<i32>} : memref<8x8x128xbf16, #tpu.memory_space<vmem>>, vector<1x8x128xbf16>,
    %c1_i32 = arith.constant 1 : i32
    %63 = arith.index_cast %c1_i32 : i32 to index
    %c0_25 = arith.constant 0 : index
    %c0_26 = arith.constant 0 : index
    %64 = vector.load %arg14[%63, %c0_25, %c0_26] : memref<8x8x384xf32, #tpu.memory_space<vmem>>, vector<1x8x384xf32>
    %65 = vector.shape_cast %64 : vector<1x8x384xf32> to vector<8x384xf32>
    %c0_27 = arith.constant 0 : index
    %c0_28 = arith.constant 0 : index
    %66 = vector.load %arg4[%c0_27, %c0_28] : memref<128x384xbf16, #tpu.memory_space<vmem>>, vector<128x384xbf16>
    %67 = arith.truncf %57 : vector<8x128xf32> to vector<8x128xbf16>
    %cst_29 = arith.constant dense<0.000000e+00> : vector<8x384xf32>
    %68 = tpu.matmul %67, %66, %cst_29 {dimension_numbers = #tpu.dot_dimension_numbers<[1], [0], [0], [1], [0, 0, 1, 1], [], []>} : vector<8x128xbf16>, vector<128x384xbf16>, vector<8x384xf32> -> vector<8x384xf32>
    %69 = vector.extract_strided_slice %65 {offsets = [0, 0], sizes = [8, 128], strides = [1, 1]} : vector<8x384xf32> to vector<8x128xf32>
    %70 = vector.extract_strided_slice %68 {offsets = [0, 0], sizes = [8, 128], strides = [1, 1]} : vector<8x384xf32> to vector<8x128xf32>
    %71 = arith.addf %69, %70 : vector<8x128xf32>
    %72 = arith.negf %71 : vector<8x128xf32>
    %73 = math.exp %72 : vector<8x128xf32>
    %cst_30 = arith.constant 1.000000e+00 : f32
    %74 = vector.broadcast %cst_30 : f32 to vector<8x128xf32>
    %75 = arith.addf %74, %73 : vector<8x128xf32>
    %76 = arith.divf %74, %75 : vector<8x128xf32>
    %77 = vector.extract_strided_slice %65 {offsets = [0, 128], sizes = [8, 128], strides = [1, 1]} : vector<8x384xf32> to vector<8x128xf32>
    %78 = vector.extract_strided_slice %68 {offsets = [0, 128], sizes = [8, 128], strides = [1, 1]} : vector<8x384xf32> to vector<8x128xf32>
    %79 = arith.addf %77, %78 : vector<8x128xf32>
    %80 = arith.negf %79 : vector<8x128xf32>
    %81 = math.exp %80 : vector<8x128xf32>
    %cst_31 = arith.constant 1.000000e+00 : f32
    %82 = vector.broadcast %cst_31 : f32 to vector<8x128xf32>
    %83 = arith.addf %82, %81 : vector<8x128xf32>
    %84 = arith.divf %82, %83 : vector<8x128xf32>
    %85 = vector.extract_strided_slice %65 {offsets = [0, 256], sizes = [8, 128], strides = [1, 1]} : vector<8x384xf32> to vector<8x128xf32>
    %86 = vector.extract_strided_slice %68 {offsets = [0, 256], sizes = [8, 128], strides = [1, 1]} : vector<8x384xf32> to vector<8x128xf32>
    %87 = vector.broadcast %11 : vector<1x128xf32> to vector<8x128xf32>
    %88 = arith.addf %86, %87 : vector<8x128xf32>
    %89 = arith.mulf %76, %88 : vector<8x128xf32>
    %90 = arith.addf %85, %89 : vector<8x128xf32>
    %91 = math.tanh %90 : vector<8x128xf32>
    %cst_32 = arith.constant 1.000000e+00 : f32
    %92 = vector.broadcast %cst_32 : f32 to vector<8x128xf32>
    %93 = arith.subf %92, %84 : vector<8x128xf32>
    %94 = arith.mulf %93, %91 : vector<8x128xf32>
    %95 = arith.mulf %84, %57 : vector<8x128xf32>
    %96 = arith.addf %94, %95 : vector<8x128xf32>
    %97 = vector.broadcast %c1_i32 : i32 to vector<8x1xi32>
    %98 = arith.cmpi slt, %97, %0 : vector<8x1xi32>
    %99 = arith.extui %98 : vector<8x1xi1> to vector<8x1xi32>
    %100 = arith.sitofp %99 : vector<8x1xi32> to vector<8x1xf32>
    %101 = vector.broadcast %100 : vector<8x1xf32> to vector<8x128xf32>
    %102 = arith.mulf %101, %96 : vector<8x128xf32>
    %cst_33 = arith.constant 1.000000e+00 : f32
    %103 = vector.broadcast %cst_33 : f32 to vector<8x1xf32>
    %104 = arith.subf %103, %100 : vector<8x1xf32>
    %105 = vector.broadcast %104 : vector<8x1xf32> to vector<8x128xf32>
    %106 = arith.mulf %105, %57 : vector<8x128xf32>
    %107 = arith.addf %102, %106 : vector<8x128xf32>
    %108 = arith.truncf %107 : vector<8x128xf32> to vector<8x128xbf16>
    %109 = arith.index_cast %c1_i32 : i32 to index
    %c0_34 = arith.constant 0 : index
    %c0_35 = arith.constant 0 : index
    %110 = vector.load %arg15[%109, %c0_34, %c0_35] : memref<8x8x128xbf16, #tpu.memory_space<vmem>>, vector<1x8x128xbf16>
    %111 = vector.shape_cast %110 : vector<1x8x128xbf16> to vector<8x128xbf16>
    %112 = vector.shape_cast %108 : vector<8x128xbf16> to vector<1x8x128xbf16>
    tpu.vector_store %arg15[%109, %c0_34, %c0_35], %112 {strides = array<i32>} : memref<8x8x128xbf16, #tpu.memory_space<vmem>>, vector<1x8x128xbf16>,
    %c2_i32 = arith.constant 2 : i32
    %113 = arith.index_cast %c2_i32 : i32 to index
    %c0_36 = arith.constant 0 : index
    %c0_37 = arith.constant 0 : index
    %114 = vector.load %arg14[%113, %c0_36, %c0_37] : memref<8x8x384xf32, #tpu.memory_space<vmem>>, vector<1x8x384xf32>
    %115 = vector.shape_cast %114 : vector<1x8x384xf32> to vector<8x384xf32>
    %c0_38 = arith.constant 0 : index
    %c0_39 = arith.constant 0 : index
    %116 = vector.load %arg4[%c0_38, %c0_39] : memref<128x384xbf16, #tpu.memory_space<vmem>>, vector<128x384xbf16>
    %117 = arith.truncf %107 : vector<8x128xf32> to vector<8x128xbf16>
    %cst_40 = arith.constant dense<0.000000e+00> : vector<8x384xf32>
    %118 = tpu.matmul %117, %116, %cst_40 {dimension_numbers = #tpu.dot_dimension_numbers<[1], [0], [0], [1], [0, 0, 1, 1], [], []>} : vector<8x128xbf16>, vector<128x384xbf16>, vector<8x384xf32> -> vector<8x384xf32>
    %119 = vector.extract_strided_slice %115 {offsets = [0, 0], sizes = [8, 128], strides = [1, 1]} : vector<8x384xf32> to vector<8x128xf32>
    %120 = vector.extract_strided_slice %118 {offsets = [0, 0], sizes = [8, 128], strides = [1, 1]} : vector<8x384xf32> to vector<8x128xf32>
    %121 = arith.addf %119, %120 : vector<8x128xf32>
    %122 = arith.negf %121 : vector<8x128xf32>
    %123 = math.exp %122 : vector<8x128xf32>
    %cst_41 = arith.constant 1.000000e+00 : f32
    %124 = vector.broadcast %cst_41 : f32 to vector<8x128xf32>
    %125 = arith.addf %124, %123 : vector<8x128xf32>
    %126 = arith.divf %124, %125 : vector<8x128xf32>
    %127 = vector.extract_strided_slice %115 {offsets = [0, 128], sizes = [8, 128], strides = [1, 1]} : vector<8x384xf32> to vector<8x128xf32>
    %128 = vector.extract_strided_slice %118 {offsets = [0, 128], sizes = [8, 128], strides = [1, 1]} : vector<8x384xf32> to vector<8x128xf32>
    %129 = arith.addf %127, %128 : vector<8x128xf32>
    %130 = arith.negf %129 : vector<8x128xf32>
    %131 = math.exp %130 : vector<8x128xf32>
    %cst_42 = arith.constant 1.000000e+00 : f32
    %132 = vector.broadcast %cst_42 : f32 to vector<8x128xf32>
    %133 = arith.addf %132, %131 : vector<8x128xf32>
    %134 = arith.divf %132, %133 : vector<8x128xf32>
    %135 = vector.extract_strided_slice %115 {offsets = [0, 256], sizes = [8, 128], strides = [1, 1]} : vector<8x384xf32> to vector<8x128xf32>
    %136 = vector.extract_strided_slice %118 {offsets = [0, 256], sizes = [8, 128], strides = [1, 1]} : vector<8x384xf32> to vector<8x128xf32>
    %137 = vector.broadcast %11 : vector<1x128xf32> to vector<8x128xf32>
    %138 = arith.addf %136, %137 : vector<8x128xf32>
    %139 = arith.mulf %126, %138 : vector<8x128xf32>
    %140 = arith.addf %135, %139 : vector<8x128xf32>
    %141 = math.tanh %140 : vector<8x128xf32>
    %cst_43 = arith.constant 1.000000e+00 : f32
    %142 = vector.broadcast %cst_43 : f32 to vector<8x128xf32>
    %143 = arith.subf %142, %134 : vector<8x128xf32>
    %144 = arith.mulf %143, %141 : vector<8x128xf32>
    %145 = arith.mulf %134, %107 : vector<8x128xf32>
    %146 = arith.addf %144, %145 : vector<8x128xf32>
    %147 = vector.broadcast %c2_i32 : i32 to vector<8x1xi32>
    %148 = arith.cmpi slt, %147, %0 : vector<8x1xi32>
    %149 = arith.extui %148 : vector<8x1xi1> to vector<8x1xi32>
    %150 = arith.sitofp %149 : vector<8x1xi32> to vector<8x1xf32>
    %151 = vector.broadcast %150 : vector<8x1xf32> to vector<8x128xf32>
    %152 = arith.mulf %151, %146 : vector<8x128xf32>
    %cst_44 = arith.constant 1.000000e+00 : f32
    %153 = vector.broadcast %cst_44 : f32 to vector<8x1xf32>
    %154 = arith.subf %153, %150 : vector<8x1xf32>
    %155 = vector.broadcast %154 : vector<8x1xf32> to vector<8x128xf32>
    %156 = arith.mulf %155, %107 : vector<8x128xf32>
    %157 = arith.addf %152, %156 : vector<8x128xf32>
    %158 = arith.truncf %157 : vector<8x128xf32> to vector<8x128xbf16>
    %159 = arith.index_cast %c2_i32 : i32 to index
    %c0_45 = arith.constant 0 : index
    %c0_46 = arith.constant 0 : index
    %160 = vector.load %arg15[%159, %c0_45, %c0_46] : memref<8x8x128xbf16, #tpu.memory_space<vmem>>, vector<1x8x128xbf16>
    %161 = vector.shape_cast %160 : vector<1x8x128xbf16> to vector<8x128xbf16>
    %162 = vector.shape_cast %158 : vector<8x128xbf16> to vector<1x8x128xbf16>
    tpu.vector_store %arg15[%159, %c0_45, %c0_46], %162 {strides = array<i32>} : memref<8x8x128xbf16, #tpu.memory_space<vmem>>, vector<1x8x128xbf16>,
    %c3_i32 = arith.constant 3 : i32
    %163 = arith.index_cast %c3_i32 : i32 to index
    %c0_47 = arith.constant 0 : index
    %c0_48 = arith.constant 0 : index
    %164 = vector.load %arg14[%163, %c0_47, %c0_48] : memref<8x8x384xf32, #tpu.memory_space<vmem>>, vector<1x8x384xf32>
    %165 = vector.shape_cast %164 : vector<1x8x384xf32> to vector<8x384xf32>
    %c0_49 = arith.constant 0 : index
    %c0_50 = arith.constant 0 : index
    %166 = vector.load %arg4[%c0_49, %c0_50] : memref<128x384xbf16, #tpu.memory_space<vmem>>, vector<128x384xbf16>
    %167 = arith.truncf %157 : vector<8x128xf32> to vector<8x128xbf16>
    %cst_51 = arith.constant dense<0.000000e+00> : vector<8x384xf32>
    %168 = tpu.matmul %167, %166, %cst_51 {dimension_numbers = #tpu.dot_dimension_numbers<[1], [0], [0], [1], [0, 0, 1, 1], [], []>} : vector<8x128xbf16>, vector<128x384xbf16>, vector<8x384xf32> -> vector<8x384xf32>
    %169 = vector.extract_strided_slice %165 {offsets = [0, 0], sizes = [8, 128], strides = [1, 1]} : vector<8x384xf32> to vector<8x128xf32>
    %170 = vector.extract_strided_slice %168 {offsets = [0, 0], sizes = [8, 128], strides = [1, 1]} : vector<8x384xf32> to vector<8x128xf32>
    %171 = arith.addf %169, %170 : vector<8x128xf32>
    %172 = arith.negf %171 : vector<8x128xf32>
    %173 = math.exp %172 : vector<8x128xf32>
    %cst_52 = arith.constant 1.000000e+00 : f32
    %174 = vector.broadcast %cst_52 : f32 to vector<8x128xf32>
    %175 = arith.addf %174, %173 : vector<8x128xf32>
    %176 = arith.divf %174, %175 : vector<8x128xf32>
    %177 = vector.extract_strided_slice %165 {offsets = [0, 128], sizes = [8, 128], strides = [1, 1]} : vector<8x384xf32> to vector<8x128xf32>
    %178 = vector.extract_strided_slice %168 {offsets = [0, 128], sizes = [8, 128], strides = [1, 1]} : vector<8x384xf32> to vector<8x128xf32>
    %179 = arith.addf %177, %178 : vector<8x128xf32>
    %180 = arith.negf %179 : vector<8x128xf32>
    %181 = math.exp %180 : vector<8x128xf32>
    %cst_53 = arith.constant 1.000000e+00 : f32
    %182 = vector.broadcast %cst_53 : f32 to vector<8x128xf32>
    %183 = arith.addf %182, %181 : vector<8x128xf32>
    %184 = arith.divf %182, %183 : vector<8x128xf32>
    %185 = vector.extract_strided_slice %165 {offsets = [0, 256], sizes = [8, 128], strides = [1, 1]} : vector<8x384xf32> to vector<8x128xf32>
    %186 = vector.extract_strided_slice %168 {offsets = [0, 256], sizes = [8, 128], strides = [1, 1]} : vector<8x384xf32> to vector<8x128xf32>
    %187 = vector.broadcast %11 : vector<1x128xf32> to vector<8x128xf32>
    %188 = arith.addf %186, %187 : vector<8x128xf32>
    %189 = arith.mulf %176, %188 : vector<8x128xf32>
    %190 = arith.addf %185, %189 : vector<8x128xf32>
    %191 = math.tanh %190 : vector<8x128xf32>
    %cst_54 = arith.constant 1.000000e+00 : f32
    %192 = vector.broadcast %cst_54 : f32 to vector<8x128xf32>
    %193 = arith.subf %192, %184 : vector<8x128xf32>
    %194 = arith.mulf %193, %191 : vector<8x128xf32>
    %195 = arith.mulf %184, %157 : vector<8x128xf32>
    %196 = arith.addf %194, %195 : vector<8x128xf32>
    %197 = vector.broadcast %c3_i32 : i32 to vector<8x1xi32>
    %198 = arith.cmpi slt, %197, %0 : vector<8x1xi32>
    %199 = arith.extui %198 : vector<8x1xi1> to vector<8x1xi32>
    %200 = arith.sitofp %199 : vector<8x1xi32> to vector<8x1xf32>
    %201 = vector.broadcast %200 : vector<8x1xf32> to vector<8x128xf32>
    %202 = arith.mulf %201, %196 : vector<8x128xf32>
    %cst_55 = arith.constant 1.000000e+00 : f32
    %203 = vector.broadcast %cst_55 : f32 to vector<8x1xf32>
    %204 = arith.subf %203, %200 : vector<8x1xf32>
    %205 = vector.broadcast %204 : vector<8x1xf32> to vector<8x128xf32>
    %206 = arith.mulf %205, %157 : vector<8x128xf32>
    %207 = arith.addf %202, %206 : vector<8x128xf32>
    %208 = arith.truncf %207 : vector<8x128xf32> to vector<8x128xbf16>
    %209 = arith.index_cast %c3_i32 : i32 to index
    %c0_56 = arith.constant 0 : index
    %c0_57 = arith.constant 0 : index
    %210 = vector.load %arg15[%209, %c0_56, %c0_57] : memref<8x8x128xbf16, #tpu.memory_space<vmem>>, vector<1x8x128xbf16>
    %211 = vector.shape_cast %210 : vector<1x8x128xbf16> to vector<8x128xbf16>
    %212 = vector.shape_cast %208 : vector<8x128xbf16> to vector<1x8x128xbf16>
    tpu.vector_store %arg15[%209, %c0_56, %c0_57], %212 {strides = array<i32>} : memref<8x8x128xbf16, #tpu.memory_space<vmem>>, vector<1x8x128xbf16>,
    %c4_i32 = arith.constant 4 : i32
    %213 = arith.index_cast %c4_i32 : i32 to index
    %c0_58 = arith.constant 0 : index
    %c0_59 = arith.constant 0 : index
    %214 = vector.load %arg14[%213, %c0_58, %c0_59] : memref<8x8x384xf32, #tpu.memory_space<vmem>>, vector<1x8x384xf32>
    %215 = vector.shape_cast %214 : vector<1x8x384xf32> to vector<8x384xf32>
    %c0_60 = arith.constant 0 : index
    %c0_61 = arith.constant 0 : index
    %216 = vector.load %arg4[%c0_60, %c0_61] : memref<128x384xbf16, #tpu.memory_space<vmem>>, vector<128x384xbf16>
    %217 = arith.truncf %207 : vector<8x128xf32> to vector<8x128xbf16>
    %cst_62 = arith.constant dense<0.000000e+00> : vector<8x384xf32>
    %218 = tpu.matmul %217, %216, %cst_62 {dimension_numbers = #tpu.dot_dimension_numbers<[1], [0], [0], [1], [0, 0, 1, 1], [], []>} : vector<8x128xbf16>, vector<128x384xbf16>, vector<8x384xf32> -> vector<8x384xf32>
    %219 = vector.extract_strided_slice %215 {offsets = [0, 0], sizes = [8, 128], strides = [1, 1]} : vector<8x384xf32> to vector<8x128xf32>
    %220 = vector.extract_strided_slice %218 {offsets = [0, 0], sizes = [8, 128], strides = [1, 1]} : vector<8x384xf32> to vector<8x128xf32>
    %221 = arith.addf %219, %220 : vector<8x128xf32>
    %222 = arith.negf %221 : vector<8x128xf32>
    %223 = math.exp %222 : vector<8x128xf32>
    %cst_63 = arith.constant 1.000000e+00 : f32
    %224 = vector.broadcast %cst_63 : f32 to vector<8x128xf32>
    %225 = arith.addf %224, %223 : vector<8x128xf32>
    %226 = arith.divf %224, %225 : vector<8x128xf32>
    %227 = vector.extract_strided_slice %215 {offsets = [0, 128], sizes = [8, 128], strides = [1, 1]} : vector<8x384xf32> to vector<8x128xf32>
    %228 = vector.extract_strided_slice %218 {offsets = [0, 128], sizes = [8, 128], strides = [1, 1]} : vector<8x384xf32> to vector<8x128xf32>
    %229 = arith.addf %227, %228 : vector<8x128xf32>
    %230 = arith.negf %229 : vector<8x128xf32>
    %231 = math.exp %230 : vector<8x128xf32>
    %cst_64 = arith.constant 1.000000e+00 : f32
    %232 = vector.broadcast %cst_64 : f32 to vector<8x128xf32>
    %233 = arith.addf %232, %231 : vector<8x128xf32>
    %234 = arith.divf %232, %233 : vector<8x128xf32>
    %235 = vector.extract_strided_slice %215 {offsets = [0, 256], sizes = [8, 128], strides = [1, 1]} : vector<8x384xf32> to vector<8x128xf32>
    %236 = vector.extract_strided_slice %218 {offsets = [0, 256], sizes = [8, 128], strides = [1, 1]} : vector<8x384xf32> to vector<8x128xf32>
    %237 = vector.broadcast %11 : vector<1x128xf32> to vector<8x128xf32>
    %238 = arith.addf %236, %237 : vector<8x128xf32>
    %239 = arith.mulf %226, %238 : vector<8x128xf32>
    %240 = arith.addf %235, %239 : vector<8x128xf32>
    %241 = math.tanh %240 : vector<8x128xf32>
    %cst_65 = arith.constant 1.000000e+00 : f32
    %242 = vector.broadcast %cst_65 : f32 to vector<8x128xf32>
    %243 = arith.subf %242, %234 : vector<8x128xf32>
    %244 = arith.mulf %243, %241 : vector<8x128xf32>
    %245 = arith.mulf %234, %207 : vector<8x128xf32>
    %246 = arith.addf %244, %245 : vector<8x128xf32>
    %247 = vector.broadcast %c4_i32 : i32 to vector<8x1xi32>
    %248 = arith.cmpi slt, %247, %0 : vector<8x1xi32>
    %249 = arith.extui %248 : vector<8x1xi1> to vector<8x1xi32>
    %250 = arith.sitofp %249 : vector<8x1xi32> to vector<8x1xf32>
    %251 = vector.broadcast %250 : vector<8x1xf32> to vector<8x128xf32>
    %252 = arith.mulf %251, %246 : vector<8x128xf32>
    %cst_66 = arith.constant 1.000000e+00 : f32
    %253 = vector.broadcast %cst_66 : f32 to vector<8x1xf32>
    %254 = arith.subf %253, %250 : vector<8x1xf32>
    %255 = vector.broadcast %254 : vector<8x1xf32> to vector<8x128xf32>
    %256 = arith.mulf %255, %207 : vector<8x128xf32>
    %257 = arith.addf %252, %256 : vector<8x128xf32>
    %258 = arith.truncf %257 : vector<8x128xf32> to vector<8x128xbf16>
    %259 = arith.index_cast %c4_i32 : i32 to index
    %c0_67 = arith.constant 0 : index
    %c0_68 = arith.constant 0 : index
    %260 = vector.load %arg15[%259, %c0_67, %c0_68] : memref<8x8x128xbf16, #tpu.memory_space<vmem>>, vector<1x8x128xbf16>
    %261 = vector.shape_cast %260 : vector<1x8x128xbf16> to vector<8x128xbf16>
    %262 = vector.shape_cast %258 : vector<8x128xbf16> to vector<1x8x128xbf16>
    tpu.vector_store %arg15[%259, %c0_67, %c0_68], %262 {strides = array<i32>} : memref<8x8x128xbf16, #tpu.memory_space<vmem>>, vector<1x8x128xbf16>,
    %c5_i32 = arith.constant 5 : i32
    %263 = arith.index_cast %c5_i32 : i32 to index
    %c0_69 = arith.constant 0 : index
    %c0_70 = arith.constant 0 : index
    %264 = vector.load %arg14[%263, %c0_69, %c0_70] : memref<8x8x384xf32, #tpu.memory_space<vmem>>, vector<1x8x384xf32>
    %265 = vector.shape_cast %264 : vector<1x8x384xf32> to vector<8x384xf32>
    %c0_71 = arith.constant 0 : index
    %c0_72 = arith.constant 0 : index
    %266 = vector.load %arg4[%c0_71, %c0_72] : memref<128x384xbf16, #tpu.memory_space<vmem>>, vector<128x384xbf16>
    %267 = arith.truncf %257 : vector<8x128xf32> to vector<8x128xbf16>
    %cst_73 = arith.constant dense<0.000000e+00> : vector<8x384xf32>
    %268 = tpu.matmul %267, %266, %cst_73 {dimension_numbers = #tpu.dot_dimension_numbers<[1], [0], [0], [1], [0, 0, 1, 1], [], []>} : vector<8x128xbf16>, vector<128x384xbf16>, vector<8x384xf32> -> vector<8x384xf32>
    %269 = vector.extract_strided_slice %265 {offsets = [0, 0], sizes = [8, 128], strides = [1, 1]} : vector<8x384xf32> to vector<8x128xf32>
    %270 = vector.extract_strided_slice %268 {offsets = [0, 0], sizes = [8, 128], strides = [1, 1]} : vector<8x384xf32> to vector<8x128xf32>
    %271 = arith.addf %269, %270 : vector<8x128xf32>
    %272 = arith.negf %271 : vector<8x128xf32>
    %273 = math.exp %272 : vector<8x128xf32>
    %cst_74 = arith.constant 1.000000e+00 : f32
    %274 = vector.broadcast %cst_74 : f32 to vector<8x128xf32>
    %275 = arith.addf %274, %273 : vector<8x128xf32>
    %276 = arith.divf %274, %275 : vector<8x128xf32>
    %277 = vector.extract_strided_slice %265 {offsets = [0, 128], sizes = [8, 128], strides = [1, 1]} : vector<8x384xf32> to vector<8x128xf32>
    %278 = vector.extract_strided_slice %268 {offsets = [0, 128], sizes = [8, 128], strides = [1, 1]} : vector<8x384xf32> to vector<8x128xf32>
    %279 = arith.addf %277, %278 : vector<8x128xf32>
    %280 = arith.negf %279 : vector<8x128xf32>
    %281 = math.exp %280 : vector<8x128xf32>
    %cst_75 = arith.constant 1.000000e+00 : f32
    %282 = vector.broadcast %cst_75 : f32 to vector<8x128xf32>
    %283 = arith.addf %282, %281 : vector<8x128xf32>
    %284 = arith.divf %282, %283 : vector<8x128xf32>
    %285 = vector.extract_strided_slice %265 {offsets = [0, 256], sizes = [8, 128], strides = [1, 1]} : vector<8x384xf32> to vector<8x128xf32>
    %286 = vector.extract_strided_slice %268 {offsets = [0, 256], sizes = [8, 128], strides = [1, 1]} : vector<8x384xf32> to vector<8x128xf32>
    %287 = vector.broadcast %11 : vector<1x128xf32> to vector<8x128xf32>
    %288 = arith.addf %286, %287 : vector<8x128xf32>
    %289 = arith.mulf %276, %288 : vector<8x128xf32>
    %290 = arith.addf %285, %289 : vector<8x128xf32>
    %291 = math.tanh %290 : vector<8x128xf32>
    %cst_76 = arith.constant 1.000000e+00 : f32
    %292 = vector.broadcast %cst_76 : f32 to vector<8x128xf32>
    %293 = arith.subf %292, %284 : vector<8x128xf32>
    %294 = arith.mulf %293, %291 : vector<8x128xf32>
    %295 = arith.mulf %284, %257 : vector<8x128xf32>
    %296 = arith.addf %294, %295 : vector<8x128xf32>
    %297 = vector.broadcast %c5_i32 : i32 to vector<8x1xi32>
    %298 = arith.cmpi slt, %297, %0 : vector<8x1xi32>
    %299 = arith.extui %298 : vector<8x1xi1> to vector<8x1xi32>
    %300 = arith.sitofp %299 : vector<8x1xi32> to vector<8x1xf32>
    %301 = vector.broadcast %300 : vector<8x1xf32> to vector<8x128xf32>
    %302 = arith.mulf %301, %296 : vector<8x128xf32>
    %cst_77 = arith.constant 1.000000e+00 : f32
    %303 = vector.broadcast %cst_77 : f32 to vector<8x1xf32>
    %304 = arith.subf %303, %300 : vector<8x1xf32>
    %305 = vector.broadcast %304 : vector<8x1xf32> to vector<8x128xf32>
    %306 = arith.mulf %305, %257 : vector<8x128xf32>
    %307 = arith.addf %302, %306 : vector<8x128xf32>
    %308 = arith.truncf %307 : vector<8x128xf32> to vector<8x128xbf16>
    %309 = arith.index_cast %c5_i32 : i32 to index
    %c0_78 = arith.constant 0 : index
    %c0_79 = arith.constant 0 : index
    %310 = vector.load %arg15[%309, %c0_78, %c0_79] : memref<8x8x128xbf16, #tpu.memory_space<vmem>>, vector<1x8x128xbf16>
    %311 = vector.shape_cast %310 : vector<1x8x128xbf16> to vector<8x128xbf16>
    %312 = vector.shape_cast %308 : vector<8x128xbf16> to vector<1x8x128xbf16>
    tpu.vector_store %arg15[%309, %c0_78, %c0_79], %312 {strides = array<i32>} : memref<8x8x128xbf16, #tpu.memory_space<vmem>>, vector<1x8x128xbf16>,
    %c6_i32 = arith.constant 6 : i32
    %313 = arith.index_cast %c6_i32 : i32 to index
    %c0_80 = arith.constant 0 : index
    %c0_81 = arith.constant 0 : index
    %314 = vector.load %arg14[%313, %c0_80, %c0_81] : memref<8x8x384xf32, #tpu.memory_space<vmem>>, vector<1x8x384xf32>
    %315 = vector.shape_cast %314 : vector<1x8x384xf32> to vector<8x384xf32>
    %c0_82 = arith.constant 0 : index
    %c0_83 = arith.constant 0 : index
    %316 = vector.load %arg4[%c0_82, %c0_83] : memref<128x384xbf16, #tpu.memory_space<vmem>>, vector<128x384xbf16>
    %317 = arith.truncf %307 : vector<8x128xf32> to vector<8x128xbf16>
    %cst_84 = arith.constant dense<0.000000e+00> : vector<8x384xf32>
    %318 = tpu.matmul %317, %316, %cst_84 {dimension_numbers = #tpu.dot_dimension_numbers<[1], [0], [0], [1], [0, 0, 1, 1], [], []>} : vector<8x128xbf16>, vector<128x384xbf16>, vector<8x384xf32> -> vector<8x384xf32>
    %319 = vector.extract_strided_slice %315 {offsets = [0, 0], sizes = [8, 128], strides = [1, 1]} : vector<8x384xf32> to vector<8x128xf32>
    %320 = vector.extract_strided_slice %318 {offsets = [0, 0], sizes = [8, 128], strides = [1, 1]} : vector<8x384xf32> to vector<8x128xf32>
    %321 = arith.addf %319, %320 : vector<8x128xf32>
    %322 = arith.negf %321 : vector<8x128xf32>
    %323 = math.exp %322 : vector<8x128xf32>
    %cst_85 = arith.constant 1.000000e+00 : f32
    %324 = vector.broadcast %cst_85 : f32 to vector<8x128xf32>
    %325 = arith.addf %324, %323 : vector<8x128xf32>
    %326 = arith.divf %324, %325 : vector<8x128xf32>
    %327 = vector.extract_strided_slice %315 {offsets = [0, 128], sizes = [8, 128], strides = [1, 1]} : vector<8x384xf32> to vector<8x128xf32>
    %328 = vector.extract_strided_slice %318 {offsets = [0, 128], sizes = [8, 128], strides = [1, 1]} : vector<8x384xf32> to vector<8x128xf32>
    %329 = arith.addf %327, %328 : vector<8x128xf32>
    %330 = arith.negf %329 : vector<8x128xf32>
    %331 = math.exp %330 : vector<8x128xf32>
    %cst_86 = arith.constant 1.000000e+00 : f32
    %332 = vector.broadcast %cst_86 : f32 to vector<8x128xf32>
    %333 = arith.addf %332, %331 : vector<8x128xf32>
    %334 = arith.divf %332, %333 : vector<8x128xf32>
    %335 = vector.extract_strided_slice %315 {offsets = [0, 256], sizes = [8, 128], strides = [1, 1]} : vector<8x384xf32> to vector<8x128xf32>
    %336 = vector.extract_strided_slice %318 {offsets = [0, 256], sizes = [8, 128], strides = [1, 1]} : vector<8x384xf32> to vector<8x128xf32>
    %337 = vector.broadcast %11 : vector<1x128xf32> to vector<8x128xf32>
    %338 = arith.addf %336, %337 : vector<8x128xf32>
    %339 = arith.mulf %326, %338 : vector<8x128xf32>
    %340 = arith.addf %335, %339 : vector<8x128xf32>
    %341 = math.tanh %340 : vector<8x128xf32>
    %cst_87 = arith.constant 1.000000e+00 : f32
    %342 = vector.broadcast %cst_87 : f32 to vector<8x128xf32>
    %343 = arith.subf %342, %334 : vector<8x128xf32>
    %344 = arith.mulf %343, %341 : vector<8x128xf32>
    %345 = arith.mulf %334, %307 : vector<8x128xf32>
    %346 = arith.addf %344, %345 : vector<8x128xf32>
    %347 = vector.broadcast %c6_i32 : i32 to vector<8x1xi32>
    %348 = arith.cmpi slt, %347, %0 : vector<8x1xi32>
    %349 = arith.extui %348 : vector<8x1xi1> to vector<8x1xi32>
    %350 = arith.sitofp %349 : vector<8x1xi32> to vector<8x1xf32>
    %351 = vector.broadcast %350 : vector<8x1xf32> to vector<8x128xf32>
    %352 = arith.mulf %351, %346 : vector<8x128xf32>
    %cst_88 = arith.constant 1.000000e+00 : f32
    %353 = vector.broadcast %cst_88 : f32 to vector<8x1xf32>
    %354 = arith.subf %353, %350 : vector<8x1xf32>
    %355 = vector.broadcast %354 : vector<8x1xf32> to vector<8x128xf32>
    %356 = arith.mulf %355, %307 : vector<8x128xf32>
    %357 = arith.addf %352, %356 : vector<8x128xf32>
    %358 = arith.truncf %357 : vector<8x128xf32> to vector<8x128xbf16>
    %359 = arith.index_cast %c6_i32 : i32 to index
    %c0_89 = arith.constant 0 : index
    %c0_90 = arith.constant 0 : index
    %360 = vector.load %arg15[%359, %c0_89, %c0_90] : memref<8x8x128xbf16, #tpu.memory_space<vmem>>, vector<1x8x128xbf16>
    %361 = vector.shape_cast %360 : vector<1x8x128xbf16> to vector<8x128xbf16>
    %362 = vector.shape_cast %358 : vector<8x128xbf16> to vector<1x8x128xbf16>
    tpu.vector_store %arg15[%359, %c0_89, %c0_90], %362 {strides = array<i32>} : memref<8x8x128xbf16, #tpu.memory_space<vmem>>, vector<1x8x128xbf16>,
    %c7_i32 = arith.constant 7 : i32
    %363 = arith.index_cast %c7_i32 : i32 to index
    %c0_91 = arith.constant 0 : index
    %c0_92 = arith.constant 0 : index
    %364 = vector.load %arg14[%363, %c0_91, %c0_92] : memref<8x8x384xf32, #tpu.memory_space<vmem>>, vector<1x8x384xf32>
    %365 = vector.shape_cast %364 : vector<1x8x384xf32> to vector<8x384xf32>
    %c0_93 = arith.constant 0 : index
    %c0_94 = arith.constant 0 : index
    %366 = vector.load %arg4[%c0_93, %c0_94] : memref<128x384xbf16, #tpu.memory_space<vmem>>, vector<128x384xbf16>
    %367 = arith.truncf %357 : vector<8x128xf32> to vector<8x128xbf16>
    %cst_95 = arith.constant dense<0.000000e+00> : vector<8x384xf32>
    %368 = tpu.matmul %367, %366, %cst_95 {dimension_numbers = #tpu.dot_dimension_numbers<[1], [0], [0], [1], [0, 0, 1, 1], [], []>} : vector<8x128xbf16>, vector<128x384xbf16>, vector<8x384xf32> -> vector<8x384xf32>
    %369 = vector.extract_strided_slice %365 {offsets = [0, 0], sizes = [8, 128], strides = [1, 1]} : vector<8x384xf32> to vector<8x128xf32>
    %370 = vector.extract_strided_slice %368 {offsets = [0, 0], sizes = [8, 128], strides = [1, 1]} : vector<8x384xf32> to vector<8x128xf32>
    %371 = arith.addf %369, %370 : vector<8x128xf32>
    %372 = arith.negf %371 : vector<8x128xf32>
    %373 = math.exp %372 : vector<8x128xf32>
    %cst_96 = arith.constant 1.000000e+00 : f32
    %374 = vector.broadcast %cst_96 : f32 to vector<8x128xf32>
    %375 = arith.addf %374, %373 : vector<8x128xf32>
    %376 = arith.divf %374, %375 : vector<8x128xf32>
    %377 = vector.extract_strided_slice %365 {offsets = [0, 128], sizes = [8, 128], strides = [1, 1]} : vector<8x384xf32> to vector<8x128xf32>
    %378 = vector.extract_strided_slice %368 {offsets = [0, 128], sizes = [8, 128], strides = [1, 1]} : vector<8x384xf32> to vector<8x128xf32>
    %379 = arith.addf %377, %378 : vector<8x128xf32>
    %380 = arith.negf %379 : vector<8x128xf32>
    %381 = math.exp %380 : vector<8x128xf32>
    %cst_97 = arith.constant 1.000000e+00 : f32
    %382 = vector.broadcast %cst_97 : f32 to vector<8x128xf32>
    %383 = arith.addf %382, %381 : vector<8x128xf32>
    %384 = arith.divf %382, %383 : vector<8x128xf32>
    %385 = vector.extract_strided_slice %365 {offsets = [0, 256], sizes = [8, 128], strides = [1, 1]} : vector<8x384xf32> to vector<8x128xf32>
    %386 = vector.extract_strided_slice %368 {offsets = [0, 256], sizes = [8, 128], strides = [1, 1]} : vector<8x384xf32> to vector<8x128xf32>
    %387 = vector.broadcast %11 : vector<1x128xf32> to vector<8x128xf32>
    %388 = arith.addf %386, %387 : vector<8x128xf32>
    %389 = arith.mulf %376, %388 : vector<8x128xf32>
    %390 = arith.addf %385, %389 : vector<8x128xf32>
    %391 = math.tanh %390 : vector<8x128xf32>
    %cst_98 = arith.constant 1.000000e+00 : f32
    %392 = vector.broadcast %cst_98 : f32 to vector<8x128xf32>
    %393 = arith.subf %392, %384 : vector<8x128xf32>
    %394 = arith.mulf %393, %391 : vector<8x128xf32>
    %395 = arith.mulf %384, %357 : vector<8x128xf32>
    %396 = arith.addf %394, %395 : vector<8x128xf32>
    %397 = vector.broadcast %c7_i32 : i32 to vector<8x1xi32>
    %398 = arith.cmpi slt, %397, %0 : vector<8x1xi32>
    %399 = arith.extui %398 : vector<8x1xi1> to vector<8x1xi32>
    %400 = arith.sitofp %399 : vector<8x1xi32> to vector<8x1xf32>
    %401 = vector.broadcast %400 : vector<8x1xf32> to vector<8x128xf32>
    %402 = arith.mulf %401, %396 : vector<8x128xf32>
    %cst_99 = arith.constant 1.000000e+00 : f32
    %403 = vector.broadcast %cst_99 : f32 to vector<8x1xf32>
    %404 = arith.subf %403, %400 : vector<8x1xf32>
    %405 = vector.broadcast %404 : vector<8x1xf32> to vector<8x128xf32>
    %406 = arith.mulf %405, %357 : vector<8x128xf32>
    %407 = arith.addf %402, %406 : vector<8x128xf32>
    %408 = arith.truncf %407 : vector<8x128xf32> to vector<8x128xbf16>
    %409 = arith.index_cast %c7_i32 : i32 to index
    %c0_100 = arith.constant 0 : index
    %c0_101 = arith.constant 0 : index
    %410 = vector.load %arg15[%409, %c0_100, %c0_101] : memref<8x8x128xbf16, #tpu.memory_space<vmem>>, vector<1x8x128xbf16>
    %411 = vector.shape_cast %410 : vector<1x8x128xbf16> to vector<8x128xbf16>
    %412 = vector.shape_cast %408 : vector<8x128xbf16> to vector<1x8x128xbf16>
    tpu.vector_store %arg15[%409, %c0_100, %c0_101], %412 {strides = array<i32>} : memref<8x8x128xbf16, #tpu.memory_space<vmem>>, vector<1x8x128xbf16>,
    %c8_i32 = arith.constant 8 : i32
    %c0_102 = arith.constant 0 : index
    %c0_103 = arith.constant 0 : index
    %c0_104 = arith.constant 0 : index
    %413 = vector.load %arg15[%c0_102, %c0_103, %c0_104] : memref<8x8x128xbf16, #tpu.memory_space<vmem>>, vector<8x8x128xbf16>
    %414 = vector.shape_cast %413 : vector<8x8x128xbf16> to vector<64x128xbf16>
    %c0_105 = arith.constant 0 : index
    %c0_106 = arith.constant 0 : index
    %415 = vector.load %arg7[%c0_105, %c0_106] : memref<128x384xbf16, #tpu.memory_space<vmem>>, vector<128x384xbf16>
    %cst_107 = arith.constant dense<0.000000e+00> : vector<64x384xf32>
    %416 = tpu.matmul %414, %415, %cst_107 {dimension_numbers = #tpu.dot_dimension_numbers<[1], [0], [0], [1], [0, 0, 1, 1], [], []>} : vector<64x128xbf16>, vector<128x384xbf16>, vector<64x384xf32> -> vector<64x384xf32>
    %c0_108 = arith.constant 0 : index
    %c0_109 = arith.constant 0 : index
    %417 = vector.load %arg9[%c0_108, %c0_109] : memref<1x384xf32, #tpu.memory_space<vmem>>, vector<1x384xf32>
    %418 = vector.broadcast %417 : vector<1x384xf32> to vector<64x384xf32>
    %419 = arith.addf %416, %418 : vector<64x384xf32>
    %420 = vector.shape_cast %419 : vector<64x384xf32> to vector<8x8x384xf32>
    %c0_110 = arith.constant 0 : index
    %c0_111 = arith.constant 0 : index
    %c0_112 = arith.constant 0 : index
    %421 = vector.load %arg14[%c0_110, %c0_111, %c0_112] : memref<8x8x384xf32, #tpu.memory_space<vmem>>, vector<8x8x384xf32>
    tpu.vector_store %arg14[%c0_110, %c0_111, %c0_112], %420 {strides = array<i32>} : memref<8x8x384xf32, #tpu.memory_space<vmem>>, vector<8x8x384xf32>,
    %c0_113 = arith.constant 0 : index
    %c0_114 = arith.constant 0 : index
    %422 = vector.load %arg10[%c0_113, %c0_114] : memref<1x128xf32, #tpu.memory_space<vmem>>, vector<1x128xf32>
    %cst_115 = arith.constant 0.000000e+00 : f32
    %423 = vector.broadcast %cst_115 : f32 to vector<8x128xf32>
    %c0_i32_116 = arith.constant 0 : i32
    %424 = arith.index_cast %c0_i32_116 : i32 to index
    %c0_117 = arith.constant 0 : index
    %c0_118 = arith.constant 0 : index
    %425 = vector.load %arg14[%424, %c0_117, %c0_118] : memref<8x8x384xf32, #tpu.memory_space<vmem>>, vector<1x8x384xf32>
    %426 = vector.shape_cast %425 : vector<1x8x384xf32> to vector<8x384xf32>
    %c0_119 = arith.constant 0 : index
    %c0_120 = arith.constant 0 : index
    %427 = vector.load %arg8[%c0_119, %c0_120] : memref<128x384xbf16, #tpu.memory_space<vmem>>, vector<128x384xbf16>
    %428 = arith.truncf %423 : vector<8x128xf32> to vector<8x128xbf16>
    %cst_121 = arith.constant dense<0.000000e+00> : vector<8x384xf32>
    %429 = tpu.matmul %428, %427, %cst_121 {dimension_numbers = #tpu.dot_dimension_numbers<[1], [0], [0], [1], [0, 0, 1, 1], [], []>} : vector<8x128xbf16>, vector<128x384xbf16>, vector<8x384xf32> -> vector<8x384xf32>
    %430 = vector.extract_strided_slice %426 {offsets = [0, 0], sizes = [8, 128], strides = [1, 1]} : vector<8x384xf32> to vector<8x128xf32>
    %431 = vector.extract_strided_slice %429 {offsets = [0, 0], sizes = [8, 128], strides = [1, 1]} : vector<8x384xf32> to vector<8x128xf32>
    %432 = arith.addf %430, %431 : vector<8x128xf32>
    %433 = arith.negf %432 : vector<8x128xf32>
    %434 = math.exp %433 : vector<8x128xf32>
    %cst_122 = arith.constant 1.000000e+00 : f32
    %435 = vector.broadcast %cst_122 : f32 to vector<8x128xf32>
    %436 = arith.addf %435, %434 : vector<8x128xf32>
    %437 = arith.divf %435, %436 : vector<8x128xf32>
    %438 = vector.extract_strided_slice %426 {offsets = [0, 128], sizes = [8, 128], strides = [1, 1]} : vector<8x384xf32> to vector<8x128xf32>
    %439 = vector.extract_strided_slice %429 {offsets = [0, 128], sizes = [8, 128], strides = [1, 1]} : vector<8x384xf32> to vector<8x128xf32>
    %440 = arith.addf %438, %439 : vector<8x128xf32>
    %441 = arith.negf %440 : vector<8x128xf32>
    %442 = math.exp %441 : vector<8x128xf32>
    %cst_123 = arith.constant 1.000000e+00 : f32
    %443 = vector.broadcast %cst_123 : f32 to vector<8x128xf32>
    %444 = arith.addf %443, %442 : vector<8x128xf32>
    %445 = arith.divf %443, %444 : vector<8x128xf32>
    %446 = vector.extract_strided_slice %426 {offsets = [0, 256], sizes = [8, 128], strides = [1, 1]} : vector<8x384xf32> to vector<8x128xf32>
    %447 = vector.extract_strided_slice %429 {offsets = [0, 256], sizes = [8, 128], strides = [1, 1]} : vector<8x384xf32> to vector<8x128xf32>
    %448 = vector.broadcast %422 : vector<1x128xf32> to vector<8x128xf32>
    %449 = arith.addf %447, %448 : vector<8x128xf32>
    %450 = arith.mulf %437, %449 : vector<8x128xf32>
    %451 = arith.addf %446, %450 : vector<8x128xf32>
    %452 = math.tanh %451 : vector<8x128xf32>
    %cst_124 = arith.constant 1.000000e+00 : f32
    %453 = vector.broadcast %cst_124 : f32 to vector<8x128xf32>
    %454 = arith.subf %453, %445 : vector<8x128xf32>
    %455 = arith.mulf %454, %452 : vector<8x128xf32>
    %456 = arith.mulf %445, %423 : vector<8x128xf32>
    %457 = arith.addf %455, %456 : vector<8x128xf32>
    %458 = vector.broadcast %c0_i32_116 : i32 to vector<8x1xi32>
    %459 = arith.cmpi slt, %458, %0 : vector<8x1xi32>
    %460 = arith.extui %459 : vector<8x1xi1> to vector<8x1xi32>
    %461 = arith.sitofp %460 : vector<8x1xi32> to vector<8x1xf32>
    %462 = vector.broadcast %461 : vector<8x1xf32> to vector<8x128xf32>
    %463 = arith.mulf %462, %457 : vector<8x128xf32>
    %cst_125 = arith.constant 1.000000e+00 : f32
    %464 = vector.broadcast %cst_125 : f32 to vector<8x1xf32>
    %465 = arith.subf %464, %461 : vector<8x1xf32>
    %466 = vector.broadcast %465 : vector<8x1xf32> to vector<8x128xf32>
    %467 = arith.mulf %466, %423 : vector<8x128xf32>
    %468 = arith.addf %463, %467 : vector<8x128xf32>
    %469 = arith.truncf %468 : vector<8x128xf32> to vector<8x128xbf16>
    %470 = arith.index_cast %c0_i32_116 : i32 to index
    %c0_126 = arith.constant 0 : index
    %c0_127 = arith.constant 0 : index
    %471 = vector.load %arg16[%470, %c0_126, %c0_127] : memref<8x8x128xbf16, #tpu.memory_space<vmem>>, vector<1x8x128xbf16>
    %472 = vector.shape_cast %471 : vector<1x8x128xbf16> to vector<8x128xbf16>
    %473 = vector.shape_cast %469 : vector<8x128xbf16> to vector<1x8x128xbf16>
    tpu.vector_store %arg16[%470, %c0_126, %c0_127], %473 {strides = array<i32>} : memref<8x8x128xbf16, #tpu.memory_space<vmem>>, vector<1x8x128xbf16>,
    %c1_i32_128 = arith.constant 1 : i32
    %474 = arith.index_cast %c1_i32_128 : i32 to index
    %c0_129 = arith.constant 0 : index
    %c0_130 = arith.constant 0 : index
    %475 = vector.load %arg14[%474, %c0_129, %c0_130] : memref<8x8x384xf32, #tpu.memory_space<vmem>>, vector<1x8x384xf32>
    %476 = vector.shape_cast %475 : vector<1x8x384xf32> to vector<8x384xf32>
    %c0_131 = arith.constant 0 : index
    %c0_132 = arith.constant 0 : index
    %477 = vector.load %arg8[%c0_131, %c0_132] : memref<128x384xbf16, #tpu.memory_space<vmem>>, vector<128x384xbf16>
    %478 = arith.truncf %468 : vector<8x128xf32> to vector<8x128xbf16>
    %cst_133 = arith.constant dense<0.000000e+00> : vector<8x384xf32>
    %479 = tpu.matmul %478, %477, %cst_133 {dimension_numbers = #tpu.dot_dimension_numbers<[1], [0], [0], [1], [0, 0, 1, 1], [], []>} : vector<8x128xbf16>, vector<128x384xbf16>, vector<8x384xf32> -> vector<8x384xf32>
    %480 = vector.extract_strided_slice %476 {offsets = [0, 0], sizes = [8, 128], strides = [1, 1]} : vector<8x384xf32> to vector<8x128xf32>
    %481 = vector.extract_strided_slice %479 {offsets = [0, 0], sizes = [8, 128], strides = [1, 1]} : vector<8x384xf32> to vector<8x128xf32>
    %482 = arith.addf %480, %481 : vector<8x128xf32>
    %483 = arith.negf %482 : vector<8x128xf32>
    %484 = math.exp %483 : vector<8x128xf32>
    %cst_134 = arith.constant 1.000000e+00 : f32
    %485 = vector.broadcast %cst_134 : f32 to vector<8x128xf32>
    %486 = arith.addf %485, %484 : vector<8x128xf32>
    %487 = arith.divf %485, %486 : vector<8x128xf32>
    %488 = vector.extract_strided_slice %476 {offsets = [0, 128], sizes = [8, 128], strides = [1, 1]} : vector<8x384xf32> to vector<8x128xf32>
    %489 = vector.extract_strided_slice %479 {offsets = [0, 128], sizes = [8, 128], strides = [1, 1]} : vector<8x384xf32> to vector<8x128xf32>
    %490 = arith.addf %488, %489 : vector<8x128xf32>
    %491 = arith.negf %490 : vector<8x128xf32>
    %492 = math.exp %491 : vector<8x128xf32>
    %cst_135 = arith.constant 1.000000e+00 : f32
    %493 = vector.broadcast %cst_135 : f32 to vector<8x128xf32>
    %494 = arith.addf %493, %492 : vector<8x128xf32>
    %495 = arith.divf %493, %494 : vector<8x128xf32>
    %496 = vector.extract_strided_slice %476 {offsets = [0, 256], sizes = [8, 128], strides = [1, 1]} : vector<8x384xf32> to vector<8x128xf32>
    %497 = vector.extract_strided_slice %479 {offsets = [0, 256], sizes = [8, 128], strides = [1, 1]} : vector<8x384xf32> to vector<8x128xf32>
    %498 = vector.broadcast %422 : vector<1x128xf32> to vector<8x128xf32>
    %499 = arith.addf %497, %498 : vector<8x128xf32>
    %500 = arith.mulf %487, %499 : vector<8x128xf32>
    %501 = arith.addf %496, %500 : vector<8x128xf32>
    %502 = math.tanh %501 : vector<8x128xf32>
    %cst_136 = arith.constant 1.000000e+00 : f32
    %503 = vector.broadcast %cst_136 : f32 to vector<8x128xf32>
    %504 = arith.subf %503, %495 : vector<8x128xf32>
    %505 = arith.mulf %504, %502 : vector<8x128xf32>
    %506 = arith.mulf %495, %468 : vector<8x128xf32>
    %507 = arith.addf %505, %506 : vector<8x128xf32>
    %508 = vector.broadcast %c1_i32_128 : i32 to vector<8x1xi32>
    %509 = arith.cmpi slt, %508, %0 : vector<8x1xi32>
    %510 = arith.extui %509 : vector<8x1xi1> to vector<8x1xi32>
    %511 = arith.sitofp %510 : vector<8x1xi32> to vector<8x1xf32>
    %512 = vector.broadcast %511 : vector<8x1xf32> to vector<8x128xf32>
    %513 = arith.mulf %512, %507 : vector<8x128xf32>
    %cst_137 = arith.constant 1.000000e+00 : f32
    %514 = vector.broadcast %cst_137 : f32 to vector<8x1xf32>
    %515 = arith.subf %514, %511 : vector<8x1xf32>
    %516 = vector.broadcast %515 : vector<8x1xf32> to vector<8x128xf32>
    %517 = arith.mulf %516, %468 : vector<8x128xf32>
    %518 = arith.addf %513, %517 : vector<8x128xf32>
    %519 = arith.truncf %518 : vector<8x128xf32> to vector<8x128xbf16>
    %520 = arith.index_cast %c1_i32_128 : i32 to index
    %c0_138 = arith.constant 0 : index
    %c0_139 = arith.constant 0 : index
    %521 = vector.load %arg16[%520, %c0_138, %c0_139] : memref<8x8x128xbf16, #tpu.memory_space<vmem>>, vector<1x8x128xbf16>
    %522 = vector.shape_cast %521 : vector<1x8x128xbf16> to vector<8x128xbf16>
    %523 = vector.shape_cast %519 : vector<8x128xbf16> to vector<1x8x128xbf16>
    tpu.vector_store %arg16[%520, %c0_138, %c0_139], %523 {strides = array<i32>} : memref<8x8x128xbf16, #tpu.memory_space<vmem>>, vector<1x8x128xbf16>,
    %c2_i32_140 = arith.constant 2 : i32
    %524 = arith.index_cast %c2_i32_140 : i32 to index
    %c0_141 = arith.constant 0 : index
    %c0_142 = arith.constant 0 : index
    %525 = vector.load %arg14[%524, %c0_141, %c0_142] : memref<8x8x384xf32, #tpu.memory_space<vmem>>, vector<1x8x384xf32>
    %526 = vector.shape_cast %525 : vector<1x8x384xf32> to vector<8x384xf32>
    %c0_143 = arith.constant 0 : index
    %c0_144 = arith.constant 0 : index
    %527 = vector.load %arg8[%c0_143, %c0_144] : memref<128x384xbf16, #tpu.memory_space<vmem>>, vector<128x384xbf16>
    %528 = arith.truncf %518 : vector<8x128xf32> to vector<8x128xbf16>
    %cst_145 = arith.constant dense<0.000000e+00> : vector<8x384xf32>
    %529 = tpu.matmul %528, %527, %cst_145 {dimension_numbers = #tpu.dot_dimension_numbers<[1], [0], [0], [1], [0, 0, 1, 1], [], []>} : vector<8x128xbf16>, vector<128x384xbf16>, vector<8x384xf32> -> vector<8x384xf32>
    %530 = vector.extract_strided_slice %526 {offsets = [0, 0], sizes = [8, 128], strides = [1, 1]} : vector<8x384xf32> to vector<8x128xf32>
    %531 = vector.extract_strided_slice %529 {offsets = [0, 0], sizes = [8, 128], strides = [1, 1]} : vector<8x384xf32> to vector<8x128xf32>
    %532 = arith.addf %530, %531 : vector<8x128xf32>
    %533 = arith.negf %532 : vector<8x128xf32>
    %534 = math.exp %533 : vector<8x128xf32>
    %cst_146 = arith.constant 1.000000e+00 : f32
    %535 = vector.broadcast %cst_146 : f32 to vector<8x128xf32>
    %536 = arith.addf %535, %534 : vector<8x128xf32>
    %537 = arith.divf %535, %536 : vector<8x128xf32>
    %538 = vector.extract_strided_slice %526 {offsets = [0, 128], sizes = [8, 128], strides = [1, 1]} : vector<8x384xf32> to vector<8x128xf32>
    %539 = vector.extract_strided_slice %529 {offsets = [0, 128], sizes = [8, 128], strides = [1, 1]} : vector<8x384xf32> to vector<8x128xf32>
    %540 = arith.addf %538, %539 : vector<8x128xf32>
    %541 = arith.negf %540 : vector<8x128xf32>
    %542 = math.exp %541 : vector<8x128xf32>
    %cst_147 = arith.constant 1.000000e+00 : f32
    %543 = vector.broadcast %cst_147 : f32 to vector<8x128xf32>
    %544 = arith.addf %543, %542 : vector<8x128xf32>
    %545 = arith.divf %543, %544 : vector<8x128xf32>
    %546 = vector.extract_strided_slice %526 {offsets = [0, 256], sizes = [8, 128], strides = [1, 1]} : vector<8x384xf32> to vector<8x128xf32>
    %547 = vector.extract_strided_slice %529 {offsets = [0, 256], sizes = [8, 128], strides = [1, 1]} : vector<8x384xf32> to vector<8x128xf32>
    %548 = vector.broadcast %422 : vector<1x128xf32> to vector<8x128xf32>
    %549 = arith.addf %547, %548 : vector<8x128xf32>
    %550 = arith.mulf %537, %549 : vector<8x128xf32>
    %551 = arith.addf %546, %550 : vector<8x128xf32>
    %552 = math.tanh %551 : vector<8x128xf32>
    %cst_148 = arith.constant 1.000000e+00 : f32
    %553 = vector.broadcast %cst_148 : f32 to vector<8x128xf32>
    %554 = arith.subf %553, %545 : vector<8x128xf32>
    %555 = arith.mulf %554, %552 : vector<8x128xf32>
    %556 = arith.mulf %545, %518 : vector<8x128xf32>
    %557 = arith.addf %555, %556 : vector<8x128xf32>
    %558 = vector.broadcast %c2_i32_140 : i32 to vector<8x1xi32>
    %559 = arith.cmpi slt, %558, %0 : vector<8x1xi32>
    %560 = arith.extui %559 : vector<8x1xi1> to vector<8x1xi32>
    %561 = arith.sitofp %560 : vector<8x1xi32> to vector<8x1xf32>
    %562 = vector.broadcast %561 : vector<8x1xf32> to vector<8x128xf32>
    %563 = arith.mulf %562, %557 : vector<8x128xf32>
    %cst_149 = arith.constant 1.000000e+00 : f32
    %564 = vector.broadcast %cst_149 : f32 to vector<8x1xf32>
    %565 = arith.subf %564, %561 : vector<8x1xf32>
    %566 = vector.broadcast %565 : vector<8x1xf32> to vector<8x128xf32>
    %567 = arith.mulf %566, %518 : vector<8x128xf32>
    %568 = arith.addf %563, %567 : vector<8x128xf32>
    %569 = arith.truncf %568 : vector<8x128xf32> to vector<8x128xbf16>
    %570 = arith.index_cast %c2_i32_140 : i32 to index
    %c0_150 = arith.constant 0 : index
    %c0_151 = arith.constant 0 : index
    %571 = vector.load %arg16[%570, %c0_150, %c0_151] : memref<8x8x128xbf16, #tpu.memory_space<vmem>>, vector<1x8x128xbf16>
    %572 = vector.shape_cast %571 : vector<1x8x128xbf16> to vector<8x128xbf16>
    %573 = vector.shape_cast %569 : vector<8x128xbf16> to vector<1x8x128xbf16>
    tpu.vector_store %arg16[%570, %c0_150, %c0_151], %573 {strides = array<i32>} : memref<8x8x128xbf16, #tpu.memory_space<vmem>>, vector<1x8x128xbf16>,
    %c3_i32_152 = arith.constant 3 : i32
    %574 = arith.index_cast %c3_i32_152 : i32 to index
    %c0_153 = arith.constant 0 : index
    %c0_154 = arith.constant 0 : index
    %575 = vector.load %arg14[%574, %c0_153, %c0_154] : memref<8x8x384xf32, #tpu.memory_space<vmem>>, vector<1x8x384xf32>
    %576 = vector.shape_cast %575 : vector<1x8x384xf32> to vector<8x384xf32>
    %c0_155 = arith.constant 0 : index
    %c0_156 = arith.constant 0 : index
    %577 = vector.load %arg8[%c0_155, %c0_156] : memref<128x384xbf16, #tpu.memory_space<vmem>>, vector<128x384xbf16>
    %578 = arith.truncf %568 : vector<8x128xf32> to vector<8x128xbf16>
    %cst_157 = arith.constant dense<0.000000e+00> : vector<8x384xf32>
    %579 = tpu.matmul %578, %577, %cst_157 {dimension_numbers = #tpu.dot_dimension_numbers<[1], [0], [0], [1], [0, 0, 1, 1], [], []>} : vector<8x128xbf16>, vector<128x384xbf16>, vector<8x384xf32> -> vector<8x384xf32>
    %580 = vector.extract_strided_slice %576 {offsets = [0, 0], sizes = [8, 128], strides = [1, 1]} : vector<8x384xf32> to vector<8x128xf32>
    %581 = vector.extract_strided_slice %579 {offsets = [0, 0], sizes = [8, 128], strides = [1, 1]} : vector<8x384xf32> to vector<8x128xf32>
    %582 = arith.addf %580, %581 : vector<8x128xf32>
    %583 = arith.negf %582 : vector<8x128xf32>
    %584 = math.exp %583 : vector<8x128xf32>
    %cst_158 = arith.constant 1.000000e+00 : f32
    %585 = vector.broadcast %cst_158 : f32 to vector<8x128xf32>
    %586 = arith.addf %585, %584 : vector<8x128xf32>
    %587 = arith.divf %585, %586 : vector<8x128xf32>
    %588 = vector.extract_strided_slice %576 {offsets = [0, 128], sizes = [8, 128], strides = [1, 1]} : vector<8x384xf32> to vector<8x128xf32>
    %589 = vector.extract_strided_slice %579 {offsets = [0, 128], sizes = [8, 128], strides = [1, 1]} : vector<8x384xf32> to vector<8x128xf32>
    %590 = arith.addf %588, %589 : vector<8x128xf32>
    %591 = arith.negf %590 : vector<8x128xf32>
    %592 = math.exp %591 : vector<8x128xf32>
    %cst_159 = arith.constant 1.000000e+00 : f32
    %593 = vector.broadcast %cst_159 : f32 to vector<8x128xf32>
    %594 = arith.addf %593, %592 : vector<8x128xf32>
    %595 = arith.divf %593, %594 : vector<8x128xf32>
    %596 = vector.extract_strided_slice %576 {offsets = [0, 256], sizes = [8, 128], strides = [1, 1]} : vector<8x384xf32> to vector<8x128xf32>
    %597 = vector.extract_strided_slice %579 {offsets = [0, 256], sizes = [8, 128], strides = [1, 1]} : vector<8x384xf32> to vector<8x128xf32>
    %598 = vector.broadcast %422 : vector<1x128xf32> to vector<8x128xf32>
    %599 = arith.addf %597, %598 : vector<8x128xf32>
    %600 = arith.mulf %587, %599 : vector<8x128xf32>
    %601 = arith.addf %596, %600 : vector<8x128xf32>
    %602 = math.tanh %601 : vector<8x128xf32>
    %cst_160 = arith.constant 1.000000e+00 : f32
    %603 = vector.broadcast %cst_160 : f32 to vector<8x128xf32>
    %604 = arith.subf %603, %595 : vector<8x128xf32>
    %605 = arith.mulf %604, %602 : vector<8x128xf32>
    %606 = arith.mulf %595, %568 : vector<8x128xf32>
    %607 = arith.addf %605, %606 : vector<8x128xf32>
    %608 = vector.broadcast %c3_i32_152 : i32 to vector<8x1xi32>
    %609 = arith.cmpi slt, %608, %0 : vector<8x1xi32>
    %610 = arith.extui %609 : vector<8x1xi1> to vector<8x1xi32>
    %611 = arith.sitofp %610 : vector<8x1xi32> to vector<8x1xf32>
    %612 = vector.broadcast %611 : vector<8x1xf32> to vector<8x128xf32>
    %613 = arith.mulf %612, %607 : vector<8x128xf32>
    %cst_161 = arith.constant 1.000000e+00 : f32
    %614 = vector.broadcast %cst_161 : f32 to vector<8x1xf32>
    %615 = arith.subf %614, %611 : vector<8x1xf32>
    %616 = vector.broadcast %615 : vector<8x1xf32> to vector<8x128xf32>
    %617 = arith.mulf %616, %568 : vector<8x128xf32>
    %618 = arith.addf %613, %617 : vector<8x128xf32>
    %619 = arith.truncf %618 : vector<8x128xf32> to vector<8x128xbf16>
    %620 = arith.index_cast %c3_i32_152 : i32 to index
    %c0_162 = arith.constant 0 : index
    %c0_163 = arith.constant 0 : index
    %621 = vector.load %arg16[%620, %c0_162, %c0_163] : memref<8x8x128xbf16, #tpu.memory_space<vmem>>, vector<1x8x128xbf16>
    %622 = vector.shape_cast %621 : vector<1x8x128xbf16> to vector<8x128xbf16>
    %623 = vector.shape_cast %619 : vector<8x128xbf16> to vector<1x8x128xbf16>
    tpu.vector_store %arg16[%620, %c0_162, %c0_163], %623 {strides = array<i32>} : memref<8x8x128xbf16, #tpu.memory_space<vmem>>, vector<1x8x128xbf16>,
    %c4_i32_164 = arith.constant 4 : i32
    %624 = arith.index_cast %c4_i32_164 : i32 to index
    %c0_165 = arith.constant 0 : index
    %c0_166 = arith.constant 0 : index
    %625 = vector.load %arg14[%624, %c0_165, %c0_166] : memref<8x8x384xf32, #tpu.memory_space<vmem>>, vector<1x8x384xf32>
    %626 = vector.shape_cast %625 : vector<1x8x384xf32> to vector<8x384xf32>
    %c0_167 = arith.constant 0 : index
    %c0_168 = arith.constant 0 : index
    %627 = vector.load %arg8[%c0_167, %c0_168] : memref<128x384xbf16, #tpu.memory_space<vmem>>, vector<128x384xbf16>
    %628 = arith.truncf %618 : vector<8x128xf32> to vector<8x128xbf16>
    %cst_169 = arith.constant dense<0.000000e+00> : vector<8x384xf32>
    %629 = tpu.matmul %628, %627, %cst_169 {dimension_numbers = #tpu.dot_dimension_numbers<[1], [0], [0], [1], [0, 0, 1, 1], [], []>} : vector<8x128xbf16>, vector<128x384xbf16>, vector<8x384xf32> -> vector<8x384xf32>
    %630 = vector.extract_strided_slice %626 {offsets = [0, 0], sizes = [8, 128], strides = [1, 1]} : vector<8x384xf32> to vector<8x128xf32>
    %631 = vector.extract_strided_slice %629 {offsets = [0, 0], sizes = [8, 128], strides = [1, 1]} : vector<8x384xf32> to vector<8x128xf32>
    %632 = arith.addf %630, %631 : vector<8x128xf32>
    %633 = arith.negf %632 : vector<8x128xf32>
    %634 = math.exp %633 : vector<8x128xf32>
    %cst_170 = arith.constant 1.000000e+00 : f32
    %635 = vector.broadcast %cst_170 : f32 to vector<8x128xf32>
    %636 = arith.addf %635, %634 : vector<8x128xf32>
    %637 = arith.divf %635, %636 : vector<8x128xf32>
    %638 = vector.extract_strided_slice %626 {offsets = [0, 128], sizes = [8, 128], strides = [1, 1]} : vector<8x384xf32> to vector<8x128xf32>
    %639 = vector.extract_strided_slice %629 {offsets = [0, 128], sizes = [8, 128], strides = [1, 1]} : vector<8x384xf32> to vector<8x128xf32>
    %640 = arith.addf %638, %639 : vector<8x128xf32>
    %641 = arith.negf %640 : vector<8x128xf32>
    %642 = math.exp %641 : vector<8x128xf32>
    %cst_171 = arith.constant 1.000000e+00 : f32
    %643 = vector.broadcast %cst_171 : f32 to vector<8x128xf32>
    %644 = arith.addf %643, %642 : vector<8x128xf32>
    %645 = arith.divf %643, %644 : vector<8x128xf32>
    %646 = vector.extract_strided_slice %626 {offsets = [0, 256], sizes = [8, 128], strides = [1, 1]} : vector<8x384xf32> to vector<8x128xf32>
    %647 = vector.extract_strided_slice %629 {offsets = [0, 256], sizes = [8, 128], strides = [1, 1]} : vector<8x384xf32> to vector<8x128xf32>
    %648 = vector.broadcast %422 : vector<1x128xf32> to vector<8x128xf32>
    %649 = arith.addf %647, %648 : vector<8x128xf32>
    %650 = arith.mulf %637, %649 : vector<8x128xf32>
    %651 = arith.addf %646, %650 : vector<8x128xf32>
    %652 = math.tanh %651 : vector<8x128xf32>
    %cst_172 = arith.constant 1.000000e+00 : f32
    %653 = vector.broadcast %cst_172 : f32 to vector<8x128xf32>
    %654 = arith.subf %653, %645 : vector<8x128xf32>
    %655 = arith.mulf %654, %652 : vector<8x128xf32>
    %656 = arith.mulf %645, %618 : vector<8x128xf32>
    %657 = arith.addf %655, %656 : vector<8x128xf32>
    %658 = vector.broadcast %c4_i32_164 : i32 to vector<8x1xi32>
    %659 = arith.cmpi slt, %658, %0 : vector<8x1xi32>
    %660 = arith.extui %659 : vector<8x1xi1> to vector<8x1xi32>
    %661 = arith.sitofp %660 : vector<8x1xi32> to vector<8x1xf32>
    %662 = vector.broadcast %661 : vector<8x1xf32> to vector<8x128xf32>
    %663 = arith.mulf %662, %657 : vector<8x128xf32>
    %cst_173 = arith.constant 1.000000e+00 : f32
    %664 = vector.broadcast %cst_173 : f32 to vector<8x1xf32>
    %665 = arith.subf %664, %661 : vector<8x1xf32>
    %666 = vector.broadcast %665 : vector<8x1xf32> to vector<8x128xf32>
    %667 = arith.mulf %666, %618 : vector<8x128xf32>
    %668 = arith.addf %663, %667 : vector<8x128xf32>
    %669 = arith.truncf %668 : vector<8x128xf32> to vector<8x128xbf16>
    %670 = arith.index_cast %c4_i32_164 : i32 to index
    %c0_174 = arith.constant 0 : index
    %c0_175 = arith.constant 0 : index
    %671 = vector.load %arg16[%670, %c0_174, %c0_175] : memref<8x8x128xbf16, #tpu.memory_space<vmem>>, vector<1x8x128xbf16>
    %672 = vector.shape_cast %671 : vector<1x8x128xbf16> to vector<8x128xbf16>
    %673 = vector.shape_cast %669 : vector<8x128xbf16> to vector<1x8x128xbf16>
    tpu.vector_store %arg16[%670, %c0_174, %c0_175], %673 {strides = array<i32>} : memref<8x8x128xbf16, #tpu.memory_space<vmem>>, vector<1x8x128xbf16>,
    %c5_i32_176 = arith.constant 5 : i32
    %674 = arith.index_cast %c5_i32_176 : i32 to index
    %c0_177 = arith.constant 0 : index
    %c0_178 = arith.constant 0 : index
    %675 = vector.load %arg14[%674, %c0_177, %c0_178] : memref<8x8x384xf32, #tpu.memory_space<vmem>>, vector<1x8x384xf32>
    %676 = vector.shape_cast %675 : vector<1x8x384xf32> to vector<8x384xf32>
    %c0_179 = arith.constant 0 : index
    %c0_180 = arith.constant 0 : index
    %677 = vector.load %arg8[%c0_179, %c0_180] : memref<128x384xbf16, #tpu.memory_space<vmem>>, vector<128x384xbf16>
    %678 = arith.truncf %668 : vector<8x128xf32> to vector<8x128xbf16>
    %cst_181 = arith.constant dense<0.000000e+00> : vector<8x384xf32>
    %679 = tpu.matmul %678, %677, %cst_181 {dimension_numbers = #tpu.dot_dimension_numbers<[1], [0], [0], [1], [0, 0, 1, 1], [], []>} : vector<8x128xbf16>, vector<128x384xbf16>, vector<8x384xf32> -> vector<8x384xf32>
    %680 = vector.extract_strided_slice %676 {offsets = [0, 0], sizes = [8, 128], strides = [1, 1]} : vector<8x384xf32> to vector<8x128xf32>
    %681 = vector.extract_strided_slice %679 {offsets = [0, 0], sizes = [8, 128], strides = [1, 1]} : vector<8x384xf32> to vector<8x128xf32>
    %682 = arith.addf %680, %681 : vector<8x128xf32>
    %683 = arith.negf %682 : vector<8x128xf32>
    %684 = math.exp %683 : vector<8x128xf32>
    %cst_182 = arith.constant 1.000000e+00 : f32
    %685 = vector.broadcast %cst_182 : f32 to vector<8x128xf32>
    %686 = arith.addf %685, %684 : vector<8x128xf32>
    %687 = arith.divf %685, %686 : vector<8x128xf32>
    %688 = vector.extract_strided_slice %676 {offsets = [0, 128], sizes = [8, 128], strides = [1, 1]} : vector<8x384xf32> to vector<8x128xf32>
    %689 = vector.extract_strided_slice %679 {offsets = [0, 128], sizes = [8, 128], strides = [1, 1]} : vector<8x384xf32> to vector<8x128xf32>
    %690 = arith.addf %688, %689 : vector<8x128xf32>
    %691 = arith.negf %690 : vector<8x128xf32>
    %692 = math.exp %691 : vector<8x128xf32>
    %cst_183 = arith.constant 1.000000e+00 : f32
    %693 = vector.broadcast %cst_183 : f32 to vector<8x128xf32>
    %694 = arith.addf %693, %692 : vector<8x128xf32>
    %695 = arith.divf %693, %694 : vector<8x128xf32>
    %696 = vector.extract_strided_slice %676 {offsets = [0, 256], sizes = [8, 128], strides = [1, 1]} : vector<8x384xf32> to vector<8x128xf32>
    %697 = vector.extract_strided_slice %679 {offsets = [0, 256], sizes = [8, 128], strides = [1, 1]} : vector<8x384xf32> to vector<8x128xf32>
    %698 = vector.broadcast %422 : vector<1x128xf32> to vector<8x128xf32>
    %699 = arith.addf %697, %698 : vector<8x128xf32>
    %700 = arith.mulf %687, %699 : vector<8x128xf32>
    %701 = arith.addf %696, %700 : vector<8x128xf32>
    %702 = math.tanh %701 : vector<8x128xf32>
    %cst_184 = arith.constant 1.000000e+00 : f32
    %703 = vector.broadcast %cst_184 : f32 to vector<8x128xf32>
    %704 = arith.subf %703, %695 : vector<8x128xf32>
    %705 = arith.mulf %704, %702 : vector<8x128xf32>
    %706 = arith.mulf %695, %668 : vector<8x128xf32>
    %707 = arith.addf %705, %706 : vector<8x128xf32>
    %708 = vector.broadcast %c5_i32_176 : i32 to vector<8x1xi32>
    %709 = arith.cmpi slt, %708, %0 : vector<8x1xi32>
    %710 = arith.extui %709 : vector<8x1xi1> to vector<8x1xi32>
    %711 = arith.sitofp %710 : vector<8x1xi32> to vector<8x1xf32>
    %712 = vector.broadcast %711 : vector<8x1xf32> to vector<8x128xf32>
    %713 = arith.mulf %712, %707 : vector<8x128xf32>
    %cst_185 = arith.constant 1.000000e+00 : f32
    %714 = vector.broadcast %cst_185 : f32 to vector<8x1xf32>
    %715 = arith.subf %714, %711 : vector<8x1xf32>
    %716 = vector.broadcast %715 : vector<8x1xf32> to vector<8x128xf32>
    %717 = arith.mulf %716, %668 : vector<8x128xf32>
    %718 = arith.addf %713, %717 : vector<8x128xf32>
    %719 = arith.truncf %718 : vector<8x128xf32> to vector<8x128xbf16>
    %720 = arith.index_cast %c5_i32_176 : i32 to index
    %c0_186 = arith.constant 0 : index
    %c0_187 = arith.constant 0 : index
    %721 = vector.load %arg16[%720, %c0_186, %c0_187] : memref<8x8x128xbf16, #tpu.memory_space<vmem>>, vector<1x8x128xbf16>
    %722 = vector.shape_cast %721 : vector<1x8x128xbf16> to vector<8x128xbf16>
    %723 = vector.shape_cast %719 : vector<8x128xbf16> to vector<1x8x128xbf16>
    tpu.vector_store %arg16[%720, %c0_186, %c0_187], %723 {strides = array<i32>} : memref<8x8x128xbf16, #tpu.memory_space<vmem>>, vector<1x8x128xbf16>,
    %c6_i32_188 = arith.constant 6 : i32
    %724 = arith.index_cast %c6_i32_188 : i32 to index
    %c0_189 = arith.constant 0 : index
    %c0_190 = arith.constant 0 : index
    %725 = vector.load %arg14[%724, %c0_189, %c0_190] : memref<8x8x384xf32, #tpu.memory_space<vmem>>, vector<1x8x384xf32>
    %726 = vector.shape_cast %725 : vector<1x8x384xf32> to vector<8x384xf32>
    %c0_191 = arith.constant 0 : index
    %c0_192 = arith.constant 0 : index
    %727 = vector.load %arg8[%c0_191, %c0_192] : memref<128x384xbf16, #tpu.memory_space<vmem>>, vector<128x384xbf16>
    %728 = arith.truncf %718 : vector<8x128xf32> to vector<8x128xbf16>
    %cst_193 = arith.constant dense<0.000000e+00> : vector<8x384xf32>
    %729 = tpu.matmul %728, %727, %cst_193 {dimension_numbers = #tpu.dot_dimension_numbers<[1], [0], [0], [1], [0, 0, 1, 1], [], []>} : vector<8x128xbf16>, vector<128x384xbf16>, vector<8x384xf32> -> vector<8x384xf32>
    %730 = vector.extract_strided_slice %726 {offsets = [0, 0], sizes = [8, 128], strides = [1, 1]} : vector<8x384xf32> to vector<8x128xf32>
    %731 = vector.extract_strided_slice %729 {offsets = [0, 0], sizes = [8, 128], strides = [1, 1]} : vector<8x384xf32> to vector<8x128xf32>
    %732 = arith.addf %730, %731 : vector<8x128xf32>
    %733 = arith.negf %732 : vector<8x128xf32>
    %734 = math.exp %733 : vector<8x128xf32>
    %cst_194 = arith.constant 1.000000e+00 : f32
    %735 = vector.broadcast %cst_194 : f32 to vector<8x128xf32>
    %736 = arith.addf %735, %734 : vector<8x128xf32>
    %737 = arith.divf %735, %736 : vector<8x128xf32>
    %738 = vector.extract_strided_slice %726 {offsets = [0, 128], sizes = [8, 128], strides = [1, 1]} : vector<8x384xf32> to vector<8x128xf32>
    %739 = vector.extract_strided_slice %729 {offsets = [0, 128], sizes = [8, 128], strides = [1, 1]} : vector<8x384xf32> to vector<8x128xf32>
    %740 = arith.addf %738, %739 : vector<8x128xf32>
    %741 = arith.negf %740 : vector<8x128xf32>
    %742 = math.exp %741 : vector<8x128xf32>
    %cst_195 = arith.constant 1.000000e+00 : f32
    %743 = vector.broadcast %cst_195 : f32 to vector<8x128xf32>
    %744 = arith.addf %743, %742 : vector<8x128xf32>
    %745 = arith.divf %743, %744 : vector<8x128xf32>
    %746 = vector.extract_strided_slice %726 {offsets = [0, 256], sizes = [8, 128], strides = [1, 1]} : vector<8x384xf32> to vector<8x128xf32>
    %747 = vector.extract_strided_slice %729 {offsets = [0, 256], sizes = [8, 128], strides = [1, 1]} : vector<8x384xf32> to vector<8x128xf32>
    %748 = vector.broadcast %422 : vector<1x128xf32> to vector<8x128xf32>
    %749 = arith.addf %747, %748 : vector<8x128xf32>
    %750 = arith.mulf %737, %749 : vector<8x128xf32>
    %751 = arith.addf %746, %750 : vector<8x128xf32>
    %752 = math.tanh %751 : vector<8x128xf32>
    %cst_196 = arith.constant 1.000000e+00 : f32
    %753 = vector.broadcast %cst_196 : f32 to vector<8x128xf32>
    %754 = arith.subf %753, %745 : vector<8x128xf32>
    %755 = arith.mulf %754, %752 : vector<8x128xf32>
    %756 = arith.mulf %745, %718 : vector<8x128xf32>
    %757 = arith.addf %755, %756 : vector<8x128xf32>
    %758 = vector.broadcast %c6_i32_188 : i32 to vector<8x1xi32>
    %759 = arith.cmpi slt, %758, %0 : vector<8x1xi32>
    %760 = arith.extui %759 : vector<8x1xi1> to vector<8x1xi32>
    %761 = arith.sitofp %760 : vector<8x1xi32> to vector<8x1xf32>
    %762 = vector.broadcast %761 : vector<8x1xf32> to vector<8x128xf32>
    %763 = arith.mulf %762, %757 : vector<8x128xf32>
    %cst_197 = arith.constant 1.000000e+00 : f32
    %764 = vector.broadcast %cst_197 : f32 to vector<8x1xf32>
    %765 = arith.subf %764, %761 : vector<8x1xf32>
    %766 = vector.broadcast %765 : vector<8x1xf32> to vector<8x128xf32>
    %767 = arith.mulf %766, %718 : vector<8x128xf32>
    %768 = arith.addf %763, %767 : vector<8x128xf32>
    %769 = arith.truncf %768 : vector<8x128xf32> to vector<8x128xbf16>
    %770 = arith.index_cast %c6_i32_188 : i32 to index
    %c0_198 = arith.constant 0 : index
    %c0_199 = arith.constant 0 : index
    %771 = vector.load %arg16[%770, %c0_198, %c0_199] : memref<8x8x128xbf16, #tpu.memory_space<vmem>>, vector<1x8x128xbf16>
    %772 = vector.shape_cast %771 : vector<1x8x128xbf16> to vector<8x128xbf16>
    %773 = vector.shape_cast %769 : vector<8x128xbf16> to vector<1x8x128xbf16>
    tpu.vector_store %arg16[%770, %c0_198, %c0_199], %773 {strides = array<i32>} : memref<8x8x128xbf16, #tpu.memory_space<vmem>>, vector<1x8x128xbf16>,
    %c7_i32_200 = arith.constant 7 : i32
    %774 = arith.index_cast %c7_i32_200 : i32 to index
    %c0_201 = arith.constant 0 : index
    %c0_202 = arith.constant 0 : index
    %775 = vector.load %arg14[%774, %c0_201, %c0_202] : memref<8x8x384xf32, #tpu.memory_space<vmem>>, vector<1x8x384xf32>
    %776 = vector.shape_cast %775 : vector<1x8x384xf32> to vector<8x384xf32>
    %c0_203 = arith.constant 0 : index
    %c0_204 = arith.constant 0 : index
    %777 = vector.load %arg8[%c0_203, %c0_204] : memref<128x384xbf16, #tpu.memory_space<vmem>>, vector<128x384xbf16>
    %778 = arith.truncf %768 : vector<8x128xf32> to vector<8x128xbf16>
    %cst_205 = arith.constant dense<0.000000e+00> : vector<8x384xf32>
    %779 = tpu.matmul %778, %777, %cst_205 {dimension_numbers = #tpu.dot_dimension_numbers<[1], [0], [0], [1], [0, 0, 1, 1], [], []>} : vector<8x128xbf16>, vector<128x384xbf16>, vector<8x384xf32> -> vector<8x384xf32>
    %780 = vector.extract_strided_slice %776 {offsets = [0, 0], sizes = [8, 128], strides = [1, 1]} : vector<8x384xf32> to vector<8x128xf32>
    %781 = vector.extract_strided_slice %779 {offsets = [0, 0], sizes = [8, 128], strides = [1, 1]} : vector<8x384xf32> to vector<8x128xf32>
    %782 = arith.addf %780, %781 : vector<8x128xf32>
    %783 = arith.negf %782 : vector<8x128xf32>
    %784 = math.exp %783 : vector<8x128xf32>
    %cst_206 = arith.constant 1.000000e+00 : f32
    %785 = vector.broadcast %cst_206 : f32 to vector<8x128xf32>
    %786 = arith.addf %785, %784 : vector<8x128xf32>
    %787 = arith.divf %785, %786 : vector<8x128xf32>
    %788 = vector.extract_strided_slice %776 {offsets = [0, 128], sizes = [8, 128], strides = [1, 1]} : vector<8x384xf32> to vector<8x128xf32>
    %789 = vector.extract_strided_slice %779 {offsets = [0, 128], sizes = [8, 128], strides = [1, 1]} : vector<8x384xf32> to vector<8x128xf32>
    %790 = arith.addf %788, %789 : vector<8x128xf32>
    %791 = arith.negf %790 : vector<8x128xf32>
    %792 = math.exp %791 : vector<8x128xf32>
    %cst_207 = arith.constant 1.000000e+00 : f32
    %793 = vector.broadcast %cst_207 : f32 to vector<8x128xf32>
    %794 = arith.addf %793, %792 : vector<8x128xf32>
    %795 = arith.divf %793, %794 : vector<8x128xf32>
    %796 = vector.extract_strided_slice %776 {offsets = [0, 256], sizes = [8, 128], strides = [1, 1]} : vector<8x384xf32> to vector<8x128xf32>
    %797 = vector.extract_strided_slice %779 {offsets = [0, 256], sizes = [8, 128], strides = [1, 1]} : vector<8x384xf32> to vector<8x128xf32>
    %798 = vector.broadcast %422 : vector<1x128xf32> to vector<8x128xf32>
    %799 = arith.addf %797, %798 : vector<8x128xf32>
    %800 = arith.mulf %787, %799 : vector<8x128xf32>
    %801 = arith.addf %796, %800 : vector<8x128xf32>
    %802 = math.tanh %801 : vector<8x128xf32>
    %cst_208 = arith.constant 1.000000e+00 : f32
    %803 = vector.broadcast %cst_208 : f32 to vector<8x128xf32>
    %804 = arith.subf %803, %795 : vector<8x128xf32>
    %805 = arith.mulf %804, %802 : vector<8x128xf32>
    %806 = arith.mulf %795, %768 : vector<8x128xf32>
    %807 = arith.addf %805, %806 : vector<8x128xf32>
    %808 = vector.broadcast %c7_i32_200 : i32 to vector<8x1xi32>
    %809 = arith.cmpi slt, %808, %0 : vector<8x1xi32>
    %810 = arith.extui %809 : vector<8x1xi1> to vector<8x1xi32>
    %811 = arith.sitofp %810 : vector<8x1xi32> to vector<8x1xf32>
    %812 = vector.broadcast %811 : vector<8x1xf32> to vector<8x128xf32>
    %813 = arith.mulf %812, %807 : vector<8x128xf32>
    %cst_209 = arith.constant 1.000000e+00 : f32
    %814 = vector.broadcast %cst_209 : f32 to vector<8x1xf32>
    %815 = arith.subf %814, %811 : vector<8x1xf32>
    %816 = vector.broadcast %815 : vector<8x1xf32> to vector<8x128xf32>
    %817 = arith.mulf %816, %768 : vector<8x128xf32>
    %818 = arith.addf %813, %817 : vector<8x128xf32>
    %819 = arith.truncf %818 : vector<8x128xf32> to vector<8x128xbf16>
    %820 = arith.index_cast %c7_i32_200 : i32 to index
    %c0_210 = arith.constant 0 : index
    %c0_211 = arith.constant 0 : index
    %821 = vector.load %arg16[%820, %c0_210, %c0_211] : memref<8x8x128xbf16, #tpu.memory_space<vmem>>, vector<1x8x128xbf16>
    %822 = vector.shape_cast %821 : vector<1x8x128xbf16> to vector<8x128xbf16>
    %823 = vector.shape_cast %819 : vector<8x128xbf16> to vector<1x8x128xbf16>
    tpu.vector_store %arg16[%820, %c0_210, %c0_211], %823 {strides = array<i32>} : memref<8x8x128xbf16, #tpu.memory_space<vmem>>, vector<1x8x128xbf16>,
    %c8_i32_212 = arith.constant 8 : i32
    %c0_213 = arith.constant 0 : index
    %c0_214 = arith.constant 0 : index
    %c0_215 = arith.constant 0 : index
    %824 = vector.load %arg16[%c0_213, %c0_214, %c0_215] : memref<8x8x128xbf16, #tpu.memory_space<vmem>>, vector<8x8x128xbf16>
    %825 = vector.shape_cast %824 : vector<8x8x128xbf16> to vector<64x128xbf16>
    %c0_216 = arith.constant 0 : index
    %c0_217 = arith.constant 0 : index
    %826 = vector.load %arg11[%c0_216, %c0_217] : memref<128x128xbf16, #tpu.memory_space<vmem>>, vector<128x128xbf16>
    %cst_218 = arith.constant dense<0.000000e+00> : vector<64x128xf32>
    %827 = tpu.matmul %825, %826, %cst_218 {dimension_numbers = #tpu.dot_dimension_numbers<[1], [0], [0], [1], [0, 0, 1, 1], [], []>} : vector<64x128xbf16>, vector<128x128xbf16>, vector<64x128xf32> -> vector<64x128xf32>
    %c0_219 = arith.constant 0 : index
    %c0_220 = arith.constant 0 : index
    %828 = vector.load %arg12[%c0_219, %c0_220] : memref<1x128xf32, #tpu.memory_space<vmem>>, vector<1x128xf32>
    %829 = vector.broadcast %828 : vector<1x128xf32> to vector<64x128xf32>
    %830 = arith.addf %827, %829 : vector<64x128xf32>
    %831 = arith.negf %830 : vector<64x128xf32>
    %832 = math.exp %831 : vector<64x128xf32>
    %cst_221 = arith.constant 1.000000e+00 : f32
    %833 = vector.broadcast %cst_221 : f32 to vector<64x128xf32>
    %834 = arith.addf %833, %832 : vector<64x128xf32>
    %835 = arith.divf %833, %834 : vector<64x128xf32>
    %836 = vector.shape_cast %835 : vector<64x128xf32> to vector<8x8x128xf32>
    %c0_222 = arith.constant 0 : index
    %c0_223 = arith.constant 0 : index
    %837 = vector.load %arg11[%c0_222, %c0_223] : memref<128x128xbf16, #tpu.memory_space<vmem>>, vector<128x128xbf16>
    %838 = arith.extf %837 : vector<128x128xbf16> to vector<128x128xf32>
    %cst_224 = arith.constant dense<0.000000e+00> : vector<128xf32>
    %839 = vector.multi_reduction <add>, %838, %cst_224 [0] : vector<128x128xf32> to vector<128xf32>
    %840 = vector.shape_cast %839 : vector<128xf32> to vector<1x128xf32>
    %cst_225 = arith.constant -1.000000e+00 : f32
    %841 = vector.broadcast %cst_225 : f32 to vector<1x128xf32>
    %842 = arith.mulf %841, %840 : vector<1x128xf32>
    %c0_226 = arith.constant 0 : index
    %c0_227 = arith.constant 0 : index
    %843 = vector.load %arg12[%c0_226, %c0_227] : memref<1x128xf32, #tpu.memory_space<vmem>>, vector<1x128xf32>
    %844 = arith.addf %842, %843 : vector<1x128xf32>
    %845 = arith.negf %844 : vector<1x128xf32>
    %846 = math.exp %845 : vector<1x128xf32>
    %cst_228 = arith.constant 1.000000e+00 : f32
    %847 = vector.broadcast %cst_228 : f32 to vector<1x128xf32>
    %848 = arith.addf %847, %846 : vector<1x128xf32>
    %849 = arith.divf %847, %848 : vector<1x128xf32>
    %850 = tpu.iota {dimensions = array<i32: 0>} : vector<8x8x128xi32>
    %851 = vector.shape_cast %0 : vector<8x1xi32> to vector<1x8x1xi32>
    %852 = vector.broadcast %851 : vector<1x8x1xi32> to vector<8x8x128xi32>
    %853 = arith.cmpi slt, %850, %852 : vector<8x8x128xi32>
    %854 = vector.shape_cast %849 : vector<1x128xf32> to vector<1x1x128xf32>
    %855 = vector.shape_cast %854 : vector<1x1x128xf32> to vector<1x1x128xf32>
    %856 = vector.broadcast %855 : vector<1x1x128xf32> to vector<8x8x128xf32>
    %857 = arith.select %853, %836, %856 : vector<8x8x128xi1>, vector<8x8x128xf32>
    %c0_229 = arith.constant 0 : index
    %c0_230 = arith.constant 0 : index
    %c0_231 = arith.constant 0 : index
    %858 = vector.load %arg13[%c0_229, %c0_230, %c0_231] : memref<8x8x128xf32, #tpu.memory_space<vmem>>, vector<8x8x128xf32>
    tpu.vector_store %arg13[%c0_229, %c0_230, %c0_231], %857 {strides = array<i32>} : memref<8x8x128xf32, #tpu.memory_space<vmem>>, vector<8x8x128xf32>,
    return
  }
  func.func @transform_0(%arg0: i32) -> (i32, i32, i32) {
    %c0_i32 = arith.constant 0 : i32
    %c0_i32_0 = arith.constant 0 : i32
    %c0_i32_1 = arith.constant 0 : i32
    return %c0_i32, %arg0, %c0_i32_0 : i32, i32, i32
  }
  func.func @transform_1(%arg0: i32) -> (i32, i32) {
    %c0_i32 = arith.constant 0 : i32
    %c0_i32_0 = arith.constant 0 : i32
    return %arg0, %c0_i32 : i32, i32
  }
  func.func @transform_2(%arg0: i32) -> (i32, i32) {
    %c0_i32 = arith.constant 0 : i32
    %c0_i32_0 = arith.constant 0 : i32
    %c0_i32_1 = arith.constant 0 : i32
    return %c0_i32, %c0_i32_0 : i32, i32
  }
  func.func @transform_3(%arg0: i32) -> (i32, i32) {
    %c0_i32 = arith.constant 0 : i32
    %c0_i32_0 = arith.constant 0 : i32
    %c0_i32_1 = arith.constant 0 : i32
    return %c0_i32, %c0_i32_0 : i32, i32
  }
  func.func @transform_4(%arg0: i32) -> (i32, i32) {
    %c0_i32 = arith.constant 0 : i32
    %c0_i32_0 = arith.constant 0 : i32
    %c0_i32_1 = arith.constant 0 : i32
    return %c0_i32, %c0_i32_0 : i32, i32
  }
  func.func @transform_5(%arg0: i32) -> (i32, i32) {
    %c0_i32 = arith.constant 0 : i32
    %c0_i32_0 = arith.constant 0 : i32
    %c0_i32_1 = arith.constant 0 : i32
    return %c0_i32, %c0_i32_0 : i32, i32
  }
  func.func @transform_6(%arg0: i32) -> (i32, i32) {
    %c0_i32 = arith.constant 0 : i32
    %c0_i32_0 = arith.constant 0 : i32
    %c0_i32_1 = arith.constant 0 : i32
    return %c0_i32, %c0_i32_0 : i32, i32
  }
  func.func @transform_7(%arg0: i32) -> (i32, i32) {
    %c0_i32 = arith.constant 0 : i32
    %c0_i32_0 = arith.constant 0 : i32
    %c0_i32_1 = arith.constant 0 : i32
    return %c0_i32, %c0_i32_0 : i32, i32
  }
  func.func @transform_8(%arg0: i32) -> (i32, i32) {
    %c0_i32 = arith.constant 0 : i32
    %c0_i32_0 = arith.constant 0 : i32
    %c0_i32_1 = arith.constant 0 : i32
    return %c0_i32, %c0_i32_0 : i32, i32
  }
  func.func @transform_9(%arg0: i32) -> (i32, i32) {
    %c0_i32 = arith.constant 0 : i32
    %c0_i32_0 = arith.constant 0 : i32
    %c0_i32_1 = arith.constant 0 : i32
    return %c0_i32, %c0_i32_0 : i32, i32
  }
  func.func @transform_10(%arg0: i32) -> (i32, i32) {
    %c0_i32 = arith.constant 0 : i32
    %c0_i32_0 = arith.constant 0 : i32
    %c0_i32_1 = arith.constant 0 : i32
    return %c0_i32, %c0_i32_0 : i32, i32
  }
  func.func @transform_11(%arg0: i32) -> (i32, i32) {
    %c0_i32 = arith.constant 0 : i32
    %c0_i32_0 = arith.constant 0 : i32
    %c0_i32_1 = arith.constant 0 : i32
    return %c0_i32, %c0_i32_0 : i32, i32
  }
  func.func @transform_12(%arg0: i32) -> (i32, i32, i32) {
    %c0_i32 = arith.constant 0 : i32
    %c0_i32_0 = arith.constant 0 : i32
    %c0_i32_1 = arith.constant 0 : i32
    return %c0_i32, %arg0, %c0_i32_0 : i32, i32, i32
  }
}

</mosaic_0001>

<bundles_post_ra>
// kernel: tpu_custom_call.1
= control target key start
LH: loop header
LB: loop body
LE: loop exit
PB: predicated region body
PF: predicated region fallthrough
CT: control target
= control target key end

     0   :  { %17 = vsyncpa [#allocation6], 0  ;;  %s8629_s0 = inlined_call_operand.hbm [shape: f32[8,8,8], index: 0, kind: input, shape index: {}]   ;;  %s8630_s1 = inlined_call_operand.vmem [shape: s32[8,1], index: 1, kind: input, shape index: {}]   ;;  %s8631_s2 = inlined_call_operand.hbm [shape: bf16[8,384], index: 2, kind: input, shape index: {}]   ;;  %s8632_s3 = inlined_call_operand.hbm [shape: bf16[128,384], index: 3, kind: input, shape index: {}]   ;;  %s8633_s4 = inlined_call_operand.vmem [shape: f32[1,384], index: 4, kind: input, shape index: {}]   ;;  %s8634_s5 = inlined_call_operand.vmem [shape: f32[1,128], index: 5, kind: input, shape index: {}]   ;;  %s8635_s6 = inlined_call_operand.hbm [shape: bf16[128,384], index: 6, kind: input, shape index: {}]   ;;  %s8636_s7 = inlined_call_operand.hbm [shape: bf16[128,384], index: 7, kind: input, shape index: {}]   ;;  %s8637_s8 = inlined_call_operand.vmem [shape: f32[1,384], index: 8, kind: input, shape index: {}]   ;;  %s8638_s9 = inlined_call_operand.vmem [shape: f32[1,128], index: 9, kind: input, shape index: {}]   ;;  %s8639_s10 = inlined_call_operand.hbm [shape: bf16[128,128], index: 10, kind: input, shape index: {}]   ;;  %s8640_s11 = inlined_call_operand.vmem [shape: f32[1,128], index: 11, kind: input, shape index: {}]   ;;  %s8641_s12 = inlined_call_operand.hbm [shape: f32[8,8,128], index: 12, kind: output, shape index: {}]  }
   0x1   :  { %18 = vsyncpa [#allocation9], 0 }
   0x2   :  { %19 = vsyncpa [#allocation12], 0 }
   0x3   :  { %20 = vsyncpa [#allocation15], 0  ;;  %s42_s23 = sshll.u32 %s8631_s2, 4  ;;  %s43_s23 = int_to_ptr.hbm [resolvable:$true] %s42_s23 }
   0x4   :  { %21 = vsyncpa [#allocation7], 0  ;;  %s7825_s24 = smov [#allocation8]   ;;  %s69_s28 = sshll.u32 %s8635_s6, 4  ;;  %s70_s28 = int_to_ptr.hbm [resolvable:$true] %s69_s28 }
   0x5   :  { %s44_s25 = sshll.u32 %s7825_s24, 4  ;;  %s7826_s29 = smov [#allocation11]   ;;  %s45_s25 = int_to_ptr.vmem [resolvable:$true] %s44_s25 }
   0x6   :  { %47 = dma.hbm_to_vmem [thread:$0]  %s43_s23, 192, %s45_s25, [#allocation9]  }
   0x7   :  { %s71_s30 = sshll.u32 %s7826_s29, 4  ;;  %s26_s15 = sshll.u32 %s8629_s0, 4  ;;  %s72_s30 = int_to_ptr.vmem [resolvable:$true] %s71_s30  ;;  %s27_s15 = int_to_ptr.hbm [resolvable:$true] %s26_s15 }
   0x8   :  { %s7827_s2 = smov 192   ;;  %s7828_s16 = smov 12  }
   0x9   :  { %77 = dma.hbm_to_vmem [thread:$0]  %s70_s28, 3072, %s72_s30, [#allocation12], %s7827_s2, %s7827_s2, %s7828_s16  }
   0xa   :  { %s7829_s17 = smov [#allocation5]   ;;  %s52_s21 = sshll.u32 %s8632_s3, 4  ;;  %s53_s21 = int_to_ptr.hbm [resolvable:$true] %s52_s21 }
   0xb   :  { %s28_s18 = sshll.u32 %s7829_s17, 4  ;;  %s7830_s6 = smov 128   ;;  %s29_s18 = int_to_ptr.vmem [resolvable:$true] %s28_s18 }
   0xc   :  { %s7831_s22 = smov 8   ;;  %s7832_s0 = smov [#allocation10]  }
   0xd   :  { %34 = dma.hbm_to_vmem [thread:$0]  %s27_s15, 1024, %s29_s18, [#allocation6], %s7830_s6, %s7830_s6, %s7831_s22  }
   0xe   :  { %s54_s23 = sshll.u32 %s7832_s0, 4  ;;  %s82_s26 = sshll.u32 %s8636_s7, 4  ;;  %s55_s23 = int_to_ptr.vmem [resolvable:$true] %s54_s23  ;;  %s83_s26 = int_to_ptr.hbm [resolvable:$true] %s82_s26 }
   0xf   :  { %60 = dma.hbm_to_vmem [thread:$0]  %s53_s21, 3072, %s55_s23, [#allocation9], %s7827_s2, %s7827_s2, %s7828_s16  }
  0x10   :  { %s99_s3 = sshll.u32 %s8639_s10, 4  ;;  %s7833_s29 = smov [#allocation13]   ;;  %s100_s3 = int_to_ptr.hbm [resolvable:$true] %s99_s3 }
  0x11   :  { %s84_s30 = sshll.u32 %s7833_s29, 4  ;;  %s7834_s13 = smov [#allocation14]   ;;  %s85_s30 = int_to_ptr.vmem [resolvable:$true] %s84_s30 }
  0x12   :  { %90 = dma.hbm_to_vmem [thread:$0]  %s83_s26, 3072, %s85_s30, [#allocation12], %s7827_s2, %s7827_s2, %s7828_s16  }
  0x13   :  { %s101_s14 = sshll.u32 %s7834_s13, 4  ;;  %s7835_s15 = smov 64   ;;  %s102_s14 = int_to_ptr.vmem [resolvable:$true] %s101_s14 }
  0x14   :  { %s7836_s17 = smov 4  }
  0x15   :  { %107 = dma.hbm_to_vmem [thread:$0]  %s100_s3, 1024, %s102_s14, [#allocation15], %s7835_s15, %s7835_s15, %s7836_s17  }
  0x16   :  { %7815 = dma.done.wait [#allocation6], 1024  }
  0x17   :  { %7816 = vsyncadd [#allocation6], 4294966272 }
  0x18   :  { %7817 = dma.done.wait [#allocation9], 3264  }
  0x19   :  { %7818 = vsyncadd [#allocation9], 4294964032 }
  0x1a   :  { %7819 = dma.done.wait [#allocation12], 6144  }
  0x1b   :  { %7820 = vsyncadd [#allocation12], 4294961152 }
  0x1c   :  { %7821 = dma.done.wait [#allocation15], 1024  }
  0x1d   :  { %7822 = vsyncadd [#allocation15], 4294966272  ;;  %v5342_v0 = vld [vmem:[#allocation10 + $0xa8] sm:$0xf]  ;;  %v7023_v1 = vld [vmem:[#allocation10 + $0xb0] sm:$0xf0] }
  0x1e   :  { %v153_v2 = vld [vmem:[#allocation8 + $0x8] sm:$0xf]  ;;  %v5343_v3 = vor.u32 %v7023_v1, %v5342_v0  ;;  %v5330_v5 = vld [vmem:[#allocation10 + $0x90] sm:$0xf]  ;;  %v136_v7 = vld [vmem:[#allocation5] sm:$0xff]  ;;  %vm203_vm0 = vcmask 1043456  }
  0x1f   :  { %v186_v4 = vunpack.c.l.b16 %v153_v2  ;;  %v7020_v6 = vld [vmem:[#allocation10 + $0x98] sm:$0xf0]  ;;  %v144_v9 = vpack.c.bf16 %v136_v7, %v136_v7  ;;  %v7837_v10 = vmov 0   ;;  %v5350_v14 = vld [vmem:[#allocation10 + $0xb0] sm:$0xf]  ;;  %v152_v22 = vld [vmem:[#allocation8] sm:$0xff] }
  0x20   :  { %v137_v8 = vld [vmem:[#allocation5 + $0x8] sm:$0xff]  ;;  %7441 = vset.pattern.permute.xlu0 %v7837_v10  ;;  %7442 = vset.pattern.permute.xlu1 %v7837_v10  ;;  %v5331_v12 = vor.u32 %v7020_v6, %v5330_v5  ;;  %v5318_v16 = vld [vmem:[#allocation10 + $0x78] sm:$0xf]  ;;  %v7017_v17 = vld [vmem:[#allocation10 + $0x80] sm:$0xf0]  ;;  %vm190_vm1 = vcmask 64512   ;;  %v184_v23 = vunpack.c.l.b16 %v152_v22  ;;  %v185_v25 = vunpack.c.h.b16 %v152_v22 }
  0x21   :  { %488 = vmatpush.bf16.msra.mxu3 %v5343_v3  ;;  %v189_v11 = vpack.c.b16 %v186_v4, %v186_v4  ;;  %v145_v13 = vpack.c.bf16 %v137_v8, %v137_v8  ;;  %7443 = vset.pattern.permute.xlu2 %v7837_v10  ;;  %v170_v15 = vunpack.c.l.b16 %v144_v9  ;;  %v7024_v18 = vld [vmem:[#allocation10 + $0xb8] sm:$0xf0]  ;;  %v5338_v24 = vld [vmem:[#allocation10 + $0x98] sm:$0xf]  ;;  %v5319_v27 = vor.u32 %v7017_v17, %v5318_v16  ;;  %v7021_v28 = vld [vmem:[#allocation10 + $0xa0] sm:$0xf0] }
  0x22   :  { %v5351_v21 = vor.u32 %v7024_v18, %v5350_v14  ;;  %v140_v29 = vld [vmem:[#allocation5 + $0x20] sm:$0xff]  ;;  %v141_v30 = vld [vmem:[#allocation5 + $0x28] sm:$0xff]  ;;  %v7014_v32 = vld [vmem:[#allocation10 + $0x68] sm:$0xf0]  ;;  %v187_v33 = vpack.c.b16 %v184_v23, %v184_v23  ;;  %v5339_v34 = vor.u32 %v7021_v28, %v5338_v24  ;;  %v188_v38 = vpack.c.b16 %v185_v25, %v185_v25  ;;  %s5228_s15 = sshll.u32 %s8641_s12, 4  ;;  %s5229_s15 = int_to_ptr.hbm [resolvable:$true] %s5228_s15 }
  0x23   :  { %v211_v19 = vsel %vm203_vm0, %v189_v11, 0  ;;  %v171_v20 = vunpack.c.l.b16 %v145_v13  ;;  %v5306_v31 = vld [vmem:[#allocation10 + $0x60] sm:$0xf]  ;;  %v148_v35 = vpack.c.bf16 %v140_v29, %v140_v29  ;;  %v149_v36 = vpack.c.bf16 %v141_v30, %v141_v30  ;;  %v138_v37 = vld [vmem:[#allocation5 + $0x10] sm:$0xff]  ;;  %v139_v40 = vld [vmem:[#allocation5 + $0x18] sm:$0xff] }
  0x24   :  { %278 = vmatpush.bf16.msra.mxu2 %v211_v19  ;;  %v205_v39 = vsel %vm203_vm0, %v187_v33, 0  ;;  %v5326_v43 = vld [vmem:[#allocation10 + $0x80] sm:$0xf]  ;;  %v7018_v44 = vld [vmem:[#allocation10 + $0x88] sm:$0xf0]  ;;  %v5307_v45 = vor.u32 %v7014_v32, %v5306_v31  ;;  %v208_v46 = vsel %vm203_vm0, %v188_v38, 0  ;;  %v146_v51 = vpack.c.bf16 %v138_v37, %v138_v37 }
  0x25   :  { %489 = vmatpush.bf16.msra.mxu3 %v5331_v12  ;;  %v7930_v26 = vpack.c.b16 %v171_v20, %v170_v15  ;;  %v174_v41 = vunpack.c.l.b16 %v148_v35  ;;  %v175_v42 = vunpack.c.l.b16 %v149_v36  ;;  %7425 = vmatpush.bf16.msra.mxu1 %v205_v39  ;;  %v5294_v47 = vld [vmem:[#allocation10 + $0x48] sm:$0xf]  ;;  %v7011_v48 = vld [vmem:[#allocation10 + $0x50] sm:$0xf0]  ;;  %v5327_v50 = vor.u32 %v7018_v44, %v5326_v43  ;;  %v143_v57 = vld [vmem:[#allocation5 + $0x38] sm:$0xff] }
  0x26   :  { %220 = vmatpush.bf16.msra.mxu0 %v205_v39  ;;  %v147_v52 = vpack.c.bf16 %v139_v40, %v139_v40  ;;  %v5314_v53 = vld [vmem:[#allocation10 + $0x68] sm:$0xf]  ;;  %v7015_v54 = vld [vmem:[#allocation10 + $0x70] sm:$0xf0]  ;;  %v5295_v55 = vor.u32 %v7011_v48, %v5294_v47  ;;  %v5282_v58 = vld [vmem:[#allocation10 + $0x30] sm:$0xf]  ;;  %v172_v61 = vunpack.c.l.b16 %v146_v51  ;;  %v151_v2 = vpack.c.bf16 %v143_v57, %v143_v57 }
  0x27   :  { %5252 = vmatmul.msk.bf16.vlgmr.msra.gmra.mxu2 %vm190_vm1, %v7930_v26  ;;  %v7936_v49 = vpack.c.b16 %v175_v42, %v174_v41  ;;  %v142_v56 = vld [vmem:[#allocation5 + $0x30] sm:$0xff]  ;;  %v7008_v59 = vld [vmem:[#allocation10 + $0x38] sm:$0xf0]  ;;  %v5315_v60 = vor.u32 %v7015_v54, %v5314_v53  ;;  %v5302_v63 = vld [vmem:[#allocation10 + $0x50] sm:$0xf] }
  0x28   :  { %514 = vmatpush.bf16.msrb.mxu2 %v5351_v21  ;;  %v173_v62 = vunpack.c.l.b16 %v147_v52  ;;  %v7012_v0 = vld [vmem:[#allocation10 + $0x58] sm:$0xf0]  ;;  %v150_v1 = vpack.c.bf16 %v142_v56, %v142_v56  ;;  %v5283_v3 = vor.u32 %v7008_v59, %v5282_v58  ;;  %v5270_v4 = vld [vmem:[#allocation10 + $0x18] sm:$0xf]  ;;  %v7005_v5 = vld [vmem:[#allocation10 + $0x20] sm:$0xf0]  ;;  %v177_v9 = vunpack.c.l.b16 %v151_v2 }
  0x29   :  { %490 = vmatpush.bf16.msra.mxu3 %v5319_v27  ;;  %249 = vmatpush.bf16.msrb.mxu1 %v208_v46  ;;  %v5303_v6 = vor.u32 %v7012_v0, %v5302_v63  ;;  %v5271_v11 = vor.u32 %v7005_v5, %v5270_v4  ;;  %v5258_v12 = vld [vmem:[#allocation10] sm:$0xf]  ;;  %v7002_v13 = vld [vmem:[#allocation10 + $0x8] sm:$0xf0]  ;;  %v5344_v15 = vld [vmem:[#allocation10 + $0xb4] sm:$0xf0] }
  0x2a   :  { %5246 = vmatmul.msk.bf16.vlgmr.msra.gmra.mxu1 %vm190_vm1, %v7936_v49  ;;  %5244 = vmatmul.msk.bf16.vlgmr.msra.gmra.mxu0 %vm190_vm1, %v7930_v26  ;;  %v7942_v7 = vpack.c.b16 %v173_v62, %v172_v61  ;;  %v176_v8 = vunpack.c.l.b16 %v150_v1  ;;  %v7022_v14 = vld [vmem:[#allocation10 + $0xac] sm:$0xf]  ;;  %v5290_v16 = vld [vmem:[#allocation10 + $0x38] sm:$0xf]  ;;  %v7009_v17 = vld [vmem:[#allocation10 + $0x40] sm:$0xf0]  ;;  %v5259_v20 = vor.u32 %v7002_v13, %v5258_v12 }
  0x2b   :  { %v5291_v19 = vor.u32 %v7009_v17, %v5290_v16  ;;  %v5347_v21 = vor.u32 %v7022_v14, %v5344_v15  ;;  %v7019_v22 = vld [vmem:[#allocation10 + $0x94] sm:$0xf]  ;;  %v5332_v23 = vld [vmem:[#allocation10 + $0x9c] sm:$0xf0]  ;;  %v7006_v25 = vld [vmem:[#allocation10 + $0x28] sm:$0xf0] }
  0x2c   :  { %515 = vmatpush.bf16.msrb.mxu2 %v5339_v34  ;;  %v7946_v18 = vpack.c.b16 %v177_v9, %v176_v8  ;;  %v5278_v24 = vld [vmem:[#allocation10 + $0x20] sm:$0xf]  ;;  %v7953_v27 = vld [vmem:[%s8630_s1] sm:$0xff]  ;;  %v5335_v28 = vor.u32 %v7019_v22, %v5332_v23  ;;  %v5266_v30 = vld [vmem:[#allocation10 + $0x8] sm:$0xf]  ;;  %v7838_v34 = vmov 0.0  }
  0x2d   :  { %491 = vmatpush.bf16.msra.mxu3 %v5307_v45  ;;  %v5279_v29 = vor.u32 %v7006_v25, %v5278_v24  ;;  %vm578_vm2 = vcmp.gt.s32.totalorder %v7953_v27, 0  ;;  %v7003_v31 = vld [vmem:[#allocation10 + $0x10] sm:$0xf0]  ;;  %v7016_v32 = vld [vmem:[#allocation10 + $0x7c] sm:$0xf]  ;;  %vm848_vm3 = vcmp.gt.s32.totalorder %v7953_v27, 1 }
  0x2e   :  { %v5320_v33 = vld [vmem:[#allocation10 + $0x84] sm:$0xf0]  ;;  %v5354_v35 = vsel %vm578_vm2, 1.0, %v7838_v34  ;;  %v5267_v36 = vor.u32 %v7003_v31, %v5266_v30  ;;  %v7013_v38 = vld [vmem:[#allocation10 + $0x64] sm:$0xf]  ;;  %vm1390_vm4 = vcmp.gt.s32.totalorder %v7953_v27, 3 }
  0x2f   :  { %583 = vperm.xlu0 %7441, %v5354_v35   ;;  %v5323_v37 = vor.u32 %v7016_v32, %v5320_v33  ;;  %v5308_v39 = vld [vmem:[#allocation10 + $0x6c] sm:$0xf0]  ;;  %v587_v40 = vsub.f32 1.0, %v5354_v35  ;;  %v7010_v42 = vld [vmem:[#allocation10 + $0x4c] sm:$0xf]  ;;  %v5453_v47 = vsel %vm848_vm3, 1.0, %v7838_v34 }
  0x30   :  { %516 = vmatpush.bf16.msrb.mxu2 %v5327_v50  ;;  %v5311_v41 = vor.u32 %v7013_v38, %v5308_v39  ;;  %v5296_v43 = vld [vmem:[#allocation10 + $0x54] sm:$0xf0]  ;;  %v7007_v45 = vld [vmem:[#allocation10 + $0x34] sm:$0xf]  ;;  %v5284_v46 = vld [vmem:[#allocation10 + $0x3c] sm:$0xf0]  ;;  %853 = vperm.xlu1 %7442, %v5453_v47  }
  0x31   :  { %492 = vmatpush.bf16.msra.mxu3 %v5295_v55  ;;  %v5299_v44 = vor.u32 %v7010_v42, %v5296_v43  ;;  %v5287_v48 = vor.u32 %v7007_v45, %v5284_v46  ;;  %v5651_v50 = vsel %vm1390_vm4, 1.0, %v7838_v34  ;;  %v7004_v51 = vld [vmem:[#allocation10 + $0x1c] sm:$0xf]  ;;  %v5272_v52 = vld [vmem:[#allocation10 + $0x24] sm:$0xf0]  ;;  %vm1661_vm5 = vcmp.gt.s32.totalorder %v7953_v27, 4 }
  0x32   :  { %v857_v53 = vsub.f32 1.0, %v5453_v47  ;;  %v5275_v54 = vor.u32 %v7004_v51, %v5272_v52  ;;  %v7970_v55 = vsel %vm1661_vm5, 1.0, %v7838_v34  ;;  %v7001_v56 = vld [vmem:[#allocation10 + $0x4] sm:$0xf]  ;;  %v5260_v57 = vld [vmem:[#allocation10 + $0xc] sm:$0xf0] }
  0x33   :  { %v5263_v58 = vor.u32 %v7001_v56, %v5260_v57  ;;  %v1399_v59 = vsub.f32 1.0, %v5651_v50  ;;  %vm2203_vm6 = vcmp.gt.s32.totalorder %v7953_v27, 6  ;;  %vm2474_vm7 = vcmp.gt.s32.totalorder %v7953_v27, 7  ;;  %v5441_v0 = vld [vmem:[#allocation10 + $0xa8] sm:$0xf] }
  0x34   :  { %517 = vmatpush.bf16.msrb.mxu2 %v5315_v60  ;;  %v7980_v60 = vsel %vm2203_vm6, 1.0, %v7838_v34  ;;  %v7985_v61 = vsel %vm2474_vm7, 1.0, %v7838_v34  ;;  %v7047_v1 = vld [vmem:[#allocation10 + $0xb0] sm:$0xf0]  ;;  %v5429_v4 = vld [vmem:[#allocation10 + $0x90] sm:$0xf] }
  0x35   :  { %493 = vmatpush.bf16.msra.mxu3 %v5283_v3  ;;  %v2483_v62 = vsub.f32 1.0, %v7985_v61  ;;  %v5442_v3 = vor.u32 %v7047_v1, %v5441_v0  ;;  %v7044_v5 = vld [vmem:[#allocation10 + $0x98] sm:$0xf0]  ;;  %v5417_v12 = vld [vmem:[#allocation10 + $0x78] sm:$0xf]  ;;  %vm1932_vm11 = vcmp.gt.s32.totalorder %v7953_v27, 5 }
  0x36   :  { %v7041_v13 = vld [vmem:[#allocation10 + $0x80] sm:$0xf0]  ;;  %v7046_v24 = vld [vmem:[#allocation10 + $0xac] sm:$0xf]  ;;  %v5443_v25 = vld [vmem:[#allocation10 + $0xb4] sm:$0xf0] }
  0x37   :  { %5253 = vmatmul.msk.bf16.gmra.mxu2 %vm190_vm1, %v7942_v7  ;;  %590 = vperm.xlu0 %7441, %v587_v40   ;;  %v5418_v14 = vor.u32 %v7041_v13, %v5417_v12  ;;  %v5449_v30 = vld [vmem:[#allocation10 + $0xb0] sm:$0xf]  ;;  %v7048_v31 = vld [vmem:[#allocation10 + $0xb8] sm:$0xf0]  ;;  %v5437_v38 = vld [vmem:[#allocation10 + $0x98] sm:$0xf] }
  0x38   :  { %518 = vmatpush.bf16.msrb.mxu2 %v5303_v6  ;;  %860 = vperm.xlu1 %7442, %v857_v53   ;;  %v5450_v35 = vor.u32 %v7048_v31, %v5449_v30  ;;  %v5419_v47 = vld [vmem:[#allocation10 + $0x84] sm:$0xf0]  ;;  %v5405_v53 = vld [vmem:[#allocation10 + $0x60] sm:$0xf]  ;;  %v7037_v56 = vld [vmem:[#allocation10 + $0x64] sm:$0xf] }
  0x39   :  { %494 = vmatpush.bf16.msra.mxu3 %v5271_v11  ;;  %761 = vmatpush.bf16.msra.mxu1 %v5442_v3  ;;  %v7034_v12 = vld [vmem:[#allocation10 + $0x4c] sm:$0xf]  ;;  %v5395_v13 = vld [vmem:[#allocation10 + $0x54] sm:$0xf0]  ;;  %v5383_v31 = vld [vmem:[#allocation10 + $0x3c] sm:$0xf0] }
  0x3a   :  { %5247 = vmatmul.msk.bf16.gmra.mxu1 %vm190_vm1, %v7946_v18  ;;  %5245 = vmatmul.msk.bf16.gmra.mxu0 %vm190_vm1, %v7942_v7  ;;  %vm1119_vm12 = vcmp.gt.s32.totalorder %v7953_v27, 2 }
  0x3c   :  { %519 = vmatpush.bf16.msrb.mxu2 %v5291_v19 }
  0x3d   :  { %495 = vmatpush.bf16.msra.mxu3 %v5259_v20 }
  0x3f   :  { %1395 = vperm.xlu0 %7441, %v5651_v50   ;;  %v7042_v50 = vld [vmem:[#allocation10 + $0x88] sm:$0xf0] }
  0x40   :  { %496 = vmatmul.bf16.vlgmr.msra.gmra.mxu3 %v7837_v10  ;;  %520 = vmatpush.bf16.msrb.mxu2 %v5279_v29  ;;  %v5446_v29 = vor.u32 %v7046_v24, %v5443_v25  ;;  %v5381_v25 = vld [vmem:[#allocation10 + $0x30] sm:$0xf] }
  0x41   :  { %501 = vmatpush.bf16.msrb.mxu3 %v5347_v21  ;;  %1402 = vperm.xlu1 %7442, %v1399_v59   ;;  %v7039_v59 = vld [vmem:[#allocation10 + $0x70] sm:$0xf0] }
  0x44   :  { %521 = vmatpush.bf16.msrb.mxu2 %v5267_v36  ;;  %v7043_v36 = vld [vmem:[#allocation10 + $0x94] sm:$0xf] }
  0x45   :  { %502 = vmatpush.bf16.msrb.mxu3 %v5335_v28 }
  0x47   :  { %5254 = vmatmul.msk.bf16.gmra.mxu2 %vm190_vm1, %v7936_v49 }
  0x48   :  { %774 = vmatpush.bf16.msra.mxu2 %v5446_v29  ;;  %v7031_v29 = vld [vmem:[#allocation10 + $0x34] sm:$0xf] }
  0x49   :  { %503 = vmatpush.bf16.msrb.mxu3 %v5323_v37  ;;  %v5431_v37 = vld [vmem:[#allocation10 + $0x9c] sm:$0xf0] }
  0x4a   :  { %5248 = vmatmul.msk.bf16.vlgmr.msrb.gmra.mxu1 %vm190_vm1, %v7930_v26  ;;  %v1670_v26 = vsub.f32 1.0, %v7970_v55  ;;  %v5434_v40 = vor.u32 %v7043_v36, %v5431_v37  ;;  %v5386_v36 = vor.u32 %v7031_v29, %v5383_v31  ;;  %v2212_v31 = vsub.f32 1.0, %v7980_v60 }
  0x4c   :  { %1673 = vperm.xlu0 %7441, %v1670_v26   ;;  %775 = vmatpush.bf16.msra.mxu2 %v5434_v40  ;;  %v5407_v26 = vld [vmem:[#allocation10 + $0x6c] sm:$0xf0] }
  0x4d   :  { %504 = vmatpush.bf16.msrb.mxu3 %v5311_v41  ;;  %v7045_v41 = vld [vmem:[#allocation10 + $0xa0] sm:$0xf0] }
  0x4e   :  { %v5438_v43 = vor.u32 %v7045_v41, %v5437_v38  ;;  %v5369_v41 = vld [vmem:[#allocation10 + $0x18] sm:$0xf] }
  0x51   :  { %505 = vmatpush.bf16.msrb.mxu3 %v5299_v44  ;;  %v7040_v44 = vld [vmem:[#allocation10 + $0x7c] sm:$0xf] }
  0x52   :  { %v5422_v51 = vor.u32 %v7040_v44, %v5419_v47  ;;  %v5357_v44 = vld [vmem:[#allocation10] sm:$0xf] }
  0x54   :  { %2208 = vperm.xlu0 %7441, %v7980_v60   ;;  %776 = vmatpush.bf16.msra.mxu2 %v5422_v51  ;;  %v7028_v51 = vld [vmem:[#allocation10 + $0x1c] sm:$0xf] }
  0x55   :  { %506 = vmatpush.bf16.msrb.mxu3 %v5287_v48  ;;  %v5425_v48 = vld [vmem:[#allocation10 + $0x80] sm:$0xf] }
  0x56   :  { %v5426_v52 = vor.u32 %v7042_v50, %v5425_v48  ;;  %v7026_v50 = vld [vmem:[#allocation10 + $0x8] sm:$0xf0] }
  0x57   :  { %5255 = vmatmul.msk.bf16.gmra.mxu2 %vm190_vm1, %v7946_v18 }
  0x59   :  { %507 = vmatpush.bf16.msrb.mxu3 %v5275_v54  ;;  %v7038_v54 = vld [vmem:[#allocation10 + $0x68] sm:$0xf0] }
  0x5a   :  { %5249 = vmatmul.msk.bf16.gmra.mxu1 %vm190_vm1, %v7942_v7  ;;  %v5430_v7 = vor.u32 %v7044_v5, %v5429_v4  ;;  %v5406_v57 = vor.u32 %v7038_v54, %v5405_v53  ;;  %v5393_v4 = vld [vmem:[#allocation10 + $0x48] sm:$0xf]  ;;  %v7035_v5 = vld [vmem:[#allocation10 + $0x50] sm:$0xf0] }
  0x5c   :  { %2486 = vperm.xlu0 %7441, %v2483_v62   ;;  %762 = vmatpush.bf16.msra.mxu1 %v5430_v7  ;;  %v5410_v62 = vor.u32 %v7037_v56, %v5407_v26  ;;  %v5377_v56 = vld [vmem:[#allocation10 + $0x20] sm:$0xf]  ;;  %v5358_v26 = vor.u32 %v7026_v50, %v5357_v44 }
  0x5d   :  { %508 = vmatpush.bf16.msrb.mxu3 %v5263_v58  ;;  %v5413_v58 = vld [vmem:[#allocation10 + $0x68] sm:$0xf] }
  0x5e   :  { %v5414_v0 = vor.u32 %v7039_v59, %v5413_v58  ;;  %777 = vmatpush.bf16.msra.mxu2 %v5410_v62  ;;  %v7025_v59 = vld [vmem:[#allocation10 + $0x4] sm:$0xf]  ;;  %v5359_v62 = vld [vmem:[#allocation10 + $0xc] sm:$0xf0] }
  0x60   :  { %509 = vmatmul.bf16.vlgmr.msrb.gmra.mxu3 %v7837_v10  ;;  %763 = vmatpush.bf16.msra.mxu1 %v5418_v14 }
  0x61   :  { %787 = vmatpush.bf16.msra.mxu3 %v5450_v35  ;;  %v7033_v35 = vld [vmem:[#allocation10 + $0x40] sm:$0xf0] }
  0x64   :  { %764 = vmatpush.bf16.msra.mxu1 %v5406_v57  ;;  %v7030_v57 = vld [vmem:[#allocation10 + $0x28] sm:$0xf0] }
  0x65   :  { %788 = vmatpush.bf16.msra.mxu3 %v5438_v43  ;;  %v7029_v43 = vld [vmem:[#allocation10 + $0x20] sm:$0xf0]  ;;  %v5378_v58 = vor.u32 %v7030_v57, %v5377_v56 }
  0x66   :  { %v5370_v48 = vor.u32 %v7029_v43, %v5369_v41 }
  0x67   :  { %522 = vmatmul.bf16.vlgmr.msrb.gmra.mxu2 %v7837_v10 }
  0x69   :  { %789 = vmatpush.bf16.msra.mxu3 %v5426_v52  ;;  %v5371_v52 = vld [vmem:[#allocation10 + $0x24] sm:$0xf0] }
  0x6a   :  { %5250 = vmatmul.msk.bf16.gmra.mxu1 %vm190_vm1, %v7936_v49  ;;  %v154_v49 = vld [vmem:[%s8633_s4] sm:$0x7]  ;;  %v5374_v54 = vor.u32 %v7028_v51, %v5371_v52 }
  0x6b   :  { %v8002_v8 = vperm.slane %v154_v49, 2  ;;  %v8007_v16 = vperm.slane %v154_v49, 0  ;;  %v8028_v3 = vperm.slane %v154_v49, 1 }
  0x6d   :  { %790 = vmatpush.bf16.msra.mxu3 %v5414_v0  ;;  %v5365_v0 = vld [vmem:[#allocation10 + $0x8] sm:$0xf] }
  0x7a   :  { %5251 = vmatmul.msk.bf16.gmra.mxu1 %vm190_vm1, %v7946_v18 }
  0xa1   :  { %v8058_v44 = vpop.permute.xlu0 %583 }
  0xa7   :  { %v7997_v6 = vpop.f32.mrf.mxu1  ;;  %v222_v15 = vpop.f32.mrf.mxu0 }
  0xa8   :  { %v223_v18 = vadd.f32 %v222_v15, %v8007_v16  ;;  %v5398_v15 = vor.u32 %v7034_v12, %v5395_v13 }
  0xaa   :  { %v7993_v63 = vpop.f32.mrf.mxu2  ;;  %778 = vmatpush.bf16.msra.mxu2 %v5398_v15 }
  0xae   :  { %779 = vmatpush.bf16.msra.mxu2 %v5386_v36 }
  0xaf   :  { %v8009_v17 = vpop.f32.mrf.mxu1 }
  0xb2   :  { %v7995_v2 = vpop.f32.mrf.mxu2  ;;  %780 = vmatpush.bf16.msra.mxu2 %v5374_v54 }
  0xb7   :  { %v8014_v23 = vpop.f32.mrf.mxu1 }
  0xba   :  { %v285_v9 = vpop.f32.mrf.mxu2 }
  0xbb   :  { %v8005_v11 = vadd.f32 %v285_v9, %v8002_v8  ;;  %v5394_v9 = vor.u32 %v7035_v5, %v5393_v4  ;;  %v5362_v4 = vor.u32 %v7025_v59, %v5359_v62  ;;  %v7027_v5 = vld [vmem:[#allocation10 + $0x10] sm:$0xf0] }
  0xbd   :  { %765 = vmatpush.bf16.msra.mxu1 %v5394_v9  ;;  %v5366_v9 = vor.u32 %v7027_v5, %v5365_v0  ;;  %781 = vmatpush.bf16.msra.mxu2 %v5362_v4 }
  0xbf   :  { %v8021_v45 = vpop.f32.mrf.mxu1 }
  0xc2   :  { %v8012_v19 = vpop.f32.mrf.mxu2 }
  0xc3   :  { %v497_v20 = vpop.f32.mrf.mxu3 }
  0xc4   :  { %v527_v21 = vadd.f32 %v497_v20, %v223_v18  ;;  %v5401_v18 = vld [vmem:[#allocation10 + $0x50] sm:$0xf]  ;;  %v7036_v20 = vld [vmem:[#allocation10 + $0x58] sm:$0xf0] }
  0xc5   :  { %v5402_v49 = vor.u32 %v7036_v20, %v5401_v18 }
  0xc6   :  { %v5352_v22 = vmul.f32 -1.442695, %v527_v21 }
  0xc7   :  { %v251_v21 = vpop.f32.mrf.mxu1  ;;  %791 = vmatpush.bf16.msra.mxu3 %v5402_v49 }
  0xc8   :  { %7447 = vpow2.f32 %v5352_v22  ;;  %v252_v24 = vadd.f32 %v251_v21, %v8028_v3  ;;  %v8047_v21 = vld [vmem:[%s8634_s5] ss:$0 sm:$0xff] }
  0xca   :  { %v290_v28 = vpop.f32.mrf.mxu2 }
  0xcb   :  { %v8017_v32 = vadd.f32 %v290_v28, %v8002_v8  ;;  %v499_v33 = vpop.f32.mrf.mxu3  ;;  %v7032_v28 = vld [vmem:[#allocation10 + $0x38] sm:$0xf0] }
  0xcc   :  { %v5382_v30 = vor.u32 %v7032_v28, %v5381_v25  ;;  %v5389_v33 = vld [vmem:[#allocation10 + $0x38] sm:$0xf]  ;;  %v5849_v25 = vsel %vm1932_vm11, 1.0, %v7838_v34  ;;  %v5552_v28 = vsel %vm1119_vm12, 1.0, %v7838_v34 }
  0xcd   :  { %v5390_v37 = vor.u32 %v7033_v35, %v5389_v33  ;;  %1937 = vperm.xlu1 %7442, %v5849_v25   ;;  %1124 = vperm.xlu2 %7443, %v5552_v28   ;;  %v1128_v36 = vsub.f32 1.0, %v5552_v28  ;;  %v1941_v56 = vsub.f32 1.0, %v5849_v25  ;;  %v5528_v25 = vld [vmem:[#allocation10 + $0x90] sm:$0xf]  ;;  %v7068_v28 = vld [vmem:[#allocation10 + $0x98] sm:$0xf0] }
  0xce   :  { %v7448_v39 = vpop.eup %7447  ;;  %766 = vmatpush.bf16.msra.mxu1 %v5382_v30 }
  0xcf   :  { %v8019_v42 = vadd.f32 1.0, %v7448_v39  ;;  %792 = vmatpush.bf16.msra.mxu3 %v5390_v37 }
  0xd1   :  { %7449 = vrcp.f32 %v8019_v42  ;;  %vm537_vm8 = vweird.f32 %v8019_v42  ;;  %v543_v13 = vand.u32 2147483648, %v8019_v42  ;;  %v541_v20 = vand.u32 2147483647, %v8019_v42 }
  0xd2   :  { %v8023_v46 = vpop.f32.mrf.mxu2  ;;  %767 = vmatpush.bf16.msra.mxu1 %v5370_v48 }
  0xd3   :  { %793 = vmatpush.bf16.msra.mxu3 %v5378_v58  ;;  %vm542_vm13 = vcmp.eq.f32.partialorder %v541_v20, 8.507059e+37  ;;  %v5542_v20 = vld [vmem:[#allocation10 + $0xb4] sm:$0xf0] }
  0xd5   :  { %2215 = vperm.xlu1 %7442, %v2212_v31   ;;  %1131 = vperm.xlu2 %7443, %v1128_v36   ;;  %v5530_v31 = vld [vmem:[#allocation10 + $0x9c] sm:$0xf0] }
  0xd6   :  { %768 = vmatpush.bf16.msra.mxu1 %v5358_v26  ;;  %v591_v26 = vpop.permute.xlu0 %590 }
  0xd7   :  { %v8026_v1 = vpop.eup %7449  ;;  %794 = vmatpush.bf16.msra.mxu3 %v5366_v9  ;;  %v8062_v58 = vmul.f32 0.0, %v591_v26  ;;  %v5512_v26 = vld [vmem:[#allocation10 + $0x68] sm:$0xf] }
  0xd8   :  { %v533_v22 = vmul.f32 %v8026_v1, %v8019_v42  ;;  %vm538_vm9 = vweird.f32 %v8026_v1 }
  0xd9   :  { %vm539_vm10 = vmor %vm537_vm8, %vm538_vm9 }
  0xda   :  { %v295_v7 = vpop.f32.mrf.mxu2  ;;  %v534_v39 = vsub.f32 1.0, %v533_v22 }
  0xdb   :  { %v8031_v14 = vadd.f32 %v295_v7, %v8002_v8 }
  0xdc   :  { %v535_v7 = vmul.f32 %v8026_v1, %v534_v39 }
  0xdd   :  { %5195 = vperm.xlu1 %7442, %v7953_v27   ;;  %1666 = vperm.xlu2 %7443, %v7970_v55   ;;  %v8071_v55 = vpop.f32.mrf.mxu1 }
  0xde   :  { %v536_v18 = vadd.f32 %v8026_v1, %v535_v7 }
  0xe0   :  { %v540_v42 = vsel %vm539_vm10, %v8026_v1, %v536_v18 }
  0xe2   :  { %v8036_v47 = vpop.f32.mrf.mxu2 }
  0xe3   :  { %v510_v38 = vpop.f32.mrf.mxu3 }
  0xe4   :  { %v547_v40 = vadd.f32 %v510_v38, %v252_v24  ;;  %v544_v24 = vor.u32 1.1754944e-38, %v543_v13  ;;  %v281_v38 = vadd.f32 %v7993_v63, %v8002_v8  ;;  %v7071_v13 = vld [vmem:[#allocation10 + $0xb0] sm:$0xf0] }
  0xe5   :  { %1944 = vperm.xlu2 %7443, %v1941_v56   ;;  %v8073_v0 = vpop.f32.mrf.mxu1 }
  0xe6   :  { %v5353_v53 = vmul.f32 -1.442695, %v547_v40  ;;  %v545_v30 = vsel %vm542_vm13, %v544_v24, %v540_v42  ;;  %v7067_v42 = vld [vmem:[#allocation10 + $0x94] sm:$0xf] }
  0xe7   :  { %v5533_v36 = vor.u32 %v7067_v42, %v5530_v31  ;;  %v7060_v42 = vld [vmem:[#allocation10 + $0x58] sm:$0xf0] }
  0xe8   :  { %7451 = vpow2.f32 %v5353_v53 }
  0xea   :  { %v523_v15 = vpop.f32.mrf.mxu2 }
  0xeb   :  { %v512_v12 = vpop.f32.mrf.mxu3  ;;  %v570_v29 = vadd.f32 %v8047_v21, %v523_v15  ;;  %v7070_v15 = vld [vmem:[#allocation10 + $0xac] sm:$0xf] }
  0xec   :  { %v5540_v12 = vld [vmem:[#allocation10 + $0xa8] sm:$0xf] }
  0xed   :  { %v571_v33 = vmul.f32 %v570_v29, %v545_v30  ;;  %2479 = vperm.xlu2 %7443, %v7985_v61   ;;  %v8075_v4 = vpop.f32.mrf.mxu1  ;;  %v5541_v18 = vor.u32 %v7071_v13, %v5540_v12  ;;  %v5545_v61 = vor.u32 %v7070_v15, %v5542_v20  ;;  %v5529_v30 = vor.u32 %v7068_v28, %v5528_v25  ;;  %v7059_v20 = vld [vmem:[#allocation10 + $0x50] sm:$0xf0] }
  0xee   :  { %v7452_v22 = vpop.eup %7451  ;;  %v254_v25 = vadd.f32 %v8071_v55, %v8028_v3  ;;  %v7057_v55 = vld [vmem:[#allocation10 + $0x40] sm:$0xf0] }
  0xef   :  { %v551_v49 = vadd.f32 1.0, %v7452_v22  ;;  %v572_v34 = vadd.f32 %v571_v33, %v281_v38  ;;  %v5548_v22 = vld [vmem:[#allocation10 + $0xb0] sm:$0xf]  ;;  %1032 = vmatpush.bf16.msrb.mxu0 %v5541_v18  ;;  %1045 = vmatpush.bf16.msrb.mxu1 %v5545_v61  ;;  %v5536_v33 = vld [vmem:[#allocation10 + $0x98] sm:$0xf] }
  0xf0   :  { %v5516_v38 = vld [vmem:[#allocation10 + $0x78] sm:$0xf]  ;;  %v5492_v18 = vld [vmem:[#allocation10 + $0x48] sm:$0xf] }
  0xf1   :  { %7453 = vrcp.f32 %v551_v49  ;;  %v563_v40 = vand.u32 2147483648, %v551_v49  ;;  %v561_v43 = vand.u32 2147483647, %v551_v49  ;;  %vm557_vm15 = vweird.f32 %v551_v49  ;;  %v5494_v61 = vld [vmem:[#allocation10 + $0x54] sm:$0xf0] }
  0xf2   :  { %v525_v35 = vpop.f32.mrf.mxu2  ;;  %7455 = vtanh.f32 %v572_v34  ;;  %v7064_v34 = vld [vmem:[#allocation10 + $0x7c] sm:$0xf] }
  0xf3   :  { %v564_v48 = vor.u32 1.1754944e-38, %v563_v40  ;;  %vm562_vm1 = vcmp.eq.f32.partialorder %v561_v43, 8.507059e+37  ;;  %v7069_v35 = vld [vmem:[#allocation10 + $0xa0] sm:$0xf0]  ;;  %1033 = vmatpush.bf16.msrb.mxu0 %v5529_v30  ;;  %1046 = vmatpush.bf16.msrb.mxu1 %v5533_v36  ;;  %v5524_v43 = vld [vmem:[#allocation10 + $0x80] sm:$0xf] }
  0xf4   :  { %v5480_v36 = vld [vmem:[#allocation10 + $0x30] sm:$0xf] }
  0xf5   :  { %v8077_v5 = vpop.f32.mrf.mxu1 }
  0xf7   :  { %v7454_v37 = vpop.eup %7453 }
  0xf8   :  { %v553_v39 = vmul.f32 %v7454_v37, %v551_v49  ;;  %vm558_vm14 = vweird.f32 %v7454_v37  ;;  %v7456_v52 = vpop.eup %7455  ;;  %v7072_v49 = vld [vmem:[#allocation10 + $0xb8] sm:$0xf0] }
  0xf9   :  { %vm559_vm0 = vmor %vm557_vm15, %vm558_vm14  ;;  %v5549_v24 = vor.u32 %v7072_v49, %v5548_v22  ;;  %v5493_v22 = vor.u32 %v7059_v20, %v5492_v18  ;;  %v7058_v49 = vld [vmem:[#allocation10 + $0x4c] sm:$0xf] }
  0xfa   :  { %v554_v1 = vsub.f32 1.0, %v553_v39  ;;  %v7065_v39 = vld [vmem:[#allocation10 + $0x80] sm:$0xf0]  ;;  %v5497_v28 = vor.u32 %v7058_v49, %v5494_v61  ;;  %v5464_v49 = vld [vmem:[#allocation10 + $0x8] sm:$0xf] }
  0xfb   :  { %1058 = vmatpush.bf16.msrb.mxu2 %v5549_v24  ;;  %v5517_v40 = vor.u32 %v7065_v39, %v5516_v38  ;;  %v5500_v24 = vld [vmem:[#allocation10 + $0x50] sm:$0xf]  ;;  %v7056_v38 = vld [vmem:[#allocation10 + $0x38] sm:$0xf0]  ;;  %v7051_v61 = vld [vmem:[#allocation10 + $0x10] sm:$0xf0] }
  0xfc   :  { %v555_v41 = vmul.f32 %v7454_v37, %v554_v1  ;;  %v224_v1 = vpop.f32.mrf.mxu0  ;;  %v5501_v31 = vor.u32 %v7060_v42, %v5500_v24 }
  0xfd   :  { %v8079_v7 = vpop.f32.mrf.mxu1  ;;  %1034 = vmatpush.bf16.msrb.mxu0 %v5517_v40  ;;  %v5482_v40 = vld [vmem:[#allocation10 + $0x3c] sm:$0xf0] }
  0xfe   :  { %v556_v60 = vadd.f32 %v7454_v37, %v555_v41  ;;  %v5518_v41 = vld [vmem:[#allocation10 + $0x84] sm:$0xf0] }
 0x100   :  { %v560_v50 = vsel %vm559_vm0, %v7454_v37, %v556_v60  ;;  %v5537_v37 = vor.u32 %v7069_v35, %v5536_v33  ;;  %v7066_v60 = vld [vmem:[#allocation10 + $0x88] sm:$0xf0] }
 0x101   :  { %v565_v51 = vsel %vm562_vm1, %v564_v48, %v560_v50  ;;  %v5521_v48 = vor.u32 %v7064_v34, %v5518_v41  ;;  %v5525_v50 = vor.u32 %v7066_v60, %v5524_v43  ;;  %v5481_v34 = vor.u32 %v7056_v38, %v5480_v36  ;;  %v5488_v41 = vld [vmem:[#allocation10 + $0x38] sm:$0xf] }
 0x102   :  { %v574_v63 = vsub.f32 1.0, %v565_v51  ;;  %v576_v54 = vmul.f32 0.0, %v565_v51  ;;  %1059 = vmatpush.bf16.msrb.mxu2 %v5537_v37  ;;  %v225_v51 = vadd.f32 %v224_v1, %v8007_v16  ;;  %v7055_v1 = vld [vmem:[#allocation10 + $0x34] sm:$0xf] }
 0x103   :  { %1047 = vmatpush.bf16.msrb.mxu1 %v5521_v48  ;;  %v5485_v60 = vor.u32 %v7055_v1, %v5482_v40  ;;  %v5489_v48 = vor.u32 %v7057_v55, %v5488_v41 }
 0x104   :  { %v575_v53 = vmul.f32 %v7456_v52, %v574_v63  ;;  %v5504_v63 = vld [vmem:[#allocation10 + $0x60] sm:$0xf]  ;;  %v7062_v52 = vld [vmem:[#allocation10 + $0x68] sm:$0xf0] }
 0x105   :  { %v8081_v9 = vpop.f32.mrf.mxu1  ;;  %v5505_v56 = vor.u32 %v7062_v52, %v5504_v63  ;;  %v7052_v63 = vld [vmem:[#allocation10 + $0x1c] sm:$0xf] }
 0x106   :  { %v577_v57 = vadd.f32 %v576_v54, %v575_v53  ;;  %1060 = vmatpush.bf16.msrb.mxu2 %v5525_v50  ;;  %v7061_v53 = vld [vmem:[#allocation10 + $0x64] sm:$0xf]  ;;  %v5468_v50 = vld [vmem:[#allocation10 + $0x18] sm:$0xf] }
 0x107   :  { %1035 = vmatpush.bf16.msrb.mxu0 %v5505_v56  ;;  %v5476_v56 = vld [vmem:[#allocation10 + $0x20] sm:$0xf] }
 0x108   :  { %v586_v59 = vmul.f32 %v8058_v44, %v577_v57  ;;  %v5506_v57 = vld [vmem:[#allocation10 + $0x6c] sm:$0xf0] }
 0x109   :  { %v5509_v12 = vor.u32 %v7061_v53, %v5506_v57 }
 0x10a   :  { %v8066_v62 = vadd.f32 %v8062_v58, %v586_v59  ;;  %v7063_v59 = vld [vmem:[#allocation10 + $0x70] sm:$0xf0] }
 0x10b   :  { %v5513_v13 = vor.u32 %v7063_v59, %v5512_v26  ;;  %1048 = vmatpush.bf16.msrb.mxu1 %v5509_v12  ;;  %1036 = vmatpush.bf16.msrb.mxu0 %v5493_v22  ;;  %v7054_v26 = vld [vmem:[#allocation10 + $0x28] sm:$0xf0]  ;;  %v5456_v59 = vld [vmem:[#allocation10] sm:$0xf]  ;;  %v5458_v22 = vld [vmem:[#allocation10 + $0xc] sm:$0xf0] }
 0x10c   :  { %v595_v27 = vpack.c.bf16 %v8066_v62, %v8066_v62  ;;  %v5477_v18 = vor.u32 %v7054_v26, %v5476_v56 }
 0x10d   :  { %v8083_v29 = vpop.f32.mrf.mxu1  ;;  %1061 = vmatpush.bf16.msrb.mxu2 %v5513_v13  ;;  %v7049_v13 = vld [vmem:[#allocation10 + $0x4] sm:$0xf] }
 0x10e   :  { %596 = vst [vmem:[#allocation3] sm:$0xf] %v595_v27  ;;  %769 = vmatmul.bf16.vlgmr.msra.gmra.mxu1 %v595_v27  ;;  %782 = vmatmul.bf16.vlgmr.msra.gmra.mxu2 %v595_v27 }
 0x10f   :  { %795 = vmatmul.bf16.vlgmr.msra.gmra.mxu3 %v595_v27  ;;  %1049 = vmatpush.bf16.msrb.mxu1 %v5497_v28  ;;  %v5465_v28 = vor.u32 %v7051_v61, %v5464_v49  ;;  %v227_v61 = vpop.f32.mrf.mxu0 }
 0x110   :  { %1037 = vmatpush.bf16.msrb.mxu0 %v5481_v34 }
 0x111   :  { %1062 = vmatpush.bf16.msrb.mxu2 %v5501_v31 }
 0x113   :  { %1050 = vmatpush.bf16.msrb.mxu1 %v5485_v60  ;;  %v283_v60 = vadd.f32 %v7995_v2, %v8002_v8 }
 0x115   :  { %1063 = vmatpush.bf16.msrb.mxu2 %v5489_v48 }
 0x119   :  { %1064 = vmatpush.bf16.msrb.mxu2 %v5477_v18 }
 0x11d   :  { %1065 = vmatpush.bf16.msrb.mxu2 %v5465_v28  ;;  %v7094_v28 = vld [vmem:[#allocation10 + $0xac] sm:$0xf] }
 0x18b   :  { %v770_v54 = vpop.f32.mrf.mxu1 }
 0x18c   :  { %v800_v27 = vadd.f32 %v770_v54, %v225_v51  ;;  %v7053_v51 = vld [vmem:[#allocation10 + $0x20] sm:$0xf0]  ;;  %v5470_v54 = vld [vmem:[#allocation10 + $0x24] sm:$0xf0] }
 0x18d   :  { %v5469_v53 = vor.u32 %v7053_v51, %v5468_v50  ;;  %v5473_v57 = vor.u32 %v7052_v63, %v5470_v54  ;;  %v8094_v54 = vpop.permute.xlu1 %853 }
 0x18e   :  { %v5451_v15 = vmul.f32 -1.442695, %v800_v27  ;;  %v7050_v27 = vld [vmem:[#allocation10 + $0x8] sm:$0xf0] }
 0x18f   :  { %1038 = vmatpush.bf16.msrb.mxu0 %v5469_v53  ;;  %v5457_v20 = vor.u32 %v7050_v27, %v5456_v59  ;;  %1051 = vmatpush.bf16.msrb.mxu1 %v5473_v57 }
 0x190   :  { %7457 = vpow2.f32 %v5451_v15 }
 0x191   :  { %v783_v30 = vpop.f32.mrf.mxu2 }
 0x192   :  { %v820_v33 = vadd.f32 %v783_v30, %v254_v25  ;;  %v8088_v35 = vpop.f32.mrf.mxu3  ;;  %v5461_v25 = vor.u32 %v7049_v13, %v5458_v22 }
 0x193   :  { %v772_v37 = vpop.f32.mrf.mxu1  ;;  %1039 = vmatpush.bf16.msrb.mxu0 %v5457_v20 }
 0x194   :  { %v5452_v39 = vmul.f32 -1.442695, %v820_v33  ;;  %1052 = vmatpush.bf16.msrb.mxu1 %v5461_v25  ;;  %v7095_v25 = vld [vmem:[#allocation10 + $0xb0] sm:$0xf0] }
 0x195   :  { %v8097_v13 = vpop.permute.xlu1 %860 }
 0x196   :  { %v7458_v43 = vpop.eup %7457  ;;  %7459 = vpow2.f32 %v5452_v39  ;;  %v863_v18 = vmul.f32 %v8097_v13, %v8066_v62 }
 0x197   :  { %v804_v52 = vadd.f32 1.0, %v7458_v43  ;;  %v840_v43 = vadd.f32 %v8047_v21, %v8088_v35 }
 0x199   :  { %7461 = vrcp.f32 %v804_v52  ;;  %v785_v12 = vpop.f32.mrf.mxu2  ;;  %v816_v36 = vand.u32 2147483648, %v804_v52  ;;  %v814_v38 = vand.u32 2147483647, %v804_v52  ;;  %vm810_vm3 = vweird.f32 %v804_v52 }
 0x19a   :  { %v798_v15 = vpop.f32.mrf.mxu3 }
 0x19b   :  { %v817_v40 = vor.u32 1.1754944e-38, %v816_v36  ;;  %vm815_vm5 = vcmp.eq.f32.partialorder %v814_v38, 8.507059e+37  ;;  %v7092_v38 = vld [vmem:[#allocation10 + $0x98] sm:$0xf0] }
 0x19c   :  { %v7460_v24 = vpop.eup %7459 }
 0x19d   :  { %v824_v42 = vadd.f32 1.0, %v7460_v24  ;;  %v5639_v24 = vld [vmem:[#allocation10 + $0xa8] sm:$0xf] }
 0x19f   :  { %v7462_v30 = vpop.eup %7461  ;;  %7463 = vrcp.f32 %v824_v42  ;;  %v836_v51 = vand.u32 2147483648, %v824_v42  ;;  %v834_v53 = vand.u32 2147483647, %v824_v42  ;;  %vm830_vm7 = vweird.f32 %v824_v42 }
 0x1a0   :  { %v806_v31 = vmul.f32 %v7462_v30, %v804_v52  ;;  %vm811_vm2 = vweird.f32 %v7462_v30 }
 0x1a1   :  { %vm812_vm4 = vmor %vm810_vm3, %vm811_vm2  ;;  %v837_v57 = vor.u32 1.1754944e-38, %v836_v51  ;;  %vm835_vm9 = vcmp.eq.f32.partialorder %v834_v53, 8.507059e+37  ;;  %v7088_v51 = vld [vmem:[#allocation10 + $0x7c] sm:$0xf]  ;;  %v5617_v53 = vld [vmem:[#allocation10 + $0x84] sm:$0xf0] }
 0x1a2   :  { %v807_v33 = vsub.f32 1.0, %v806_v31  ;;  %v5647_v31 = vld [vmem:[#allocation10 + $0xb0] sm:$0xf] }
 0x1a4   :  { %v808_v37 = vmul.f32 %v7462_v30, %v807_v33  ;;  %v7096_v33 = vld [vmem:[#allocation10 + $0xb8] sm:$0xf0] }
 0x1a5   :  { %v7464_v39 = vpop.eup %7463  ;;  %v5648_v36 = vor.u32 %v7096_v33, %v5647_v31 }
 0x1a6   :  { %v826_v34 = vmul.f32 %v7464_v39, %v824_v42  ;;  %v809_v1 = vadd.f32 %v7462_v30, %v808_v37  ;;  %vm831_vm6 = vweird.f32 %v7464_v39  ;;  %v5640_v42 = vor.u32 %v7095_v25, %v5639_v24  ;;  %v5627_v37 = vld [vmem:[#allocation10 + $0x90] sm:$0xf]  ;;  %v5611_v24 = vld [vmem:[#allocation10 + $0x68] sm:$0xf]  ;;  %v7087_v25 = vld [vmem:[#allocation10 + $0x70] sm:$0xf0] }
 0x1a7   :  { %vm832_vm8 = vmor %vm830_vm7, %vm831_vm6  ;;  %1329 = vmatpush.bf16.msra.mxu1 %v5648_v36  ;;  %v5612_v31 = vor.u32 %v7087_v25, %v5611_v24  ;;  %v7082_v36 = vld [vmem:[#allocation10 + $0x4c] sm:$0xf] }
 0x1a8   :  { %v827_v41 = vsub.f32 1.0, %v826_v34  ;;  %v813_v55 = vsel %vm812_vm4, %v7462_v30, %v809_v1  ;;  %v5641_v30 = vld [vmem:[#allocation10 + $0xb4] sm:$0xf0]  ;;  %1303 = vmatpush.bf16.msrb.mxu3 %v5640_v42  ;;  %v8106_v34 = vpop.f32.mrf.mxu0  ;;  %v5628_v1 = vor.u32 %v7092_v38, %v5627_v37 }
 0x1a9   :  { %v818_v48 = vsel %vm815_vm5, %v817_v40, %v813_v55  ;;  %v5629_v40 = vld [vmem:[#allocation10 + $0x9c] sm:$0xf0]  ;;  %v7093_v55 = vld [vmem:[#allocation10 + $0xa0] sm:$0xf0]  ;;  %v5593_v37 = vld [vmem:[#allocation10 + $0x54] sm:$0xf0] }
 0x1aa   :  { %v828_v50 = vmul.f32 %v7464_v39, %v827_v41  ;;  %v841_v63 = vmul.f32 %v840_v43, %v818_v48  ;;  %v5635_v41 = vld [vmem:[#allocation10 + $0x98] sm:$0xf] }
 0x1ab   :  { %v5615_v48 = vld [vmem:[#allocation10 + $0x78] sm:$0xf] }
 0x1ac   :  { %v829_v52 = vadd.f32 %v7464_v39, %v828_v50  ;;  %v842_v56 = vadd.f32 %v841_v63, %v283_v60  ;;  %v5636_v60 = vor.u32 %v7093_v55, %v5635_v41  ;;  %1304 = vmatpush.bf16.msrb.mxu3 %v5628_v1  ;;  %v7089_v50 = vld [vmem:[#allocation10 + $0x80] sm:$0xf0]  ;;  %v5599_v1 = vld [vmem:[#allocation10 + $0x50] sm:$0xf] }
 0x1ad   :  { %v5616_v63 = vor.u32 %v7089_v50, %v5615_v48  ;;  %v7079_v48 = vld [vmem:[#allocation10 + $0x34] sm:$0xf] }
 0x1ae   :  { %v833_v26 = vsel %vm832_vm8, %v7464_v39, %v829_v52  ;;  %7465 = vtanh.f32 %v842_v56  ;;  %v7091_v39 = vld [vmem:[#allocation10 + $0x94] sm:$0xf]  ;;  %1330 = vmatpush.bf16.msra.mxu1 %v5636_v60  ;;  %v5623_v52 = vld [vmem:[#allocation10 + $0x80] sm:$0xf]  ;;  %v7090_v56 = vld [vmem:[#allocation10 + $0x88] sm:$0xf0] }
 0x1af   :  { %v838_v35 = vsel %vm835_vm9, %v837_v57, %v833_v26  ;;  %v5632_v43 = vor.u32 %v7091_v39, %v5629_v40  ;;  %v5620_v57 = vor.u32 %v7088_v51, %v5617_v53  ;;  %v5624_v26 = vor.u32 %v7090_v56, %v5623_v52  ;;  %v7084_v40 = vld [vmem:[#allocation10 + $0x58] sm:$0xf0]  ;;  %v5581_v53 = vld [vmem:[#allocation10 + $0x3c] sm:$0xf0]  ;;  %v5587_v52 = vld [vmem:[#allocation10 + $0x38] sm:$0xf] }
 0x1b0   :  { %v844_v59 = vsub.f32 1.0, %v838_v35  ;;  %v846_v12 = vmul.f32 %v838_v35, %v8066_v62  ;;  %v5644_v62 = vor.u32 %v7094_v28, %v5641_v30  ;;  %1305 = vmatpush.bf16.msrb.mxu3 %v5616_v63  ;;  %v257_v35 = vadd.f32 %v8073_v0, %v8028_v3  ;;  %v7080_v60 = vld [vmem:[#allocation10 + $0x38] sm:$0xf0]  ;;  %v7081_v56 = vld [vmem:[#allocation10 + $0x40] sm:$0xf0] }
 0x1b1   :  { %v5596_v39 = vor.u32 %v7082_v36, %v5593_v37  ;;  %v5600_v41 = vor.u32 %v7084_v40, %v5599_v1  ;;  %v5563_v36 = vld [vmem:[#allocation10 + $0x8] sm:$0xf] }
 0x1b2   :  { %1316 = vmatpush.bf16.msra.mxu0 %v5644_v62  ;;  %1331 = vmatpush.bf16.msra.mxu1 %v5624_v26  ;;  %v7083_v62 = vld [vmem:[#allocation10 + $0x50] sm:$0xf0]  ;;  %v5588_v26 = vor.u32 %v7081_v56, %v5587_v52 }
 0x1b4   :  { %v7466_v27 = vpop.eup %7465 }
 0x1b5   :  { %v845_v2 = vmul.f32 %v7466_v27, %v844_v59  ;;  %v228_v59 = vadd.f32 %v227_v61, %v8007_v16  ;;  %v5603_v27 = vld [vmem:[#allocation10 + $0x60] sm:$0xf]  ;;  %v5591_v61 = vld [vmem:[#allocation10 + $0x48] sm:$0xf] }
 0x1b6   :  { %1317 = vmatpush.bf16.msra.mxu0 %v5632_v43  ;;  %1332 = vmatpush.bf16.msra.mxu1 %v5612_v31  ;;  %v5592_v38 = vor.u32 %v7083_v62, %v5591_v61  ;;  %v5579_v43 = vld [vmem:[#allocation10 + $0x30] sm:$0xf] }
 0x1b7   :  { %v847_v15 = vadd.f32 %v846_v12, %v845_v2  ;;  %v7086_v2 = vld [vmem:[#allocation10 + $0x68] sm:$0xf0]  ;;  %v7085_v12 = vld [vmem:[#allocation10 + $0x64] sm:$0xf]  ;;  %v5580_v63 = vor.u32 %v7080_v60, %v5579_v43  ;;  %v5557_v62 = vld [vmem:[#allocation10 + $0xc] sm:$0xf0] }
 0x1b9   :  { %v856_v20 = vmul.f32 %v8094_v54, %v847_v15 }
 0x1ba   :  { %1318 = vmatpush.bf16.msra.mxu0 %v5620_v57  ;;  %1333 = vmatpush.bf16.msra.mxu1 %v5600_v41  ;;  %v5584_v57 = vor.u32 %v7079_v48, %v5581_v53 }
 0x1bb   :  { %v8102_v22 = vadd.f32 %v863_v18, %v856_v20  ;;  %v5604_v20 = vor.u32 %v7086_v2, %v5603_v27  ;;  %v7077_v27 = vld [vmem:[#allocation10 + $0x20] sm:$0xf0]  ;;  %v7076_v2 = vld [vmem:[#allocation10 + $0x1c] sm:$0xf] }
 0x1bd   :  { %v865_v49 = vpack.c.bf16 %v8102_v22, %v8102_v22  ;;  %1306 = vmatpush.bf16.msrb.mxu3 %v5604_v20  ;;  %v5569_v20 = vld [vmem:[#allocation10 + $0x24] sm:$0xf0] }
 0x1be   :  { %1334 = vmatpush.bf16.msra.mxu1 %v5588_v26  ;;  %v5572_v25 = vor.u32 %v7076_v2, %v5569_v20 }
 0x1bf   :  { %867 = vst [vmem:[#allocation3 + $0x4] sm:$0xf] %v865_v49  ;;  %1040 = vmatmul.bf16.vlgmr.msrb.gmra.mxu0 %v865_v49  ;;  %1053 = vmatmul.bf16.vlgmr.msrb.gmra.mxu1 %v865_v49 }
 0x1c0   :  { %1066 = vmatmul.bf16.vlgmr.msrb.gmra.mxu2 %v865_v49  ;;  %v5605_v49 = vld [vmem:[#allocation10 + $0x6c] sm:$0xf0] }
 0x1c1   :  { %v5608_v30 = vor.u32 %v7085_v12, %v5605_v49  ;;  %1307 = vmatpush.bf16.msrb.mxu3 %v5592_v38  ;;  %v5575_v49 = vld [vmem:[#allocation10 + $0x20] sm:$0xf]  ;;  %v7075_v38 = vld [vmem:[#allocation10 + $0x10] sm:$0xf0] }
 0x1c3   :  { %1319 = vmatpush.bf16.msra.mxu0 %v5608_v30  ;;  %v7074_v30 = vld [vmem:[#allocation10 + $0x8] sm:$0xf0] }
 0x1c5   :  { %1308 = vmatpush.bf16.msrb.mxu3 %v5580_v63 }
 0x1c7   :  { %1320 = vmatpush.bf16.msra.mxu0 %v5596_v39  ;;  %v5564_v39 = vor.u32 %v7075_v38, %v5563_v36  ;;  %v7118_v36 = vld [vmem:[#allocation10 + $0xac] sm:$0xf]  ;;  %v5740_v38 = vld [vmem:[#allocation10 + $0xb4] sm:$0xf0] }
 0x1cb   :  { %1321 = vmatpush.bf16.msra.mxu0 %v5584_v57 }
 0x1cf   :  { %1322 = vmatpush.bf16.msra.mxu0 %v5572_v25 }
 0x23c   :  { %v1041_v15 = vpop.f32.mrf.mxu0  ;;  %v1054_v18 = vpop.f32.mrf.mxu1 }
 0x23d   :  { %v1071_v28 = vadd.f32 %v1041_v15, %v228_v59  ;;  %v1091_v42 = vadd.f32 %v1054_v18, %v257_v35  ;;  %v5567_v59 = vld [vmem:[#allocation10 + $0x18] sm:$0xf] }
 0x23e   :  { %v5568_v18 = vor.u32 %v7077_v27, %v5567_v59 }
 0x23f   :  { %v5550_v33 = vmul.f32 -1.442695, %v1071_v28  ;;  %v5551_v0 = vmul.f32 -1.442695, %v1091_v42  ;;  %v7078_v28 = vld [vmem:[#allocation10 + $0x28] sm:$0xf0] }
 0x240   :  { %v5555_v42 = vld [vmem:[#allocation10] sm:$0xf]  ;;  %1309 = vmatpush.bf16.msrb.mxu3 %v5568_v18  ;;  %v8115_v18 = vpop.permute.xlu2 %1124 }
 0x241   :  { %7467 = vpow2.f32 %v5550_v33  ;;  %v7073_v33 = vld [vmem:[#allocation10 + $0x4] sm:$0xf]  ;;  %v5556_v61 = vor.u32 %v7074_v30, %v5555_v42 }
 0x242   :  { %7469 = vpow2.f32 %v5551_v0  ;;  %v5576_v0 = vor.u32 %v7078_v28, %v5575_v49  ;;  %v5560_v37 = vor.u32 %v7073_v33, %v5557_v62  ;;  %v7119_v62 = vld [vmem:[#allocation10 + $0xb0] sm:$0xf0] }
 0x243   :  { %v8111_v55 = vpop.f32.mrf.mxu2 }
 0x244   :  { %v1043_v50 = vpop.f32.mrf.mxu0  ;;  %v1056_v51 = vpop.f32.mrf.mxu1  ;;  %1335 = vmatpush.bf16.msra.mxu1 %v5576_v0  ;;  %1310 = vmatpush.bf16.msrb.mxu3 %v5556_v61  ;;  %v1111_v26 = vadd.f32 %v8047_v21, %v8111_v55  ;;  %v5738_v61 = vld [vmem:[#allocation10 + $0xa8] sm:$0xf] }
 0x245   :  { %1323 = vmatpush.bf16.msra.mxu0 %v5560_v37  ;;  %v5739_v37 = vor.u32 %v7119_v62, %v5738_v61  ;;  %v5710_v61 = vld [vmem:[#allocation10 + $0x68] sm:$0xf]  ;;  %v7111_v62 = vld [vmem:[#allocation10 + $0x70] sm:$0xf0] }
 0x247   :  { %v7468_v35 = vpop.eup %7467  ;;  %1574 = vmatpush.bf16.msra.mxu2 %v5739_v37 }
 0x248   :  { %v7470_v12 = vpop.eup %7469  ;;  %v1075_v15 = vadd.f32 1.0, %v7468_v35  ;;  %1336 = vmatpush.bf16.msra.mxu1 %v5564_v39  ;;  %v8119_v30 = vpop.permute.xlu2 %1131  ;;  %v5746_v39 = vld [vmem:[#allocation10 + $0xb0] sm:$0xf] }
 0x249   :  { %v1095_v24 = vadd.f32 1.0, %v7470_v12 }
 0x24a   :  { %7471 = vrcp.f32 %v1075_v15  ;;  %v1087_v50 = vand.u32 2147483648, %v1075_v15  ;;  %v1085_v63 = vand.u32 2147483647, %v1075_v15  ;;  %vm1081_vm11 = vweird.f32 %v1075_v15 }
 0x24b   :  { %7473 = vrcp.f32 %v1095_v24  ;;  %v1069_v31 = vpop.f32.mrf.mxu2  ;;  %v1107_v27 = vand.u32 2147483648, %v1095_v24  ;;  %vm1101_vm15 = vweird.f32 %v1095_v24  ;;  %v1105_v12 = vand.u32 2147483647, %v1095_v24 }
 0x24c   :  { %v1088_v56 = vor.u32 1.1754944e-38, %v1087_v50  ;;  %vm1086_vm13 = vcmp.eq.f32.partialorder %v1085_v63, 8.507059e+37  ;;  %v5728_v50 = vld [vmem:[#allocation10 + $0x9c] sm:$0xf0]  ;;  %v7117_v63 = vld [vmem:[#allocation10 + $0xa0] sm:$0xf0] }
 0x24d   :  { %v1108_v49 = vor.u32 1.1754944e-38, %v1107_v27  ;;  %vm1106_vm1 = vcmp.eq.f32.partialorder %v1105_v12, 8.507059e+37  ;;  %v7113_v27 = vld [vmem:[#allocation10 + $0x80] sm:$0xf0] }
 0x250   :  { %v7472_v1 = vpop.eup %7471 }
 0x251   :  { %v7474_v40 = vpop.eup %7473  ;;  %v1077_v41 = vmul.f32 %v7472_v1, %v1075_v15  ;;  %vm1082_vm10 = vweird.f32 %v7472_v1 }
 0x252   :  { %v1097_v43 = vmul.f32 %v7474_v40, %v1095_v24  ;;  %vm1083_vm12 = vmor %vm1081_vm11, %vm1082_vm10  ;;  %vm1102_vm14 = vweird.f32 %v7474_v40  ;;  %v1134_v24 = vmul.f32 %v8119_v30, %v8102_v22 }
 0x253   :  { %v1078_v60 = vsub.f32 1.0, %v1077_v41  ;;  %vm1103_vm0 = vmor %vm1101_vm15, %vm1102_vm14  ;;  %v5726_v41 = vld [vmem:[#allocation10 + $0x90] sm:$0xf] }
 0x254   :  { %v1098_v48 = vsub.f32 1.0, %v1097_v43  ;;  %v7116_v43 = vld [vmem:[#allocation10 + $0x98] sm:$0xf0] }
 0x255   :  { %v1079_v51 = vmul.f32 %v7472_v1, %v1078_v60  ;;  %v7115_v60 = vld [vmem:[#allocation10 + $0x94] sm:$0xf] }
 0x256   :  { %v1099_v53 = vmul.f32 %v7474_v40, %v1098_v48  ;;  %v5727_v48 = vor.u32 %v7116_v43, %v5726_v41  ;;  %v7106_v43 = vld [vmem:[#allocation10 + $0x4c] sm:$0xf] }
 0x257   :  { %v1080_v52 = vadd.f32 %v7472_v1, %v1079_v51  ;;  %v5734_v51 = vld [vmem:[#allocation10 + $0x98] sm:$0xf] }
 0x258   :  { %v1100_v35 = vadd.f32 %v7474_v40, %v1099_v53  ;;  %v259_v53 = vadd.f32 %v8075_v4, %v8028_v3  ;;  %1575 = vmatpush.bf16.msra.mxu2 %v5727_v48  ;;  %v230_v4 = vadd.f32 %v8106_v34, %v8007_v16  ;;  %v5690_v34 = vld [vmem:[#allocation10 + $0x48] sm:$0xf]  ;;  %v5698_v48 = vld [vmem:[#allocation10 + $0x50] sm:$0xf] }
 0x259   :  { %v1084_v57 = vsel %vm1083_vm12, %v7472_v1, %v1080_v52  ;;  %v7120_v1 = vld [vmem:[#allocation10 + $0xb8] sm:$0xf0]  ;;  %v5731_v52 = vor.u32 %v7115_v60, %v5728_v50  ;;  %v5692_v60 = vld [vmem:[#allocation10 + $0x54] sm:$0xf0] }
 0x25a   :  { %v1089_v59 = vsel %vm1086_vm13, %v1088_v56, %v1084_v57  ;;  %v1104_v15 = vsel %vm1103_vm0, %v7474_v40, %v1100_v35  ;;  %v5743_v40 = vor.u32 %v7118_v36, %v5740_v38  ;;  %v5735_v56 = vor.u32 %v7117_v63, %v5734_v51  ;;  %v7108_v63 = vld [vmem:[#allocation10 + $0x58] sm:$0xf0] }
 0x25b   :  { %v1112_v2 = vmul.f32 %v1111_v26, %v1089_v59  ;;  %v1109_v25 = vsel %vm1106_vm1, %v1108_v49, %v1104_v15  ;;  %v5714_v59 = vld [vmem:[#allocation10 + $0x78] sm:$0xf]  ;;  %v5722_v15 = vld [vmem:[#allocation10 + $0x80] sm:$0xf]  ;;  %v7114_v49 = vld [vmem:[#allocation10 + $0x88] sm:$0xf0]  ;;  %v5711_v38 = vor.u32 %v7111_v62, %v5710_v61  ;;  %v5695_v51 = vor.u32 %v7106_v43, %v5692_v60 }
 0x25c   :  { %v1115_v28 = vsub.f32 1.0, %v1109_v25  ;;  %v1117_v55 = vmul.f32 %v1109_v25, %v8102_v22  ;;  %v5747_v22 = vor.u32 %v7120_v1, %v5746_v39  ;;  %1587 = vmatpush.bf16.msra.mxu3 %v5743_v40  ;;  %v5715_v12 = vor.u32 %v7113_v27, %v5714_v59  ;;  %v7103_v59 = vld [vmem:[#allocation10 + $0x34] sm:$0xf]  ;;  %v5680_v27 = vld [vmem:[#allocation10 + $0x3c] sm:$0xf0] }
 0x25d   :  { %v1113_v20 = vadd.f32 %v1112_v2, %v8005_v11  ;;  %v7112_v2 = vld [vmem:[#allocation10 + $0x7c] sm:$0xf]  ;;  %v7098_v61 = vld [vmem:[#allocation10 + $0x8] sm:$0xf0] }
 0x25e   :  { %1600 = vmatpush.bf16.msrb.mxu0 %v5747_v22  ;;  %1576 = vmatpush.bf16.msra.mxu2 %v5715_v12  ;;  %v7107_v22 = vld [vmem:[#allocation10 + $0x50] sm:$0xf0]  ;;  %v5686_v12 = vld [vmem:[#allocation10 + $0x38] sm:$0xf] }
 0x25f   :  { %7475 = vtanh.f32 %v1113_v20  ;;  %v5716_v20 = vld [vmem:[#allocation10 + $0x84] sm:$0xf0]  ;;  %v5691_v41 = vor.u32 %v7107_v22, %v5690_v34 }
 0x260   :  { %1588 = vmatpush.bf16.msra.mxu3 %v5731_v52  ;;  %v7104_v52 = vld [vmem:[#allocation10 + $0x38] sm:$0xf0] }
 0x262   :  { %1601 = vmatpush.bf16.msrb.mxu0 %v5735_v56 }
 0x265   :  { %v7476_v42 = vpop.eup %7475 }
 0x266   :  { %v1116_v21 = vmul.f32 %v7476_v42, %v1115_v28  ;;  %v5719_v28 = vor.u32 %v7112_v2, %v5716_v20  ;;  %v5723_v42 = vor.u32 %v7114_v49, %v5722_v15  ;;  %v5683_v2 = vor.u32 %v7103_v59, %v5680_v27  ;;  %v7105_v20 = vld [vmem:[#allocation10 + $0x40] sm:$0xf0]  ;;  %v5666_v15 = vld [vmem:[#allocation10 + $0x18] sm:$0xf]  ;;  %v8141_v27 = vld [vmem:[%s8634_s5] ss:$0 sm:$0xff] }
 0x268   :  { %v1118_v31 = vadd.f32 %v1117_v55, %v1116_v21  ;;  %1589 = vmatpush.bf16.msra.mxu3 %v5719_v28  ;;  %1602 = vmatpush.bf16.msrb.mxu0 %v5723_v42  ;;  %v5702_v21 = vld [vmem:[#allocation10 + $0x60] sm:$0xf]  ;;  %v7110_v55 = vld [vmem:[#allocation10 + $0x68] sm:$0xf0]  ;;  %v5687_v28 = vor.u32 %v7105_v20, %v5686_v12  ;;  %v7100_v42 = vld [vmem:[#allocation10 + $0x1c] sm:$0xf] }
 0x26a   :  { %v1127_v33 = vmul.f32 %v8115_v18, %v1118_v31  ;;  %v7109_v31 = vld [vmem:[#allocation10 + $0x64] sm:$0xf] }
 0x26c   :  { %v8124_v0 = vadd.f32 %v1134_v24, %v1127_v33  ;;  %v5703_v33 = vor.u32 %v7110_v55, %v5702_v21  ;;  %1603 = vmatpush.bf16.msrb.mxu0 %v5711_v38  ;;  %v5674_v21 = vld [vmem:[#allocation10 + $0x20] sm:$0xf]  ;;  %v5656_v38 = vld [vmem:[#allocation10 + $0xc] sm:$0xf0] }
 0x26e   :  { %v1136_v11 = vpack.c.bf16 %v8124_v0, %v8124_v0  ;;  %1577 = vmatpush.bf16.msra.mxu2 %v5703_v33 }
 0x270   :  { %1138 = vst [vmem:[#allocation3 + $0x8] sm:$0xf] %v1136_v11  ;;  %1311 = vmatmul.bf16.vlgmr.msrb.gmra.mxu3 %v1136_v11  ;;  %1324 = vmatmul.bf16.vlgmr.msra.gmra.mxu0 %v1136_v11 }
 0x271   :  { %1337 = vmatmul.bf16.vlgmr.msra.gmra.mxu1 %v1136_v11  ;;  %v5704_v11 = vld [vmem:[#allocation10 + $0x6c] sm:$0xf0] }
 0x272   :  { %v5707_v37 = vor.u32 %v7109_v31, %v5704_v11  ;;  %1578 = vmatpush.bf16.msra.mxu2 %v5691_v41  ;;  %v7102_v31 = vld [vmem:[#allocation10 + $0x28] sm:$0xf0]  ;;  %v5654_v11 = vld [vmem:[#allocation10] sm:$0xf] }
 0x274   :  { %1590 = vmatpush.bf16.msra.mxu3 %v5707_v37  ;;  %v7097_v37 = vld [vmem:[#allocation10 + $0x4] sm:$0xf] }
 0x275   :  { %v5659_v22 = vor.u32 %v7097_v37, %v5656_v38 }
 0x278   :  { %1591 = vmatpush.bf16.msra.mxu3 %v5695_v51 }
 0x27c   :  { %1592 = vmatpush.bf16.msra.mxu3 %v5683_v2 }
 0x2ed   :  { %v1325_v57 = vpop.f32.mrf.mxu0 }
 0x2ee   :  { %v1362_v26 = vadd.f32 %v1325_v57, %v259_v53  ;;  %v8130_v35 = vpop.f32.mrf.mxu1  ;;  %v5678_v53 = vld [vmem:[#allocation10 + $0x30] sm:$0xf]  ;;  %v5699_v57 = vor.u32 %v7108_v63, %v5698_v48 }
 0x2ef   :  { %v1382_v2 = vadd.f32 %v8141_v27, %v8130_v35 }
 0x2f0   :  { %v5650_v25 = vmul.f32 -1.442695, %v1362_v26  ;;  %v5679_v26 = vor.u32 %v7104_v52, %v5678_v53  ;;  %1604 = vmatpush.bf16.msrb.mxu0 %v5699_v57 }
 0x2f2   :  { %7477 = vpow2.f32 %v5650_v25  ;;  %v7101_v25 = vld [vmem:[#allocation10 + $0x20] sm:$0xf0]  ;;  %1579 = vmatpush.bf16.msra.mxu2 %v5679_v26 }
 0x2f3   :  { %v1312_v24 = vpop.f32.mrf.mxu3  ;;  %v5667_v55 = vor.u32 %v7101_v25, %v5666_v15 }
 0x2f4   :  { %v1342_v36 = vadd.f32 %v1312_v24, %v230_v4  ;;  %v5668_v4 = vld [vmem:[#allocation10 + $0x24] sm:$0xf0]  ;;  %1605 = vmatpush.bf16.msrb.mxu0 %v5687_v28 }
 0x2f5   :  { %v1327_v39 = vpop.f32.mrf.mxu0  ;;  %v5671_v33 = vor.u32 %v7100_v42, %v5668_v4 }
 0x2f6   :  { %v5649_v1 = vmul.f32 -1.442695, %v1342_v36  ;;  %v1340_v40 = vpop.f32.mrf.mxu1  ;;  %v5675_v36 = vor.u32 %v7102_v31, %v5674_v21  ;;  %v5662_v39 = vld [vmem:[#allocation10 + $0x8] sm:$0xf]  ;;  %1580 = vmatpush.bf16.msra.mxu2 %v5667_v55 }
 0x2f7   :  { %v5655_v40 = vor.u32 %v7098_v61, %v5654_v11  ;;  %1593 = vmatpush.bf16.msra.mxu3 %v5671_v33  ;;  %v8151_v61 = vpop.permute.xlu0 %1395 }
 0x2f8   :  { %v7478_v50 = vpop.eup %7477  ;;  %7479 = vpow2.f32 %v5649_v1  ;;  %v7099_v1 = vld [vmem:[#allocation10 + $0x10] sm:$0xf0]  ;;  %1606 = vmatpush.bf16.msrb.mxu0 %v5675_v36 }
 0x2f9   :  { %v8134_v56 = vadd.f32 1.0, %v7478_v50  ;;  %v5663_v41 = vor.u32 %v7099_v1, %v5662_v39  ;;  %v5837_v39 = vld [vmem:[#allocation10 + $0xa8] sm:$0xf]  ;;  %v7143_v1 = vld [vmem:[#allocation10 + $0xb0] sm:$0xf0] }
 0x2fa   :  { %1581 = vmatpush.bf16.msra.mxu2 %v5655_v40  ;;  %v7142_v40 = vld [vmem:[#allocation10 + $0xac] sm:$0xf] }
 0x2fb   :  { %v1314_v49 = vpop.f32.mrf.mxu3  ;;  %7481 = vrcp.f32 %v8134_v56  ;;  %1594 = vmatpush.bf16.msra.mxu3 %v5659_v22  ;;  %v1378_v25 = vand.u32 2147483648, %v8134_v56  ;;  %vm1372_vm7 = vweird.f32 %v8134_v56  ;;  %v1376_v42 = vand.u32 2147483647, %v8134_v56  ;;  %v5839_v22 = vld [vmem:[#allocation10 + $0xb4] sm:$0xf0] }
 0x2fc   :  { %1607 = vmatpush.bf16.msrb.mxu0 %v5663_v41  ;;  %v288_v49 = vadd.f32 %v8012_v19, %v8002_v8  ;;  %v5845_v41 = vld [vmem:[#allocation10 + $0xb0] sm:$0xf] }
 0x2fd   :  { %v1379_v55 = vor.u32 1.1754944e-38, %v1378_v25  ;;  %vm1377_vm9 = vcmp.eq.f32.partialorder %v1376_v42, 8.507059e+37  ;;  %v5815_v25 = vld [vmem:[#allocation10 + $0x84] sm:$0xf0]  ;;  %v7138_v42 = vld [vmem:[#allocation10 + $0x88] sm:$0xf0] }
 0x2fe   :  { %v7480_v24 = vpop.eup %7479 }
 0x2ff   :  { %v1346_v62 = vadd.f32 1.0, %v7480_v24 }
 0x301   :  { %7483 = vrcp.f32 %v1346_v62  ;;  %v7482_v34 = vpop.eup %7481  ;;  %v1358_v63 = vand.u32 2147483648, %v1346_v62  ;;  %v1356_v52 = vand.u32 2147483647, %v1346_v62  ;;  %vm1352_vm3 = vweird.f32 %v1346_v62 }
 0x302   :  { %v1368_v43 = vmul.f32 %v7482_v34, %v8134_v56  ;;  %vm1373_vm6 = vweird.f32 %v7482_v34 }
 0x303   :  { %v1359_v59 = vor.u32 1.1754944e-38, %v1358_v63  ;;  %vm1357_vm5 = vcmp.eq.f32.partialorder %v1356_v52, 8.507059e+37  ;;  %vm1374_vm8 = vmor %vm1372_vm7, %vm1373_vm6  ;;  %v5833_v52 = vld [vmem:[#allocation10 + $0x98] sm:$0xf] }
 0x304   :  { %v1369_v50 = vsub.f32 1.0, %v1368_v43  ;;  %v7144_v43 = vld [vmem:[#allocation10 + $0xb8] sm:$0xf0] }
 0x306   :  { %v1370_v57 = vmul.f32 %v7482_v34, %v1369_v50  ;;  %v7140_v50 = vld [vmem:[#allocation10 + $0x98] sm:$0xf0] }
 0x307   :  { %v7484_v60 = vpop.eup %7483 }
 0x308   :  { %v1348_v48 = vmul.f32 %v7484_v60, %v1346_v62  ;;  %vm1353_vm2 = vweird.f32 %v7484_v60  ;;  %v1371_v20 = vadd.f32 %v7482_v34, %v1370_v57  ;;  %v8153_v62 = vpop.permute.xlu1 %1402  ;;  %v7141_v57 = vld [vmem:[#allocation10 + $0xa0] sm:$0xf0] }
 0x309   :  { %vm1354_vm4 = vmor %vm1352_vm3, %vm1353_vm2  ;;  %v1405_v56 = vmul.f32 %v8153_v62, %v8124_v0 }
 0x30a   :  { %v1349_v51 = vsub.f32 1.0, %v1348_v48  ;;  %v1375_v21 = vsel %vm1374_vm8, %v7482_v34, %v1371_v20  ;;  %v5838_v34 = vor.u32 %v7143_v1, %v5837_v39  ;;  %v5846_v48 = vor.u32 %v7144_v43, %v5845_v41  ;;  %v7137_v20 = vld [vmem:[#allocation10 + $0x80] sm:$0xf0]  ;;  %v7135_v39 = vld [vmem:[#allocation10 + $0x70] sm:$0xf0] }
 0x30b   :  { %v1380_v35 = vsel %vm1377_vm9, %v1379_v55, %v1375_v21  ;;  %v233_v55 = vadd.f32 %v7997_v6, %v8007_v16 }
 0x30c   :  { %v1350_v53 = vmul.f32 %v7484_v60, %v1349_v51  ;;  %v1386_v31 = vsub.f32 1.0, %v1380_v35  ;;  %v1388_v11 = vmul.f32 %v1380_v35, %v8124_v0  ;;  %1845 = vmatpush.bf16.msrb.mxu1 %v5838_v34  ;;  %1871 = vmatpush.bf16.msrb.mxu3 %v5846_v48  ;;  %v5825_v0 = vld [vmem:[#allocation10 + $0x90] sm:$0xf]  ;;  %v7139_v51 = vld [vmem:[#allocation10 + $0x94] sm:$0xf]  ;;  %v262_v35 = vadd.f32 %v8077_v5, %v8028_v3 }
 0x30d   :  { %v5826_v63 = vor.u32 %v7140_v50, %v5825_v0  ;;  %v5789_v5 = vld [vmem:[#allocation10 + $0x48] sm:$0xf]  ;;  %v7130_v48 = vld [vmem:[#allocation10 + $0x4c] sm:$0xf]  ;;  %v5791_v0 = vld [vmem:[#allocation10 + $0x54] sm:$0xf0] }
 0x30e   :  { %v1351_v26 = vadd.f32 %v7484_v60, %v1350_v53  ;;  %v5827_v53 = vld [vmem:[#allocation10 + $0x9c] sm:$0xf0] }
 0x310   :  { %v1355_v12 = vsel %vm1354_vm4, %v7484_v60, %v1351_v26  ;;  %v5842_v60 = vor.u32 %v7142_v40, %v5839_v22  ;;  %v5830_v26 = vor.u32 %v7139_v51, %v5827_v53  ;;  %1846 = vmatpush.bf16.msrb.mxu1 %v5826_v63  ;;  %v5794_v51 = vor.u32 %v7130_v48, %v5791_v0  ;;  %v5797_v63 = vld [vmem:[#allocation10 + $0x50] sm:$0xf]  ;;  %v7132_v53 = vld [vmem:[#allocation10 + $0x58] sm:$0xf0] }
 0x311   :  { %v1360_v15 = vsel %vm1357_vm5, %v1359_v59, %v1355_v12  ;;  %v5834_v59 = vor.u32 %v7141_v57, %v5833_v52  ;;  %v5813_v12 = vld [vmem:[#allocation10 + $0x78] sm:$0xf]  ;;  %v5777_v52 = vld [vmem:[#allocation10 + $0x30] sm:$0xf]  ;;  %v5798_v57 = vor.u32 %v7132_v53, %v5797_v63 }
 0x312   :  { %v1383_v28 = vmul.f32 %v1382_v2, %v1360_v15  ;;  %1858 = vmatpush.bf16.msrb.mxu2 %v5842_v60  ;;  %v7136_v15 = vld [vmem:[#allocation10 + $0x7c] sm:$0xf]  ;;  %v7131_v60 = vld [vmem:[#allocation10 + $0x50] sm:$0xf0] }
 0x313   :  { %1872 = vmatpush.bf16.msrb.mxu3 %v5834_v59  ;;  %v5790_v50 = vor.u32 %v7131_v60, %v5789_v5  ;;  %v7127_v59 = vld [vmem:[#allocation10 + $0x34] sm:$0xf] }
 0x314   :  { %v1384_v4 = vadd.f32 %v1383_v28, %v288_v49  ;;  %v5814_v49 = vor.u32 %v7137_v20, %v5813_v12  ;;  %v5821_v28 = vld [vmem:[#allocation10 + $0x80] sm:$0xf] }
 0x315   :  { %v5822_v21 = vor.u32 %v7138_v42, %v5821_v28  ;;  %v5779_v12 = vld [vmem:[#allocation10 + $0x3c] sm:$0xf0]  ;;  %v5765_v28 = vld [vmem:[#allocation10 + $0x18] sm:$0xf] }
 0x316   :  { %7485 = vtanh.f32 %v1384_v4  ;;  %1859 = vmatpush.bf16.msrb.mxu2 %v5830_v26  ;;  %v5818_v4 = vor.u32 %v7136_v15, %v5815_v25  ;;  %1847 = vmatpush.bf16.msrb.mxu1 %v5814_v49  ;;  %v7128_v26 = vld [vmem:[#allocation10 + $0x38] sm:$0xf0]  ;;  %v5782_v15 = vor.u32 %v7127_v59, %v5779_v12  ;;  %v5785_v49 = vld [vmem:[#allocation10 + $0x38] sm:$0xf]  ;;  %v7129_v25 = vld [vmem:[#allocation10 + $0x40] sm:$0xf0] }
 0x317   :  { %1873 = vmatpush.bf16.msrb.mxu3 %v5822_v21  ;;  %v5778_v20 = vor.u32 %v7128_v26, %v5777_v52  ;;  %v5786_v21 = vor.u32 %v7129_v25, %v5785_v49 }
 0x31a   :  { %1860 = vmatpush.bf16.msrb.mxu2 %v5818_v4 }
 0x31c   :  { %v7486_v24 = vpop.eup %7485 }
 0x31d   :  { %v1387_v33 = vmul.f32 %v7486_v24, %v1386_v31  ;;  %v5801_v31 = vld [vmem:[#allocation10 + $0x60] sm:$0xf]  ;;  %v7134_v24 = vld [vmem:[#allocation10 + $0x68] sm:$0xf0] }
 0x31f   :  { %v1389_v19 = vadd.f32 %v1388_v11, %v1387_v33  ;;  %v7133_v33 = vld [vmem:[#allocation10 + $0x64] sm:$0xf] }
 0x321   :  { %v1398_v36 = vmul.f32 %v8151_v61, %v1389_v19 }
 0x323   :  { %v8158_v37 = vadd.f32 %v1405_v56, %v1398_v36  ;;  %v5802_v36 = vor.u32 %v7134_v24, %v5801_v31  ;;  %v5803_v56 = vld [vmem:[#allocation10 + $0x6c] sm:$0xf0]  ;;  %v5767_v31 = vld [vmem:[#allocation10 + $0x24] sm:$0xf0]  ;;  %v5773_v24 = vld [vmem:[#allocation10 + $0x20] sm:$0xf] }
 0x324   :  { %v5806_v34 = vor.u32 %v7133_v33, %v5803_v56  ;;  %v7126_v33 = vld [vmem:[#allocation10 + $0x28] sm:$0xf0]  ;;  %v5753_v56 = vld [vmem:[#allocation10] sm:$0xf] }
 0x325   :  { %v1407_v38 = vpack.c.bf16 %v8158_v37, %v8158_v37  ;;  %1848 = vmatpush.bf16.msrb.mxu1 %v5802_v36 }
 0x326   :  { %1861 = vmatpush.bf16.msrb.mxu2 %v5806_v34  ;;  %v7121_v34 = vld [vmem:[#allocation10 + $0x4] sm:$0xf] }
 0x327   :  { %1409 = vst [vmem:[#allocation3 + $0xc] sm:$0xf] %v1407_v38  ;;  %1582 = vmatmul.bf16.vlgmr.msra.gmra.mxu2 %v1407_v38  ;;  %1595 = vmatmul.bf16.vlgmr.msra.gmra.mxu3 %v1407_v38 }
 0x328   :  { %1608 = vmatmul.bf16.vlgmr.msrb.gmra.mxu0 %v1407_v38  ;;  %v5809_v38 = vld [vmem:[#allocation10 + $0x68] sm:$0xf] }
 0x329   :  { %v5810_v22 = vor.u32 %v7135_v39, %v5809_v38  ;;  %1849 = vmatpush.bf16.msrb.mxu1 %v5790_v50  ;;  %v7122_v38 = vld [vmem:[#allocation10 + $0x8] sm:$0xf0] }
 0x32a   :  { %1862 = vmatpush.bf16.msrb.mxu2 %v5794_v51  ;;  %v5754_v5 = vor.u32 %v7122_v38, %v5753_v56  ;;  %v8172_v38 = vpop.permute.xlu0 %1673 }
 0x32b   :  { %1874 = vmatpush.bf16.msrb.mxu3 %v5810_v22  ;;  %v5755_v22 = vld [vmem:[#allocation10 + $0xc] sm:$0xf0] }
 0x32c   :  { %v5758_v60 = vor.u32 %v7121_v34, %v5755_v22  ;;  %v5944_v22 = vld [vmem:[#allocation10 + $0xb0] sm:$0xf] }
 0x32d   :  { %1850 = vmatpush.bf16.msrb.mxu1 %v5778_v20 }
 0x32e   :  { %1863 = vmatpush.bf16.msrb.mxu2 %v5782_v15 }
 0x32f   :  { %1875 = vmatpush.bf16.msrb.mxu3 %v5798_v57 }
 0x333   :  { %1876 = vmatpush.bf16.msrb.mxu3 %v5786_v21 }
 0x3a5   :  { %v8162_v2 = vpop.f32.mrf.mxu0 }
 0x3a6   :  { %v1653_v49 = vadd.f32 %v8141_v27, %v8162_v2 }
 0x3aa   :  { %v1583_v11 = vpop.f32.mrf.mxu2  ;;  %v1596_v19 = vpop.f32.mrf.mxu3 }
 0x3ab   :  { %v1613_v1 = vadd.f32 %v1583_v11, %v233_v55  ;;  %v1633_v40 = vadd.f32 %v1596_v19, %v262_v35  ;;  %v7125_v55 = vld [vmem:[#allocation10 + $0x20] sm:$0xf0]  ;;  %v7124_v35 = vld [vmem:[#allocation10 + $0x1c] sm:$0xf] }
 0x3ac   :  { %v5766_v19 = vor.u32 %v7125_v55, %v5765_v28  ;;  %v5770_v36 = vor.u32 %v7124_v35, %v5767_v31 }
 0x3ad   :  { %v5748_v6 = vmul.f32 -1.442695, %v1613_v1  ;;  %v5749_v41 = vmul.f32 -1.442695, %v1633_v40  ;;  %v1611_v43 = vpop.f32.mrf.mxu0  ;;  %v5774_v40 = vor.u32 %v7126_v33, %v5773_v24 }
 0x3ae   :  { %v7123_v43 = vld [vmem:[#allocation10 + $0x10] sm:$0xf0]  ;;  %1851 = vmatpush.bf16.msrb.mxu1 %v5766_v19  ;;  %1864 = vmatpush.bf16.msrb.mxu2 %v5770_v36 }
 0x3af   :  { %7487 = vpow2.f32 %v5748_v6  ;;  %1877 = vmatpush.bf16.msrb.mxu3 %v5774_v40 }
 0x3b0   :  { %7489 = vpow2.f32 %v5749_v41  ;;  %v5761_v41 = vld [vmem:[#allocation10 + $0x8] sm:$0xf] }
 0x3b1   :  { %v5762_v48 = vor.u32 %v7123_v43, %v5761_v41  ;;  %v5932_v43 = vld [vmem:[#allocation10 + $0x98] sm:$0xf] }
 0x3b2   :  { %v1585_v42 = vpop.f32.mrf.mxu2  ;;  %v1598_v4 = vpop.f32.mrf.mxu3  ;;  %1852 = vmatpush.bf16.msrb.mxu1 %v5754_v5  ;;  %1865 = vmatpush.bf16.msrb.mxu2 %v5758_v60  ;;  %v7165_v5 = vld [vmem:[#allocation10 + $0xa0] sm:$0xf0] }
 0x3b3   :  { %1878 = vmatpush.bf16.msrb.mxu3 %v5762_v48  ;;  %v5933_v60 = vor.u32 %v7165_v5, %v5932_v43  ;;  %v5920_v48 = vld [vmem:[#allocation10 + $0x80] sm:$0xf]  ;;  %v7157_v43 = vld [vmem:[#allocation10 + $0x64] sm:$0xf] }
 0x3b5   :  { %v7488_v11 = vpop.eup %7487 }
 0x3b6   :  { %v7490_v39 = vpop.eup %7489  ;;  %v1617_v1 = vadd.f32 1.0, %v7488_v11 }
 0x3b7   :  { %v1637_v6 = vadd.f32 1.0, %v7490_v39  ;;  %v8174_v39 = vpop.permute.xlu2 %1666 }
 0x3b8   :  { %7491 = vrcp.f32 %v1617_v1  ;;  %v1629_v52 = vand.u32 2147483648, %v1617_v1  ;;  %v1627_v59 = vand.u32 2147483647, %v1617_v1  ;;  %vm1623_vm11 = vweird.f32 %v1617_v1 }
 0x3b9   :  { %7493 = vrcp.f32 %v1637_v6  ;;  %v1649_v21 = vand.u32 2147483648, %v1637_v6  ;;  %vm1643_vm15 = vweird.f32 %v1637_v6  ;;  %v1647_v55 = vand.u32 2147483647, %v1637_v6 }
 0x3ba   :  { %v1630_v15 = vor.u32 1.1754944e-38, %v1629_v52  ;;  %vm1628_vm13 = vcmp.eq.f32.partialorder %v1627_v59, 8.507059e+37  ;;  %v7167_v52 = vld [vmem:[#allocation10 + $0xb0] sm:$0xf0]  ;;  %v5938_v59 = vld [vmem:[#allocation10 + $0xb4] sm:$0xf0] }
 0x3bb   :  { %v1650_v24 = vor.u32 1.1754944e-38, %v1649_v21  ;;  %vm1648_vm1 = vcmp.eq.f32.partialorder %v1647_v55, 8.507059e+37  ;;  %v5926_v21 = vld [vmem:[#allocation10 + $0x9c] sm:$0xf0] }
 0x3be   :  { %v7492_v0 = vpop.eup %7491 }
 0x3bf   :  { %v7494_v50 = vpop.eup %7493  ;;  %v1619_v51 = vmul.f32 %v7492_v0, %v1617_v1  ;;  %vm1624_vm10 = vweird.f32 %v7492_v0 }
 0x3c0   :  { %v1639_v63 = vmul.f32 %v7494_v50, %v1637_v6  ;;  %vm1625_vm12 = vmor %vm1623_vm11, %vm1624_vm10  ;;  %vm1644_vm14 = vweird.f32 %v7494_v50  ;;  %v7168_v6 = vld [vmem:[#allocation10 + $0xb8] sm:$0xf0] }
 0x3c1   :  { %v1620_v53 = vsub.f32 1.0, %v1619_v51  ;;  %vm1645_vm0 = vmor %vm1643_vm15, %vm1644_vm14  ;;  %v5945_v41 = vor.u32 %v7168_v6, %v5944_v22  ;;  %v7159_v51 = vld [vmem:[#allocation10 + $0x70] sm:$0xf0]  ;;  %v5900_v6 = vld [vmem:[#allocation10 + $0x60] sm:$0xf] }
 0x3c2   :  { %v1640_v57 = vsub.f32 1.0, %v1639_v63 }
 0x3c3   :  { %v1621_v26 = vmul.f32 %v7492_v0, %v1620_v53  ;;  %2142 = vmatpush.bf16.msra.mxu2 %v5945_v41  ;;  %v5936_v53 = vld [vmem:[#allocation10 + $0xa8] sm:$0xf]  ;;  %v7158_v41 = vld [vmem:[#allocation10 + $0x68] sm:$0xf0] }
 0x3c4   :  { %v1641_v12 = vmul.f32 %v7494_v50, %v1640_v57  ;;  %v7166_v57 = vld [vmem:[#allocation10 + $0xac] sm:$0xf] }
 0x3c5   :  { %v1622_v20 = vadd.f32 %v7492_v0, %v1621_v26  ;;  %v5937_v26 = vor.u32 %v7167_v52, %v5936_v53  ;;  %v5888_v52 = vld [vmem:[#allocation10 + $0x48] sm:$0xf] }
 0x3c6   :  { %v1642_v42 = vadd.f32 %v7494_v50, %v1641_v12  ;;  %v5941_v12 = vor.u32 %v7166_v57, %v5938_v59  ;;  %v7155_v57 = vld [vmem:[#allocation10 + $0x50] sm:$0xf0]  ;;  %v5890_v59 = vld [vmem:[#allocation10 + $0x54] sm:$0xf0] }
 0x3c7   :  { %v1626_v25 = vsel %vm1625_vm12, %v7492_v0, %v1622_v20  ;;  %2143 = vmatpush.bf16.msra.mxu2 %v5933_v60  ;;  %v7162_v0 = vld [vmem:[#allocation10 + $0x88] sm:$0xf0]  ;;  %2116 = vmatpush.bf16.msra.mxu0 %v5937_v26  ;;  %v5896_v20 = vld [vmem:[#allocation10 + $0x50] sm:$0xf]  ;;  %v5901_v60 = vor.u32 %v7158_v41, %v5900_v6  ;;  %v5866_v41 = vld [vmem:[#allocation10 + $0x24] sm:$0xf0] }
 0x3c8   :  { %v1631_v28 = vsel %vm1628_vm13, %v1630_v15, %v1626_v25  ;;  %v1646_v31 = vsel %vm1645_vm0, %v7494_v50, %v1642_v42  ;;  %v5908_v50 = vld [vmem:[#allocation10 + $0x68] sm:$0xf]  ;;  %v7156_v15 = vld [vmem:[#allocation10 + $0x58] sm:$0xf0]  ;;  %2129 = vmatpush.bf16.msra.mxu1 %v5941_v12  ;;  %v5924_v25 = vld [vmem:[#allocation10 + $0x90] sm:$0xf] }
 0x3c9   :  { %v1654_v4 = vmul.f32 %v1653_v49, %v1631_v28  ;;  %v1651_v33 = vsel %vm1648_vm1, %v1650_v24, %v1646_v31  ;;  %v5909_v63 = vor.u32 %v7159_v51, %v5908_v50  ;;  %v5897_v49 = vor.u32 %v7156_v15, %v5896_v20  ;;  %v7164_v28 = vld [vmem:[#allocation10 + $0x98] sm:$0xf0]  ;;  %v7163_v42 = vld [vmem:[#allocation10 + $0x94] sm:$0xf]  ;;  %v7153_v31 = vld [vmem:[#allocation10 + $0x40] sm:$0xf0] }
 0x3ca   :  { %v1657_v11 = vsub.f32 1.0, %v1651_v33  ;;  %v1659_v36 = vmul.f32 %v1651_v33, %v8158_v37  ;;  %v5929_v55 = vor.u32 %v7163_v42, %v5926_v21  ;;  %v5912_v33 = vld [vmem:[#allocation10 + $0x78] sm:$0xf]  ;;  %v5860_v50 = vld [vmem:[#allocation10 + $0x8] sm:$0xf]  ;;  %v264_v20 = vadd.f32 %v8079_v7, %v8028_v3 }
 0x3cb   :  { %v1655_v35 = vadd.f32 %v1654_v4, %v8017_v32  ;;  %v1676_v32 = vmul.f32 %v8172_v38, %v8158_v37  ;;  %v5921_v37 = vor.u32 %v7162_v0, %v5920_v48  ;;  %v5925_v4 = vor.u32 %v7164_v28, %v5924_v25  ;;  %v5902_v48 = vld [vmem:[#allocation10 + $0x6c] sm:$0xf0]  ;;  %v7147_v51 = vld [vmem:[#allocation10 + $0x10] sm:$0xf0]  ;;  %v7154_v26 = vld [vmem:[#allocation10 + $0x4c] sm:$0xf] }
 0x3cc   :  { %2130 = vmatpush.bf16.msra.mxu1 %v5929_v55  ;;  %v5861_v53 = vor.u32 %v7147_v51, %v5860_v50  ;;  %v6150_v12 = vld [vmem:[#allocation11 + $0xa8] sm:$0xf]  ;;  %v5893_v15 = vor.u32 %v7154_v26, %v5890_v59  ;;  %v5876_v21 = vld [vmem:[#allocation10 + $0x30] sm:$0xf]  ;;  %v7152_v55 = vld [vmem:[#allocation10 + $0x38] sm:$0xf0] }
 0x3cd   :  { %7495 = vtanh.f32 %v1655_v35  ;;  %2144 = vmatpush.bf16.msra.mxu2 %v5921_v37  ;;  %2117 = vmatpush.bf16.msra.mxu0 %v5925_v4  ;;  %v5884_v35 = vld [vmem:[#allocation10 + $0x38] sm:$0xf]  ;;  %v5905_v37 = vor.u32 %v7157_v43, %v5902_v48  ;;  %v7216_v7 = vld [vmem:[#allocation11 + $0x98] sm:$0xf0]  ;;  %v5852_v48 = vld [vmem:[#allocation10] sm:$0xf] }
 0x3ce   :  { %v5885_v24 = vor.u32 %v7153_v31, %v5884_v35  ;;  %v7151_v35 = vld [vmem:[#allocation10 + $0x34] sm:$0xf]  ;;  %v6126_v43 = vld [vmem:[#allocation11 + $0x78] sm:$0xf]  ;;  %v7145_v50 = vld [vmem:[#allocation10 + $0x4] sm:$0xf] }
 0x3d1   :  { %2145 = vmatpush.bf16.msra.mxu2 %v5909_v63 }
 0x3d3   :  { %v7496_v19 = vpop.eup %7495 }
 0x3d4   :  { %v1658_v2 = vmul.f32 %v7496_v19, %v1657_v11  ;;  %v7161_v11 = vld [vmem:[#allocation10 + $0x80] sm:$0xf0]  ;;  %v7160_v19 = vld [vmem:[#allocation10 + $0x7c] sm:$0xf] }
 0x3d5   :  { %2146 = vmatpush.bf16.msra.mxu2 %v5897_v49  ;;  %v7219_v49 = vld [vmem:[#allocation11 + $0xb0] sm:$0xf0] }
 0x3d6   :  { %v1660_v56 = vadd.f32 %v1659_v36, %v1658_v2  ;;  %v5913_v2 = vor.u32 %v7161_v11, %v5912_v33  ;;  %v5914_v36 = vld [vmem:[#allocation10 + $0x84] sm:$0xf0]  ;;  %v6151_v28 = vor.u32 %v7219_v49, %v6150_v12  ;;  %v5878_v33 = vld [vmem:[#allocation10 + $0x3c] sm:$0xf0]  ;;  %v6138_v11 = vld [vmem:[#allocation11 + $0x90] sm:$0xf] }
 0x3d7   :  { %v7207_v49 = vld [vmem:[#allocation11 + $0x50] sm:$0xf0] }
 0x3d8   :  { %v1669_v1 = vmul.f32 %v8174_v39, %v1660_v56  ;;  %v5917_v56 = vor.u32 %v7160_v19, %v5914_v36  ;;  %2118 = vmatpush.bf16.msra.mxu0 %v5913_v2  ;;  %v5881_v2 = vor.u32 %v7151_v35, %v5878_v33  ;;  %v6139_v36 = vor.u32 %v7216_v7, %v6138_v11 }
 0x3d9   :  { %2147 = vmatpush.bf16.msra.mxu2 %v5885_v24  ;;  %v5877_v24 = vor.u32 %v7152_v55, %v5876_v21  ;;  %v6090_v21 = vld [vmem:[#allocation11 + $0x30] sm:$0xf]  ;;  %v7204_v55 = vld [vmem:[#allocation11 + $0x38] sm:$0xf0] }
 0x3da   :  { %v8179_v40 = vadd.f32 %v1676_v32, %v1669_v1  ;;  %v5872_v1 = vld [vmem:[#allocation10 + $0x20] sm:$0xf]  ;;  %v7150_v32 = vld [vmem:[#allocation10 + $0x28] sm:$0xf0]  ;;  %2131 = vmatpush.bf16.msra.mxu1 %v5917_v56  ;;  %v6091_v11 = vor.u32 %v7204_v55, %v6090_v21  ;;  %v6043_v21 = vld [vmem:[#allocation10 + $0xb0] sm:$0xf] }
 0x3db   :  { %v5873_v22 = vor.u32 %v7150_v32, %v5872_v1  ;;  %v5864_v1 = vld [vmem:[#allocation10 + $0x18] sm:$0xf]  ;;  %v7149_v32 = vld [vmem:[#allocation10 + $0x20] sm:$0xf0]  ;;  %v7192_v55 = vld [vmem:[#allocation10 + $0xb8] sm:$0xf0] }
 0x3dc   :  { %v1678_v34 = vpack.c.bf16 %v8179_v40, %v8179_v40  ;;  %2119 = vmatpush.bf16.msra.mxu0 %v5901_v60  ;;  %v5865_v6 = vor.u32 %v7149_v32, %v5864_v1  ;;  %v7213_v60 = vld [vmem:[#allocation11 + $0x80] sm:$0xf0] }
 0x3dd   :  { %2148 = vmatpush.bf16.msra.mxu2 %v5873_v22 }
 0x3de   :  { %1680 = vst [vmem:[#allocation3 + $0x10] sm:$0xf] %v1678_v34  ;;  %1853 = vmatmul.bf16.vlgmr.msrb.gmra.mxu1 %v1678_v34  ;;  %1866 = vmatmul.bf16.vlgmr.msrb.gmra.mxu2 %v1678_v34 }
 0x3df   :  { %1879 = vmatmul.bf16.vlgmr.msrb.gmra.mxu3 %v1678_v34  ;;  %v235_v34 = vadd.f32 %v8009_v17, %v8007_v16  ;;  %2132 = vmatpush.bf16.msra.mxu1 %v5905_v37  ;;  %v5889_v17 = vor.u32 %v7155_v57, %v5888_v52  ;;  %v5854_v52 = vld [vmem:[#allocation10 + $0xc] sm:$0xf0]  ;;  %v6114_v57 = vld [vmem:[#allocation11 + $0x60] sm:$0xf] }
 0x3e0   :  { %v5857_v26 = vor.u32 %v7145_v50, %v5854_v52 }
 0x3e1   :  { %2149 = vmatpush.bf16.msra.mxu2 %v5861_v53  ;;  %2120 = vmatpush.bf16.msra.mxu0 %v5889_v17  ;;  %v7210_v17 = vld [vmem:[#allocation11 + $0x68] sm:$0xf0] }
 0x3e2   :  { %v6115_v12 = vor.u32 %v7210_v17, %v6114_v57 }
 0x3e3   :  { %2133 = vmatpush.bf16.msra.mxu1 %v5893_v15  ;;  %v6102_v15 = vld [vmem:[#allocation11 + $0x48] sm:$0xf] }
 0x3e5   :  { %2694 = vmatpush.bf16.msrb.mxu2 %v6151_v28  ;;  %2121 = vmatpush.bf16.msra.mxu0 %v5877_v24 }
 0x3e7   :  { %2134 = vmatpush.bf16.msra.mxu1 %v5881_v2  ;;  %v7201_v2 = vld [vmem:[#allocation11 + $0x20] sm:$0xf0] }
 0x3e9   :  { %2695 = vmatpush.bf16.msrb.mxu2 %v6139_v36  ;;  %2122 = vmatpush.bf16.msra.mxu0 %v5865_v6 }
 0x45b   :  { %v1854_v5 = vpop.f32.mrf.mxu1 }
 0x45c   :  { %v1884_v0 = vadd.f32 %v1854_v5, %v235_v34  ;;  %v7148_v34 = vld [vmem:[#allocation10 + $0x1c] sm:$0xf] }
 0x45d   :  { %v5869_v5 = vor.u32 %v7148_v34, %v5866_v41 }
 0x45e   :  { %v5847_v63 = vmul.f32 -1.442695, %v1884_v0  ;;  %v7146_v0 = vld [vmem:[#allocation10 + $0x8] sm:$0xf0] }
 0x45f   :  { %2135 = vmatpush.bf16.msra.mxu1 %v5869_v5  ;;  %v5853_v53 = vor.u32 %v7146_v0, %v5852_v48  ;;  %v7198_v48 = vld [vmem:[#allocation11 + $0x8] sm:$0xf0] }
 0x460   :  { %7497 = vpow2.f32 %v5847_v63  ;;  %v6127_v63 = vor.u32 %v7213_v60, %v6126_v43  ;;  %v293_v43 = vadd.f32 %v8023_v46, %v8002_v8  ;;  %v6066_v60 = vld [vmem:[#allocation11] sm:$0xf] }
 0x461   :  { %v1867_v25 = vpop.f32.mrf.mxu2  ;;  %2123 = vmatpush.bf16.msra.mxu0 %v5853_v53 }
 0x462   :  { %v1904_v42 = vadd.f32 %v1867_v25, %v264_v20  ;;  %v8187_v4 = vpop.f32.mrf.mxu3  ;;  %2696 = vmatpush.bf16.msrb.mxu2 %v6127_v63 }
 0x463   :  { %v1856_v31 = vpop.f32.mrf.mxu1  ;;  %2136 = vmatpush.bf16.msra.mxu1 %v5857_v26  ;;  %v1924_v32 = vadd.f32 %v8141_v27, %v8187_v4  ;;  %v6067_v27 = vor.u32 %v7198_v48, %v6066_v60  ;;  %v5995_v60 = vld [vmem:[#allocation10 + $0x50] sm:$0xf]  ;;  %v7180_v48 = vld [vmem:[#allocation10 + $0x58] sm:$0xf0] }
 0x464   :  { %v5848_v19 = vmul.f32 -1.442695, %v1904_v42  ;;  %v6103_v42 = vor.u32 %v7207_v49, %v6102_v15  ;;  %v8196_v15 = vpop.permute.xlu2 %1944 }
 0x465   :  { %v1947_v49 = vmul.f32 %v8196_v15, %v8179_v40 }
 0x466   :  { %v7498_v56 = vpop.eup %7497  ;;  %7499 = vpow2.f32 %v5848_v19  ;;  %2697 = vmatpush.bf16.msrb.mxu2 %v6115_v12  ;;  %v6078_v19 = vld [vmem:[#allocation11 + $0x18] sm:$0xf]  ;;  %v8194_v12 = vpop.permute.xlu1 %1937 }
 0x467   :  { %v1888_v22 = vadd.f32 1.0, %v7498_v56  ;;  %v6079_v41 = vor.u32 %v7201_v2, %v6078_v19  ;;  %v7186_v19 = vld [vmem:[#allocation10 + $0x88] sm:$0xf0] }
 0x469   :  { %7501 = vrcp.f32 %v1888_v22  ;;  %v1869_v37 = vpop.f32.mrf.mxu2  ;;  %v1900_v31 = vand.u32 2147483648, %v1888_v22  ;;  %v1898_v33 = vand.u32 2147483647, %v1888_v22  ;;  %vm1894_vm3 = vweird.f32 %v1888_v22 }
 0x46a   :  { %v1882_v51 = vpop.f32.mrf.mxu3  ;;  %2698 = vmatpush.bf16.msrb.mxu2 %v6103_v42  ;;  %v8205_v42 = vld [vmem:[#allocation3] sm:$0xff] }
 0x46b   :  { %v1901_v1 = vor.u32 1.1754944e-38, %v1900_v31  ;;  %vm1899_vm5 = vcmp.eq.f32.partialorder %v1898_v33, 8.507059e+37  ;;  %v6044_v31 = vor.u32 %v7192_v55, %v6043_v21  ;;  %v8208_v33 = vld [vmem:[#allocation3 + $0x8] sm:$0xff] }
 0x46c   :  { %v7500_v59 = vpop.eup %7499  ;;  %v5999_v55 = vld [vmem:[#allocation10 + $0x60] sm:$0xf] }
 0x46d   :  { %v1908_v20 = vadd.f32 1.0, %v7500_v59  ;;  %2413 = vmatpush.bf16.msrb.mxu1 %v6044_v31  ;;  %v7181_v31 = vld [vmem:[#allocation10 + $0x64] sm:$0xf] }
 0x46e   :  { %2699 = vmatpush.bf16.msrb.mxu2 %v6091_v11 }
 0x46f   :  { %v7502_v25 = vpop.eup %7501  ;;  %7503 = vrcp.f32 %v1908_v20  ;;  %v1920_v37 = vand.u32 2147483648, %v1908_v20  ;;  %v1918_v50 = vand.u32 2147483647, %v1908_v20  ;;  %vm1914_vm7 = vweird.f32 %v1908_v20 }
 0x470   :  { %v1890_v28 = vmul.f32 %v7502_v25, %v1888_v22  ;;  %vm1895_vm2 = vweird.f32 %v7502_v25 }
 0x471   :  { %vm1896_vm4 = vmor %vm1894_vm3, %vm1895_vm2  ;;  %v1921_v4 = vor.u32 1.1754944e-38, %v1920_v37  ;;  %vm1919_vm9 = vcmp.eq.f32.partialorder %v1918_v50, 8.507059e+37  ;;  %v6023_v37 = vld [vmem:[#allocation10 + $0x90] sm:$0xf]  ;;  %v7187_v50 = vld [vmem:[#allocation10 + $0x94] sm:$0xf] }
 0x472   :  { %v1891_v35 = vsub.f32 1.0, %v1890_v28  ;;  %2700 = vmatpush.bf16.msrb.mxu2 %v6079_v41 }
 0x474   :  { %v1892_v24 = vmul.f32 %v7502_v25, %v1891_v35  ;;  %v6031_v35 = vld [vmem:[#allocation10 + $0x98] sm:$0xf] }
 0x475   :  { %v7504_v7 = vpop.eup %7503 }
 0x476   :  { %v1910_v36 = vmul.f32 %v7504_v7, %v1908_v20  ;;  %v1893_v56 = vadd.f32 %v7502_v25, %v1892_v24  ;;  %vm1915_vm6 = vweird.f32 %v7504_v7  ;;  %2701 = vmatpush.bf16.msrb.mxu2 %v6067_v27  ;;  %v7189_v24 = vld [vmem:[#allocation10 + $0xa0] sm:$0xf0] }
 0x477   :  { %vm1916_vm8 = vmor %vm1914_vm7, %vm1915_vm6 }
 0x478   :  { %v1911_v34 = vsub.f32 1.0, %v1910_v36  ;;  %v1897_v6 = vsel %vm1896_vm4, %v7502_v25, %v1893_v56  ;;  %v6007_v36 = vld [vmem:[#allocation10 + $0x68] sm:$0xf]  ;;  %v7183_v56 = vld [vmem:[#allocation10 + $0x70] sm:$0xf0] }
 0x479   :  { %v1902_v5 = vsel %vm1899_vm5, %v1901_v1, %v1897_v6  ;;  %v6008_v1 = vor.u32 %v7183_v56, %v6007_v36  ;;  %v7190_v6 = vld [vmem:[#allocation10 + $0xac] sm:$0xf]  ;;  %v5987_v56 = vld [vmem:[#allocation10 + $0x48] sm:$0xf] }
 0x47a   :  { %v1912_v0 = vmul.f32 %v7504_v7, %v1911_v34  ;;  %v1925_v22 = vmul.f32 %v1924_v32, %v1902_v5  ;;  %v6035_v32 = vld [vmem:[#allocation10 + $0xa8] sm:$0xf]  ;;  %v7191_v34 = vld [vmem:[#allocation10 + $0xb0] sm:$0xf0] }
 0x47b   :  { %v6036_v41 = vor.u32 %v7191_v34, %v6035_v32  ;;  %v7178_v34 = vld [vmem:[#allocation10 + $0x4c] sm:$0xf] }
 0x47c   :  { %v1913_v51 = vadd.f32 %v7504_v7, %v1912_v0  ;;  %v1926_v63 = vadd.f32 %v1925_v22, %v293_v43  ;;  %v6037_v43 = vld [vmem:[#allocation10 + $0xb4] sm:$0xf0]  ;;  %v5996_v0 = vor.u32 %v7180_v48, %v5995_v60  ;;  %v7188_v22 = vld [vmem:[#allocation10 + $0x98] sm:$0xf0]  ;;  %v5975_v48 = vld [vmem:[#allocation10 + $0x30] sm:$0xf] }
 0x47d   :  { %v6040_v5 = vor.u32 %v7190_v6, %v6037_v43  ;;  %2387 = vmatpush.bf16.msra.mxu3 %v6036_v41  ;;  %v5989_v6 = vld [vmem:[#allocation10 + $0x54] sm:$0xf0]  ;;  %v6246_v41 = vld [vmem:[#allocation13 + $0xa8] sm:$0xf] }
 0x47e   :  { %v1917_v53 = vsel %vm1916_vm8, %v7504_v7, %v1913_v51  ;;  %7505 = vtanh.f32 %v1926_v63  ;;  %v6019_v7 = vld [vmem:[#allocation10 + $0x80] sm:$0xf]  ;;  %v6024_v51 = vor.u32 %v7188_v22, %v6023_v37  ;;  %v5992_v43 = vor.u32 %v7178_v34, %v5989_v6  ;;  %v7175_v37 = vld [vmem:[#allocation10 + $0x34] sm:$0xf]  ;;  %v7218_v34 = vld [vmem:[#allocation11 + $0xac] sm:$0xf] }
 0x47f   :  { %v1922_v52 = vsel %vm1919_vm9, %v1921_v4, %v1917_v53  ;;  %v6020_v2 = vor.u32 %v7186_v19, %v6019_v7  ;;  %2400 = vmatpush.bf16.msrb.mxu0 %v6040_v5  ;;  %v6025_v63 = vld [vmem:[#allocation10 + $0x9c] sm:$0xf0]  ;;  %v5983_v4 = vld [vmem:[#allocation10 + $0x38] sm:$0xf]  ;;  %v7177_v53 = vld [vmem:[#allocation10 + $0x40] sm:$0xf0] }
 0x480   :  { %v1928_v46 = vsub.f32 1.0, %v1922_v52  ;;  %v1930_v26 = vmul.f32 %v1922_v52, %v8179_v40  ;;  %v6032_v40 = vor.u32 %v7189_v24, %v6031_v35  ;;  %v6028_v27 = vor.u32 %v7187_v50, %v6025_v63  ;;  %v7182_v35 = vld [vmem:[#allocation10 + $0x68] sm:$0xf0]  ;;  %v5959_v19 = vld [vmem:[#allocation10 + $0x8] sm:$0xf] }
 0x481   :  { %2388 = vmatpush.bf16.msra.mxu3 %v6024_v51  ;;  %v5984_v52 = vor.u32 %v7177_v53, %v5983_v4  ;;  %v6000_v24 = vor.u32 %v7182_v35, %v5999_v55  ;;  %v7243_v5 = vld [vmem:[#allocation13 + $0xb0] sm:$0xf0]  ;;  %v5977_v50 = vld [vmem:[#allocation10 + $0x3c] sm:$0xf0]  ;;  %v6234_v51 = vld [vmem:[#allocation13 + $0x90] sm:$0xf] }
 0x482   :  { %2414 = vmatpush.bf16.msrb.mxu1 %v6032_v40  ;;  %v6001_v40 = vld [vmem:[#allocation10 + $0x6c] sm:$0xf0]  ;;  %v6247_v60 = vor.u32 %v7243_v5, %v6246_v41  ;;  %v7240_v63 = vld [vmem:[#allocation13 + $0x98] sm:$0xf0]  ;;  %v5963_v53 = vld [vmem:[#allocation10 + $0x18] sm:$0xf] }
 0x483   :  { %2401 = vmatpush.bf16.msrb.mxu0 %v6028_v27  ;;  %v6004_v7 = vor.u32 %v7181_v31, %v6001_v40  ;;  %v5980_v27 = vor.u32 %v7175_v37, %v5977_v50  ;;  %v6235_v4 = vor.u32 %v7240_v63, %v6234_v51  ;;  %v5951_v40 = vld [vmem:[#allocation10] sm:$0xf]  ;;  %v6152_v41 = vld [vmem:[#allocation11 + $0xb4] sm:$0xf0]  ;;  %v7220_v5 = vld [vmem:[#allocation11 + $0xb8] sm:$0xf0] }
 0x484   :  { %v7506_v57 = vpop.eup %7505  ;;  %v7231_v37 = vld [vmem:[#allocation13 + $0x50] sm:$0xf0]  ;;  %v6140_v63 = vld [vmem:[#allocation11 + $0x9c] sm:$0xf0] }
 0x485   :  { %v1929_v17 = vmul.f32 %v7506_v57, %v1928_v46  ;;  %v6011_v46 = vld [vmem:[#allocation10 + $0x78] sm:$0xf]  ;;  %v7185_v57 = vld [vmem:[#allocation10 + $0x80] sm:$0xf0]  ;;  %v7215_v51 = vld [vmem:[#allocation11 + $0x94] sm:$0xf] }
 0x486   :  { %2415 = vmatpush.bf16.msrb.mxu1 %v6020_v2  ;;  %v7171_v2 = vld [vmem:[#allocation10 + $0x10] sm:$0xf0] }
 0x487   :  { %v1931_v59 = vadd.f32 %v1930_v26, %v1929_v17  ;;  %v7184_v17 = vld [vmem:[#allocation10 + $0x7c] sm:$0xf]  ;;  %v6012_v26 = vor.u32 %v7185_v57, %v6011_v46  ;;  %v5960_v36 = vor.u32 %v7171_v2, %v5959_v19  ;;  %v238_v57 = vadd.f32 %v8014_v23, %v8007_v16  ;;  %v7169_v19 = vld [vmem:[#allocation10 + $0x4] sm:$0xf] }
 0x488   :  { %v7172_v46 = vld [vmem:[#allocation10 + $0x1c] sm:$0xf] }
 0x489   :  { %v1940_v20 = vmul.f32 %v8194_v12, %v1931_v59  ;;  %v6013_v59 = vld [vmem:[#allocation10 + $0x84] sm:$0xf0]  ;;  %2389 = vmatpush.bf16.msra.mxu3 %v6012_v26 }
 0x48a   :  { %2416 = vmatpush.bf16.msrb.mxu1 %v6008_v1  ;;  %v7179_v1 = vld [vmem:[#allocation10 + $0x50] sm:$0xf0] }
 0x48b   :  { %v8201_v25 = vadd.f32 %v1947_v49, %v1940_v20  ;;  %v6016_v20 = vor.u32 %v7184_v17, %v6013_v59  ;;  %v5971_v49 = vld [vmem:[#allocation10 + $0x20] sm:$0xf]  ;;  %v5988_v32 = vor.u32 %v7179_v1, %v5987_v56  ;;  %v267_v17 = vadd.f32 %v8081_v9, %v8028_v3  ;;  %v5965_v59 = vld [vmem:[#allocation10 + $0x24] sm:$0xf0] }
 0x48c   :  { %v5968_v55 = vor.u32 %v7172_v46, %v5965_v59  ;;  %v6210_v1 = vld [vmem:[#allocation13 + $0x60] sm:$0xf]  ;;  %v7217_v46 = vld [vmem:[#allocation11 + $0xa0] sm:$0xf0] }
 0x48d   :  { %v1949_v28 = vpack.c.bf16 %v8201_v25, %v8201_v25  ;;  %2402 = vmatpush.bf16.msrb.mxu0 %v6016_v20  ;;  %2390 = vmatpush.bf16.msra.mxu3 %v6000_v24  ;;  %v6222_v20 = vld [vmem:[#allocation13 + $0x78] sm:$0xf] }
 0x48e   :  { %2417 = vmatpush.bf16.msrb.mxu1 %v5996_v0  ;;  %v7176_v0 = vld [vmem:[#allocation10 + $0x38] sm:$0xf0] }
 0x48f   :  { %1951 = vst [vmem:[#allocation3 + $0x14] sm:$0xf] %v1949_v28  ;;  %2124 = vmatmul.bf16.vlgmr.msra.gmra.mxu0 %v1949_v28  ;;  %2137 = vmatmul.bf16.vlgmr.msra.gmra.mxu1 %v1949_v28  ;;  %v5976_v22 = vor.u32 %v7176_v0, %v5975_v48  ;;  %v6198_v0 = vld [vmem:[#allocation13 + $0x48] sm:$0xf] }
 0x490   :  { %2150 = vmatmul.bf16.vlgmr.msra.gmra.mxu2 %v1949_v28  ;;  %v7174_v28 = vld [vmem:[#allocation10 + $0x28] sm:$0xf0]  ;;  %v6199_v50 = vor.u32 %v7231_v37, %v6198_v0  ;;  %v6110_v0 = vld [vmem:[#allocation11 + $0x50] sm:$0xf] }
 0x491   :  { %v5972_v21 = vor.u32 %v7174_v28, %v5971_v49  ;;  %2403 = vmatpush.bf16.msrb.mxu0 %v6004_v7  ;;  %2391 = vmatpush.bf16.msra.mxu3 %v5988_v32  ;;  %v7237_v49 = vld [vmem:[#allocation13 + $0x80] sm:$0xf0]  ;;  %v7170_v7 = vld [vmem:[#allocation10 + $0x8] sm:$0xf0] }
 0x492   :  { %2418 = vmatpush.bf16.msrb.mxu1 %v5984_v52  ;;  %v7173_v52 = vld [vmem:[#allocation10 + $0x20] sm:$0xf0]  ;;  %v6223_v35 = vor.u32 %v7237_v49, %v6222_v20  ;;  %v5952_v9 = vor.u32 %v7170_v7, %v5951_v40  ;;  %v7234_v32 = vld [vmem:[#allocation13 + $0x68] sm:$0xf0]  ;;  %v7212_v49 = vld [vmem:[#allocation11 + $0x7c] sm:$0xf] }
 0x493   :  { %v5964_v26 = vor.u32 %v7173_v52, %v5963_v53  ;;  %v6211_v6 = vor.u32 %v7234_v32, %v6210_v1  ;;  %v6143_v52 = vor.u32 %v7215_v51, %v6140_v63  ;;  %v6122_v32 = vld [vmem:[#allocation11 + $0x68] sm:$0xf]  ;;  %v7208_v51 = vld [vmem:[#allocation11 + $0x58] sm:$0xf0] }
 0x495   :  { %2404 = vmatpush.bf16.msrb.mxu0 %v5992_v43  ;;  %2392 = vmatpush.bf16.msra.mxu3 %v5976_v22  ;;  %v6158_v43 = vld [vmem:[#allocation11 + $0xb0] sm:$0xf] }
 0x496   :  { %v8211_v11 = vld [vmem:[#allocation3 + $0x10] sm:$0xff]  ;;  %2419 = vmatpush.bf16.msrb.mxu1 %v5972_v21  ;;  %v6159_v48 = vor.u32 %v7220_v5, %v6158_v43  ;;  %v7222_v43 = vld [vmem:[#allocation13 + $0x8] sm:$0xf0] }
 0x499   :  { %2405 = vmatpush.bf16.msrb.mxu0 %v5980_v27  ;;  %2393 = vmatpush.bf16.msra.mxu3 %v5964_v26  ;;  %v6146_v27 = vld [vmem:[#allocation11 + $0x98] sm:$0xf]  ;;  %v7228_v26 = vld [vmem:[#allocation13 + $0x38] sm:$0xf0] }
 0x49a   :  { %2420 = vmatpush.bf16.msrb.mxu1 %v5960_v36  ;;  %v5953_v36 = vld [vmem:[#allocation10 + $0xc] sm:$0xf0] }
 0x49b   :  { %v5956_v56 = vor.u32 %v7169_v19, %v5953_v36  ;;  %v6174_v19 = vld [vmem:[#allocation13 + $0x18] sm:$0xf]  ;;  %v7209_v36 = vld [vmem:[#allocation11 + $0x64] sm:$0xf] }
 0x49d   :  { %2406 = vmatpush.bf16.msrb.mxu0 %v5968_v55  ;;  %2394 = vmatpush.bf16.msra.mxu3 %v5952_v9 }
 0x49e   :  { %2969 = vmatpush.bf16.msra.mxu1 %v6247_v60  ;;  %v6155_v60 = vor.u32 %v7218_v34, %v6152_v41  ;;  %v7211_v34 = vld [vmem:[#allocation11 + $0x70] sm:$0xf0]  ;;  %v6162_v41 = vld [vmem:[#allocation13] sm:$0xf] }
 0x49f   :  { %v6163_v5 = vor.u32 %v7222_v43, %v6162_v41 }
 0x4a0   :  { %2702 = vmatmul.bf16.vlgmr.msrb.gmra.mxu2 %v8205_v42 }
 0x4a1   :  { %2407 = vmatpush.bf16.msrb.mxu0 %v5956_v56  ;;  %2723 = vmatpush.bf16.msrb.mxu3 %v6155_v60  ;;  %v6116_v56 = vld [vmem:[#allocation11 + $0x6c] sm:$0xf0]  ;;  %v7206_v60 = vld [vmem:[#allocation11 + $0x4c] sm:$0xf] }
 0x4a2   :  { %2970 = vmatpush.bf16.msra.mxu1 %v6235_v4  ;;  %v6119_v1 = vor.u32 %v7209_v36, %v6116_v56 }
 0x4a5   :  { %2752 = vmatpush.bf16.msra.mxu0 %v6159_v48  ;;  %2724 = vmatpush.bf16.msrb.mxu3 %v6143_v52  ;;  %v6104_v48 = vld [vmem:[#allocation11 + $0x54] sm:$0xf0] }
 0x4a6   :  { %2971 = vmatpush.bf16.msra.mxu1 %v6223_v35 }
 0x4aa   :  { %2972 = vmatpush.bf16.msra.mxu1 %v6211_v6  ;;  %v6123_v6 = vor.u32 %v7211_v34, %v6122_v32  ;;  %v8234_v32 = vld [vmem:[%s8634_s5] ss:$0 sm:$0xff] }
 0x4ae   :  { %2973 = vmatpush.bf16.msra.mxu1 %v6199_v50  ;;  %v6107_v50 = vor.u32 %v7206_v60, %v6104_v48  ;;  %v6068_v60 = vld [vmem:[#allocation11 + $0xc] sm:$0xf0]  ;;  %v6074_v48 = vld [vmem:[#allocation11 + $0x8] sm:$0xf] }
 0x4b0   :  { %2707 = vmatmul.bf16.gmra.mxu2 %v8208_v33 }
 0x4c0   :  { %2712 = vmatmul.bf16.gmra.mxu2 %v8211_v11 }
 0x50c   :  { %v2125_v28 = vpop.f32.mrf.mxu0  ;;  %v2138_v21 = vpop.f32.mrf.mxu1 }
 0x50d   :  { %v2155_v31 = vadd.f32 %v2125_v28, %v238_v57  ;;  %v2175_v24 = vadd.f32 %v2138_v21, %v267_v17  ;;  %v6147_v57 = vor.u32 %v7217_v46, %v6146_v27  ;;  %v6186_v17 = vld [vmem:[#allocation13 + $0x30] sm:$0xf]  ;;  %v6128_v28 = vld [vmem:[#allocation11 + $0x84] sm:$0xf0]  ;;  %v6134_v21 = vld [vmem:[#allocation11 + $0x80] sm:$0xf] }
 0x50e   :  { %v6187_v20 = vor.u32 %v7228_v26, %v6186_v17  ;;  %v7203_v46 = vld [vmem:[#allocation11 + $0x34] sm:$0xf] }
 0x50f   :  { %v5946_v23 = vmul.f32 -1.442695, %v2155_v31  ;;  %v5947_v2 = vmul.f32 -1.442695, %v2175_v24  ;;  %2753 = vmatpush.bf16.msra.mxu0 %v6147_v57  ;;  %v6131_v31 = vor.u32 %v7212_v49, %v6128_v28  ;;  %v7214_v24 = vld [vmem:[#allocation11 + $0x88] sm:$0xf0] }
 0x510   :  { %v6135_v7 = vor.u32 %v7214_v24, %v6134_v21  ;;  %2974 = vmatpush.bf16.msra.mxu1 %v6187_v20  ;;  %v6092_v57 = vld [vmem:[#allocation11 + $0x3c] sm:$0xf0]  ;;  %v6098_v20 = vld [vmem:[#allocation11 + $0x38] sm:$0xf]  ;;  %v7205_v49 = vld [vmem:[#allocation11 + $0x40] sm:$0xf0] }
 0x511   :  { %7507 = vpow2.f32 %v5946_v23  ;;  %2725 = vmatpush.bf16.msrb.mxu3 %v6131_v31  ;;  %v7200_v24 = vld [vmem:[#allocation11 + $0x1c] sm:$0xf] }
 0x512   :  { %7509 = vpow2.f32 %v5947_v2  ;;  %v7225_v2 = vld [vmem:[#allocation13 + $0x20] sm:$0xf0] }
 0x513   :  { %v8218_v22 = vpop.f32.mrf.mxu2  ;;  %2754 = vmatpush.bf16.msra.mxu0 %v6135_v7  ;;  %v6175_v9 = vor.u32 %v7225_v2, %v6174_v19  ;;  %v6080_v7 = vld [vmem:[#allocation11 + $0x24] sm:$0xf0]  ;;  %v6086_v19 = vld [vmem:[#allocation11 + $0x20] sm:$0xf]  ;;  %v7202_v2 = vld [vmem:[#allocation11 + $0x28] sm:$0xf0] }
 0x514   :  { %v2127_v4 = vpop.f32.mrf.mxu0  ;;  %v2140_v53 = vpop.f32.mrf.mxu1  ;;  %v6083_v36 = vor.u32 %v7200_v24, %v6080_v7  ;;  %v6087_v56 = vor.u32 %v7202_v2, %v6086_v19  ;;  %v2195_v34 = vadd.f32 %v8234_v32, %v8218_v22  ;;  %v6236_v24 = vld [vmem:[#allocation13 + $0x9c] sm:$0xf0]  ;;  %v7236_v19 = vld [vmem:[#allocation13 + $0x7c] sm:$0xf]  ;;  %v7233_v2 = vld [vmem:[#allocation13 + $0x64] sm:$0xf] }
 0x515   :  { %2975 = vmatpush.bf16.msra.mxu1 %v6175_v9  ;;  %2726 = vmatpush.bf16.msrb.mxu3 %v6119_v1  ;;  %v6111_v4 = vor.u32 %v7208_v51, %v6110_v0 }
 0x517   :  { %v7508_v59 = vpop.eup %7507  ;;  %2755 = vmatpush.bf16.msra.mxu0 %v6123_v6 }
 0x518   :  { %v7510_v55 = vpop.eup %7509  ;;  %v8220_v35 = vadd.f32 1.0, %v7508_v59  ;;  %v6095_v59 = vor.u32 %v7203_v46, %v6092_v57 }
 0x519   :  { %v8222_v40 = vadd.f32 1.0, %v7510_v55  ;;  %2976 = vmatpush.bf16.msra.mxu1 %v6163_v5  ;;  %2727 = vmatpush.bf16.msrb.mxu3 %v6107_v50  ;;  %v6099_v55 = vor.u32 %v7205_v49, %v6098_v20  ;;  %v7197_v5 = vld [vmem:[#allocation11 + $0x4] sm:$0xf]  ;;  %v7199_v50 = vld [vmem:[#allocation11 + $0x10] sm:$0xf0] }
 0x51a   :  { %7511 = vrcp.f32 %v8220_v35  ;;  %v2171_v26 = vand.u32 2147483648, %v8220_v35  ;;  %v2169_v21 = vand.u32 2147483647, %v8220_v35  ;;  %vm2165_vm11 = vweird.f32 %v8220_v35  ;;  %v7242_v20 = vld [vmem:[#allocation13 + $0xac] sm:$0xf] }
 0x51b   :  { %7513 = vrcp.f32 %v8222_v40  ;;  %v2153_v23 = vpop.f32.mrf.mxu2  ;;  %2756 = vmatpush.bf16.msra.mxu0 %v6111_v4  ;;  %vm2185_vm15 = vweird.f32 %v8222_v40  ;;  %v2189_v0 = vand.u32 2147483647, %v8222_v40  ;;  %v6075_v51 = vor.u32 %v7199_v50, %v6074_v48  ;;  %v6248_v49 = vld [vmem:[#allocation13 + $0xb4] sm:$0xf0]  ;;  %v7221_v48 = vld [vmem:[#allocation13 + $0x4] sm:$0xf] }
 0x51c   :  { %v2172_v9 = vor.u32 1.1754944e-38, %v2171_v26  ;;  %vm2170_vm13 = vcmp.eq.f32.partialorder %v2169_v21, 8.507059e+37  ;;  %v8243_v26 = vpop.permute.xlu0 %2208 }
 0x51d   :  { %2728 = vmatpush.bf16.msrb.mxu3 %v6095_v59  ;;  %vm2190_vm1 = vcmp.eq.f32.partialorder %v2189_v0, 8.507059e+37  ;;  %v8245_v59 = vpop.permute.xlu1 %2215  ;;  %v6164_v0 = vld [vmem:[#allocation13 + $0xc] sm:$0xf0] }
 0x51f   :  { %2757 = vmatpush.bf16.msra.mxu0 %v6099_v55  ;;  %v6251_v55 = vor.u32 %v7242_v20, %v6248_v49  ;;  %v7244_v20 = vld [vmem:[#allocation13 + $0xb8] sm:$0xf0]  ;;  %v6242_v49 = vld [vmem:[#allocation13 + $0x98] sm:$0xf] }
 0x520   :  { %v7512_v37 = vpop.eup %7511 }
 0x521   :  { %v7514_v63 = vpop.eup %7513  ;;  %v2161_v27 = vmul.f32 %v7512_v37, %v8220_v35  ;;  %vm2166_vm10 = vweird.f32 %v7512_v37  ;;  %v2191_v35 = vand.u32 2147483648, %v8222_v40  ;;  %2729 = vmatpush.bf16.msrb.mxu3 %v6083_v36 }
 0x522   :  { %v2181_v53 = vmul.f32 %v7514_v63, %v8222_v40  ;;  %vm2167_vm12 = vmor %vm2165_vm11, %vm2166_vm10  ;;  %vm2186_vm14 = vweird.f32 %v7514_v63 }
 0x523   :  { %v2162_v52 = vsub.f32 1.0, %v2161_v27  ;;  %2758 = vmatpush.bf16.msra.mxu0 %v6087_v56  ;;  %vm2187_vm0 = vmor %vm2185_vm15, %vm2186_vm14  ;;  %v2192_v4 = vor.u32 1.1754944e-38, %v2191_v35  ;;  %v7230_v56 = vld [vmem:[#allocation13 + $0x4c] sm:$0xf]  ;;  %v6188_v35 = vld [vmem:[#allocation13 + $0x3c] sm:$0xf0] }
 0x524   :  { %v2182_v17 = vsub.f32 1.0, %v2181_v53 }
 0x525   :  { %v2163_v28 = vmul.f32 %v7512_v37, %v2162_v52 }
 0x526   :  { %v2183_v31 = vmul.f32 %v7514_v63, %v2182_v17 }
 0x527   :  { %v2164_v23 = vadd.f32 %v7512_v37, %v2163_v28  ;;  %2759 = vmatpush.bf16.msra.mxu0 %v6075_v51 }
 0x528   :  { %v2184_v6 = vadd.f32 %v7514_v63, %v2183_v31  ;;  %v7239_v31 = vld [vmem:[#allocation13 + $0x94] sm:$0xf] }
 0x529   :  { %v2168_v1 = vsel %vm2167_vm12, %v7512_v37, %v2164_v23  ;;  %v6071_v37 = vor.u32 %v7197_v5, %v6068_v60  ;;  %v6239_v7 = vor.u32 %v7239_v31, %v6236_v24  ;;  %v6224_v23 = vld [vmem:[#allocation13 + $0x84] sm:$0xf0] }
 0x52a   :  { %v2173_v41 = vsel %vm2170_vm13, %v2172_v9, %v2168_v1  ;;  %v2188_v27 = vsel %vm2187_vm0, %v7514_v63, %v2184_v6  ;;  %v2218_v63 = vmul.f32 %v8245_v59, %v8201_v25  ;;  %v6212_v9 = vld [vmem:[#allocation13 + $0x6c] sm:$0xf0]  ;;  %v6200_v1 = vld [vmem:[#allocation13 + $0x54] sm:$0xf0]  ;;  %v7227_v6 = vld [vmem:[#allocation13 + $0x34] sm:$0xf] }
 0x52b   :  { %v2196_v43 = vmul.f32 %v2195_v34, %v2173_v41  ;;  %2730 = vmatpush.bf16.msrb.mxu3 %v6071_v37  ;;  %v2193_v53 = vsel %vm2190_vm1, %v2192_v4, %v2188_v27  ;;  %v6215_v36 = vor.u32 %v7233_v2, %v6212_v9  ;;  %v6203_v34 = vor.u32 %v7230_v56, %v6200_v1  ;;  %v6176_v5 = vld [vmem:[#allocation13 + $0x24] sm:$0xf0]  ;;  %v7235_v56 = vld [vmem:[#allocation13 + $0x70] sm:$0xf0] }
 0x52c   :  { %v2199_v52 = vsub.f32 1.0, %v2193_v53  ;;  %v2201_v40 = vmul.f32 %v2193_v53, %v8201_v25  ;;  %v6227_v25 = vor.u32 %v7236_v19, %v6224_v23  ;;  %v6191_v41 = vor.u32 %v7227_v6, %v6188_v35  ;;  %v6230_v23 = vld [vmem:[#allocation13 + $0x80] sm:$0xf] }
 0x52d   :  { %v2197_v22 = vadd.f32 %v2196_v43, %v8031_v14  ;;  %v7224_v43 = vld [vmem:[#allocation13 + $0x1c] sm:$0xf]  ;;  %v6167_v37 = vor.u32 %v7221_v48, %v6164_v0  ;;  %v240_v4 = vadd.f32 %v8021_v45, %v8007_v16 }
 0x52e   :  { %v6179_v60 = vor.u32 %v7224_v43, %v6176_v5  ;;  %v6206_v5 = vld [vmem:[#allocation13 + $0x50] sm:$0xf] }
 0x52f   :  { %7515 = vtanh.f32 %v2197_v22 }
 0x535   :  { %v7516_v46 = vpop.eup %7515 }
 0x536   :  { %v2200_v57 = vmul.f32 %v7516_v46, %v2199_v52 }
 0x538   :  { %v2202_v17 = vadd.f32 %v2201_v40, %v2200_v57 }
 0x53a   :  { %v2211_v14 = vmul.f32 %v8243_v26, %v2202_v17 }
 0x53c   :  { %v8250_v28 = vadd.f32 %v2218_v63, %v2211_v14  ;;  %v6254_v63 = vld [vmem:[#allocation13 + $0xb0] sm:$0xf] }
 0x53d   :  { %v6255_v45 = vor.u32 %v7244_v20, %v6254_v63 }
 0x53e   :  { %v2220_v21 = vpack.c.bf16 %v8250_v28, %v8250_v28 }
 0x53f   :  { %2995 = vmatpush.bf16.msra.mxu2 %v6255_v45 }
 0x540   :  { %2222 = vst [vmem:[#allocation3 + $0x18] sm:$0xf] %v2220_v21  ;;  %2395 = vmatmul.bf16.vlgmr.msra.gmra.mxu3 %v2220_v21  ;;  %2408 = vmatmul.bf16.vlgmr.msrb.gmra.mxu0 %v2220_v21 }
 0x541   :  { %2421 = vmatmul.bf16.vlgmr.msrb.gmra.mxu1 %v2220_v21  ;;  %v7241_v21 = vld [vmem:[#allocation13 + $0xa0] sm:$0xf0] }
 0x542   :  { %2982 = vmatpush.bf16.msrb.mxu1 %v6251_v55  ;;  %v6243_v31 = vor.u32 %v7241_v21, %v6242_v49  ;;  %v7223_v49 = vld [vmem:[#allocation13 + $0x10] sm:$0xf0] }
 0x544   :  { %2996 = vmatpush.bf16.msra.mxu2 %v6243_v31 }
 0x546   :  { %2983 = vmatpush.bf16.msrb.mxu1 %v6239_v7 }
 0x54a   :  { %2984 = vmatpush.bf16.msrb.mxu1 %v6227_v25  ;;  %v7238_v25 = vld [vmem:[#allocation13 + $0x88] sm:$0xf0] }
 0x54b   :  { %v6231_v9 = vor.u32 %v7238_v25, %v6230_v23  ;;  %v6344_v23 = vld [vmem:[#allocation13 + $0xa8] sm:$0xf]  ;;  %v7267_v25 = vld [vmem:[#allocation13 + $0xb0] sm:$0xf0] }
 0x54d   :  { %2997 = vmatpush.bf16.msra.mxu2 %v6231_v9 }
 0x54e   :  { %2985 = vmatpush.bf16.msrb.mxu1 %v6215_v36  ;;  %v6218_v36 = vld [vmem:[#allocation13 + $0x68] sm:$0xf] }
 0x550   :  { %2731 = vmatmul.bf16.vlgmr.msrb.gmra.mxu3 %v8205_v42  ;;  %2760 = vmatmul.bf16.vlgmr.msra.gmra.mxu0 %v8205_v42  ;;  %v269_v42 = vadd.f32 %v8083_v29, %v8028_v3 }
 0x551   :  { %2977 = vmatmul.bf16.vlgmr.msra.gmra.mxu1 %v7837_v10 }
 0x552   :  { %2986 = vmatpush.bf16.msrb.mxu1 %v6203_v34 }
 0x556   :  { %2987 = vmatpush.bf16.msrb.mxu1 %v6191_v41  ;;  %v6219_v41 = vor.u32 %v7235_v56, %v6218_v36  ;;  %v6345_v56 = vor.u32 %v7267_v25, %v6344_v23  ;;  %v7257_v23 = vld [vmem:[#allocation13 + $0x64] sm:$0xf]  ;;  %v6310_v25 = vld [vmem:[#allocation13 + $0x6c] sm:$0xf0] }
 0x558   :  { %2998 = vmatpush.bf16.msra.mxu2 %v6219_v41  ;;  %3226 = vmatpush.bf16.msra.mxu3 %v6345_v56  ;;  %v6313_v56 = vor.u32 %v7257_v23, %v6310_v25  ;;  %v6274_v23 = vld [vmem:[#allocation13 + $0x24] sm:$0xf0] }
 0x55a   :  { %2988 = vmatpush.bf16.msrb.mxu1 %v6179_v60  ;;  %v7232_v60 = vld [vmem:[#allocation13 + $0x58] sm:$0xf0] }
 0x55e   :  { %2989 = vmatpush.bf16.msrb.mxu1 %v6167_v37 }
 0x560   :  { %2736 = vmatmul.bf16.gmra.mxu3 %v8208_v33  ;;  %2765 = vmatmul.bf16.gmra.mxu0 %v8208_v33 }
 0x561   :  { %2990 = vmatmul.bf16.vlgmr.msrb.gmra.mxu1 %v7837_v10 }
 0x570   :  { %2741 = vmatmul.bf16.gmra.mxu3 %v8211_v11  ;;  %2770 = vmatmul.bf16.gmra.mxu0 %v8211_v11 }
 0x5bd   :  { %v2409_v50 = vpop.f32.mrf.mxu0 }
 0x5be   :  { %v2446_v22 = vadd.f32 %v2409_v50, %v269_v42  ;;  %v2422_v51 = vpop.f32.mrf.mxu1 }
 0x5bf   :  { %v2466_v42 = vadd.f32 %v8234_v32, %v2422_v51 }
 0x5c0   :  { %v6046_v27 = vmul.f32 -1.442695, %v2446_v22  ;;  %v6207_v22 = vor.u32 %v7232_v60, %v6206_v5  ;;  %v6320_v5 = vld [vmem:[#allocation13 + $0x78] sm:$0xf]  ;;  %v7261_v60 = vld [vmem:[#allocation13 + $0x80] sm:$0xf0] }
 0x5c2   :  { %7517 = vpow2.f32 %v6046_v27  ;;  %2999 = vmatpush.bf16.msra.mxu2 %v6207_v22  ;;  %v8294_v22 = vld [vmem:[%s8637_s8] sm:$0x7] }
 0x5c3   :  { %v2396_v53 = vpop.f32.mrf.mxu3 }
 0x5c4   :  { %v2426_v52 = vadd.f32 %v2396_v53, %v240_v4  ;;  %v6194_v53 = vld [vmem:[#allocation13 + $0x38] sm:$0xf] }
 0x5c5   :  { %v2411_v33 = vpop.f32.mrf.mxu0 }
 0x5c6   :  { %v6045_v46 = vmul.f32 -1.442695, %v2426_v52  ;;  %v2424_v57 = vpop.f32.mrf.mxu1  ;;  %v7229_v52 = vld [vmem:[#allocation13 + $0x40] sm:$0xf0]  ;;  %v298_v33 = vadd.f32 %v8036_v47, %v8002_v8  ;;  %v6170_v47 = vld [vmem:[#allocation13 + $0x8] sm:$0xf] }
 0x5c7   :  { %v6195_v51 = vor.u32 %v7229_v52, %v6194_v53  ;;  %v7263_v52 = vld [vmem:[#allocation13 + $0x94] sm:$0xf] }
 0x5c8   :  { %v7518_v40 = vpop.eup %7517  ;;  %7519 = vpow2.f32 %v6045_v46 }
 0x5c9   :  { %v8266_v17 = vadd.f32 1.0, %v7518_v40  ;;  %3000 = vmatpush.bf16.msra.mxu2 %v6195_v51  ;;  %v7258_v51 = vld [vmem:[#allocation13 + $0x68] sm:$0xf0] }
 0x5cb   :  { %v2398_v11 = vpop.f32.mrf.mxu3  ;;  %7521 = vrcp.f32 %v8266_v17  ;;  %v2462_v46 = vand.u32 2147483648, %v8266_v17  ;;  %vm2456_vm7 = vweird.f32 %v8266_v17  ;;  %v2460_v40 = vand.u32 2147483647, %v8266_v17 }
 0x5cd   :  { %v2463_v63 = vor.u32 1.1754944e-38, %v2462_v46  ;;  %vm2461_vm9 = vcmp.eq.f32.partialorder %v2460_v40, 8.507059e+37 }
 0x5ce   :  { %v7520_v3 = vpop.eup %7519  ;;  %v8269_v29 = vpop.f32.mrf.mxu1 }
 0x5cf   :  { %v2430_v14 = vadd.f32 1.0, %v7520_v3  ;;  %v6182_v3 = vld [vmem:[#allocation13 + $0x20] sm:$0xf] }
 0x5d1   :  { %7523 = vrcp.f32 %v2430_v14  ;;  %v7522_v16 = vpop.eup %7521  ;;  %v2442_v34 = vand.u32 2147483648, %v2430_v14  ;;  %v2440_v35 = vand.u32 2147483647, %v2430_v14  ;;  %vm2436_vm3 = vweird.f32 %v2430_v14 }
 0x5d2   :  { %v2452_v55 = vmul.f32 %v7522_v16, %v8266_v17  ;;  %vm2457_vm6 = vweird.f32 %v7522_v16  ;;  %v6171_v17 = vor.u32 %v7223_v49, %v6170_v47  ;;  %v6352_v47 = vld [vmem:[#allocation13 + $0xb0] sm:$0xf]  ;;  %v7268_v49 = vld [vmem:[#allocation13 + $0xb8] sm:$0xf0] }
 0x5d3   :  { %v2443_v37 = vor.u32 1.1754944e-38, %v2442_v34  ;;  %vm2441_vm5 = vcmp.eq.f32.partialorder %v2440_v35, 8.507059e+37  ;;  %vm2458_vm8 = vmor %vm2456_vm7, %vm2457_vm6  ;;  %v7266_v34 = vld [vmem:[#allocation13 + $0xac] sm:$0xf] }
 0x5d4   :  { %v2453_v2 = vsub.f32 1.0, %v2452_v55 }
 0x5d6   :  { %v2980_v24 = vpop.f32.mrf.mxu1  ;;  %v2454_v43 = vmul.f32 %v7522_v16, %v2453_v2  ;;  %v6332_v2 = vld [vmem:[#allocation13 + $0x90] sm:$0xf] }
 0x5d7   :  { %v7524_v7 = vpop.eup %7523 }
 0x5d8   :  { %v2432_v19 = vmul.f32 %v7524_v7, %v2430_v14  ;;  %vm2437_vm2 = vweird.f32 %v7524_v7  ;;  %v2455_v27 = vadd.f32 %v7522_v16, %v2454_v43  ;;  %v7226_v14 = vld [vmem:[#allocation13 + $0x28] sm:$0xf0] }
 0x5d9   :  { %vm2438_vm4 = vmor %vm2436_vm3, %vm2437_vm2  ;;  %v6183_v8 = vor.u32 %v7226_v14, %v6182_v3 }
 0x5da   :  { %v2433_v1 = vsub.f32 1.0, %v2432_v19  ;;  %v2459_v11 = vsel %vm2458_vm8, %v7522_v16, %v2455_v27  ;;  %v8281_v16 = vpop.permute.xlu0 %2486  ;;  %v8283_v19 = vpop.permute.xlu2 %2479  ;;  %v8297_v27 = vperm.slane %v8294_v22, 0 }
 0x5db   :  { %v2464_v45 = vsel %vm2461_vm9, %v2463_v63, %v2459_v11  ;;  %3001 = vmatpush.bf16.msra.mxu2 %v6183_v8  ;;  %v2489_v9 = vmul.f32 %v8281_v16, %v8250_v28  ;;  %v2732_v11 = vpop.f32.mrf.mxu3  ;;  %v7260_v63 = vld [vmem:[#allocation13 + $0x7c] sm:$0xf] }
 0x5dc   :  { %v2434_v6 = vmul.f32 %v7524_v7, %v2433_v1  ;;  %v2470_v21 = vsub.f32 1.0, %v2464_v45  ;;  %v2472_v31 = vmul.f32 %v2464_v45, %v8250_v28  ;;  %v7264_v1 = vld [vmem:[#allocation13 + $0x98] sm:$0xf0]  ;;  %v2703_v28 = vpop.f32.mrf.mxu2 }
 0x5dd   :  { %v6333_v43 = vor.u32 %v7264_v1, %v6332_v2  ;;  %v2704_v53 = vadd.f32 %v2703_v28, %v8297_v27  ;;  %v7254_v28 = vld [vmem:[#allocation13 + $0x4c] sm:$0xf] }
 0x5de   :  { %v2435_v48 = vadd.f32 %v7524_v7, %v2434_v6  ;;  %v8272_v0 = vpop.f32.mrf.mxu1  ;;  %v6346_v6 = vld [vmem:[#allocation13 + $0xb4] sm:$0xf0] }
 0x5df   :  { %3002 = vmatpush.bf16.msra.mxu2 %v6171_v17  ;;  %v6349_v35 = vor.u32 %v7266_v34, %v6346_v6  ;;  %3227 = vmatpush.bf16.msra.mxu3 %v6333_v43  ;;  %v3008_v46 = vadd.f32 %v8269_v29, %v2704_v53  ;;  %v6353_v17 = vor.u32 %v7268_v49, %v6352_v47  ;;  %v6328_v34 = vld [vmem:[#allocation13 + $0x80] sm:$0xf]  ;;  %v7262_v6 = vld [vmem:[#allocation13 + $0x88] sm:$0xf0]  ;;  %v6316_v43 = vld [vmem:[#allocation13 + $0x68] sm:$0xf] }
 0x5e0   :  { %v2439_v50 = vsel %vm2438_vm4, %v7524_v7, %v2435_v48  ;;  %v6298_v53 = vld [vmem:[#allocation13 + $0x54] sm:$0xf0] }
 0x5e1   :  { %v2444_v4 = vsel %vm2441_vm5, %v2443_v37, %v2439_v50  ;;  %3239 = vmatpush.bf16.msrb.mxu0 %v6349_v35  ;;  %v6321_v37 = vor.u32 %v7261_v60, %v6320_v5  ;;  %v6256_v40 = vmul.f32 -1.442695, %v3008_v46  ;;  %3252 = vmatpush.bf16.msra.mxu1 %v6353_v17  ;;  %v6329_v35 = vor.u32 %v7262_v6, %v6328_v34  ;;  %v7259_v5 = vld [vmem:[#allocation13 + $0x70] sm:$0xf0]  ;;  %v7256_v46 = vld [vmem:[#allocation13 + $0x58] sm:$0xf0] }
 0x5e2   :  { %v2467_v57 = vmul.f32 %v2466_v42, %v2444_v4  ;;  %v6317_v60 = vor.u32 %v7259_v5, %v6316_v43  ;;  %v6260_v17 = vld [vmem:[#allocation13] sm:$0xf]  ;;  %v6262_v6 = vld [vmem:[#allocation13 + $0xc] sm:$0xf0] }
 0x5e3   :  { %3228 = vmatpush.bf16.msra.mxu3 %v6321_v37 }
 0x5e4   :  { %v2468_v32 = vadd.f32 %v2467_v57, %v298_v33  ;;  %v8289_v50 = vpop.f32.mrf.mxu2  ;;  %v6334_v33 = vld [vmem:[#allocation13 + $0x9c] sm:$0xf0]  ;;  %v8304_v57 = vperm.slane %v8294_v22, 1 }
 0x5e6   :  { %7525 = vtanh.f32 %v2468_v32  ;;  %v2993_v20 = vpop.f32.mrf.mxu1  ;;  %v6308_v32 = vld [vmem:[#allocation13 + $0x60] sm:$0xf]  ;;  %v2733_v45 = vadd.f32 %v2732_v11, %v8304_v57  ;;  %v7251_v11 = vld [vmem:[#allocation13 + $0x34] sm:$0xf] }
 0x5e7   :  { %v6309_v3 = vor.u32 %v7258_v51, %v6308_v32  ;;  %v6322_v20 = vld [vmem:[#allocation13 + $0x84] sm:$0xf0]  ;;  %7527 = vpow2.f32 %v6256_v40  ;;  %v6284_v32 = vld [vmem:[#allocation13 + $0x30] sm:$0xf]  ;;  %v7252_v51 = vld [vmem:[#allocation13 + $0x38] sm:$0xf0] }
 0x5e8   :  { %v6325_v8 = vor.u32 %v7260_v63, %v6322_v20  ;;  %v3028_v29 = vadd.f32 %v8272_v0, %v2733_v45  ;;  %v6286_v63 = vld [vmem:[#allocation13 + $0x3c] sm:$0xf0]  ;;  %v6292_v20 = vld [vmem:[#allocation13 + $0x38] sm:$0xf]  ;;  %v7253_v45 = vld [vmem:[#allocation13 + $0x40] sm:$0xf0] }
 0x5e9   :  { %3229 = vmatpush.bf16.msra.mxu3 %v6309_v3  ;;  %v6285_v3 = vor.u32 %v7252_v51, %v6284_v32  ;;  %v6293_v47 = vor.u32 %v7253_v45, %v6292_v20  ;;  %v8338_v32 = vld [vmem:[%s8638_s9] ss:$0 sm:$0xff] }
 0x5ec   :  { %v7526_v55 = vpop.eup %7525  ;;  %v8299_v4 = vpop.f32.mrf.mxu2 }
 0x5ed   :  { %v2471_v24 = vmul.f32 %v7526_v55, %v2470_v21  ;;  %v6296_v21 = vld [vmem:[#allocation13 + $0x48] sm:$0xf]  ;;  %v7255_v55 = vld [vmem:[#allocation13 + $0x50] sm:$0xf0]  ;;  %v7528_v2 = vpop.eup %7527 }
 0x5ee   :  { %v8312_v0 = vadd.f32 1.0, %v7528_v2  ;;  %v6280_v2 = vld [vmem:[#allocation13 + $0x20] sm:$0xf] }
 0x5ef   :  { %v2473_v7 = vadd.f32 %v2472_v31, %v2471_v24  ;;  %v6340_v31 = vld [vmem:[#allocation13 + $0x98] sm:$0xf]  ;;  %v6297_v24 = vor.u32 %v7255_v55, %v6296_v21  ;;  %v7249_v55 = vld [vmem:[#allocation13 + $0x20] sm:$0xf0] }
 0x5f0   :  { %v6272_v21 = vld [vmem:[#allocation13 + $0x18] sm:$0xf]  ;;  %vm3018_vm11 = vweird.f32 %v8312_v0 }
 0x5f1   :  { %v2482_v36 = vmul.f32 %v8283_v19, %v2473_v7  ;;  %v7265_v7 = vld [vmem:[#allocation13 + $0xa0] sm:$0xf0]  ;;  %3230 = vmatpush.bf16.msra.mxu3 %v6297_v24  ;;  %v7246_v24 = vld [vmem:[#allocation13 + $0x8] sm:$0xf0] }
 0x5f2   :  { %v6261_v43 = vor.u32 %v7246_v24, %v6260_v17 }
 0x5f3   :  { %v2490_v41 = vadd.f32 %v2489_v9, %v2482_v36  ;;  %v6257_v9 = vmul.f32 -1.442695, %v3028_v29  ;;  %v6341_v36 = vor.u32 %v7265_v7, %v6340_v31  ;;  %v6289_v29 = vor.u32 %v7251_v11, %v6286_v63  ;;  %v7248_v7 = vld [vmem:[#allocation13 + $0x1c] sm:$0xf]  ;;  %v2761_v63 = vpop.f32.mrf.mxu0 }
 0x5f4   :  { %v8306_v14 = vpop.f32.mrf.mxu2  ;;  %v6273_v31 = vor.u32 %v7249_v55, %v6272_v21  ;;  %v6277_v25 = vor.u32 %v7248_v7, %v6274_v23  ;;  %v8341_v11 = vperm.slane %v8294_v22, 2 }
 0x5f5   :  { %v2491_v48 = vpack.c.bf16 %v2490_v41, %v2490_v41  ;;  %7529 = vpow2.f32 %v6257_v9  ;;  %3253 = vmatpush.bf16.msra.mxu1 %v6341_v36  ;;  %3231 = vmatpush.bf16.msra.mxu3 %v6285_v3  ;;  %v7250_v9 = vld [vmem:[#allocation13 + $0x28] sm:$0xf0]  ;;  %v7245_v36 = vld [vmem:[#allocation13 + $0x4] sm:$0xf] }
 0x5f6   :  { %7531 = vrcp.f32 %v8312_v0  ;;  %v6281_v34 = vor.u32 %v7250_v9, %v6280_v2  ;;  %v6265_v5 = vor.u32 %v7245_v36, %v6262_v6 }
 0x5f7   :  { %2493 = vst [vmem:[#allocation3 + $0x1c] sm:$0xf] %v2491_v48 }
 0x5f9   :  { %3254 = vmatpush.bf16.msra.mxu1 %v6329_v35  ;;  %v6268_v35 = vld [vmem:[#allocation13 + $0x8] sm:$0xf]  ;;  %3232 = vmatpush.bf16.msra.mxu3 %v6273_v31 }
 0x5fb   :  { %v7530_v41 = vpop.eup %7529 }
 0x5fc   :  { %v8310_v1 = vpop.f32.mrf.mxu2  ;;  %v8315_v48 = vpop.eup %7531 }
 0x5fd   :  { %3255 = vmatpush.bf16.msra.mxu1 %v6317_v60  ;;  %3233 = vmatpush.bf16.msra.mxu3 %v6261_v43  ;;  %vm3019_vm10 = vweird.f32 %v8315_v48 }
 0x5fe   :  { %v7196_v42 = vld [vmem:[#allocation3 + $0x18] sm:$0xff]  ;;  %vm3020_vm12 = vmor %vm3018_vm11, %vm3019_vm10 }
 0x5ff   :  { %2717 = vmatmul.bf16.gmra.mxu2 %v7196_v42  ;;  %2746 = vmatmul.bf16.gmra.mxu3 %v7196_v42 }
 0x600   :  { %2775 = vmatmul.bf16.gmra.mxu0 %v7196_v42  ;;  %v8319_v42 = vadd.f32 1.0, %v7530_v41  ;;  %v7247_v41 = vld [vmem:[#allocation13 + $0x10] sm:$0xf0] }
 0x601   :  { %v6269_v60 = vor.u32 %v7247_v41, %v6268_v35  ;;  %v2734_v35 = vpop.f32.mrf.mxu3 }
 0x602   :  { %7533 = vrcp.f32 %v8319_v42  ;;  %v3044_v21 = vand.u32 2147483648, %v8319_v42  ;;  %vm3038_vm15 = vweird.f32 %v8319_v42  ;;  %v3042_v22 = vand.u32 2147483647, %v8319_v42 }
 0x604   :  { %v8317_v37 = vpop.f32.mrf.mxu2  ;;  %v3045_v31 = vor.u32 1.1754944e-38, %v3044_v21  ;;  %vm3043_vm1 = vcmp.eq.f32.partialorder %v3042_v22, 8.507059e+37  ;;  %v2735_v21 = vadd.f32 %v2734_v35, %v8304_v57  ;;  %v7288_v22 = vld [vmem:[#allocation13 + $0x98] sm:$0xf0]  ;;  %v7285_v35 = vld [vmem:[#allocation13 + $0x80] sm:$0xf0] }
 0x609   :  { %v8359_v43 = vpop.f32.mrf.mxu3 }
 0x60f   :  { %3003 = vmatmul.bf16.vlgmr.msra.gmra.mxu2 %v7837_v10  ;;  %v6337_v10 = vor.u32 %v7263_v52, %v6334_v33  ;;  %v6304_v52 = vld [vmem:[#allocation13 + $0x50] sm:$0xf]  ;;  %v6301_v33 = vor.u32 %v7254_v28, %v6298_v53 }
 0x610   :  { %v6305_v40 = vor.u32 %v7256_v46, %v6304_v52 }
 0x611   :  { %3240 = vmatpush.bf16.msrb.mxu0 %v6337_v10  ;;  %v3014_v10 = vmul.f32 %v8315_v48, %v8312_v0 }
 0x612   :  { %3256 = vmatpush.bf16.msra.mxu1 %v6305_v40  ;;  %v3022_v40 = vand.u32 2147483647, %v8312_v0 }
 0x614   :  { %vm3023_vm13 = vcmp.eq.f32.partialorder %v3022_v40, 8.507059e+37  ;;  %v6442_v40 = vld [vmem:[#allocation13 + $0xa8] sm:$0xf] }
 0x615   :  { %3241 = vmatpush.bf16.msrb.mxu0 %v6325_v8  ;;  %v3015_v8 = vsub.f32 1.0, %v3014_v10  ;;  %v3024_v10 = vand.u32 2147483648, %v8312_v0 }
 0x616   :  { %3257 = vmatpush.bf16.msra.mxu1 %v6293_v47  ;;  %v2762_v47 = vadd.f32 %v2761_v63, %v8341_v11 }
 0x617   :  { %v3016_v53 = vmul.f32 %v8315_v48, %v3015_v8  ;;  %v3025_v45 = vor.u32 1.1754944e-38, %v3024_v10 }
 0x619   :  { %3242 = vmatpush.bf16.msrb.mxu0 %v6313_v56  ;;  %v7534_v56 = vpop.eup %7533  ;;  %v3017_v46 = vadd.f32 %v8315_v48, %v3016_v53 }
 0x61a   :  { %3258 = vmatpush.bf16.msra.mxu1 %v6281_v34  ;;  %v3034_v28 = vmul.f32 %v7534_v56, %v8319_v42  ;;  %vm3039_vm14 = vweird.f32 %v7534_v56 }
 0x61b   :  { %v3021_v3 = vsel %vm3020_vm12, %v8315_v48, %v3017_v46  ;;  %vm3040_vm0 = vmor %vm3038_vm15, %vm3039_vm14 }
 0x61c   :  { %v3026_v0 = vsel %vm3023_vm13, %v3025_v45, %v3021_v3  ;;  %v7290_v3 = vld [vmem:[#allocation13 + $0xac] sm:$0xf]  ;;  %v6450_v45 = vld [vmem:[#allocation13 + $0xb0] sm:$0xf] }
 0x61d   :  { %3243 = vmatpush.bf16.msrb.mxu0 %v6301_v33  ;;  %v3035_v33 = vsub.f32 1.0, %v3034_v28 }
 0x61e   :  { %3259 = vmatpush.bf16.msra.mxu1 %v6269_v60 }
 0x61f   :  { %v3036_v51 = vmul.f32 %v7534_v56, %v3035_v33 }
 0x621   :  { %3244 = vmatpush.bf16.msrb.mxu0 %v6289_v29  ;;  %v3037_v29 = vadd.f32 %v7534_v56, %v3036_v51  ;;  %v7291_v51 = vld [vmem:[#allocation13 + $0xb0] sm:$0xf0] }
 0x622   :  { %v6443_v63 = vor.u32 %v7291_v51, %v6442_v40  ;;  %v7284_v51 = vld [vmem:[#allocation13 + $0x7c] sm:$0xf] }
 0x623   :  { %v3041_v17 = vsel %vm3040_vm0, %v7534_v56, %v3037_v29  ;;  %v8355_v56 = vpop.f32.mrf.mxu0 }
 0x624   :  { %v3046_v7 = vsel %vm3043_vm1, %v3045_v31, %v3041_v17  ;;  %3482 = vmatpush.bf16.msrb.mxu2 %v6443_v63  ;;  %v6426_v63 = vld [vmem:[#allocation13 + $0x80] sm:$0xf] }
 0x625   :  { %3245 = vmatpush.bf16.msrb.mxu0 %v6277_v25  ;;  %v3055_v23 = vsub.f32 1.0, %v3046_v7  ;;  %v3057_v9 = vmul.f32 0.0, %v3046_v7  ;;  %v6438_v7 = vld [vmem:[#allocation13 + $0x98] sm:$0xf] }
 0x629   :  { %3246 = vmatpush.bf16.msrb.mxu0 %v6265_v5 }
 0x62b   :  { %v8357_v41 = vpop.f32.mrf.mxu0 }
 0x633   :  { %v8361_v5 = vpop.f32.mrf.mxu0 }
 0x682   :  { %v8324_v49 = vpop.f32.mrf.mxu2 }
 0x68a   :  { %v8328_v52 = vpop.f32.mrf.mxu2 }
 0x692   :  { %v3004_v20 = vpop.f32.mrf.mxu2 }
 0x693   :  { %v3051_v8 = vadd.f32 %v8338_v32, %v3004_v20  ;;  %v6444_v20 = vld [vmem:[#allocation13 + $0xb4] sm:$0xf0] }
 0x694   :  { %v6447_v29 = vor.u32 %v7290_v3, %v6444_v20  ;;  %v6420_v3 = vld [vmem:[#allocation13 + $0x84] sm:$0xf0]  ;;  %v2706_v20 = vadd.f32 %v8289_v50, %v8297_v27 }
 0x695   :  { %v3052_v55 = vmul.f32 %v3051_v8, %v3026_v0  ;;  %v7292_v8 = vld [vmem:[#allocation13 + $0xb8] sm:$0xf0] }
 0x696   :  { %v6451_v0 = vor.u32 %v7292_v8, %v6450_v45  ;;  %3495 = vmatpush.bf16.msrb.mxu3 %v6447_v29  ;;  %v6423_v45 = vor.u32 %v7284_v51, %v6420_v3  ;;  %v7286_v8 = vld [vmem:[#allocation13 + $0x88] sm:$0xf0]  ;;  %v6396_v51 = vld [vmem:[#allocation13 + $0x54] sm:$0xf0]  ;;  %v6402_v3 = vld [vmem:[#allocation13 + $0x50] sm:$0xf] }
 0x697   :  { %v3053_v48 = vadd.f32 %v3052_v55, %v2762_v47  ;;  %v6430_v55 = vld [vmem:[#allocation13 + $0x90] sm:$0xf] }
 0x698   :  { %3508 = vmatpush.bf16.msra.mxu0 %v6451_v0  ;;  %v6431_v31 = vor.u32 %v7288_v22, %v6430_v55  ;;  %v6427_v0 = vor.u32 %v7286_v8, %v6426_v63  ;;  %v6406_v55 = vld [vmem:[#allocation13 + $0x60] sm:$0xf]  ;;  %v7282_v22 = vld [vmem:[#allocation13 + $0x68] sm:$0xf0]  ;;  %v6382_v8 = vld [vmem:[#allocation13 + $0x30] sm:$0xf] }
 0x699   :  { %7535 = vtanh.f32 %v3053_v48  ;;  %v7287_v48 = vld [vmem:[#allocation13 + $0x94] sm:$0xf] }
 0x69a   :  { %v3006_v24 = vpop.f32.mrf.mxu2  ;;  %3483 = vmatpush.bf16.msrb.mxu2 %v6431_v31  ;;  %v6407_v31 = vor.u32 %v7282_v22, %v6406_v55  ;;  %v7275_v55 = vld [vmem:[#allocation13 + $0x34] sm:$0xf]  ;;  %v6384_v22 = vld [vmem:[#allocation13 + $0x3c] sm:$0xf0] }
 0x69b   :  { %v6432_v24 = vld [vmem:[#allocation13 + $0x9c] sm:$0xf0] }
 0x69f   :  { %v7536_v25 = vpop.eup %7535 }
 0x6a0   :  { %v3056_v2 = vmul.f32 %v7536_v25, %v3055_v23  ;;  %v7289_v23 = vld [vmem:[#allocation13 + $0xa0] sm:$0xf0] }
 0x6a2   :  { %v3058_v36 = vadd.f32 %v3057_v9, %v3056_v2  ;;  %v6435_v9 = vor.u32 %v7287_v48, %v6432_v24  ;;  %v7281_v48 = vld [vmem:[#allocation13 + $0x64] sm:$0xf]  ;;  %v6408_v24 = vld [vmem:[#allocation13 + $0x6c] sm:$0xf0] }
 0x6a3   :  { %v6411_v50 = vor.u32 %v7281_v48, %v6408_v24  ;;  %v6390_v48 = vld [vmem:[#allocation13 + $0x38] sm:$0xf] }
 0x6a4   :  { %v3059_v34 = vmul.f32 %v3058_v36, %v8058_v44  ;;  %v8363_v44 = vpop.f32.mrf.mxu3  ;;  %v6439_v36 = vor.u32 %v7289_v23, %v6438_v7  ;;  %3496 = vmatpush.bf16.msrb.mxu3 %v6435_v9  ;;  %v6414_v7 = vld [vmem:[#allocation13 + $0x68] sm:$0xf]  ;;  %v7283_v23 = vld [vmem:[#allocation13 + $0x70] sm:$0xf0] }
 0x6a6   :  { %v8351_v6 = vadd.f32 %v3059_v34, %v8062_v58  ;;  %v8365_v58 = vpop.f32.mrf.mxu0  ;;  %3509 = vmatpush.bf16.msra.mxu0 %v6439_v36  ;;  %v6415_v36 = vor.u32 %v7283_v23, %v6414_v7  ;;  %v6387_v7 = vor.u32 %v7275_v55, %v6384_v22  ;;  %v6370_v23 = vld [vmem:[#allocation13 + $0x18] sm:$0xf]  ;;  %v7271_v22 = vld [vmem:[#allocation13 + $0x10] sm:$0xf0] }
 0x6a8   :  { %v3061_v42 = vpack.c.bf16 %v8351_v6, %v8351_v6  ;;  %3497 = vmatpush.bf16.msrb.mxu3 %v6423_v45  ;;  %v7280_v45 = vld [vmem:[#allocation13 + $0x58] sm:$0xf0] }
 0x6aa   :  { %3062 = vst [vmem:[#allocation4] sm:$0xf] %v3061_v42  ;;  %3234 = vmatmul.bf16.vlgmr.msra.gmra.mxu3 %v3061_v42  ;;  %3247 = vmatmul.bf16.vlgmr.msrb.gmra.mxu0 %v3061_v42 }
 0x6ab   :  { %3260 = vmatmul.bf16.vlgmr.msra.gmra.mxu1 %v3061_v42  ;;  %v6418_v42 = vld [vmem:[#allocation13 + $0x78] sm:$0xf]  ;;  %3510 = vmatpush.bf16.msra.mxu0 %v6427_v0 }
 0x6ac   :  { %v8367_v60 = vpop.f32.mrf.mxu3  ;;  %v6419_v40 = vor.u32 %v7285_v35, %v6418_v42  ;;  %v7279_v42 = vld [vmem:[#allocation13 + $0x50] sm:$0xf0]  ;;  %3498 = vmatpush.bf16.msrb.mxu3 %v6411_v50  ;;  %v7272_v50 = vld [vmem:[#allocation13 + $0x1c] sm:$0xf] }
 0x6ae   :  { %v8369_v28 = vpop.f32.mrf.mxu0  ;;  %3484 = vmatpush.bf16.msrb.mxu2 %v6419_v40  ;;  %v7278_v40 = vld [vmem:[#allocation13 + $0x4c] sm:$0xf] }
 0x6af   :  { %3511 = vmatpush.bf16.msra.mxu0 %v6415_v36  ;;  %v6378_v36 = vld [vmem:[#allocation13 + $0x20] sm:$0xf] }
 0x6b2   :  { %3485 = vmatpush.bf16.msrb.mxu2 %v6407_v31 }
 0x6b4   :  { %v8371_v53 = vpop.f32.mrf.mxu3 }
 0x6b6   :  { %v8373_v33 = vpop.f32.mrf.mxu0 }
 0x6bc   :  { %v8375_v46 = vpop.f32.mrf.mxu3 }
 0x6be   :  { %v8377_v10 = vpop.f32.mrf.mxu0 }
 0x6c4   :  { %v8379_v47 = vpop.f32.mrf.mxu3 }
 0x727   :  { %v3248_v17 = vpop.f32.mrf.mxu0 }
 0x728   :  { %v3285_v25 = vadd.f32 %v3248_v17, %v2735_v21  ;;  %v8382_v2 = vpop.f32.mrf.mxu1 }
 0x72a   :  { %v6355_v34 = vmul.f32 -1.442695, %v3285_v25 }
 0x72c   :  { %7537 = vpow2.f32 %v6355_v34  ;;  %v6394_v34 = vld [vmem:[#allocation13 + $0x48] sm:$0xf] }
 0x72d   :  { %v3235_v29 = vpop.f32.mrf.mxu3  ;;  %v6395_v35 = vor.u32 %v7279_v42, %v6394_v34  ;;  %v6372_v34 = vld [vmem:[#allocation13 + $0x24] sm:$0xf0] }
 0x72e   :  { %v3265_v21 = vadd.f32 %v3235_v29, %v2706_v20  ;;  %v6399_v20 = vor.u32 %v7278_v40, %v6396_v51  ;;  %v7276_v29 = vld [vmem:[#allocation13 + $0x38] sm:$0xf0]  ;;  %v7274_v40 = vld [vmem:[#allocation13 + $0x28] sm:$0xf0] }
 0x72f   :  { %v3250_v17 = vpop.f32.mrf.mxu0  ;;  %3486 = vmatpush.bf16.msrb.mxu2 %v6395_v35  ;;  %v6383_v24 = vor.u32 %v7276_v29, %v6382_v8  ;;  %v6358_v35 = vld [vmem:[#allocation13] sm:$0xf]  ;;  %v7269_v8 = vld [vmem:[#allocation13 + $0x4] sm:$0xf]  ;;  %v6360_v29 = vld [vmem:[#allocation13 + $0xc] sm:$0xf0] }
 0x730   :  { %v6354_v25 = vmul.f32 -1.442695, %v3265_v21  ;;  %v3263_v9 = vpop.f32.mrf.mxu1  ;;  %v6403_v21 = vor.u32 %v7280_v45, %v6402_v3  ;;  %v7277_v17 = vld [vmem:[#allocation13 + $0x40] sm:$0xf0]  ;;  %3499 = vmatpush.bf16.msrb.mxu3 %v6399_v20  ;;  %v7270_v45 = vld [vmem:[#allocation13 + $0x8] sm:$0xf0]  ;;  %v6379_v20 = vor.u32 %v7274_v40, %v6378_v36 }
 0x731   :  { %v6391_v9 = vor.u32 %v7277_v17, %v6390_v48  ;;  %v6359_v48 = vor.u32 %v7270_v45, %v6358_v35  ;;  %v6363_v17 = vor.u32 %v7269_v8, %v6360_v29  ;;  %v2764_v8 = vadd.f32 %v8355_v56, %v8341_v11 }
 0x732   :  { %v7538_v63 = vpop.eup %7537  ;;  %7539 = vpow2.f32 %v6354_v25  ;;  %v7273_v25 = vld [vmem:[#allocation13 + $0x20] sm:$0xf0]  ;;  %3512 = vmatpush.bf16.msra.mxu0 %v6403_v21  ;;  %v6366_v21 = vld [vmem:[#allocation13 + $0x8] sm:$0xf] }
 0x733   :  { %v8386_v0 = vadd.f32 1.0, %v7538_v63  ;;  %3487 = vmatpush.bf16.msrb.mxu2 %v6383_v24  ;;  %v6371_v3 = vor.u32 %v7273_v25, %v6370_v23  ;;  %v6375_v63 = vor.u32 %v7272_v50, %v6372_v34  ;;  %v6367_v24 = vor.u32 %v7271_v22, %v6366_v21 }
 0x734   :  { %3500 = vmatpush.bf16.msrb.mxu3 %v6387_v7 }
 0x735   :  { %v3237_v31 = vpop.f32.mrf.mxu3  ;;  %7541 = vrcp.f32 %v8386_v0  ;;  %v3301_v29 = vand.u32 2147483648, %v8386_v0  ;;  %vm3295_vm7 = vweird.f32 %v8386_v0 }
 0x736   :  { %3513 = vmatpush.bf16.msra.mxu0 %v6391_v9 }
 0x737   :  { %3488 = vmatpush.bf16.msrb.mxu2 %v6371_v3 }
 0x738   :  { %v7540_v42 = vpop.eup %7539  ;;  %3501 = vmatpush.bf16.msrb.mxu3 %v6375_v63  ;;  %v3305_v63 = vadd.f32 %v8338_v32, %v8382_v2 }
 0x739   :  { %v3269_v51 = vadd.f32 1.0, %v7540_v42 }
 0x73a   :  { %3514 = vmatpush.bf16.msra.mxu0 %v6379_v20 }
 0x73b   :  { %7543 = vrcp.f32 %v3269_v51  ;;  %v7542_v55 = vpop.eup %7541  ;;  %3489 = vmatpush.bf16.msrb.mxu2 %v6359_v48  ;;  %v3281_v50 = vand.u32 2147483648, %v3269_v51  ;;  %v3279_v42 = vand.u32 2147483647, %v3269_v51  ;;  %vm3275_vm3 = vweird.f32 %v3269_v51 }
 0x73c   :  { %v3291_v31 = vmul.f32 %v7542_v55, %v8386_v0  ;;  %3502 = vmatpush.bf16.msrb.mxu3 %v6363_v17  ;;  %vm3296_vm6 = vweird.f32 %v7542_v55  ;;  %v3302_v17 = vor.u32 1.1754944e-38, %v3301_v29  ;;  %v6536_v29 = vld [vmem:[#allocation13 + $0x98] sm:$0xf] }
 0x73d   :  { %v3282_v3 = vor.u32 1.1754944e-38, %v3281_v50  ;;  %vm3280_vm5 = vcmp.eq.f32.partialorder %v3279_v42, 8.507059e+37  ;;  %vm3297_vm8 = vmor %vm3295_vm7, %vm3296_vm6  ;;  %v7314_v42 = vld [vmem:[#allocation13 + $0xac] sm:$0xf] }
 0x73e   :  { %v3292_v25 = vsub.f32 1.0, %v3291_v31  ;;  %3515 = vmatpush.bf16.msra.mxu0 %v6367_v24 }
 0x740   :  { %v3293_v36 = vmul.f32 %v7542_v55, %v3292_v25  ;;  %v3314_v25 = vmul.f32 %v8351_v6, %v8097_v13 }
 0x741   :  { %v7544_v7 = vpop.eup %7543 }
 0x742   :  { %v3271_v23 = vmul.f32 %v7544_v7, %v3269_v51  ;;  %vm3276_vm2 = vweird.f32 %v7544_v7  ;;  %v3294_v45 = vadd.f32 %v7542_v55, %v3293_v36  ;;  %v3299_v51 = vand.u32 2147483647, %v8386_v0 }
 0x743   :  { %vm3277_vm4 = vmor %vm3275_vm3, %vm3276_vm2 }
 0x744   :  { %v3272_v9 = vsub.f32 1.0, %v3271_v23  ;;  %v3298_v48 = vsel %vm3297_vm8, %v7542_v55, %v3294_v45  ;;  %vm3300_vm9 = vcmp.eq.f32.partialorder %v3299_v51, 8.507059e+37  ;;  %v6540_v55 = vld [vmem:[#allocation13 + $0xa8] sm:$0xf]  ;;  %v7311_v45 = vld [vmem:[#allocation13 + $0x94] sm:$0xf] }
 0x745   :  { %v3303_v2 = vsel %vm3300_vm9, %v3302_v17, %v3298_v48  ;;  %v6516_v17 = vld [vmem:[#allocation13 + $0x78] sm:$0xf] }
 0x746   :  { %v3273_v34 = vmul.f32 %v7544_v7, %v3272_v9  ;;  %v3309_v31 = vsub.f32 1.0, %v3303_v2 }
 0x748   :  { %v3274_v40 = vadd.f32 %v7544_v7, %v3273_v34  ;;  %v7315_v34 = vld [vmem:[#allocation13 + $0xb0] sm:$0xf0] }
 0x749   :  { %v6541_v36 = vor.u32 %v7315_v34, %v6540_v55 }
 0x74a   :  { %v3278_v35 = vsel %vm3277_vm4, %v7544_v7, %v3274_v40  ;;  %v3311_v7 = vmul.f32 %v3303_v2, %v8351_v6  ;;  %v6542_v40 = vld [vmem:[#allocation13 + $0xb4] sm:$0xf0]  ;;  %v7312_v6 = vld [vmem:[#allocation13 + $0x98] sm:$0xf0]  ;;  %v7309_v2 = vld [vmem:[#allocation13 + $0x80] sm:$0xf0] }
 0x74b   :  { %v3283_v20 = vsel %vm3280_vm5, %v3282_v3, %v3278_v35  ;;  %v6548_v3 = vld [vmem:[#allocation13 + $0xb0] sm:$0xf]  ;;  %v6545_v35 = vor.u32 %v7314_v42, %v6542_v40  ;;  %3738 = vmatpush.bf16.msrb.mxu1 %v6541_v36 }
 0x74c   :  { %v3306_v21 = vmul.f32 %v3305_v63, %v3283_v20  ;;  %v7316_v63 = vld [vmem:[#allocation13 + $0xb8] sm:$0xf0] }
 0x74d   :  { %v6549_v13 = vor.u32 %v7316_v63, %v6548_v3  ;;  %3751 = vmatpush.bf16.msra.mxu2 %v6545_v35  ;;  %v6504_v3 = vld [vmem:[#allocation13 + $0x60] sm:$0xf]  ;;  %v7306_v63 = vld [vmem:[#allocation13 + $0x68] sm:$0xf0]  ;;  %v7305_v35 = vld [vmem:[#allocation13 + $0x64] sm:$0xf] }
 0x74e   :  { %v3307_v22 = vadd.f32 %v3306_v21, %v2764_v8  ;;  %v6530_v8 = vld [vmem:[#allocation13 + $0x9c] sm:$0xf0]  ;;  %v7313_v21 = vld [vmem:[#allocation13 + $0xa0] sm:$0xf0] }
 0x74f   :  { %3764 = vmatpush.bf16.msra.mxu3 %v6549_v13  ;;  %v6537_v48 = vor.u32 %v7313_v21, %v6536_v29  ;;  %v6505_v13 = vor.u32 %v7306_v63, %v6504_v3  ;;  %v6492_v21 = vld [vmem:[#allocation13 + $0x48] sm:$0xf] }
 0x750   :  { %7545 = vtanh.f32 %v3307_v22  ;;  %v6533_v22 = vor.u32 %v7311_v45, %v6530_v8  ;;  %v7307_v45 = vld [vmem:[#allocation13 + $0x70] sm:$0xf0] }
 0x752   :  { %3752 = vmatpush.bf16.msra.mxu2 %v6533_v22  ;;  %v7303_v22 = vld [vmem:[#allocation13 + $0x50] sm:$0xf0] }
 0x753   :  { %3765 = vmatpush.bf16.msra.mxu3 %v6537_v48  ;;  %v7302_v48 = vld [vmem:[#allocation13 + $0x4c] sm:$0xf] }
 0x756   :  { %v7546_v24 = vpop.eup %7545 }
 0x757   :  { %v3310_v23 = vmul.f32 %v7546_v24, %v3309_v31  ;;  %v7308_v31 = vld [vmem:[#allocation13 + $0x7c] sm:$0xf]  ;;  %v6517_v24 = vor.u32 %v7309_v2, %v6516_v17  ;;  %v6493_v17 = vor.u32 %v7303_v22, %v6492_v21  ;;  %v6494_v2 = vld [vmem:[#allocation13 + $0x54] sm:$0xf0]  ;;  %v7298_v22 = vld [vmem:[#allocation13 + $0x28] sm:$0xf0] }
 0x759   :  { %v3312_v56 = vadd.f32 %v3311_v7, %v3310_v23  ;;  %v6518_v7 = vld [vmem:[#allocation13 + $0x84] sm:$0xf0]  ;;  %v6524_v23 = vld [vmem:[#allocation13 + $0x80] sm:$0xf] }
 0x75b   :  { %v3313_v9 = vmul.f32 %v3312_v56, %v8094_v54  ;;  %v6528_v54 = vld [vmem:[#allocation13 + $0x90] sm:$0xf]  ;;  %v7310_v56 = vld [vmem:[#allocation13 + $0x88] sm:$0xf0] }
 0x75c   :  { %v6529_v20 = vor.u32 %v7312_v6, %v6528_v54  ;;  %v6525_v55 = vor.u32 %v7310_v56, %v6524_v23  ;;  %v6506_v54 = vld [vmem:[#allocation13 + $0x6c] sm:$0xf0]  ;;  %v6512_v6 = vld [vmem:[#allocation13 + $0x68] sm:$0xf] }
 0x75d   :  { %v8401_v50 = vadd.f32 %v3314_v25, %v3313_v9  ;;  %v2709_v25 = vadd.f32 %v8299_v4, %v8297_v27  ;;  %v2738_v9 = vadd.f32 %v8359_v43, %v8304_v57  ;;  %v6509_v43 = vor.u32 %v7305_v35, %v6506_v54  ;;  %v7297_v54 = vld [vmem:[#allocation13 + $0x20] sm:$0xf0] }
 0x75e   :  { %3739 = vmatpush.bf16.msrb.mxu1 %v6529_v20  ;;  %3766 = vmatpush.bf16.msra.mxu3 %v6525_v55  ;;  %v6513_v29 = vor.u32 %v7307_v45, %v6512_v6  ;;  %v7299_v55 = vld [vmem:[#allocation13 + $0x34] sm:$0xf]  ;;  %v7296_v6 = vld [vmem:[#allocation13 + $0x1c] sm:$0xf] }
 0x75f   :  { %v3316_v0 = vpack.c.bf16 %v8401_v50, %v8401_v50 }
 0x761   :  { %3318 = vst [vmem:[#allocation4 + $0x4] sm:$0xf] %v3316_v0  ;;  %3490 = vmatmul.bf16.vlgmr.msrb.gmra.mxu2 %v3316_v0  ;;  %3503 = vmatmul.bf16.vlgmr.msrb.gmra.mxu3 %v3316_v0 }
 0x762   :  { %3516 = vmatmul.bf16.vlgmr.msra.gmra.mxu0 %v3316_v0  ;;  %v6521_v0 = vor.u32 %v7308_v31, %v6518_v7  ;;  %3740 = vmatpush.bf16.msrb.mxu1 %v6517_v24  ;;  %v6500_v31 = vld [vmem:[#allocation13 + $0x50] sm:$0xf]  ;;  %v7304_v24 = vld [vmem:[#allocation13 + $0x58] sm:$0xf0]  ;;  %v6497_v7 = vor.u32 %v7302_v48, %v6494_v2  ;;  %v6456_v48 = vld [vmem:[#allocation13] sm:$0xf] }
 0x763   :  { %3767 = vmatpush.bf16.msra.mxu3 %v6513_v29  ;;  %v6501_v23 = vor.u32 %v7304_v24, %v6500_v31  ;;  %v7293_v2 = vld [vmem:[#allocation13 + $0x4] sm:$0xf] }
 0x764   :  { %3753 = vmatpush.bf16.msra.mxu2 %v6521_v0  ;;  %v7300_v0 = vld [vmem:[#allocation13 + $0x38] sm:$0xf0] }
 0x766   :  { %3741 = vmatpush.bf16.msrb.mxu1 %v6505_v13  ;;  %v6468_v13 = vld [vmem:[#allocation13 + $0x18] sm:$0xf] }
 0x767   :  { %3768 = vmatpush.bf16.msra.mxu3 %v6501_v23  ;;  %v6464_v23 = vld [vmem:[#allocation13 + $0x8] sm:$0xf] }
 0x768   :  { %3754 = vmatpush.bf16.msra.mxu2 %v6509_v43  ;;  %v6476_v43 = vld [vmem:[#allocation13 + $0x20] sm:$0xf] }
 0x769   :  { %v6477_v31 = vor.u32 %v7298_v22, %v6476_v43 }
 0x76a   :  { %3742 = vmatpush.bf16.msrb.mxu1 %v6493_v17  ;;  %v7294_v17 = vld [vmem:[#allocation13 + $0x8] sm:$0xf0] }
 0x76b   :  { %v6457_v24 = vor.u32 %v7294_v17, %v6456_v48 }
 0x76c   :  { %3755 = vmatpush.bf16.msra.mxu2 %v6497_v7  ;;  %v6458_v7 = vld [vmem:[#allocation13 + $0xc] sm:$0xf0] }
 0x7df   :  { %v8405_v51 = vpop.f32.mrf.mxu0 }
 0x7e4   :  { %v3491_v34 = vpop.f32.mrf.mxu2  ;;  %v3504_v42 = vpop.f32.mrf.mxu3 }
 0x7e5   :  { %v3521_v36 = vadd.f32 %v3491_v34, %v2709_v25  ;;  %v3541_v40 = vadd.f32 %v3504_v42, %v2738_v9  ;;  %v6480_v9 = vld [vmem:[#allocation13 + $0x30] sm:$0xf]  ;;  %v6482_v42 = vld [vmem:[#allocation13 + $0x3c] sm:$0xf0] }
 0x7e6   :  { %v6481_v34 = vor.u32 %v7300_v0, %v6480_v9  ;;  %v6485_v63 = vor.u32 %v7299_v55, %v6482_v42 }
 0x7e7   :  { %v6452_v4 = vmul.f32 -1.442695, %v3521_v36  ;;  %v6453_v20 = vmul.f32 -1.442695, %v3541_v40  ;;  %v3519_v8 = vpop.f32.mrf.mxu0  ;;  %v6488_v36 = vld [vmem:[#allocation13 + $0x38] sm:$0xf] }
 0x7e8   :  { %v7301_v40 = vld [vmem:[#allocation13 + $0x40] sm:$0xf0]  ;;  %3743 = vmatpush.bf16.msrb.mxu1 %v6481_v34  ;;  %v6470_v8 = vld [vmem:[#allocation13 + $0x24] sm:$0xf0]  ;;  %3756 = vmatpush.bf16.msra.mxu2 %v6485_v63 }
 0x7e9   :  { %7547 = vpow2.f32 %v6452_v4  ;;  %v6489_v35 = vor.u32 %v7301_v40, %v6488_v36  ;;  %v6473_v21 = vor.u32 %v7296_v6, %v6470_v8 }
 0x7ea   :  { %7549 = vpow2.f32 %v6453_v20  ;;  %v6469_v20 = vor.u32 %v7297_v54, %v6468_v13 }
 0x7eb   :  { %3769 = vmatpush.bf16.msra.mxu3 %v6489_v35 }
 0x7ec   :  { %v3493_v56 = vpop.f32.mrf.mxu2  ;;  %v3506_v25 = vpop.f32.mrf.mxu3  ;;  %3744 = vmatpush.bf16.msrb.mxu1 %v6469_v20  ;;  %3757 = vmatpush.bf16.msra.mxu2 %v6473_v21  ;;  %v2767_v21 = vadd.f32 %v8357_v41, %v8341_v11  ;;  %v3570_v41 = vmul.f32 %v8401_v50, %v8119_v30  ;;  %v6626_v30 = vld [vmem:[#allocation13 + $0x90] sm:$0xf] }
 0x7ed   :  { %v6461_v56 = vor.u32 %v7293_v2, %v6458_v7  ;;  %v7295_v25 = vld [vmem:[#allocation13 + $0x10] sm:$0xf0] }
 0x7ee   :  { %v6465_v9 = vor.u32 %v7295_v25, %v6464_v23 }
 0x7ef   :  { %v7548_v3 = vpop.eup %7547  ;;  %3770 = vmatpush.bf16.msra.mxu3 %v6477_v31 }
 0x7f0   :  { %v7550_v45 = vpop.eup %7549  ;;  %v3525_v4 = vadd.f32 1.0, %v7548_v3  ;;  %3745 = vmatpush.bf16.msrb.mxu1 %v6457_v24  ;;  %3758 = vmatpush.bf16.msra.mxu2 %v6461_v56 }
 0x7f1   :  { %v3545_v29 = vadd.f32 1.0, %v7550_v45  ;;  %v3561_v45 = vadd.f32 %v8338_v32, %v8405_v51 }
 0x7f2   :  { %7551 = vrcp.f32 %v3525_v4  ;;  %v3537_v40 = vand.u32 2147483648, %v3525_v4  ;;  %v3535_v35 = vand.u32 2147483647, %v3525_v4  ;;  %vm3531_vm11 = vweird.f32 %v3525_v4 }
 0x7f3   :  { %7553 = vrcp.f32 %v3545_v29  ;;  %3771 = vmatpush.bf16.msra.mxu3 %v6465_v9  ;;  %v3557_v48 = vand.u32 2147483648, %v3545_v29  ;;  %vm3551_vm15 = vweird.f32 %v3545_v29  ;;  %v3555_v17 = vand.u32 2147483647, %v3545_v29 }
 0x7f4   :  { %v3538_v6 = vor.u32 1.1754944e-38, %v3537_v40  ;;  %vm3536_vm13 = vcmp.eq.f32.partialorder %v3535_v35, 8.507059e+37  ;;  %v6640_v40 = vld [vmem:[#allocation13 + $0xb4] sm:$0xf0] }
 0x7f5   :  { %v3558_v31 = vor.u32 1.1754944e-38, %v3557_v48  ;;  %vm3556_vm1 = vcmp.eq.f32.partialorder %v3555_v17, 8.507059e+37  ;;  %v7332_v48 = vld [vmem:[#allocation13 + $0x7c] sm:$0xf] }
 0x7f8   :  { %v7552_v0 = vpop.eup %7551 }
 0x7f9   :  { %v7554_v55 = vpop.eup %7553  ;;  %v3527_v34 = vmul.f32 %v7552_v0, %v3525_v4  ;;  %vm3532_vm10 = vweird.f32 %v7552_v0 }
 0x7fa   :  { %v3547_v42 = vmul.f32 %v7554_v55, %v3545_v29  ;;  %vm3533_vm12 = vmor %vm3531_vm11, %vm3532_vm10  ;;  %vm3552_vm14 = vweird.f32 %v7554_v55 }
 0x7fb   :  { %v3528_v36 = vsub.f32 1.0, %v3527_v34  ;;  %vm3553_vm0 = vmor %vm3551_vm15, %vm3552_vm14  ;;  %v7339_v34 = vld [vmem:[#allocation13 + $0xb0] sm:$0xf0] }
 0x7fc   :  { %v3548_v3 = vsub.f32 1.0, %v3547_v42  ;;  %v7338_v42 = vld [vmem:[#allocation13 + $0xac] sm:$0xf] }
 0x7fd   :  { %v3529_v63 = vmul.f32 %v7552_v0, %v3528_v36 }
 0x7fe   :  { %v3549_v13 = vmul.f32 %v7554_v55, %v3548_v3  ;;  %v6646_v3 = vld [vmem:[#allocation13 + $0xb0] sm:$0xf] }
 0x7ff   :  { %v3530_v54 = vadd.f32 %v7552_v0, %v3529_v63  ;;  %v7340_v63 = vld [vmem:[#allocation13 + $0xb8] sm:$0xf0] }
 0x800   :  { %v3550_v43 = vadd.f32 %v7554_v55, %v3549_v13  ;;  %v6647_v35 = vor.u32 %v7340_v63, %v6646_v3  ;;  %v7335_v13 = vld [vmem:[#allocation13 + $0x94] sm:$0xf]  ;;  %v6590_v63 = vld [vmem:[#allocation13 + $0x48] sm:$0xf] }
 0x801   :  { %v3534_v20 = vsel %vm3533_vm12, %v7552_v0, %v3530_v54 }
 0x802   :  { %v3539_v8 = vsel %vm3536_vm13, %v3538_v6, %v3534_v20  ;;  %v3554_v4 = vsel %vm3553_vm0, %v7554_v55, %v3550_v43  ;;  %v6638_v55 = vld [vmem:[#allocation13 + $0xa8] sm:$0xf]  ;;  %4020 = vmatpush.bf16.msrb.mxu2 %v6647_v35  ;;  %v6628_v6 = vld [vmem:[#allocation13 + $0x9c] sm:$0xf0]  ;;  %v7337_v20 = vld [vmem:[#allocation13 + $0xa0] sm:$0xf0] }
 0x803   :  { %v3562_v22 = vmul.f32 %v3561_v45, %v3539_v8  ;;  %v3559_v24 = vsel %vm3556_vm1, %v3558_v31, %v3554_v4  ;;  %v6639_v36 = vor.u32 %v7339_v34, %v6638_v55  ;;  %v6634_v45 = vld [vmem:[#allocation13 + $0x98] sm:$0xf]  ;;  %v6631_v8 = vor.u32 %v7335_v13, %v6628_v6  ;;  %v6622_v4 = vld [vmem:[#allocation13 + $0x80] sm:$0xf]  ;;  %v7334_v31 = vld [vmem:[#allocation13 + $0x88] sm:$0xf0] }
 0x804   :  { %v3565_v51 = vsub.f32 1.0, %v3559_v24  ;;  %v3567_v56 = vmul.f32 %v3559_v24, %v8401_v50  ;;  %v7336_v50 = vld [vmem:[#allocation13 + $0x98] sm:$0xf0]  ;;  %v6635_v43 = vor.u32 %v7337_v20, %v6634_v45  ;;  %v2711_v24 = vadd.f32 %v8306_v14, %v8297_v27  ;;  %v6604_v55 = vld [vmem:[#allocation13 + $0x6c] sm:$0xf0] }
 0x805   :  { %v3563_v2 = vadd.f32 %v3562_v22, %v2767_v21  ;;  %3994 = vmatpush.bf16.msrb.mxu0 %v6639_v36  ;;  %v6627_v54 = vor.u32 %v7336_v50, %v6626_v30  ;;  %v6614_v21 = vld [vmem:[#allocation13 + $0x78] sm:$0xf]  ;;  %v7333_v22 = vld [vmem:[#allocation13 + $0x80] sm:$0xf0]  ;;  %v6610_v34 = vld [vmem:[#allocation13 + $0x68] sm:$0xf]  ;;  %v2740_v14 = vadd.f32 %v8363_v44, %v8304_v57 }
 0x806   :  { %4021 = vmatpush.bf16.msrb.mxu2 %v6635_v43  ;;  %v6615_v17 = vor.u32 %v7333_v22, %v6614_v21  ;;  %v7326_v35 = vld [vmem:[#allocation13 + $0x4c] sm:$0xf]  ;;  %v6592_v13 = vld [vmem:[#allocation13 + $0x54] sm:$0xf0]  ;;  %v7328_v6 = vld [vmem:[#allocation13 + $0x58] sm:$0xf0] }
 0x807   :  { %7555 = vtanh.f32 %v3563_v2  ;;  %v6616_v2 = vld [vmem:[#allocation13 + $0x84] sm:$0xf0]  ;;  %v6578_v44 = vld [vmem:[#allocation13 + $0x30] sm:$0xf] }
 0x809   :  { %3995 = vmatpush.bf16.msrb.mxu0 %v6627_v54  ;;  %v6598_v54 = vld [vmem:[#allocation13 + $0x50] sm:$0xf] }
 0x80a   :  { %v6599_v43 = vor.u32 %v7328_v6, %v6598_v54  ;;  %v6562_v54 = vld [vmem:[#allocation13 + $0x8] sm:$0xf]  ;;  %v7319_v6 = vld [vmem:[#allocation13 + $0x10] sm:$0xf0] }
 0x80d   :  { %v7556_v7 = vpop.eup %7555  ;;  %3996 = vmatpush.bf16.msrb.mxu0 %v6615_v17 }
 0x80e   :  { %v3566_v23 = vmul.f32 %v7556_v7, %v3565_v51  ;;  %v6619_v51 = vor.u32 %v7332_v48, %v6616_v2  ;;  %v6623_v7 = vor.u32 %v7334_v31, %v6622_v4  ;;  %v7324_v48 = vld [vmem:[#allocation13 + $0x38] sm:$0xf0]  ;;  %v7323_v2 = vld [vmem:[#allocation13 + $0x34] sm:$0xf]  ;;  %v6580_v4 = vld [vmem:[#allocation13 + $0x3c] sm:$0xf0] }
 0x80f   :  { %v6579_v17 = vor.u32 %v7324_v48, %v6578_v44  ;;  %v6586_v31 = vld [vmem:[#allocation13 + $0x38] sm:$0xf] }
 0x810   :  { %v3568_v25 = vadd.f32 %v3567_v56, %v3566_v23  ;;  %4022 = vmatpush.bf16.msrb.mxu2 %v6623_v7  ;;  %v7325_v7 = vld [vmem:[#allocation13 + $0x40] sm:$0xf0] }
 0x812   :  { %v3569_v9 = vmul.f32 %v3568_v25, %v8115_v18  ;;  %v6643_v18 = vor.u32 %v7338_v42, %v6640_v40  ;;  %v6602_v25 = vld [vmem:[#allocation13 + $0x60] sm:$0xf]  ;;  %v7331_v42 = vld [vmem:[#allocation13 + $0x70] sm:$0xf0] }
 0x813   :  { %v6611_v3 = vor.u32 %v7331_v42, %v6610_v34 }
 0x814   :  { %v8419_v0 = vadd.f32 %v3570_v41, %v3569_v9  ;;  %4007 = vmatpush.bf16.msra.mxu1 %v6643_v18  ;;  %v7330_v9 = vld [vmem:[#allocation13 + $0x68] sm:$0xf0]  ;;  %v7329_v41 = vld [vmem:[#allocation13 + $0x64] sm:$0xf]  ;;  %v7327_v18 = vld [vmem:[#allocation13 + $0x50] sm:$0xf0] }
 0x815   :  { %v6607_v40 = vor.u32 %v7329_v41, %v6604_v55  ;;  %4023 = vmatpush.bf16.msrb.mxu2 %v6611_v3  ;;  %v6591_v50 = vor.u32 %v7327_v18, %v6590_v63  ;;  %v7320_v41 = vld [vmem:[#allocation13 + $0x1c] sm:$0xf]  ;;  %v6568_v55 = vld [vmem:[#allocation13 + $0x24] sm:$0xf0]  ;;  %v7322_v3 = vld [vmem:[#allocation13 + $0x28] sm:$0xf0] }
 0x816   :  { %v3572_v29 = vpack.c.bf16 %v8419_v0, %v8419_v0  ;;  %v7318_v18 = vld [vmem:[#allocation13 + $0x8] sm:$0xf0] }
 0x818   :  { %3574 = vst [vmem:[#allocation4 + $0x8] sm:$0xf] %v3572_v29  ;;  %3746 = vmatmul.bf16.vlgmr.msrb.gmra.mxu1 %v3572_v29  ;;  %3759 = vmatmul.bf16.vlgmr.msra.gmra.mxu2 %v3572_v29 }
 0x819   :  { %3772 = vmatmul.bf16.vlgmr.msra.gmra.mxu3 %v3572_v29  ;;  %4008 = vmatpush.bf16.msra.mxu1 %v6631_v8  ;;  %v6603_v29 = vor.u32 %v7330_v9, %v6602_v25  ;;  %v6595_v8 = vor.u32 %v7326_v35, %v6592_v13  ;;  %v6566_v25 = vld [vmem:[#allocation13 + $0x18] sm:$0xf]  ;;  %v7321_v9 = vld [vmem:[#allocation13 + $0x20] sm:$0xf0]  ;;  %v6556_v13 = vld [vmem:[#allocation13 + $0xc] sm:$0xf0] }
 0x81a   :  { %4024 = vmatpush.bf16.msrb.mxu2 %v6599_v43  ;;  %v6567_v42 = vor.u32 %v7321_v9, %v6566_v25  ;;  %v7317_v35 = vld [vmem:[#allocation13 + $0x4] sm:$0xf]  ;;  %v6563_v43 = vor.u32 %v7319_v6, %v6562_v54  ;;  %v2769_v9 = vadd.f32 %v8361_v5, %v8341_v11  ;;  %v6736_v54 = vld [vmem:[#allocation13 + $0xa8] sm:$0xf]  ;;  %v7363_v6 = vld [vmem:[#allocation13 + $0xb0] sm:$0xf0] }
 0x81b   :  { %3997 = vmatpush.bf16.msrb.mxu0 %v6603_v29 }
 0x81d   :  { %4009 = vmatpush.bf16.msra.mxu1 %v6619_v51  ;;  %v6583_v51 = vor.u32 %v7323_v2, %v6580_v4 }
 0x81f   :  { %3998 = vmatpush.bf16.msrb.mxu0 %v6591_v50 }
 0x821   :  { %4010 = vmatpush.bf16.msra.mxu1 %v6607_v40  ;;  %v6574_v40 = vld [vmem:[#allocation13 + $0x20] sm:$0xf] }
 0x822   :  { %v6575_v63 = vor.u32 %v7322_v3, %v6574_v40 }
 0x823   :  { %3999 = vmatpush.bf16.msrb.mxu0 %v6579_v17 }
 0x825   :  { %4011 = vmatpush.bf16.msra.mxu1 %v6595_v8  ;;  %v6559_v8 = vor.u32 %v7317_v35, %v6556_v13 }
 0x827   :  { %4000 = vmatpush.bf16.msrb.mxu0 %v6567_v42 }
 0x829   :  { %4012 = vmatpush.bf16.msra.mxu1 %v6583_v51 }
 0x895   :  { %v3747_v23 = vpop.f32.mrf.mxu1 }
 0x896   :  { %v3777_v56 = vadd.f32 %v3747_v23, %v2711_v24 }
 0x898   :  { %v6550_v36 = vmul.f32 -1.442695, %v3777_v56  ;;  %v6587_v56 = vor.u32 %v7325_v7, %v6586_v31 }
 0x89a   :  { %7557 = vpow2.f32 %v6550_v36  ;;  %4025 = vmatpush.bf16.msrb.mxu2 %v6587_v56  ;;  %v6571_v36 = vor.u32 %v7320_v41, %v6568_v55 }
 0x89b   :  { %v3760_v30 = vpop.f32.mrf.mxu2 }
 0x89c   :  { %v3797_v45 = vadd.f32 %v3760_v30, %v2740_v14  ;;  %v8427_v20 = vpop.f32.mrf.mxu3  ;;  %v6554_v14 = vld [vmem:[#allocation13] sm:$0xf]  ;;  %4013 = vmatpush.bf16.msra.mxu1 %v6571_v36 }
 0x89d   :  { %v3749_v21 = vpop.f32.mrf.mxu1  ;;  %v6555_v50 = vor.u32 %v7318_v18, %v6554_v14  ;;  %v3817_v25 = vadd.f32 %v8338_v32, %v8427_v20 }
 0x89e   :  { %v6551_v22 = vmul.f32 -1.442695, %v3797_v45  ;;  %4026 = vmatpush.bf16.msrb.mxu2 %v6575_v63 }
 0x89f   :  { %4001 = vmatpush.bf16.msrb.mxu0 %v6555_v50 }
 0x8a0   :  { %v7558_v24 = vpop.eup %7557  ;;  %7559 = vpow2.f32 %v6551_v22  ;;  %4014 = vmatpush.bf16.msra.mxu1 %v6559_v8  ;;  %v6737_v8 = vor.u32 %v7363_v6, %v6736_v54 }
 0x8a1   :  { %v3781_v23 = vadd.f32 1.0, %v7558_v24 }
 0x8a2   :  { %4027 = vmatpush.bf16.msrb.mxu2 %v6563_v43  ;;  %v6738_v43 = vld [vmem:[#allocation13 + $0xb4] sm:$0xf0]  ;;  %4250 = vmatpush.bf16.msrb.mxu3 %v6737_v8  ;;  %v7351_v8 = vld [vmem:[#allocation13 + $0x50] sm:$0xf0] }
 0x8a3   :  { %7561 = vrcp.f32 %v3781_v23  ;;  %v3762_v29 = vpop.f32.mrf.mxu2  ;;  %v3793_v48 = vand.u32 2147483648, %v3781_v23  ;;  %v3791_v2 = vand.u32 2147483647, %v3781_v23  ;;  %vm3787_vm3 = vweird.f32 %v3781_v23 }
 0x8a4   :  { %v3775_v34 = vpop.f32.mrf.mxu3 }
 0x8a5   :  { %v3794_v51 = vor.u32 1.1754944e-38, %v3793_v48  ;;  %vm3792_vm5 = vcmp.eq.f32.partialorder %v3791_v2, 8.507059e+37  ;;  %v7359_v48 = vld [vmem:[#allocation13 + $0x94] sm:$0xf]  ;;  %v6726_v2 = vld [vmem:[#allocation13 + $0x9c] sm:$0xf0] }
 0x8a6   :  { %v7560_v30 = vpop.eup %7559 }
 0x8a7   :  { %v3801_v45 = vadd.f32 1.0, %v7560_v30  ;;  %v3826_v30 = vmul.f32 %v8419_v0, %v8153_v62  ;;  %v6724_v62 = vld [vmem:[#allocation13 + $0x90] sm:$0xf] }
 0x8a9   :  { %v7562_v21 = vpop.eup %7561  ;;  %7563 = vrcp.f32 %v3801_v45  ;;  %v3813_v55 = vand.u32 2147483648, %v3801_v45  ;;  %v3811_v42 = vand.u32 2147483647, %v3801_v45  ;;  %vm3807_vm7 = vweird.f32 %v3801_v45 }
 0x8aa   :  { %v3783_v22 = vmul.f32 %v7562_v21, %v3781_v23  ;;  %vm3788_vm2 = vweird.f32 %v7562_v21 }
 0x8ab   :  { %vm3789_vm4 = vmor %vm3787_vm3, %vm3788_vm2  ;;  %v3814_v40 = vor.u32 1.1754944e-38, %v3813_v55  ;;  %vm3812_vm9 = vcmp.eq.f32.partialorder %v3811_v42, 8.507059e+37  ;;  %v7358_v55 = vld [vmem:[#allocation13 + $0x88] sm:$0xf0]  ;;  %v2743_v42 = vadd.f32 %v8367_v60, %v8304_v57 }
 0x8ac   :  { %v3784_v44 = vsub.f32 1.0, %v3783_v22  ;;  %v7364_v22 = vld [vmem:[#allocation13 + $0xb8] sm:$0xf0] }
 0x8ae   :  { %v3785_v17 = vmul.f32 %v7562_v21, %v3784_v44 }
 0x8af   :  { %v7564_v4 = vpop.eup %7563 }
 0x8b0   :  { %v3803_v31 = vmul.f32 %v7564_v4, %v3801_v45  ;;  %v3786_v24 = vadd.f32 %v7562_v21, %v3785_v17  ;;  %vm3808_vm6 = vweird.f32 %v7564_v4  ;;  %v7362_v45 = vld [vmem:[#allocation13 + $0xac] sm:$0xf] }
 0x8b1   :  { %vm3809_vm8 = vmor %vm3807_vm7, %vm3808_vm6 }
 0x8b2   :  { %v3804_v7 = vsub.f32 1.0, %v3803_v31  ;;  %v3790_v56 = vsel %vm3789_vm4, %v7562_v21, %v3786_v24  ;;  %v6744_v21 = vld [vmem:[#allocation13 + $0xb0] sm:$0xf]  ;;  %v7361_v31 = vld [vmem:[#allocation13 + $0xa0] sm:$0xf0]  ;;  %v6729_v24 = vor.u32 %v7359_v48, %v6726_v2 }
 0x8b3   :  { %v3795_v41 = vsel %vm3792_vm5, %v3794_v51, %v3790_v56  ;;  %v6745_v44 = vor.u32 %v7364_v22, %v6744_v21  ;;  %v7357_v56 = vld [vmem:[#allocation13 + $0x80] sm:$0xf0]  ;;  %v6690_v22 = vld [vmem:[#allocation13 + $0x54] sm:$0xf0] }
 0x8b4   :  { %v3805_v29 = vmul.f32 %v7564_v4, %v3804_v7  ;;  %v3818_v34 = vmul.f32 %v3817_v25, %v3795_v41  ;;  %v6712_v7 = vld [vmem:[#allocation13 + $0x78] sm:$0xf]  ;;  %v7356_v25 = vld [vmem:[#allocation13 + $0x7c] sm:$0xf]  ;;  %v6714_v41 = vld [vmem:[#allocation13 + $0x84] sm:$0xf0] }
 0x8b5   :  { %4276 = vmatpush.bf16.msrb.mxu1 %v6745_v44  ;;  %v7352_v44 = vld [vmem:[#allocation13 + $0x58] sm:$0xf0] }
 0x8b6   :  { %v3806_v36 = vadd.f32 %v7564_v4, %v3805_v29  ;;  %v3819_v23 = vadd.f32 %v3818_v34, %v2769_v9  ;;  %v6713_v9 = vor.u32 %v7357_v56, %v6712_v7  ;;  %v6720_v29 = vld [vmem:[#allocation13 + $0x80] sm:$0xf]  ;;  %v2714_v34 = vadd.f32 %v8310_v1, %v8297_v27  ;;  %v6684_v56 = vld [vmem:[#allocation13 + $0x38] sm:$0xf] }
 0x8b7   :  { %v6678_v7 = vld [vmem:[#allocation13 + $0x3c] sm:$0xf0] }
 0x8b8   :  { %v3810_v3 = vsel %vm3809_vm8, %v7564_v4, %v3806_v36  ;;  %7565 = vtanh.f32 %v3819_v23  ;;  %v6732_v4 = vld [vmem:[#allocation13 + $0x98] sm:$0xf]  ;;  %v6717_v36 = vor.u32 %v7356_v25, %v6714_v41  ;;  %v6721_v23 = vor.u32 %v7358_v55, %v6720_v29  ;;  %v7349_v25 = vld [vmem:[#allocation13 + $0x40] sm:$0xf0] }
 0x8b9   :  { %v3815_v14 = vsel %vm3812_vm9, %v3814_v40, %v3810_v3  ;;  %v6733_v51 = vor.u32 %v7361_v31, %v6732_v4  ;;  %v6676_v4 = vld [vmem:[#allocation13 + $0x30] sm:$0xf]  ;;  %v7348_v31 = vld [vmem:[#allocation13 + $0x38] sm:$0xf0]  ;;  %v6685_v29 = vor.u32 %v7349_v25, %v6684_v56 }
 0x8ba   :  { %v3821_v63 = vsub.f32 1.0, %v3815_v14  ;;  %v3823_v5 = vmul.f32 %v3815_v14, %v8419_v0  ;;  %v7360_v0 = vld [vmem:[#allocation13 + $0x98] sm:$0xf0] }
 0x8bb   :  { %v6725_v17 = vor.u32 %v7360_v0, %v6724_v62  ;;  %4277 = vmatpush.bf16.msrb.mxu1 %v6733_v51  ;;  %v6677_v51 = vor.u32 %v7348_v31, %v6676_v4 }
 0x8bd   :  { %4251 = vmatpush.bf16.msrb.mxu3 %v6725_v17 }
 0x8be   :  { %v7566_v32 = vpop.eup %7565 }
 0x8bf   :  { %v3822_v20 = vmul.f32 %v7566_v32, %v3821_v63  ;;  %4278 = vmatpush.bf16.msrb.mxu1 %v6721_v23  ;;  %v6700_v32 = vld [vmem:[#allocation13 + $0x60] sm:$0xf]  ;;  %v7345_v23 = vld [vmem:[#allocation13 + $0x20] sm:$0xf0] }
 0x8c1   :  { %v3824_v18 = vadd.f32 %v3823_v5, %v3822_v20  ;;  %4252 = vmatpush.bf16.msrb.mxu3 %v6713_v9  ;;  %v7354_v20 = vld [vmem:[#allocation13 + $0x68] sm:$0xf0]  ;;  %v7353_v5 = vld [vmem:[#allocation13 + $0x64] sm:$0xf] }
 0x8c3   :  { %v3825_v35 = vmul.f32 %v3824_v18, %v8151_v61  ;;  %v6741_v61 = vor.u32 %v7362_v45, %v6738_v43  ;;  %v6701_v18 = vor.u32 %v7354_v20, %v6700_v32  ;;  %v6688_v45 = vld [vmem:[#allocation13 + $0x48] sm:$0xf]  ;;  %v7350_v43 = vld [vmem:[#allocation13 + $0x4c] sm:$0xf]  ;;  %v6672_v20 = vld [vmem:[#allocation13 + $0x20] sm:$0xf] }
 0x8c4   :  { %v6689_v21 = vor.u32 %v7351_v8, %v6688_v45  ;;  %v6693_v0 = vor.u32 %v7350_v43, %v6690_v22  ;;  %v7343_v45 = vld [vmem:[#allocation13 + $0x10] sm:$0xf0] }
 0x8c5   :  { %v8437_v50 = vadd.f32 %v3826_v30, %v3825_v35  ;;  %4263 = vmatpush.bf16.msra.mxu0 %v6741_v61  ;;  %v6702_v35 = vld [vmem:[#allocation13 + $0x6c] sm:$0xf0]  ;;  %v6708_v30 = vld [vmem:[#allocation13 + $0x68] sm:$0xf]  ;;  %4253 = vmatpush.bf16.msrb.mxu3 %v6701_v18 }
 0x8c6   :  { %v6705_v6 = vor.u32 %v7353_v5, %v6702_v35  ;;  %v6696_v61 = vld [vmem:[#allocation13 + $0x50] sm:$0xf]  ;;  %v7346_v5 = vld [vmem:[#allocation13 + $0x28] sm:$0xf0]  ;;  %v6652_v35 = vld [vmem:[#allocation13] sm:$0xf] }
 0x8c7   :  { %v3828_v13 = vpack.c.bf16 %v8437_v50, %v8437_v50  ;;  %v6697_v48 = vor.u32 %v7352_v44, %v6696_v61  ;;  %v6673_v18 = vor.u32 %v7346_v5, %v6672_v20 }
 0x8c9   :  { %3830 = vst [vmem:[#allocation4 + $0xc] sm:$0xf] %v3828_v13  ;;  %4002 = vmatmul.bf16.vlgmr.msrb.gmra.mxu0 %v3828_v13  ;;  %4015 = vmatmul.bf16.vlgmr.msra.gmra.mxu1 %v3828_v13 }
 0x8ca   :  { %4028 = vmatmul.bf16.vlgmr.msrb.gmra.mxu2 %v3828_v13  ;;  %4264 = vmatpush.bf16.msra.mxu0 %v6729_v24  ;;  %v7355_v13 = vld [vmem:[#allocation13 + $0x70] sm:$0xf0] }
 0x8cb   :  { %v6709_v60 = vor.u32 %v7355_v13, %v6708_v30  ;;  %4254 = vmatpush.bf16.msrb.mxu3 %v6689_v21  ;;  %v7347_v24 = vld [vmem:[#allocation13 + $0x34] sm:$0xf]  ;;  %v7342_v30 = vld [vmem:[#allocation13 + $0x8] sm:$0xf0] }
 0x8cc   :  { %v6681_v41 = vor.u32 %v7347_v24, %v6678_v7  ;;  %v6653_v13 = vor.u32 %v7342_v30, %v6652_v35  ;;  %v8450_v7 = vld [vmem:[%s8638_s9] ss:$0 sm:$0xff]  ;;  %v6842_v35 = vld [vmem:[#allocation13 + $0xb0] sm:$0xf]  ;;  %v7388_v30 = vld [vmem:[#allocation13 + $0xb8] sm:$0xf0] }
 0x8cd   :  { %4279 = vmatpush.bf16.msrb.mxu1 %v6709_v60 }
 0x8ce   :  { %4265 = vmatpush.bf16.msra.mxu0 %v6717_v36  ;;  %v6664_v36 = vld [vmem:[#allocation13 + $0x18] sm:$0xf] }
 0x8cf   :  { %4255 = vmatpush.bf16.msrb.mxu3 %v6677_v51 }
 0x8d1   :  { %4280 = vmatpush.bf16.msrb.mxu1 %v6697_v48 }
 0x8d2   :  { %4266 = vmatpush.bf16.msra.mxu0 %v6705_v6  ;;  %v6660_v6 = vld [vmem:[#allocation13 + $0x8] sm:$0xf] }
 0x8d3   :  { %v6661_v43 = vor.u32 %v7343_v45, %v6660_v6  ;;  %v7379_v45 = vld [vmem:[#allocation13 + $0x70] sm:$0xf0] }
 0x8d5   :  { %4281 = vmatpush.bf16.msrb.mxu1 %v6685_v29 }
 0x8d6   :  { %4267 = vmatpush.bf16.msra.mxu0 %v6693_v0 }
 0x8d9   :  { %4282 = vmatpush.bf16.msrb.mxu1 %v6673_v18 }
 0x8da   :  { %4268 = vmatpush.bf16.msra.mxu0 %v6681_v41  ;;  %v2772_v41 = vadd.f32 %v8365_v58, %v8341_v11  ;;  %v4082_v58 = vmul.f32 %v8437_v50, %v8172_v38 }
 0x8dd   :  { %4283 = vmatpush.bf16.msrb.mxu1 %v6661_v43  ;;  %v6834_v43 = vld [vmem:[#allocation13 + $0xa8] sm:$0xf] }
 0x946   :  { %v4003_v40 = vpop.f32.mrf.mxu0  ;;  %v4016_v3 = vpop.f32.mrf.mxu1 }
 0x947   :  { %v4033_v14 = vadd.f32 %v4003_v40, %v2714_v34  ;;  %v4053_v63 = vadd.f32 %v4016_v3, %v2743_v42  ;;  %v7344_v40 = vld [vmem:[#allocation13 + $0x1c] sm:$0xf] }
 0x949   :  { %v6648_v1 = vmul.f32 -1.442695, %v4033_v14  ;;  %v6649_v54 = vmul.f32 -1.442695, %v4053_v63  ;;  %v6666_v14 = vld [vmem:[#allocation13 + $0x24] sm:$0xf0]  ;;  %v6665_v63 = vor.u32 %v7345_v23, %v6664_v36 }
 0x94a   :  { %v6669_v32 = vor.u32 %v7344_v40, %v6666_v14 }
 0x94b   :  { %7567 = vpow2.f32 %v6648_v1  ;;  %4256 = vmatpush.bf16.msrb.mxu3 %v6665_v63  ;;  %v7341_v1 = vld [vmem:[#allocation13 + $0x4] sm:$0xf] }
 0x94c   :  { %7569 = vpow2.f32 %v6649_v54  ;;  %4269 = vmatpush.bf16.msra.mxu0 %v6669_v32  ;;  %v6654_v54 = vld [vmem:[#allocation13 + $0xc] sm:$0xf0] }
 0x94d   :  { %v8445_v62 = vpop.f32.mrf.mxu2  ;;  %v6657_v60 = vor.u32 %v7341_v1, %v6654_v54  ;;  %v6830_v1 = vld [vmem:[#allocation13 + $0x98] sm:$0xf]  ;;  %v7385_v54 = vld [vmem:[#allocation13 + $0xa0] sm:$0xf0] }
 0x94e   :  { %v4005_v17 = vpop.f32.mrf.mxu0  ;;  %v4018_v2 = vpop.f32.mrf.mxu1  ;;  %v4073_v56 = vadd.f32 %v8450_v7, %v8445_v62  ;;  %v6831_v6 = vor.u32 %v7385_v54, %v6830_v1  ;;  %v7378_v1 = vld [vmem:[#allocation13 + $0x68] sm:$0xf0]  ;;  %v7377_v54 = vld [vmem:[#allocation13 + $0x64] sm:$0xf] }
 0x94f   :  { %4257 = vmatpush.bf16.msrb.mxu3 %v6653_v13  ;;  %v6843_v13 = vor.u32 %v7388_v30, %v6842_v35 }
 0x950   :  { %4270 = vmatpush.bf16.msra.mxu0 %v6657_v60  ;;  %v7382_v60 = vld [vmem:[#allocation13 + $0x88] sm:$0xf0] }
 0x951   :  { %v7568_v9 = vpop.eup %7567 }
 0x952   :  { %v7570_v55 = vpop.eup %7569  ;;  %v4037_v34 = vadd.f32 1.0, %v7568_v9 }
 0x953   :  { %v4057_v42 = vadd.f32 1.0, %v7570_v55 }
 0x954   :  { %7571 = vrcp.f32 %v4037_v34  ;;  %v4049_v48 = vand.u32 2147483648, %v4037_v34  ;;  %v4047_v2 = vand.u32 2147483647, %v4037_v34  ;;  %vm4043_vm11 = vweird.f32 %v4037_v34  ;;  %4532 = vmatpush.bf16.msrb.mxu0 %v6843_v13  ;;  %v6798_v13 = vld [vmem:[#allocation13 + $0x60] sm:$0xf] }
 0x955   :  { %7573 = vrcp.f32 %v4057_v42  ;;  %v4031_v3 = vpop.f32.mrf.mxu2  ;;  %v4069_v29 = vand.u32 2147483648, %v4057_v42  ;;  %vm4063_vm15 = vweird.f32 %v4057_v42 }
 0x956   :  { %v4050_v24 = vor.u32 1.1754944e-38, %v4049_v48  ;;  %vm4048_vm13 = vcmp.eq.f32.partialorder %v4047_v2, 8.507059e+37  ;;  %v6794_v48 = vld [vmem:[#allocation13 + $0x50] sm:$0xf]  ;;  %v2745_v2 = vadd.f32 %v8371_v53, %v8304_v57  ;;  %v6810_v53 = vld [vmem:[#allocation13 + $0x78] sm:$0xf] }
 0x957   :  { %v4070_v40 = vor.u32 1.1754944e-38, %v4069_v29 }
 0x958   :  { %4533 = vmatpush.bf16.msrb.mxu0 %v6831_v6 }
 0x95a   :  { %v7572_v8 = vpop.eup %7571 }
 0x95b   :  { %v7574_v21 = vpop.eup %7573  ;;  %v4039_v22 = vmul.f32 %v7572_v8, %v4037_v34  ;;  %vm4044_vm10 = vweird.f32 %v7572_v8  ;;  %v4067_v34 = vand.u32 2147483647, %v4057_v42 }
 0x95c   :  { %v4059_v61 = vmul.f32 %v7574_v21, %v4057_v42  ;;  %vm4045_vm12 = vmor %vm4043_vm11, %vm4044_vm10  ;;  %vm4064_vm14 = vweird.f32 %v7574_v21 }
 0x95d   :  { %v4040_v44 = vsub.f32 1.0, %v4039_v22  ;;  %vm4065_vm0 = vmor %vm4063_vm15, %vm4064_vm14  ;;  %vm4068_vm1 = vcmp.eq.f32.partialorder %v4067_v34, 8.507059e+37  ;;  %v7386_v22 = vld [vmem:[#allocation13 + $0xac] sm:$0xf]  ;;  %v6782_v34 = vld [vmem:[#allocation13 + $0x38] sm:$0xf] }
 0x95e   :  { %v4060_v0 = vsub.f32 1.0, %v4059_v61 }
 0x95f   :  { %v4041_v17 = vmul.f32 %v7572_v8, %v4040_v44  ;;  %v6836_v44 = vld [vmem:[#allocation13 + $0xb4] sm:$0xf0] }
 0x960   :  { %v4061_v4 = vmul.f32 %v7574_v21, %v4060_v0  ;;  %v6839_v0 = vor.u32 %v7386_v22, %v6836_v44  ;;  %v7375_v22 = vld [vmem:[#allocation13 + $0x50] sm:$0xf0] }
 0x961   :  { %v4042_v31 = vadd.f32 %v7572_v8, %v4041_v17  ;;  %v7376_v17 = vld [vmem:[#allocation13 + $0x58] sm:$0xf0] }
 0x962   :  { %v4062_v25 = vadd.f32 %v7574_v21, %v4061_v4  ;;  %4519 = vmatpush.bf16.msra.mxu3 %v6839_v0  ;;  %v6795_v4 = vor.u32 %v7376_v17, %v6794_v48  ;;  %v6788_v48 = vld [vmem:[#allocation13 + $0x54] sm:$0xf0] }
 0x963   :  { %v4046_v51 = vsel %vm4045_vm12, %v7572_v8, %v4042_v31  ;;  %v6822_v31 = vld [vmem:[#allocation13 + $0x90] sm:$0xf]  ;;  %v7424_v17 = vld [vmem:[#allocation14 + $0x38] sm:$0xff] }
 0x964   :  { %v4051_v9 = vsel %vm4048_vm13, %v4050_v24, %v4046_v51  ;;  %v4066_v23 = vsel %vm4065_vm0, %v7574_v21, %v4062_v25  ;;  %v7387_v21 = vld [vmem:[#allocation13 + $0xb0] sm:$0xf0]  ;;  %v7384_v24 = vld [vmem:[#allocation13 + $0x98] sm:$0xf0] }
 0x965   :  { %v4074_v55 = vmul.f32 %v4073_v56, %v4051_v9  ;;  %v4071_v3 = vsel %vm4068_vm1, %v4070_v40, %v4066_v23  ;;  %v6835_v61 = vor.u32 %v7387_v21, %v6834_v43  ;;  %v7383_v51 = vld [vmem:[#allocation13 + $0x94] sm:$0xf]  ;;  %v6823_v25 = vor.u32 %v7384_v24, %v6822_v31  ;;  %v6824_v9 = vld [vmem:[#allocation13 + $0x9c] sm:$0xf0]  ;;  %v6786_v21 = vld [vmem:[#allocation13 + $0x48] sm:$0xf] }
 0x966   :  { %v4077_v14 = vsub.f32 1.0, %v4071_v3  ;;  %v4079_v32 = vmul.f32 %v4071_v3, %v8437_v50  ;;  %v6806_v50 = vld [vmem:[#allocation13 + $0x68] sm:$0xf]  ;;  %v7381_v3 = vld [vmem:[#allocation13 + $0x80] sm:$0xf0]  ;;  %v6787_v0 = vor.u32 %v7375_v22, %v6786_v21 }
 0x967   :  { %v4075_v36 = vadd.f32 %v4074_v55, %v2772_v41  ;;  %v6807_v8 = vor.u32 %v7379_v45, %v6806_v50  ;;  %4506 = vmatpush.bf16.msra.mxu2 %v6835_v61  ;;  %v6827_v55 = vor.u32 %v7383_v51, %v6824_v9  ;;  %v6758_v45 = vld [vmem:[#allocation13 + $0x8] sm:$0xf]  ;;  %v7374_v61 = vld [vmem:[#allocation13 + $0x4c] sm:$0xf]  ;;  %v7372_v24 = vld [vmem:[#allocation13 + $0x38] sm:$0xf0] }
 0x968   :  { %v6791_v31 = vor.u32 %v7374_v61, %v6788_v48  ;;  %v7371_v51 = vld [vmem:[#allocation13 + $0x34] sm:$0xf]  ;;  %v7418_v61 = vld [vmem:[#allocation14 + $0x8] sm:$0xff] }
 0x969   :  { %7575 = vtanh.f32 %v4075_v36  ;;  %v7373_v36 = vld [vmem:[#allocation13 + $0x40] sm:$0xf0]  ;;  %4520 = vmatpush.bf16.msra.mxu3 %v6827_v55 }
 0x96a   :  { %v6783_v40 = vor.u32 %v7373_v36, %v6782_v34  ;;  %v6762_v34 = vld [vmem:[#allocation13 + $0x18] sm:$0xf]  ;;  %v7369_v36 = vld [vmem:[#allocation13 + $0x20] sm:$0xf0] }
 0x96b   :  { %4507 = vmatpush.bf16.msra.mxu2 %v6823_v25 }
 0x96f   :  { %v7576_v63 = vpop.eup %7575 }
 0x970   :  { %v4078_v62 = vmul.f32 %v7576_v63, %v4077_v14  ;;  %v6811_v14 = vor.u32 %v7381_v3, %v6810_v53  ;;  %v7380_v63 = vld [vmem:[#allocation13 + $0x7c] sm:$0xf] }
 0x972   :  { %v4080_v20 = vadd.f32 %v4079_v32, %v4078_v62  ;;  %v6812_v62 = vld [vmem:[#allocation13 + $0x84] sm:$0xf0]  ;;  %v2716_v32 = vadd.f32 %v8317_v37, %v8297_v27  ;;  %4508 = vmatpush.bf16.msra.mxu2 %v6811_v14  ;;  %v6763_v14 = vor.u32 %v7369_v36, %v6762_v34 }
 0x974   :  { %v4081_v5 = vmul.f32 %v4080_v20, %v8174_v39  ;;  %v6818_v39 = vld [vmem:[#allocation13 + $0x80] sm:$0xf]  ;;  %v6815_v20 = vor.u32 %v7380_v63, %v6812_v62  ;;  %v7422_v63 = vld [vmem:[#allocation14 + $0x28] sm:$0xff] }
 0x975   :  { %v6819_v38 = vor.u32 %v7382_v60, %v6818_v39  ;;  %v6799_v39 = vor.u32 %v7378_v1, %v6798_v13  ;;  %v6800_v60 = vld [vmem:[#allocation13 + $0x6c] sm:$0xf0] }
 0x976   :  { %v8460_v18 = vadd.f32 %v4082_v58, %v4081_v5  ;;  %v6770_v58 = vld [vmem:[#allocation13 + $0x20] sm:$0xf]  ;;  %4521 = vmatpush.bf16.msra.mxu3 %v6815_v20  ;;  %v6803_v37 = vor.u32 %v7377_v54, %v6800_v60  ;;  %v7366_v20 = vld [vmem:[#allocation13 + $0x8] sm:$0xf0] }
 0x977   :  { %4534 = vmatpush.bf16.msrb.mxu0 %v6819_v38  ;;  %4509 = vmatpush.bf16.msra.mxu2 %v6799_v39  ;;  %v7420_v39 = vld [vmem:[#allocation14 + $0x18] sm:$0xff] }
 0x978   :  { %v4084_v42 = vpack.c.bf16 %v8460_v18, %v8460_v18 }
 0x97a   :  { %4086 = vst [vmem:[#allocation4 + $0x10] sm:$0xf] %v4084_v42  ;;  %4258 = vmatmul.bf16.vlgmr.msrb.gmra.mxu3 %v4084_v42  ;;  %4271 = vmatmul.bf16.vlgmr.msra.gmra.mxu0 %v4084_v42 }
 0x97b   :  { %4284 = vmatmul.bf16.vlgmr.msrb.gmra.mxu1 %v4084_v42  ;;  %4535 = vmatpush.bf16.msrb.mxu0 %v6807_v8  ;;  %v7370_v42 = vld [vmem:[#allocation13 + $0x28] sm:$0xf0]  ;;  %v7367_v8 = vld [vmem:[#allocation13 + $0x10] sm:$0xf0] }
 0x97c   :  { %v6771_v30 = vor.u32 %v7370_v42, %v6770_v58  ;;  %v6759_v43 = vor.u32 %v7367_v8, %v6758_v45  ;;  %4522 = vmatpush.bf16.msra.mxu3 %v6803_v37  ;;  %4510 = vmatpush.bf16.msra.mxu2 %v6787_v0  ;;  %v6752_v58 = vld [vmem:[#allocation13 + $0xc] sm:$0xf0] }
 0x97d   :  { %v7419_v37 = vld [vmem:[#allocation14 + $0x10] sm:$0xff] }
 0x97f   :  { %4536 = vmatpush.bf16.msrb.mxu0 %v6795_v4 }
 0x980   :  { %4523 = vmatpush.bf16.msra.mxu3 %v6791_v31 }
 0x983   :  { %4537 = vmatpush.bf16.msrb.mxu0 %v6783_v40  ;;  %v6764_v40 = vld [vmem:[#allocation13 + $0x24] sm:$0xf0] }
 0x987   :  { %4538 = vmatpush.bf16.msrb.mxu0 %v6771_v30  ;;  %v7421_v30 = vld [vmem:[#allocation14 + $0x20] sm:$0xff] }
 0x98b   :  { %4539 = vmatpush.bf16.msrb.mxu0 %v6759_v43 }
 0x98f   :  { %4955 = vmatpush.bf16.msra.mxu0 %v7424_v17 }
 0x9f7   :  { %v4272_v56 = vpop.f32.mrf.mxu0 }
 0x9f8   :  { %v4309_v41 = vadd.f32 %v4272_v56, %v2745_v2  ;;  %v8466_v29 = vpop.f32.mrf.mxu1  ;;  %v6774_v2 = vld [vmem:[#allocation13 + $0x30] sm:$0xf]  ;;  %v6776_v56 = vld [vmem:[#allocation13 + $0x3c] sm:$0xf0] }
 0x9f9   :  { %v6775_v9 = vor.u32 %v7372_v24, %v6774_v2  ;;  %v6779_v55 = vor.u32 %v7371_v51, %v6776_v56  ;;  %v2774_v2 = vadd.f32 %v8369_v28, %v8341_v11  ;;  %v7417_v56 = vld [vmem:[#allocation14] sm:$0xff] }
 0x9fa   :  { %v6747_v23 = vmul.f32 -1.442695, %v4309_v41  ;;  %v7423_v41 = vld [vmem:[#allocation14 + $0x30] sm:$0xff] }
 0x9fb   :  { %4511 = vmatpush.bf16.msra.mxu2 %v6775_v9  ;;  %4956 = vmatpush.bf16.msra.mxu0 %v7423_v41 }
 0x9fc   :  { %7577 = vpow2.f32 %v6747_v23  ;;  %v7368_v23 = vld [vmem:[#allocation13 + $0x1c] sm:$0xf]  ;;  %4524 = vmatpush.bf16.msra.mxu3 %v6779_v55 }
 0x9fd   :  { %v4259_v5 = vpop.f32.mrf.mxu3  ;;  %v6767_v62 = vor.u32 %v7368_v23, %v6764_v40 }
 0x9fe   :  { %v4289_v35 = vadd.f32 %v4259_v5, %v2716_v32  ;;  %v6750_v32 = vld [vmem:[#allocation13] sm:$0xf]  ;;  %v7365_v5 = vld [vmem:[#allocation13 + $0x4] sm:$0xf] }
 0x9ff   :  { %v4274_v6 = vpop.f32.mrf.mxu0  ;;  %4512 = vmatpush.bf16.msra.mxu2 %v6763_v14  ;;  %4957 = vmatpush.bf16.msra.mxu0 %v7422_v63  ;;  %v6755_v13 = vor.u32 %v7365_v5, %v6752_v58  ;;  %v7413_v14 = vld [vmem:[#allocation4] sm:$0xff]  ;;  %v7414_v63 = vld [vmem:[#allocation4 + $0x8] sm:$0xff] }
 0xa00   :  { %v6746_v38 = vmul.f32 -1.442695, %v4289_v35  ;;  %v4287_v50 = vpop.f32.mrf.mxu1  ;;  %v6751_v35 = vor.u32 %v7366_v20, %v6750_v32  ;;  %4525 = vmatpush.bf16.msra.mxu3 %v6767_v62  ;;  %v4863_v32 = vld [vmem:[#allocation14] sm:$0xff]   ;;  %v4867_v58 = vld [vmem:[#allocation14 + $0x10] sm:$0xff]  }
 0xa01   :  { %v5136_v20 = vunpack.c.l.bf16 %v4863_v32  ;;  %v5137_v5 = vunpack.c.h.bf16 %v4863_v32  ;;  %v6932_v32 = vld [vmem:[#allocation13 + $0xa8] sm:$0xf] }
 0xa02   :  { %v7578_v44 = vpop.eup %7577  ;;  %7579 = vpow2.f32 %v6746_v38 }
 0xa03   :  { %v8470_v4 = vadd.f32 1.0, %v7578_v44  ;;  %4513 = vmatpush.bf16.msra.mxu2 %v6751_v35  ;;  %4958 = vmatpush.bf16.msra.mxu0 %v7421_v30  ;;  %v4329_v44 = vadd.f32 %v8450_v7, %v8466_v29  ;;  %v5140_v30 = vunpack.c.l.bf16 %v4867_v58 }
 0xa04   :  { %4526 = vmatpush.bf16.msra.mxu3 %v6755_v13 }
 0xa05   :  { %v4261_v25 = vpop.f32.mrf.mxu3  ;;  %7581 = vrcp.f32 %v8470_v4  ;;  %v4325_v31 = vand.u32 2147483648, %v8470_v4  ;;  %vm4319_vm7 = vweird.f32 %v8470_v4  ;;  %v4323_v51 = vand.u32 2147483647, %v8470_v4 }
 0xa07   :  { %4959 = vmatpush.bf16.msra.mxu0 %v7420_v39  ;;  %v4326_v9 = vor.u32 1.1754944e-38, %v4325_v31  ;;  %vm4324_vm9 = vcmp.eq.f32.partialorder %v4323_v51, 8.507059e+37 }
 0xa08   :  { %v7580_v53 = vpop.eup %7579 }
 0xa09   :  { %v4293_v3 = vadd.f32 1.0, %v7580_v53 }
 0xa0b   :  { %7583 = vrcp.f32 %v4293_v3  ;;  %v7582_v42 = vpop.eup %7581  ;;  %v4305_v50 = vand.u32 2147483648, %v4293_v3  ;;  %v4303_v8 = vand.u32 2147483647, %v4293_v3  ;;  %vm4299_vm3 = vweird.f32 %v4293_v3  ;;  %4960 = vmatpush.bf16.msra.mxu0 %v7419_v37 }
 0xa0c   :  { %v4315_v1 = vmul.f32 %v7582_v42, %v8470_v4  ;;  %vm4320_vm6 = vweird.f32 %v7582_v42  ;;  %v4338_v4 = vmul.f32 %v8460_v18, %v8196_v15 }
 0xa0d   :  { %v4306_v22 = vor.u32 1.1754944e-38, %v4305_v50  ;;  %vm4304_vm5 = vcmp.eq.f32.partialorder %v4303_v8, 8.507059e+37  ;;  %vm4321_vm8 = vmor %vm4319_vm7, %vm4320_vm6 }
 0xa0e   :  { %v4316_v60 = vsub.f32 1.0, %v4315_v1  ;;  %v4869_v1 = vld [vmem:[#allocation14 + $0x18] sm:$0xff]  }
 0xa0f   :  { %4961 = vmatpush.bf16.msra.mxu0 %v7418_v61  ;;  %v5142_v39 = vunpack.c.l.bf16 %v4869_v1  ;;  %v5143_v50 = vunpack.c.h.bf16 %v4869_v1  ;;  %v7407_v1 = vld [vmem:[#allocation13 + $0x94] sm:$0xf] }
 0xa10   :  { %v4317_v43 = vmul.f32 %v7582_v42, %v4316_v60 }
 0xa11   :  { %v7584_v54 = vpop.eup %7583 }
 0xa12   :  { %v4295_v6 = vmul.f32 %v7584_v54, %v4293_v3  ;;  %vm4300_vm2 = vweird.f32 %v7584_v54  ;;  %v4318_v48 = vadd.f32 %v7582_v42, %v4317_v43  ;;  %v4873_v43 = vld [vmem:[#allocation14 + $0x28] sm:$0xff]  }
 0xa13   :  { %vm4301_vm4 = vmor %vm4299_vm3, %vm4300_vm2  ;;  %4962 = vmatpush.bf16.msra.mxu0 %v7417_v56  ;;  %v5146_v61 = vunpack.c.l.bf16 %v4873_v43 }
 0xa14   :  { %v4296_v38 = vsub.f32 1.0, %v4295_v6  ;;  %v4322_v29 = vsel %vm4321_vm8, %v7582_v42, %v4318_v48  ;;  %v5147_v48 = vunpack.c.h.bf16 %v4873_v43  ;;  %v7404_v43 = vld [vmem:[#allocation13 + $0x7c] sm:$0xf] }
 0xa15   :  { %v4327_v41 = vsel %vm4324_vm9, %v4326_v9, %v4322_v29 }
 0xa16   :  { %v4297_v45 = vmul.f32 %v7584_v54, %v4296_v38  ;;  %v4333_v55 = vsub.f32 1.0, %v4327_v41  ;;  %v4335_v28 = vmul.f32 %v4327_v41, %v8460_v18  ;;  %v5152_v18 = vadd.f32 %v5137_v5, %v5136_v20  ;;  %v4871_v38 = vld [vmem:[#allocation14 + $0x20] sm:$0xff]   ;;  %v7410_v20 = vld [vmem:[#allocation13 + $0xac] sm:$0xf] }
 0xa18   :  { %v4298_v21 = vadd.f32 %v7584_v54, %v4297_v45  ;;  %v5144_v45 = vunpack.c.l.bf16 %v4871_v38 }
 0xa1a   :  { %v4302_v0 = vsel %vm4301_vm4, %v7584_v54, %v4298_v21  ;;  %v5141_v54 = vunpack.c.h.bf16 %v4867_v58  ;;  %v5145_v21 = vunpack.c.h.bf16 %v4871_v38  ;;  %v7412_v58 = vld [vmem:[#allocation13 + $0xb8] sm:$0xf0]  ;;  %v7409_v38 = vld [vmem:[#allocation13 + $0xa0] sm:$0xf0] }
 0xa1b   :  { %v4307_v17 = vsel %vm4304_vm5, %v4306_v22, %v4302_v0  ;;  %v4875_v0 = vld [vmem:[#allocation14 + $0x30] sm:$0xff]  }
 0xa1c   :  { %v4330_v24 = vmul.f32 %v4329_v44, %v4307_v17  ;;  %v5149_v51 = vunpack.c.h.bf16 %v4875_v0 }
 0xa1e   :  { %v4331_v25 = vadd.f32 %v4330_v24, %v2774_v2  ;;  %v5148_v2 = vunpack.c.l.bf16 %v4875_v0  ;;  %v4877_v24 = vld [vmem:[#allocation14 + $0x38] sm:$0xff]   ;;  %v6916_v0 = vld [vmem:[#allocation13 + $0x80] sm:$0xf] }
 0xa1f   :  { %v5151_v9 = vunpack.c.h.bf16 %v4877_v24 }
 0xa20   :  { %7585 = vtanh.f32 %v4331_v25  ;;  %v5150_v25 = vunpack.c.l.bf16 %v4877_v24 }
 0xa26   :  { %v7586_v34 = vpop.eup %7585 }
 0xa27   :  { %v4334_v36 = vmul.f32 %v7586_v34, %v4333_v55 }
 0xa29   :  { %v4336_v23 = vadd.f32 %v4335_v28, %v4334_v36 }
 0xa2b   :  { %v4337_v40 = vmul.f32 %v4336_v23, %v8194_v12  ;;  %v4865_v12 = vld [vmem:[#allocation14 + $0x8] sm:$0xff]  }
 0xa2c   :  { %v5138_v15 = vunpack.c.l.bf16 %v4865_v12  ;;  %v5139_v42 = vunpack.c.h.bf16 %v4865_v12  ;;  %v7411_v12 = vld [vmem:[#allocation13 + $0xb0] sm:$0xf0] }
 0xa2d   :  { %v8485_v53 = vadd.f32 %v4338_v4, %v4337_v40  ;;  %v6933_v5 = vor.u32 %v7411_v12, %v6932_v32  ;;  %v6886_v32 = vld [vmem:[#allocation13 + $0x54] sm:$0xf0] }
 0xa2e   :  { %v5153_v35 = vadd.f32 %v5152_v18, %v5138_v15  ;;  %v6934_v15 = vld [vmem:[#allocation13 + $0xb4] sm:$0xf0]  ;;  %v6940_v18 = vld [vmem:[#allocation13 + $0xb0] sm:$0xf] }
 0xa2f   :  { %v4340_v3 = vpack.c.bf16 %v8485_v53, %v8485_v53  ;;  %4762 = vmatpush.bf16.msra.mxu1 %v6933_v5  ;;  %v8504_v5 = vld [vmem:[%s8640_s11] ss:$0 sm:$0xff] }
 0xa30   :  { %v5154_v13 = vadd.f32 %v5153_v35, %v5139_v42  ;;  %v6937_v42 = vor.u32 %v7410_v20, %v6934_v15  ;;  %v6941_v35 = vor.u32 %v7412_v58, %v6940_v18  ;;  %v6892_v58 = vld [vmem:[#allocation13 + $0x50] sm:$0xf] }
 0xa31   :  { %4342 = vst [vmem:[#allocation4 + $0x14] sm:$0xf] %v4340_v3  ;;  %4514 = vmatmul.bf16.vlgmr.msra.gmra.mxu2 %v4340_v3  ;;  %4527 = vmatmul.bf16.vlgmr.msra.gmra.mxu3 %v4340_v3 }
 0xa32   :  { %4540 = vmatmul.bf16.vlgmr.msrb.gmra.mxu0 %v4340_v3  ;;  %v5155_v6 = vadd.f32 %v5154_v13, %v5140_v30  ;;  %4775 = vmatpush.bf16.msrb.mxu2 %v6937_v42  ;;  %v6920_v30 = vld [vmem:[#allocation13 + $0x90] sm:$0xf]  ;;  %v7408_v13 = vld [vmem:[#allocation13 + $0x98] sm:$0xf0] }
 0xa33   :  { %4788 = vmatpush.bf16.msrb.mxu3 %v6941_v35  ;;  %v7400_v42 = vld [vmem:[#allocation13 + $0x58] sm:$0xf0] }
 0xa34   :  { %v5156_v60 = vadd.f32 %v5155_v6, %v5141_v54  ;;  %v6921_v6 = vor.u32 %v7408_v13, %v6920_v30  ;;  %v6893_v35 = vor.u32 %v7400_v42, %v6892_v58  ;;  %v6872_v30 = vld [vmem:[#allocation13 + $0x30] sm:$0xf]  ;;  %v7396_v13 = vld [vmem:[#allocation13 + $0x38] sm:$0xf0] }
 0xa36   :  { %v5157_v37 = vadd.f32 %v5156_v60, %v5142_v39  ;;  %v6922_v39 = vld [vmem:[#allocation13 + $0x9c] sm:$0xf0]  ;;  %v6928_v60 = vld [vmem:[#allocation13 + $0x98] sm:$0xf]  ;;  %4763 = vmatpush.bf16.msra.mxu1 %v6921_v6 }
 0xa38   :  { %v7415_v62 = vld [vmem:[#allocation4 + $0x10] sm:$0xff]  ;;  %v5158_v8 = vadd.f32 %v5157_v37, %v5143_v50  ;;  %v6925_v50 = vor.u32 %v7407_v1, %v6922_v39  ;;  %v6929_v37 = vor.u32 %v7409_v38, %v6928_v60  ;;  %v7395_v1 = vld [vmem:[#allocation13 + $0x34] sm:$0xf]  ;;  %v6873_v60 = vor.u32 %v7396_v13, %v6872_v30  ;;  %v6874_v38 = vld [vmem:[#allocation13 + $0x3c] sm:$0xf0] }
 0xa3a   :  { %v5159_v22 = vadd.f32 %v5158_v8, %v5144_v45  ;;  %4776 = vmatpush.bf16.msrb.mxu2 %v6925_v50  ;;  %4789 = vmatpush.bf16.msrb.mxu3 %v6929_v37  ;;  %v6908_v45 = vld [vmem:[#allocation13 + $0x78] sm:$0xf]  ;;  %v7405_v8 = vld [vmem:[#allocation13 + $0x80] sm:$0xf0] }
 0xa3b   :  { %v6880_v50 = vld [vmem:[#allocation13 + $0x38] sm:$0xf] }
 0xa3c   :  { %v5160_v44 = vadd.f32 %v5159_v22, %v5145_v21  ;;  %v2719_v21 = vadd.f32 %v8324_v49, %v8297_v27  ;;  %v2748_v22 = vadd.f32 %v8375_v46, %v8304_v57  ;;  %v7401_v49 = vld [vmem:[#allocation13 + $0x64] sm:$0xf] }
 0xa3e   :  { %v5161_v17 = vadd.f32 %v5160_v44, %v5146_v61  ;;  %v6909_v61 = vor.u32 %v7405_v8, %v6908_v45  ;;  %v6910_v44 = vld [vmem:[#allocation13 + $0x84] sm:$0xf0] }
 0xa3f   :  { %v6913_v24 = vor.u32 %v7404_v43, %v6910_v44  ;;  %v6877_v43 = vor.u32 %v7395_v1, %v6874_v38 }
 0xa40   :  { %v5162_v31 = vadd.f32 %v5161_v17, %v5147_v48  ;;  %v7406_v48 = vld [vmem:[#allocation13 + $0x88] sm:$0xf0]  ;;  %4764 = vmatpush.bf16.msra.mxu1 %v6909_v61 }
 0xa41   :  { %4777 = vmatpush.bf16.msrb.mxu2 %v6913_v24  ;;  %v7392_v24 = vld [vmem:[#allocation13 + $0x1c] sm:$0xf] }
 0xa42   :  { %4963 = vmatmul.bf16.vlgmr.msra.gmra.mxu0 %v7413_v14  ;;  %v5163_v56 = vadd.f32 %v5162_v31, %v5148_v2  ;;  %v4879_v14 = vld [vmem:[%s8640_s11] sm:$0x1] }
 0xa44   :  { %v5164_v29 = vadd.f32 %v5163_v56, %v5149_v51  ;;  %v6917_v51 = vor.u32 %v7406_v48, %v6916_v0  ;;  %v6860_v0 = vld [vmem:[#allocation13 + $0x18] sm:$0xf]  ;;  %v7393_v48 = vld [vmem:[#allocation13 + $0x20] sm:$0xf0] }
 0xa46   :  { %v5165_v41 = vadd.f32 %v5164_v29, %v5150_v25  ;;  %4790 = vmatpush.bf16.msrb.mxu3 %v6917_v51  ;;  %v6896_v29 = vld [vmem:[#allocation13 + $0x60] sm:$0xf]  ;;  %v6862_v51 = vld [vmem:[#allocation13 + $0x24] sm:$0xf0] }
 0xa48   :  { %v5166_v55 = vadd.f32 %v5165_v41, %v5151_v9  ;;  %v7402_v9 = vld [vmem:[#allocation13 + $0x68] sm:$0xf0] }
 0xa4a   :  { %v5167_v34 = vrot.slane %v5166_v55, 4 }
 0xa4c   :  { %v5168_v28 = vadd.f32 %v5167_v34, %v5166_v55 }
 0xa4e   :  { %v5169_v36 = vrot.slane %v5168_v28, 2 }
 0xa50   :  { %v5170_v23 = vadd.f32 %v5169_v36, %v5168_v28  ;;  %v6897_v28 = vor.u32 %v7402_v9, %v6896_v29  ;;  %v6898_v36 = vld [vmem:[#allocation13 + $0x6c] sm:$0xf0]  ;;  %v7394_v29 = vld [vmem:[#allocation13 + $0x28] sm:$0xf0]  ;;  %v6848_v9 = vld [vmem:[#allocation13] sm:$0xf] }
 0xa52   :  { %4968 = vmatmul.bf16.gmra.mxu0 %v7414_v63  ;;  %v5171_v40 = vrot.slane %v5170_v23, 1  ;;  %4765 = vmatpush.bf16.msra.mxu1 %v6897_v28  ;;  %v7389_v28 = vld [vmem:[#allocation13 + $0x4] sm:$0xf] }
 0xa54   :  { %v5172_v4 = vadd.f32 %v5171_v40, %v5170_v23  ;;  %v6904_v23 = vld [vmem:[#allocation13 + $0x68] sm:$0xf]  ;;  %v7403_v40 = vld [vmem:[#allocation13 + $0x70] sm:$0xf0] }
 0xa56   :  { %v5173_v3 = vmul.f32 -1.0, %v5172_v4  ;;  %v6901_v4 = vor.u32 %v7401_v49, %v6898_v36  ;;  %v7390_v49 = vld [vmem:[#allocation13 + $0x8] sm:$0xf0]  ;;  %v6850_v36 = vld [vmem:[#allocation13 + $0xc] sm:$0xf0] }
 0xa58   :  { %v5174_v63 = vadd.f32 %v5173_v3, %v4879_v14  ;;  %v6905_v3 = vor.u32 %v7403_v40, %v6904_v23  ;;  %v6884_v14 = vld [vmem:[#allocation13 + $0x48] sm:$0xf]  ;;  %4778 = vmatpush.bf16.msrb.mxu2 %v6901_v4 }
 0xa59   :  { %v6856_v23 = vld [vmem:[#allocation13 + $0x8] sm:$0xf] }
 0xa5a   :  { %4791 = vmatpush.bf16.msrb.mxu3 %v6905_v3 }
 0xa5e   :  { %4792 = vmatpush.bf16.msrb.mxu3 %v6893_v35 }
 0xa62   :  { %4973 = vmatmul.bf16.gmra.mxu0 %v7415_v62  ;;  %v7000_v62 = vmul.f32 -1.442695, %v5174_v63  ;;  %v7399_v63 = vld [vmem:[#allocation13 + $0x50] sm:$0xf0] }
 0xa63   :  { %v6885_v15 = vor.u32 %v7399_v63, %v6884_v14  ;;  %v6853_v14 = vor.u32 %v7389_v28, %v6850_v36  ;;  %v7391_v63 = vld [vmem:[#allocation13 + $0x10] sm:$0xf0] }
 0xa64   :  { %7587 = vpow2.f32 %v7000_v62  ;;  %v7398_v62 = vld [vmem:[#allocation13 + $0x4c] sm:$0xf] }
 0xa65   :  { %v6889_v18 = vor.u32 %v7398_v62, %v6886_v32  ;;  %4766 = vmatpush.bf16.msra.mxu1 %v6885_v15 }
 0xa67   :  { %4779 = vmatpush.bf16.msrb.mxu2 %v6889_v18 }
 0xa69   :  { %4767 = vmatpush.bf16.msra.mxu1 %v6873_v60 }
 0xa6a   :  { %v7588_v17 = vpop.eup %7587 }
 0xa6b   :  { %v8498_v34 = vadd.f32 1.0, %v7588_v17  ;;  %4780 = vmatpush.bf16.msrb.mxu2 %v6877_v43 }
 0xa6d   :  { %vm5184_vm11 = vweird.f32 %v8498_v34 }
 0xaaf   :  { %v8492_v54 = vpop.f32.mrf.mxu0 }
 0xab4   :  { %v4515_v2 = vpop.f32.mrf.mxu2  ;;  %v4528_v31 = vpop.f32.mrf.mxu3 }
 0xab5   :  { %v4545_v56 = vadd.f32 %v4515_v2, %v2719_v21  ;;  %v4565_v25 = vadd.f32 %v4528_v31, %v2748_v22  ;;  %v7397_v21 = vld [vmem:[#allocation13 + $0x40] sm:$0xf0]  ;;  %v6861_v31 = vor.u32 %v7393_v48, %v6860_v0 }
 0xab6   :  { %v6881_v44 = vor.u32 %v7397_v21, %v6880_v50  ;;  %v4585_v50 = vadd.f32 %v8450_v7, %v8492_v54  ;;  %v4594_v7 = vmul.f32 %v8485_v53, %v8245_v59 }
 0xab7   :  { %v6844_v41 = vmul.f32 -1.442695, %v4545_v56  ;;  %v6845_v55 = vmul.f32 -1.442695, %v4565_v25  ;;  %v4543_v46 = vpop.f32.mrf.mxu0  ;;  %v6868_v56 = vld [vmem:[#allocation13 + $0x20] sm:$0xf]  ;;  %4768 = vmatpush.bf16.msra.mxu1 %v6861_v31  ;;  %v6865_v25 = vor.u32 %v7392_v24, %v6862_v51 }
 0xab8   :  { %4793 = vmatpush.bf16.msrb.mxu3 %v6881_v44  ;;  %v6849_v46 = vor.u32 %v7390_v49, %v6848_v9 }
 0xab9   :  { %7589 = vpow2.f32 %v6844_v41  ;;  %4781 = vmatpush.bf16.msrb.mxu2 %v6865_v25 }
 0xaba   :  { %7591 = vpow2.f32 %v6845_v55  ;;  %v6869_v55 = vor.u32 %v7394_v29, %v6868_v56 }
 0xabb   :  { %7593 = vrcp.f32 %v8498_v34  ;;  %4769 = vmatpush.bf16.msra.mxu1 %v6849_v46 }
 0xabc   :  { %v4517_v12 = vpop.f32.mrf.mxu2  ;;  %v4530_v20 = vpop.f32.mrf.mxu3  ;;  %4794 = vmatpush.bf16.msrb.mxu3 %v6869_v55 }
 0xabd   :  { %v6857_v12 = vor.u32 %v7391_v63, %v6856_v23  ;;  %4782 = vmatpush.bf16.msrb.mxu2 %v6853_v14 }
 0xabf   :  { %v7590_v6 = vpop.eup %7589  ;;  %v4964_v39 = vpop.f32.mrf.mxu0 }
 0xac0   :  { %v7592_v37 = vpop.eup %7591  ;;  %v8506_v45 = vadd.f32 1.0, %v7590_v6  ;;  %v4965_v8 = vadd.f32 %v8504_v5, %v4964_v39  ;;  %4795 = vmatpush.bf16.msrb.mxu3 %v6857_v12 }
 0xac1   :  { %v8509_v22 = vpop.eup %7593  ;;  %v8511_v61 = vadd.f32 1.0, %v7592_v37 }
 0xac2   :  { %7595 = vrcp.f32 %v8506_v45  ;;  %v6992_v17 = vmul.f32 -1.442695, %v4965_v8  ;;  %v5180_v2 = vmul.f32 %v8509_v22, %v8498_v34  ;;  %v4561_v42 = vand.u32 2147483648, %v8506_v45 }
 0xac3   :  { %7597 = vrcp.f32 %v8511_v61  ;;  %v4559_v1 = vand.u32 2147483647, %v8506_v45  ;;  %vm4555_vm12 = vweird.f32 %v8506_v45  ;;  %vm5185_vm13 = vweird.f32 %v8509_v22 }
 0xac4   :  { %7599 = vpow2.f32 %v6992_v17  ;;  %v5181_v4 = vsub.f32 1.0, %v5180_v2  ;;  %v4562_v37 = vor.u32 1.1754944e-38, %v4561_v42  ;;  %v5190_v8 = vand.u32 2147483648, %v8498_v34  ;;  %vm8545_vm1 = vmor %vm5184_vm11, %vm5185_vm13 }
 0xac5   :  { %vm4560_vm15 = vcmp.eq.f32.partialorder %v4559_v1, 8.507059e+37  ;;  %v2777_v2 = vadd.f32 %v8373_v33, %v8341_v11  ;;  %v4581_v24 = vand.u32 2147483648, %v8511_v61  ;;  %vm4575_vm2 = vweird.f32 %v8511_v61 }
 0xac6   :  { %v5182_v30 = vmul.f32 %v8509_v22, %v5181_v4  ;;  %v4579_v56 = vand.u32 2147483647, %v8511_v61  ;;  %v5191_v25 = vor.u32 1.1754944e-38, %v5190_v8  ;;  %v8565_v4 = vpop.permute.xlu1 %5195 }
 0xac7   :  { %v4966_v41 = vpop.f32.mrf.mxu0  ;;  %vm5197_vm8 = vcmp.gt.s32.totalorder %v8565_v4, 0 }
 0xac8   :  { %v7596_v40 = vpop.eup %7595  ;;  %v4967_v3 = vadd.f32 %v8504_v5, %v4966_v41  ;;  %v5183_v44 = vadd.f32 %v8509_v22, %v5182_v30  ;;  %v4582_v41 = vor.u32 1.1754944e-38, %v4581_v24  ;;  %vm4580_vm5 = vcmp.eq.f32.partialorder %v4579_v56, 8.507059e+37 }
 0xac9   :  { %v8518_v62 = vpop.eup %7597  ;;  %v4551_v32 = vmul.f32 %v7596_v40, %v8506_v45  ;;  %vm4556_vm10 = vweird.f32 %v7596_v40  ;;  %v5188_v45 = vand.u32 2147483647, %v8498_v34 }
 0xaca   :  { %v4571_v20 = vmul.f32 %v8518_v62, %v8511_v61  ;;  %v6993_v15 = vmul.f32 -1.442695, %v4967_v3  ;;  %v7600_v58 = vpop.eup %7599  ;;  %vm4557_vm14 = vmor %vm4555_vm12, %vm4556_vm10  ;;  %vm4576_vm0 = vweird.f32 %v8518_v62  ;;  %v5187_v9 = vsel %vm8545_vm1, %v8509_v22, %v5183_v44 }
 0xacb   :  { %v4552_v18 = vsub.f32 1.0, %v4551_v32  ;;  %v8526_v6 = vadd.f32 1.0, %v7600_v58  ;;  %vm4577_vm3 = vmor %vm4575_vm2, %vm4576_vm0  ;;  %vm5189_vm4 = vcmp.eq.f32.partialorder %v5188_v45, 8.507059e+37 }
 0xacc   :  { %v4572_v35 = vsub.f32 1.0, %v4571_v20  ;;  %7601 = vpow2.f32 %v6993_v15  ;;  %v5192_v46 = vsel %vm5189_vm4, %v5191_v25, %v5187_v9  ;;  %vm5199_vm4 = vcmp.gt.s32.totalorder %v8565_v4, 2 }
 0xacd   :  { %v4553_v13 = vmul.f32 %v7596_v40, %v4552_v18  ;;  %7603 = vrcp.f32 %v8526_v6  ;;  %v5025_v23 = vand.u32 2147483647, %v8526_v6  ;;  %v5027_v22 = vand.u32 2147483648, %v8526_v6 }
 0xace   :  { %v4573_v39 = vmul.f32 %v8518_v62, %v4572_v35  ;;  %vm5021_vm7 = vweird.f32 %v8526_v6 }
 0xacf   :  { %v4554_v60 = vadd.f32 %v7596_v40, %v4553_v13  ;;  %v4969_v38 = vpop.f32.mrf.mxu0  ;;  %vm5026_vm10 = vcmp.eq.f32.partialorder %v5025_v23, 8.507059e+37  ;;  %v5028_v58 = vor.u32 1.1754944e-38, %v5027_v22 }
 0xad0   :  { %v4970_v43 = vadd.f32 %v8504_v5, %v4969_v38  ;;  %v4574_v17 = vadd.f32 %v8518_v62, %v4573_v39 }
 0xad1   :  { %v4558_v21 = vsel %vm4557_vm14, %v7596_v40, %v4554_v60 }
 0xad2   :  { %v7602_v0 = vpop.eup %7601  ;;  %v4563_v48 = vsel %vm4560_vm15, %v4562_v37, %v4558_v21  ;;  %v6994_v54 = vmul.f32 -1.442695, %v4970_v43  ;;  %v4578_v33 = vsel %vm4577_vm3, %v8518_v62, %v4574_v17  ;;  %v8568_v62 = vperm.slane %v5192_v46, 0 }
 0xad3   :  { %v4586_v31 = vmul.f32 %v4585_v50, %v4563_v48  ;;  %v8552_v51 = vadd.f32 1.0, %v7602_v0  ;;  %v7604_v34 = vpop.eup %7603  ;;  %v4583_v36 = vsel %vm4580_vm5, %v4582_v41, %v4578_v33  ;;  %vm5198_vm15 = vcmp.gt.s32.totalorder %v8565_v4, 1 }
 0xad4   :  { %7605 = vpow2.f32 %v6994_v54  ;;  %v5017_v49 = vmul.f32 %v7604_v34, %v8526_v6  ;;  %vm5022_vm6 = vweird.f32 %v7604_v34  ;;  %v4589_v12 = vsub.f32 1.0, %v4583_v36 }
 0xad5   :  { %v4587_v29 = vadd.f32 %v4586_v31, %v2777_v2  ;;  %7607 = vrcp.f32 %v8552_v51  ;;  %vm5023_vm9 = vmor %vm5021_vm7, %vm5022_vm6  ;;  %v4591_v35 = vmul.f32 %v4583_v36, %v8485_v53  ;;  %v5040_v6 = vand.u32 2147483647, %v8552_v51 }
 0xad6   :  { %v5018_v61 = vsub.f32 1.0, %v5017_v49  ;;  %v5042_v39 = vand.u32 2147483648, %v8552_v51  ;;  %vm5036_vm12 = vweird.f32 %v8552_v51 }
 0xad7   :  { %7609 = vtanh.f32 %v4587_v29  ;;  %v4971_v55 = vpop.f32.mrf.mxu0  ;;  %vm5041_vm14 = vcmp.eq.f32.partialorder %v5040_v6, 8.507059e+37 }
 0xad8   :  { %v4972_v28 = vadd.f32 %v8504_v5, %v4971_v55  ;;  %v5019_v3 = vmul.f32 %v7604_v34, %v5018_v61  ;;  %v5043_v48 = vor.u32 1.1754944e-38, %v5042_v39 }
 0xada   :  { %v7606_v40 = vpop.eup %7605  ;;  %v6995_v14 = vmul.f32 -1.442695, %v4972_v28  ;;  %v5020_v20 = vadd.f32 %v7604_v34, %v5019_v3 }
 0xadb   :  { %v7608_v63 = vpop.eup %7607  ;;  %v8570_v32 = vadd.f32 1.0, %v7606_v40 }
 0xadc   :  { %v5032_v15 = vmul.f32 %v7608_v63, %v8552_v51  ;;  %7611 = vpow2.f32 %v6995_v14  ;;  %v5024_v30 = vsel %vm5023_vm9, %v7604_v34, %v5020_v20  ;;  %vm5037_vm11 = vweird.f32 %v7608_v63 }
 0xadd   :  { %v7610_v18 = vpop.eup %7609  ;;  %7613 = vrcp.f32 %v8570_v32  ;;  %v5029_v1 = vsel %vm5026_vm10, %v5028_v58, %v5024_v30  ;;  %vm5038_vm13 = vmor %vm5036_vm12, %vm5037_vm11  ;;  %v5055_v56 = vand.u32 2147483647, %v8570_v32  ;;  %v5057_v25 = vand.u32 2147483648, %v8570_v32 }
 0xade   :  { %v4590_v42 = vmul.f32 %v7610_v18, %v4589_v12  ;;  %v5033_v13 = vsub.f32 1.0, %v5032_v15  ;;  %v5206_v38 = vsel %vm5197_vm8, %v5029_v1, %v8568_v62  ;;  %vm5051_vm1 = vweird.f32 %v8570_v32 }
 0xadf   :  { %v4974_v60 = vpop.f32.mrf.mxu0  ;;  %5214 = vst [vmem:[#allocation16] sm:$0xff] %v5206_v38  ;;  %v5058_v55 = vor.u32 1.1754944e-38, %v5057_v25  ;;  %vm5056_vm3 = vcmp.eq.f32.partialorder %v5055_v56, 8.507059e+37  ;;  %vm5200_vm9 = vcmp.gt.s32.totalorder %v8565_v4, 3  ;;  %v2750_v25 = vadd.f32 %v8379_v47, %v8304_v57 }
 0xae0   :  { %v5034_v50 = vmul.f32 %v7608_v63, %v5033_v13  ;;  %v4975_v37 = vadd.f32 %v8504_v5, %v4974_v60  ;;  %v4592_v8 = vadd.f32 %v4591_v35, %v4590_v42 }
 0xae2   :  { %v7612_v43 = vpop.eup %7611  ;;  %v5035_v21 = vadd.f32 %v7608_v63, %v5034_v50  ;;  %v6996_v44 = vmul.f32 -1.442695, %v4975_v37  ;;  %v4593_v45 = vmul.f32 %v4592_v8, %v8243_v26 }
 0xae3   :  { %v7614_v0 = vpop.eup %7613  ;;  %v5011_v17 = vadd.f32 1.0, %v7612_v43 }
 0xae4   :  { %v5039_v54 = vsel %vm5038_vm13, %v7608_v63, %v5035_v21  ;;  %v5047_v2 = vmul.f32 %v7614_v0, %v8570_v32  ;;  %7615 = vpow2.f32 %v6996_v44  ;;  %v8588_v51 = vadd.f32 %v4594_v7, %v4593_v45 }
 0xae5   :  { %v5044_v31 = vsel %vm5041_vm14, %v5043_v48, %v5039_v54  ;;  %7617 = vrcp.f32 %v5011_v17  ;;  %vm5052_vm0 = vweird.f32 %v7614_v0  ;;  %v5072_v40 = vand.u32 2147483648, %v5011_v17 }
 0xae6   :  { %v5207_v24 = vsel %vm5198_vm15, %v5044_v31, %v8568_v62  ;;  %v5048_v26 = vsub.f32 1.0, %v5047_v2  ;;  %v4596_v29 = vpack.c.bf16 %v8588_v51, %v8588_v51  ;;  %vm5053_vm2 = vmor %vm5051_vm1, %vm5052_vm0  ;;  %v5070_v14 = vand.u32 2147483647, %v5011_v17 }
 0xae7   :  { %5215 = vst [vmem:[#allocation16 + $0x8] sm:$0xff] %v5207_v24  ;;  %v4976_v59 = vpop.f32.mrf.mxu0  ;;  %vm5066_vm6 = vweird.f32 %v5011_v17  ;;  %v5073_v20 = vor.u32 1.1754944e-38, %v5072_v40  ;;  %vm5201_vm14 = vcmp.gt.s32.totalorder %v8565_v4, 4  ;;  %v2721_v31 = vadd.f32 %v8328_v52, %v8297_v27 }
 0xae8   :  { %v5049_v53 = vmul.f32 %v7614_v0, %v5048_v26  ;;  %v4977_v34 = vadd.f32 %v8504_v5, %v4976_v59  ;;  %4598 = vst [vmem:[#allocation4 + $0x18] sm:$0xf] %v4596_v29  ;;  %4770 = vmatmul.bf16.vlgmr.msra.gmra.mxu1 %v4596_v29  ;;  %4783 = vmatmul.bf16.vlgmr.msrb.gmra.mxu2 %v4596_v29  ;;  %vm5071_vm8 = vcmp.eq.f32.partialorder %v5070_v14, 8.507059e+37 }
 0xae9   :  { %4796 = vmatmul.bf16.vlgmr.msrb.gmra.mxu3 %v4596_v29 }
 0xaea   :  { %v7616_v9 = vpop.eup %7615  ;;  %v5050_v33 = vadd.f32 %v7614_v0, %v5049_v53  ;;  %v6997_v49 = vmul.f32 -1.442695, %v4977_v34 }
 0xaeb   :  { %v7618_v41 = vpop.eup %7617  ;;  %v5012_v61 = vadd.f32 1.0, %v7616_v9 }
 0xaec   :  { %v5054_v46 = vsel %vm5053_vm2, %v7614_v0, %v5050_v33  ;;  %v5062_v28 = vmul.f32 %v7618_v41, %v5011_v17  ;;  %7619 = vpow2.f32 %v6997_v49  ;;  %vm5067_vm5 = vweird.f32 %v7618_v41 }
 0xaed   :  { %v5059_v36 = vsel %vm5056_vm3, %v5058_v55, %v5054_v46  ;;  %7621 = vrcp.f32 %v5012_v61  ;;  %vm5068_vm7 = vmor %vm5066_vm6, %vm5067_vm5  ;;  %v5087_v13 = vand.u32 2147483648, %v5012_v61  ;;  %v5085_v6 = vand.u32 2147483647, %v5012_v61 }
 0xaee   :  { %v5208_v23 = vsel %vm5199_vm4, %v5059_v36, %v8568_v62  ;;  %v5063_v22 = vsub.f32 1.0, %v5062_v28  ;;  %vm5081_vm11 = vweird.f32 %v5012_v61  ;;  %vm5202_vm3 = vcmp.gt.s32.totalorder %v8565_v4, 5 }
 0xaef   :  { %5216 = vst [vmem:[#allocation16 + $0x10] sm:$0xff] %v5208_v23  ;;  %v5088_v38 = vor.u32 1.1754944e-38, %v5087_v13  ;;  %vm5086_vm13 = vcmp.eq.f32.partialorder %v5085_v6, 8.507059e+37 }
 0xaf0   :  { %v5064_v3 = vmul.f32 %v7618_v41, %v5063_v22 }
 0xaf2   :  { %v7620_v63 = vpop.eup %7619  ;;  %v5065_v32 = vadd.f32 %v7618_v41, %v5064_v3 }
 0xaf3   :  { %v7622_v12 = vpop.eup %7621  ;;  %v5013_v15 = vadd.f32 1.0, %v7620_v63 }
 0xaf4   :  { %v5069_v18 = vsel %vm5068_vm7, %v7618_v41, %v5065_v32  ;;  %v5077_v58 = vmul.f32 %v7622_v12, %v5012_v61  ;;  %vm5082_vm10 = vweird.f32 %v7622_v12  ;;  %v7646_v32 = vld [vmem:[%s8638_s9] ss:$0 sm:$0xff]  ;;  %s7839_s9 = smov [#allocation16]  }
 0xaf5   :  { %v5074_v42 = vsel %vm5071_vm8, %v5073_v20, %v5069_v18  ;;  %7623 = vrcp.f32 %v5013_v15  ;;  %vm5083_vm12 = vmor %vm5081_vm11, %vm5082_vm10  ;;  %v5102_v44 = vand.u32 2147483648, %v5013_v15  ;;  %v5100_v0 = vand.u32 2147483647, %v5013_v15  ;;  %s5226_s30 = sshll.u32 %s7839_s9, 4  ;;  %s5227_s30 = int_to_ptr.vmem [resolvable:$true] %s5226_s30 }
 0xaf6   :  { %v5209_v35 = vsel %vm5200_vm9, %v5074_v42, %v8568_v62  ;;  %v5078_v30 = vsub.f32 1.0, %v5077_v58  ;;  %vm5096_vm0 = vweird.f32 %v5013_v15  ;;  %v2779_v20 = vadd.f32 %v8377_v10, %v8341_v11 }
 0xaf7   :  { %5217 = vst [vmem:[#allocation16 + $0x18] sm:$0xff] %v5209_v35  ;;  %v5103_v17 = vor.u32 1.1754944e-38, %v5102_v44  ;;  %vm5101_vm2 = vcmp.eq.f32.partialorder %v5100_v0, 8.507059e+37 }
 0xaf8   :  { %v5079_v1 = vmul.f32 %v7622_v12, %v5078_v30 }
 0xafa   :  { %v5080_v39 = vadd.f32 %v7622_v12, %v5079_v1 }
 0xafb   :  { %v7624_v60 = vpop.eup %7623 }
 0xafc   :  { %v5084_v50 = vsel %vm5083_vm12, %v7622_v12, %v5080_v39  ;;  %v5092_v37 = vmul.f32 %v7624_v60, %v5013_v15  ;;  %vm5097_vm15 = vweird.f32 %v7624_v60 }
 0xafd   :  { %v5089_v8 = vsel %vm5086_vm13, %v5088_v38, %v5084_v50  ;;  %vm5098_vm1 = vmor %vm5096_vm0, %vm5097_vm15  ;;  %vm5203_vm0 = vcmp.gt.s32.totalorder %v8565_v4, 6 }
 0xafe   :  { %v5210_v43 = vsel %vm5201_vm14, %v5089_v8, %v8568_v62  ;;  %v5093_v21 = vsub.f32 1.0, %v5092_v37  ;;  %v4850_v8 = vmul.f32 %v8588_v51, %v8281_v16 }
 0xaff   :  { %5218 = vst [vmem:[#allocation16 + $0x20] sm:$0xff] %v5210_v43 }
 0xb00   :  { %v5094_v45 = vmul.f32 %v7624_v60, %v5093_v21 }
 0xb02   :  { %v5095_v48 = vadd.f32 %v7624_v60, %v5094_v45 }
 0xb04   :  { %v5099_v7 = vsel %vm5098_vm1, %v7624_v60, %v5095_v48 }
 0xb05   :  { %v5104_v54 = vsel %vm5101_vm2, %v5103_v17, %v5099_v7 }
 0xb06   :  { %v5211_v2 = vsel %vm5202_vm3, %v5104_v54, %v8568_v62 }
 0xb07   :  { %5219 = vst [vmem:[#allocation16 + $0x28] sm:$0xff] %v5211_v2 }
 0xb65   :  { %v4771_v24 = vpop.f32.mrf.mxu1 }
 0xb66   :  { %v4801_v26 = vadd.f32 %v4771_v24, %v2721_v31 }
 0xb68   :  { %v6942_v56 = vmul.f32 -1.442695, %v4801_v26 }
 0xb6a   :  { %7625 = vpow2.f32 %v6942_v56 }
 0xb6b   :  { %v4784_v59 = vpop.f32.mrf.mxu2 }
 0xb6c   :  { %v4821_v53 = vadd.f32 %v4784_v59, %v2750_v25  ;;  %v4797_v34 = vpop.f32.mrf.mxu3 }
 0xb6d   :  { %v4773_v29 = vpop.f32.mrf.mxu1  ;;  %v4841_v12 = vadd.f32 %v7646_v32, %v4797_v34 }
 0xb6e   :  { %v6943_v9 = vmul.f32 -1.442695, %v4821_v53 }
 0xb70   :  { %v7626_v33 = vpop.eup %7625  ;;  %7627 = vpow2.f32 %v6943_v9 }
 0xb71   :  { %v4805_v49 = vadd.f32 1.0, %v7626_v33 }
 0xb73   :  { %7629 = vrcp.f32 %v4805_v49  ;;  %v4786_v41 = vpop.f32.mrf.mxu2  ;;  %v4817_v36 = vand.u32 2147483648, %v4805_v49  ;;  %v4815_v47 = vand.u32 2147483647, %v4805_v49  ;;  %vm4811_vm5 = vweird.f32 %v4805_v49 }
 0xb74   :  { %v4799_v55 = vpop.f32.mrf.mxu3 }
 0xb75   :  { %v4818_v3 = vor.u32 1.1754944e-38, %v4817_v36  ;;  %vm4816_vm7 = vcmp.eq.f32.partialorder %v4815_v47, 8.507059e+37 }
 0xb76   :  { %v7628_v61 = vpop.eup %7627 }
 0xb77   :  { %v4825_v27 = vadd.f32 1.0, %v7628_v61 }
 0xb79   :  { %v7630_v52 = vpop.eup %7629  ;;  %7631 = vrcp.f32 %v4825_v27  ;;  %v4837_v58 = vand.u32 2147483648, %v4825_v27  ;;  %v4835_v35 = vand.u32 2147483647, %v4825_v27  ;;  %vm4831_vm9 = vweird.f32 %v4825_v27 }
 0xb7a   :  { %v4807_v46 = vmul.f32 %v7630_v52, %v4805_v49  ;;  %vm4812_vm4 = vweird.f32 %v7630_v52 }
 0xb7b   :  { %vm4813_vm6 = vmor %vm4811_vm5, %vm4812_vm4  ;;  %v4838_v1 = vor.u32 1.1754944e-38, %v4837_v58  ;;  %vm4836_vm11 = vcmp.eq.f32.partialorder %v4835_v35, 8.507059e+37  ;;  %vm5204_vm5 = vcmp.gt.s32.totalorder %v8565_v4, 7 }
 0xb7c   :  { %v4808_v28 = vsub.f32 1.0, %v4807_v46 }
 0xb7e   :  { %v4809_v57 = vmul.f32 %v7630_v52, %v4808_v28 }
 0xb7f   :  { %v7632_v23 = vpop.eup %7631 }
 0xb80   :  { %v4827_v22 = vmul.f32 %v7632_v23, %v4825_v27  ;;  %v4810_v40 = vadd.f32 %v7630_v52, %v4809_v57  ;;  %vm4832_vm8 = vweird.f32 %v7632_v23 }
 0xb81   :  { %vm4833_vm10 = vmor %vm4831_vm9, %vm4832_vm8 }
 0xb82   :  { %v4828_v14 = vsub.f32 1.0, %v4827_v22  ;;  %v4814_v63 = vsel %vm4813_vm6, %v7630_v52, %v4810_v40 }
 0xb83   :  { %v4819_v15 = vsel %vm4816_vm7, %v4818_v3, %v4814_v63 }
 0xb84   :  { %v4829_v18 = vmul.f32 %v7632_v23, %v4828_v14  ;;  %v4842_v42 = vmul.f32 %v4841_v12, %v4819_v15 }
 0xb86   :  { %v4830_v30 = vadd.f32 %v7632_v23, %v4829_v18  ;;  %v4843_v13 = vadd.f32 %v4842_v42, %v2779_v20 }
 0xb88   :  { %v4834_v6 = vsel %vm4833_vm10, %v7632_v23, %v4830_v30  ;;  %7633 = vtanh.f32 %v4843_v13 }
 0xb89   :  { %v4839_v39 = vsel %vm4836_vm11, %v4838_v1, %v4834_v6 }
 0xb8a   :  { %v4845_v60 = vsub.f32 1.0, %v4839_v39  ;;  %v4847_v11 = vmul.f32 %v4839_v39, %v8588_v51 }
 0xb8e   :  { %v7634_v38 = vpop.eup %7633 }
 0xb8f   :  { %v4846_v50 = vmul.f32 %v7634_v38, %v4845_v60 }
 0xb91   :  { %v4848_v10 = vadd.f32 %v4847_v11, %v4846_v50 }
 0xb93   :  { %v4849_v37 = vmul.f32 %v4848_v10, %v8283_v19 }
 0xb95   :  { %v4851_v43 = vadd.f32 %v4850_v8, %v4849_v37 }
 0xb97   :  { %v4852_v21 = vpack.c.bf16 %v4851_v43, %v4851_v43 }
 0xb99   :  { %4854 = vst [vmem:[#allocation4 + $0x1c] sm:$0xf] %v4852_v21 }
 0xba0   :  { %v7416_v44 = vld [vmem:[#allocation4 + $0x18] sm:$0xff] }
 0xba1   :  { %4978 = vmatmul.bf16.gmra.mxu0 %v7416_v44 }
 0xc1e   :  { %v4979_v45 = vpop.f32.mrf.mxu0 }
 0xc1f   :  { %v4980_v0 = vadd.f32 %v8504_v5, %v4979_v45 }
 0xc21   :  { %v6998_v48 = vmul.f32 -1.442695, %v4980_v0 }
 0xc23   :  { %7635 = vpow2.f32 %v6998_v48 }
 0xc26   :  { %v4981_v17 = vpop.f32.mrf.mxu0 }
 0xc27   :  { %v4982_v7 = vadd.f32 %v8504_v5, %v4981_v17 }
 0xc29   :  { %v7636_v54 = vpop.eup %7635  ;;  %v6999_v2 = vmul.f32 -1.442695, %v4982_v7 }
 0xc2a   :  { %v5014_v31 = vadd.f32 1.0, %v7636_v54 }
 0xc2b   :  { %7637 = vpow2.f32 %v6999_v2 }
 0xc2c   :  { %7639 = vrcp.f32 %v5014_v31  ;;  %v5117_v56 = vand.u32 2147483648, %v5014_v31  ;;  %v5115_v59 = vand.u32 2147483647, %v5014_v31  ;;  %vm5111_vm13 = vweird.f32 %v5014_v31 }
 0xc2e   :  { %v5118_v5 = vor.u32 1.1754944e-38, %v5117_v56  ;;  %vm5116_vm15 = vcmp.eq.f32.partialorder %v5115_v59, 8.507059e+37 }
 0xc31   :  { %v7638_v19 = vpop.eup %7637 }
 0xc32   :  { %v7640_v16 = vpop.eup %7639  ;;  %v5015_v51 = vadd.f32 1.0, %v7638_v19 }
 0xc33   :  { %v5107_v24 = vmul.f32 %v7640_v16, %v5014_v31  ;;  %vm5112_vm12 = vweird.f32 %v7640_v16 }
 0xc34   :  { %7641 = vrcp.f32 %v5015_v51  ;;  %vm5113_vm14 = vmor %vm5111_vm13, %vm5112_vm12  ;;  %v5132_v55 = vand.u32 2147483648, %v5015_v51  ;;  %v5130_v27 = vand.u32 2147483647, %v5015_v51  ;;  %vm5126_vm2 = vweird.f32 %v5015_v51 }
 0xc35   :  { %v5108_v26 = vsub.f32 1.0, %v5107_v24 }
 0xc36   :  { %v5133_v46 = vor.u32 1.1754944e-38, %v5132_v55  ;;  %vm5131_vm4 = vcmp.eq.f32.partialorder %v5130_v27, 8.507059e+37 }
 0xc37   :  { %v5109_v25 = vmul.f32 %v7640_v16, %v5108_v26 }
 0xc39   :  { %v5110_v53 = vadd.f32 %v7640_v16, %v5109_v25 }
 0xc3a   :  { %v7642_v34 = vpop.eup %7641 }
 0xc3b   :  { %v5114_v29 = vsel %vm5113_vm14, %v7640_v16, %v5110_v53  ;;  %v5122_v9 = vmul.f32 %v7642_v34, %v5015_v51  ;;  %vm5127_vm1 = vweird.f32 %v7642_v34 }
 0xc3c   :  { %v5119_v33 = vsel %vm5116_vm15, %v5118_v5, %v5114_v29  ;;  %vm5128_vm3 = vmor %vm5126_vm2, %vm5127_vm1 }
 0xc3d   :  { %v5212_v49 = vsel %vm5203_vm0, %v5119_v33, %v8568_v62  ;;  %v5123_v41 = vsub.f32 1.0, %v5122_v9 }
 0xc3e   :  { %5220 = vst [vmem:[#allocation16 + $0x30] sm:$0xff] %v5212_v49 }
 0xc3f   :  { %v5124_v61 = vmul.f32 %v7642_v34, %v5123_v41 }
 0xc41   :  { %v5125_v52 = vadd.f32 %v7642_v34, %v5124_v61 }
 0xc43   :  { %v5129_v28 = vsel %vm5128_vm3, %v7642_v34, %v5125_v52 }
 0xc44   :  { %v5134_v36 = vsel %vm5131_vm4, %v5133_v46, %v5129_v28 }
 0xc45   :  { %v5213_v57 = vsel %vm5204_vm5, %v5134_v36, %v8568_v62 }
 0xc46   :  { %5221 = vst [vmem:[#allocation16 + $0x38] sm:$0xff] %v5213_v57 }
 0xc47   :  { %5234 = dma.vmem_to_hbm [thread:$0]  %s5227_s30, 1024, %s5229_s15, [#allocation7], %s7830_s6, %s7830_s6, %s7831_s22  }
 0xc48   :  { %7823 = dma.done.wait [#allocation7], 1024  }
 0xc49   :  { %7824 = vsyncadd [#allocation7], 4294966272 }
 0xc4a   :  { %5239 = vsyncpa [#allocation6], 1 }
 0xc4b   :  { %5240 = vsyncpa [#allocation9], 1 }
 0xc4c   :  { %5241 = vsyncpa [#allocation12], 1 }
 0xc4d   :  { %5242 = vsyncpa [#allocation15], 1 }
 0xc4e   :  { %5243 = vsyncpa [#allocation7], 1 }

</bundles_post_ra>
